<compile_context>
chip_gen: v7x
topology: tpu7x:2x2x1
jax: 0.10.0
libtpu: 0.0.40
codegen_flags: <defaults>
</compile_context>

<pallas_src>
import jax
import jax.numpy as jnp
from jax.experimental import pallas as pl


# ----------------------------------------------------------------------------
# In-kernel building blocks (all operate on VMEM-resident values).
# ----------------------------------------------------------------------------
def _pad1_hw(x):
    """Zero-pad H and W by 1 on each side: (B,H,W,C) -> (B,H+2,W+2,C)."""
    B, H, W, C = x.shape
    zr = jnp.zeros((B, 1, W, C), x.dtype)
    x = jnp.concatenate([zr, x, zr], axis=1)
    zc = jnp.zeros((B, H + 2, 1, C), x.dtype)
    return jnp.concatenate([zc, x, zc], axis=2)


def _conv_pool_relu(x, w_ref, b_ref):
    """Conv2d(3x3, pad=1) + MaxPool2d(2,2) + ReLU on an NHWC value.

    x     : (B, H, W, Cin)  f32
    w_ref : (9*Cin, Cout)   bf16, row index = (3*dy + dx)*Cin + cin
    b_ref : (1, Cout)       f32
    returns (B, H//2, W//2, Cout) f32
    """
    B, H, W, Cin = x.shape
    Cout = w_ref.shape[-1]

    xp = _pad1_hw(x)                                     # (B, H+2, W+2, Cin)

    # im2col: lane-concat the 9 shifted views -> single MXU matmul (K = 9*Cin).
    cols = []
    for k in range(9):
        dy, dx = k // 3, k % 3
        cols.append(xp[:, dy:dy + H, dx:dx + W, :].reshape(B * H * W, Cin))
    patches = jnp.concatenate(cols, axis=-1)             # (B*H*W, 9*Cin)
    y = jnp.dot(patches.astype(jnp.bfloat16), w_ref[...],
                preferred_element_type=jnp.float32)      # (B*H*W, Cout) f32
    y = y + b_ref[...]                                   # bias broadcast

    # MaxPool2d(2,2) in registers (ReLU-after-pool == pool-after-ReLU).
    y = y.reshape(B * H * (W // 2), 2, Cout)             # pair adjacent x
    y = jnp.maximum(y[:, 0, :], y[:, 1, :])              # (B*H*(W//2), Cout)
    y = y.reshape(B * (H // 2), 2, W // 2, Cout)         # pair adjacent y rows
    y = jnp.maximum(y[:, 0, :, :], y[:, 1, :, :])        # (B*(H//2), W//2, Cout)
    y = jnp.maximum(y, 0.0)                              # ReLU
    return y.reshape(B, H // 2, W // 2, Cout)


def _dense(h, w_ref, b_ref, relu):
    y = jnp.dot(h.astype(jnp.bfloat16), w_ref[...],
                preferred_element_type=jnp.float32) + b_ref[...]
    return jnp.maximum(y, 0.0) if relu else y


def make_convnet54_kernel(n_conv_layers):
    """Build the fused kernel: refs = (x, conv w/b pairs..., fc w/b pairs..., out)."""
    def kernel(*refs):
        x_ref = refs[0]
        conv_refs = refs[1:1 + 2 * n_conv_layers]
        fc_refs = refs[1 + 2 * n_conv_layers:-1]
        o_ref = refs[-1]

        x = x_ref[...]                                   # (B, H, W, Cin) f32
        for i in range(n_conv_layers):
            x = _conv_pool_relu(x, conv_refs[2 * i], conv_refs[2 * i + 1])

        # Flatten in NHWC order -> lane-dense (B, Hf*Wf*Cf).  The PyTorch NCHW
        # `view` ordering was folded into fc1's weight rows at init time.
        B, Hf, Wf, Cf = x.shape
        pieces = [x[:, i, j, :] for i in range(Hf) for j in range(Wf)]
        h = jnp.concatenate(pieces, axis=-1)             # (B, Hf*Wf*Cf)

        h = _dense(h, fc_refs[0], fc_refs[1], relu=True)          # fc1 + ReLU
        h = _dense(h, fc_refs[2], fc_refs[3], relu=True)          # fc2 + ReLU
        h = _dense(h, fc_refs[4], fc_refs[5], relu=True)          # fc3 + ReLU
        o_ref[...] = _dense(h, fc_refs[6], fc_refs[7], relu=False)  # output
    return kernel


# ----------------------------------------------------------------------------
# Host-side wrapper: one pallas_call for the entire network.
# ----------------------------------------------------------------------------
def _full_spec(shape):
    ndim = len(shape)
    return pl.BlockSpec(shape, lambda: (0,) * ndim)


def convnet54_forward(x_nchw, conv_params, fc_params):
    n_conv_layers = len(conv_params)
    # NCHW (PyTorch) -> NHWC once on the tiny network input (single XLA op).
    x = jnp.transpose(x_nchw, (0, 2, 3, 1)).astype(jnp.float32)

    flat_params = []
    for w, b in list(conv_params) + list(fc_params):
        flat_params += [w, b]
    args = (x, *flat_params)

    B = x.shape[0]
    out_dim = fc_params[-1][0].shape[1]
    out_shape = jax.ShapeDtypeStruct((B, out_dim), jnp.float32)
    return pl.pallas_call(
        make_convnet54_kernel(n_conv_layers),
        out_shape=out_shape,
        in_specs=[_full_spec(a.shape) for a in args],
        out_specs=_full_spec(out_shape.shape),
    )(*args)


# ----------------------------------------------------------------------------
# Parameter init (deterministic, synthetic), matching the module's structure.
# ----------------------------------------------------------------------------
def init_params(key, input_size, in_channels, n_conv_layers):
    chans = [in_channels] + [16 * 2 ** i for i in range(n_conv_layers)]
    keys = jax.random.split(key, 2 * n_conv_layers + 8)
    ki = 0

    conv_params = []
    for i in range(n_conv_layers):
        cin, cout = chans[i], chans[i + 1]
        fan_in = 9 * cin
        # im2col layout (9*Cin, Cout): row = (3*dy + dx)*Cin + cin
        # (<-> PyTorch Conv2d weight (Cout, Cin, 3, 3)); stored as bf16.
        w = (jax.random.normal(keys[ki], (9 * cin, cout), jnp.float32)
             / jnp.sqrt(fan_in)).astype(jnp.bfloat16)
        ki += 1
        b = 0.01 * jax.random.normal(keys[ki], (1, cout), jnp.float32)
        ki += 1
        conv_params.append((w, b))

    Hf = input_size[0] // 2 ** n_conv_layers
    Wf = input_size[1] // 2 ** n_conv_layers
    Cf = chans[-1]
    flat = Cf * Hf * Wf
    dims = [flat, 1024, 512, 128, 1]

    fc_params = []
    for i in range(4):
        # (in, out) layout, i.e. transpose of PyTorch Linear weight (out, in).
        w = jax.random.normal(keys[ki], (dims[i], dims[i + 1]), jnp.float32) / \
            jnp.sqrt(dims[i])
        ki += 1
        b = 0.01 * jax.random.normal(keys[ki], (1, dims[i + 1]), jnp.float32)
        ki += 1
        if i == 0:
            # Fold PyTorch's NCHW flatten order (c*Hf*Wf + h*Wf + w) into fc1's
            # rows so the kernel can flatten directly in NHWC ((h*Wf+w)*Cf + c).
            perm = jnp.transpose(
                jnp.arange(flat).reshape(Cf, Hf, Wf), (1, 2, 0)).reshape(-1)
            w = w[perm, :]
        fc_params.append((w.astype(jnp.bfloat16), b))
    return conv_params, fc_params


if __name__ == "__main__":
    input_size = (16, 16)
    in_channels = 4
    n_conv_layers = 2
    batch = 2

    key = jax.random.PRNGKey(0)
    k_params, k_x = jax.random.split(key)
    conv_params, fc_params = init_params(k_params, input_size, in_channels,
                                         n_conv_layers)
    x = jax.random.normal(
        k_x, (batch, in_channels, input_size[0], input_size[1]), jnp.float32)

    fwd = jax.jit(convnet54_forward)
    out = jax.block_until_ready(fwd(x, conv_params, fc_params))
    assert out.shape == (batch, 1) and out.dtype == jnp.float32
    print("KERNEL_OK")
</pallas_src>

<mosaic_0001>
module attributes {stable_mosaic.version = 11 : i64} {
  func.func @kernel(%arg0: memref<2x16x16x4xf32, #tpu.memory_space<vmem>>, %arg1: memref<36x16xbf16, #tpu.memory_space<vmem>>, %arg2: memref<1x16xf32, #tpu.memory_space<vmem>>, %arg3: memref<144x32xbf16, #tpu.memory_space<vmem>>, %arg4: memref<1x32xf32, #tpu.memory_space<vmem>>, %arg5: memref<512x1024xbf16, #tpu.memory_space<vmem>>, %arg6: memref<1x1024xf32, #tpu.memory_space<vmem>>, %arg7: memref<1024x512xbf16, #tpu.memory_space<vmem>>, %arg8: memref<1x512xf32, #tpu.memory_space<vmem>>, %arg9: memref<512x128xbf16, #tpu.memory_space<vmem>>, %arg10: memref<1x128xf32, #tpu.memory_space<vmem>>, %arg11: memref<128x1xbf16, #tpu.memory_space<vmem>>, %arg12: memref<1x1xf32, #tpu.memory_space<vmem>>, %arg13: memref<2x1xf32, #tpu.memory_space<vmem>>) attributes {dimension_semantics = [], scalar_prefetch = 0 : i64, scratch_operands = 0 : i64, tpu.core_type = #tpu.core_type<tc>} {
    %c0 = arith.constant 0 : index
    %c0_0 = arith.constant 0 : index
    %c0_1 = arith.constant 0 : index
    %c0_2 = arith.constant 0 : index
    %0 = vector.load %arg0[%c0, %c0_0, %c0_1, %c0_2] : memref<2x16x16x4xf32, #tpu.memory_space<vmem>>, vector<2x16x16x4xf32>
    %cst = arith.constant 0.000000e+00 : f32
    %1 = vector.broadcast %cst : f32 to vector<2x1x16x4xf32>
    %2 = tpu.concatenate %1, %0, %1 in 1 : vector<2x1x16x4xf32>, vector<2x16x16x4xf32>, vector<2x1x16x4xf32> -> vector<2x18x16x4xf32>
    %cst_3 = arith.constant 0.000000e+00 : f32
    %3 = vector.broadcast %cst_3 : f32 to vector<2x18x1x4xf32>
    %4 = tpu.concatenate %3, %2, %3 in 2 : vector<2x18x1x4xf32>, vector<2x18x16x4xf32>, vector<2x18x1x4xf32> -> vector<2x18x18x4xf32>
    %5 = vector.extract_strided_slice %4 {offsets = [0, 0, 0, 0], sizes = [2, 16, 16, 4], strides = [1, 1, 1, 1]} : vector<2x18x18x4xf32> to vector<2x16x16x4xf32>
    %6 = vector.shape_cast %5 : vector<2x16x16x4xf32> to vector<512x4xf32>
    %7 = vector.extract_strided_slice %4 {offsets = [0, 0, 1, 0], sizes = [2, 16, 16, 4], strides = [1, 1, 1, 1]} : vector<2x18x18x4xf32> to vector<2x16x16x4xf32>
    %8 = vector.shape_cast %7 : vector<2x16x16x4xf32> to vector<512x4xf32>
    %9 = vector.extract_strided_slice %4 {offsets = [0, 0, 2, 0], sizes = [2, 16, 16, 4], strides = [1, 1, 1, 1]} : vector<2x18x18x4xf32> to vector<2x16x16x4xf32>
    %10 = vector.shape_cast %9 : vector<2x16x16x4xf32> to vector<512x4xf32>
    %11 = vector.extract_strided_slice %4 {offsets = [0, 1, 0, 0], sizes = [2, 16, 16, 4], strides = [1, 1, 1, 1]} : vector<2x18x18x4xf32> to vector<2x16x16x4xf32>
    %12 = vector.shape_cast %11 : vector<2x16x16x4xf32> to vector<512x4xf32>
    %13 = vector.extract_strided_slice %4 {offsets = [0, 1, 1, 0], sizes = [2, 16, 16, 4], strides = [1, 1, 1, 1]} : vector<2x18x18x4xf32> to vector<2x16x16x4xf32>
    %14 = vector.shape_cast %13 : vector<2x16x16x4xf32> to vector<512x4xf32>
    %15 = vector.extract_strided_slice %4 {offsets = [0, 1, 2, 0], sizes = [2, 16, 16, 4], strides = [1, 1, 1, 1]} : vector<2x18x18x4xf32> to vector<2x16x16x4xf32>
    %16 = vector.shape_cast %15 : vector<2x16x16x4xf32> to vector<512x4xf32>
    %17 = vector.extract_strided_slice %4 {offsets = [0, 2, 0, 0], sizes = [2, 16, 16, 4], strides = [1, 1, 1, 1]} : vector<2x18x18x4xf32> to vector<2x16x16x4xf32>
    %18 = vector.shape_cast %17 : vector<2x16x16x4xf32> to vector<512x4xf32>
    %19 = vector.extract_strided_slice %4 {offsets = [0, 2, 1, 0], sizes = [2, 16, 16, 4], strides = [1, 1, 1, 1]} : vector<2x18x18x4xf32> to vector<2x16x16x4xf32>
    %20 = vector.shape_cast %19 : vector<2x16x16x4xf32> to vector<512x4xf32>
    %21 = vector.extract_strided_slice %4 {offsets = [0, 2, 2, 0], sizes = [2, 16, 16, 4], strides = [1, 1, 1, 1]} : vector<2x18x18x4xf32> to vector<2x16x16x4xf32>
    %22 = vector.shape_cast %21 : vector<2x16x16x4xf32> to vector<512x4xf32>
    %23 = tpu.concatenate %6, %8, %10, %12, %14, %16, %18, %20, %22 in 1 : vector<512x4xf32>, vector<512x4xf32>, vector<512x4xf32>, vector<512x4xf32>, vector<512x4xf32>, vector<512x4xf32>, vector<512x4xf32>, vector<512x4xf32>, vector<512x4xf32> -> vector<512x36xf32>
    %24 = arith.truncf %23 : vector<512x36xf32> to vector<512x36xbf16>
    %c0_4 = arith.constant 0 : index
    %c0_5 = arith.constant 0 : index
    %25 = vector.load %arg1[%c0_4, %c0_5] : memref<36x16xbf16, #tpu.memory_space<vmem>>, vector<36x16xbf16>
    %cst_6 = arith.constant dense<0.000000e+00> : vector<512x16xf32>
    %26 = tpu.matmul %24, %25, %cst_6 {dimension_numbers = #tpu.dot_dimension_numbers<[1], [0], [0], [1], [0, 0, 1, 1], [], []>} : vector<512x36xbf16>, vector<36x16xbf16>, vector<512x16xf32> -> vector<512x16xf32>
    %c0_7 = arith.constant 0 : index
    %c0_8 = arith.constant 0 : index
    %27 = vector.load %arg2[%c0_7, %c0_8] : memref<1x16xf32, #tpu.memory_space<vmem>>, vector<1x16xf32>
    %28 = vector.broadcast %27 : vector<1x16xf32> to vector<512x16xf32>
    %29 = arith.addf %26, %28 : vector<512x16xf32>
    %30 = vector.shape_cast %29 : vector<512x16xf32> to vector<256x2x16xf32>
    %31 = vector.extract_strided_slice %30 {offsets = [0, 0, 0], sizes = [256, 1, 16], strides = [1, 1, 1]} : vector<256x2x16xf32> to vector<256x1x16xf32>
    %32 = vector.shape_cast %31 : vector<256x1x16xf32> to vector<256x16xf32>
    %33 = vector.extract_strided_slice %30 {offsets = [0, 1, 0], sizes = [256, 1, 16], strides = [1, 1, 1]} : vector<256x2x16xf32> to vector<256x1x16xf32>
    %34 = vector.shape_cast %33 : vector<256x1x16xf32> to vector<256x16xf32>
    %35 = arith.maximumf %32, %34 : vector<256x16xf32>
    %36 = vector.shape_cast %35 : vector<256x16xf32> to vector<16x2x8x16xf32>
    %37 = vector.extract_strided_slice %36 {offsets = [0, 0, 0, 0], sizes = [16, 1, 8, 16], strides = [1, 1, 1, 1]} : vector<16x2x8x16xf32> to vector<16x1x8x16xf32>
    %38 = vector.shape_cast %37 : vector<16x1x8x16xf32> to vector<16x8x16xf32>
    %39 = vector.extract_strided_slice %36 {offsets = [0, 1, 0, 0], sizes = [16, 1, 8, 16], strides = [1, 1, 1, 1]} : vector<16x2x8x16xf32> to vector<16x1x8x16xf32>
    %40 = vector.shape_cast %39 : vector<16x1x8x16xf32> to vector<16x8x16xf32>
    %41 = arith.maximumf %38, %40 : vector<16x8x16xf32>
    %cst_9 = arith.constant 0.000000e+00 : f32
    %42 = vector.broadcast %cst_9 : f32 to vector<16x8x16xf32>
    %43 = arith.maximumf %41, %42 : vector<16x8x16xf32>
    %44 = vector.shape_cast %43 : vector<16x8x16xf32> to vector<2x8x8x16xf32>
    %cst_10 = arith.constant 0.000000e+00 : f32
    %45 = vector.broadcast %cst_10 : f32 to vector<2x1x8x16xf32>
    %46 = tpu.concatenate %45, %44, %45 in 1 : vector<2x1x8x16xf32>, vector<2x8x8x16xf32>, vector<2x1x8x16xf32> -> vector<2x10x8x16xf32>
    %cst_11 = arith.constant 0.000000e+00 : f32
    %47 = vector.broadcast %cst_11 : f32 to vector<2x10x1x16xf32>
    %48 = tpu.concatenate %47, %46, %47 in 2 : vector<2x10x1x16xf32>, vector<2x10x8x16xf32>, vector<2x10x1x16xf32> -> vector<2x10x10x16xf32>
    %49 = vector.extract_strided_slice %48 {offsets = [0, 0, 0, 0], sizes = [2, 8, 8, 16], strides = [1, 1, 1, 1]} : vector<2x10x10x16xf32> to vector<2x8x8x16xf32>
    %50 = vector.shape_cast %49 : vector<2x8x8x16xf32> to vector<128x16xf32>
    %51 = vector.extract_strided_slice %48 {offsets = [0, 0, 1, 0], sizes = [2, 8, 8, 16], strides = [1, 1, 1, 1]} : vector<2x10x10x16xf32> to vector<2x8x8x16xf32>
    %52 = vector.shape_cast %51 : vector<2x8x8x16xf32> to vector<128x16xf32>
    %53 = vector.extract_strided_slice %48 {offsets = [0, 0, 2, 0], sizes = [2, 8, 8, 16], strides = [1, 1, 1, 1]} : vector<2x10x10x16xf32> to vector<2x8x8x16xf32>
    %54 = vector.shape_cast %53 : vector<2x8x8x16xf32> to vector<128x16xf32>
    %55 = vector.extract_strided_slice %48 {offsets = [0, 1, 0, 0], sizes = [2, 8, 8, 16], strides = [1, 1, 1, 1]} : vector<2x10x10x16xf32> to vector<2x8x8x16xf32>
    %56 = vector.shape_cast %55 : vector<2x8x8x16xf32> to vector<128x16xf32>
    %57 = vector.extract_strided_slice %48 {offsets = [0, 1, 1, 0], sizes = [2, 8, 8, 16], strides = [1, 1, 1, 1]} : vector<2x10x10x16xf32> to vector<2x8x8x16xf32>
    %58 = vector.shape_cast %57 : vector<2x8x8x16xf32> to vector<128x16xf32>
    %59 = vector.extract_strided_slice %48 {offsets = [0, 1, 2, 0], sizes = [2, 8, 8, 16], strides = [1, 1, 1, 1]} : vector<2x10x10x16xf32> to vector<2x8x8x16xf32>
    %60 = vector.shape_cast %59 : vector<2x8x8x16xf32> to vector<128x16xf32>
    %61 = vector.extract_strided_slice %48 {offsets = [0, 2, 0, 0], sizes = [2, 8, 8, 16], strides = [1, 1, 1, 1]} : vector<2x10x10x16xf32> to vector<2x8x8x16xf32>
    %62 = vector.shape_cast %61 : vector<2x8x8x16xf32> to vector<128x16xf32>
    %63 = vector.extract_strided_slice %48 {offsets = [0, 2, 1, 0], sizes = [2, 8, 8, 16], strides = [1, 1, 1, 1]} : vector<2x10x10x16xf32> to vector<2x8x8x16xf32>
    %64 = vector.shape_cast %63 : vector<2x8x8x16xf32> to vector<128x16xf32>
    %65 = vector.extract_strided_slice %48 {offsets = [0, 2, 2, 0], sizes = [2, 8, 8, 16], strides = [1, 1, 1, 1]} : vector<2x10x10x16xf32> to vector<2x8x8x16xf32>
    %66 = vector.shape_cast %65 : vector<2x8x8x16xf32> to vector<128x16xf32>
    %67 = tpu.concatenate %50, %52, %54, %56, %58, %60, %62, %64, %66 in 1 : vector<128x16xf32>, vector<128x16xf32>, vector<128x16xf32>, vector<128x16xf32>, vector<128x16xf32>, vector<128x16xf32>, vector<128x16xf32>, vector<128x16xf32>, vector<128x16xf32> -> vector<128x144xf32>
    %68 = arith.truncf %67 : vector<128x144xf32> to vector<128x144xbf16>
    %c0_12 = arith.constant 0 : index
    %c0_13 = arith.constant 0 : index
    %69 = vector.load %arg3[%c0_12, %c0_13] : memref<144x32xbf16, #tpu.memory_space<vmem>>, vector<144x32xbf16>
    %cst_14 = arith.constant dense<0.000000e+00> : vector<128x32xf32>
    %70 = tpu.matmul %68, %69, %cst_14 {dimension_numbers = #tpu.dot_dimension_numbers<[1], [0], [0], [1], [0, 0, 1, 1], [], []>} : vector<128x144xbf16>, vector<144x32xbf16>, vector<128x32xf32> -> vector<128x32xf32>
    %c0_15 = arith.constant 0 : index
    %c0_16 = arith.constant 0 : index
    %71 = vector.load %arg4[%c0_15, %c0_16] : memref<1x32xf32, #tpu.memory_space<vmem>>, vector<1x32xf32>
    %72 = vector.broadcast %71 : vector<1x32xf32> to vector<128x32xf32>
    %73 = arith.addf %70, %72 : vector<128x32xf32>
    %74 = vector.shape_cast %73 : vector<128x32xf32> to vector<64x2x32xf32>
    %75 = vector.extract_strided_slice %74 {offsets = [0, 0, 0], sizes = [64, 1, 32], strides = [1, 1, 1]} : vector<64x2x32xf32> to vector<64x1x32xf32>
    %76 = vector.shape_cast %75 : vector<64x1x32xf32> to vector<64x32xf32>
    %77 = vector.extract_strided_slice %74 {offsets = [0, 1, 0], sizes = [64, 1, 32], strides = [1, 1, 1]} : vector<64x2x32xf32> to vector<64x1x32xf32>
    %78 = vector.shape_cast %77 : vector<64x1x32xf32> to vector<64x32xf32>
    %79 = arith.maximumf %76, %78 : vector<64x32xf32>
    %80 = vector.shape_cast %79 : vector<64x32xf32> to vector<8x2x4x32xf32>
    %81 = vector.extract_strided_slice %80 {offsets = [0, 0, 0, 0], sizes = [8, 1, 4, 32], strides = [1, 1, 1, 1]} : vector<8x2x4x32xf32> to vector<8x1x4x32xf32>
    %82 = vector.shape_cast %81 : vector<8x1x4x32xf32> to vector<8x4x32xf32>
    %83 = vector.extract_strided_slice %80 {offsets = [0, 1, 0, 0], sizes = [8, 1, 4, 32], strides = [1, 1, 1, 1]} : vector<8x2x4x32xf32> to vector<8x1x4x32xf32>
    %84 = vector.shape_cast %83 : vector<8x1x4x32xf32> to vector<8x4x32xf32>
    %85 = arith.maximumf %82, %84 : vector<8x4x32xf32>
    %cst_17 = arith.constant 0.000000e+00 : f32
    %86 = vector.broadcast %cst_17 : f32 to vector<8x4x32xf32>
    %87 = arith.maximumf %85, %86 : vector<8x4x32xf32>
    %88 = vector.shape_cast %87 : vector<8x4x32xf32> to vector<2x4x4x32xf32>
    %89 = vector.extract_strided_slice %88 {offsets = [0, 0, 0, 0], sizes = [2, 1, 1, 32], strides = [1, 1, 1, 1]} : vector<2x4x4x32xf32> to vector<2x1x1x32xf32>
    %90 = vector.shape_cast %89 : vector<2x1x1x32xf32> to vector<2x32xf32>
    %91 = vector.extract_strided_slice %88 {offsets = [0, 0, 1, 0], sizes = [2, 1, 1, 32], strides = [1, 1, 1, 1]} : vector<2x4x4x32xf32> to vector<2x1x1x32xf32>
    %92 = vector.shape_cast %91 : vector<2x1x1x32xf32> to vector<2x32xf32>
    %93 = vector.extract_strided_slice %88 {offsets = [0, 0, 2, 0], sizes = [2, 1, 1, 32], strides = [1, 1, 1, 1]} : vector<2x4x4x32xf32> to vector<2x1x1x32xf32>
    %94 = vector.shape_cast %93 : vector<2x1x1x32xf32> to vector<2x32xf32>
    %95 = vector.extract_strided_slice %88 {offsets = [0, 0, 3, 0], sizes = [2, 1, 1, 32], strides = [1, 1, 1, 1]} : vector<2x4x4x32xf32> to vector<2x1x1x32xf32>
    %96 = vector.shape_cast %95 : vector<2x1x1x32xf32> to vector<2x32xf32>
    %97 = vector.extract_strided_slice %88 {offsets = [0, 1, 0, 0], sizes = [2, 1, 1, 32], strides = [1, 1, 1, 1]} : vector<2x4x4x32xf32> to vector<2x1x1x32xf32>
    %98 = vector.shape_cast %97 : vector<2x1x1x32xf32> to vector<2x32xf32>
    %99 = vector.extract_strided_slice %88 {offsets = [0, 1, 1, 0], sizes = [2, 1, 1, 32], strides = [1, 1, 1, 1]} : vector<2x4x4x32xf32> to vector<2x1x1x32xf32>
    %100 = vector.shape_cast %99 : vector<2x1x1x32xf32> to vector<2x32xf32>
    %101 = vector.extract_strided_slice %88 {offsets = [0, 1, 2, 0], sizes = [2, 1, 1, 32], strides = [1, 1, 1, 1]} : vector<2x4x4x32xf32> to vector<2x1x1x32xf32>
    %102 = vector.shape_cast %101 : vector<2x1x1x32xf32> to vector<2x32xf32>
    %103 = vector.extract_strided_slice %88 {offsets = [0, 1, 3, 0], sizes = [2, 1, 1, 32], strides = [1, 1, 1, 1]} : vector<2x4x4x32xf32> to vector<2x1x1x32xf32>
    %104 = vector.shape_cast %103 : vector<2x1x1x32xf32> to vector<2x32xf32>
    %105 = vector.extract_strided_slice %88 {offsets = [0, 2, 0, 0], sizes = [2, 1, 1, 32], strides = [1, 1, 1, 1]} : vector<2x4x4x32xf32> to vector<2x1x1x32xf32>
    %106 = vector.shape_cast %105 : vector<2x1x1x32xf32> to vector<2x32xf32>
    %107 = vector.extract_strided_slice %88 {offsets = [0, 2, 1, 0], sizes = [2, 1, 1, 32], strides = [1, 1, 1, 1]} : vector<2x4x4x32xf32> to vector<2x1x1x32xf32>
    %108 = vector.shape_cast %107 : vector<2x1x1x32xf32> to vector<2x32xf32>
    %109 = vector.extract_strided_slice %88 {offsets = [0, 2, 2, 0], sizes = [2, 1, 1, 32], strides = [1, 1, 1, 1]} : vector<2x4x4x32xf32> to vector<2x1x1x32xf32>
    %110 = vector.shape_cast %109 : vector<2x1x1x32xf32> to vector<2x32xf32>
    %111 = vector.extract_strided_slice %88 {offsets = [0, 2, 3, 0], sizes = [2, 1, 1, 32], strides = [1, 1, 1, 1]} : vector<2x4x4x32xf32> to vector<2x1x1x32xf32>
    %112 = vector.shape_cast %111 : vector<2x1x1x32xf32> to vector<2x32xf32>
    %113 = vector.extract_strided_slice %88 {offsets = [0, 3, 0, 0], sizes = [2, 1, 1, 32], strides = [1, 1, 1, 1]} : vector<2x4x4x32xf32> to vector<2x1x1x32xf32>
    %114 = vector.shape_cast %113 : vector<2x1x1x32xf32> to vector<2x32xf32>
    %115 = vector.extract_strided_slice %88 {offsets = [0, 3, 1, 0], sizes = [2, 1, 1, 32], strides = [1, 1, 1, 1]} : vector<2x4x4x32xf32> to vector<2x1x1x32xf32>
    %116 = vector.shape_cast %115 : vector<2x1x1x32xf32> to vector<2x32xf32>
    %117 = vector.extract_strided_slice %88 {offsets = [0, 3, 2, 0], sizes = [2, 1, 1, 32], strides = [1, 1, 1, 1]} : vector<2x4x4x32xf32> to vector<2x1x1x32xf32>
    %118 = vector.shape_cast %117 : vector<2x1x1x32xf32> to vector<2x32xf32>
    %119 = vector.extract_strided_slice %88 {offsets = [0, 3, 3, 0], sizes = [2, 1, 1, 32], strides = [1, 1, 1, 1]} : vector<2x4x4x32xf32> to vector<2x1x1x32xf32>
    %120 = vector.shape_cast %119 : vector<2x1x1x32xf32> to vector<2x32xf32>
    %121 = tpu.concatenate %90, %92, %94, %96, %98, %100, %102, %104, %106, %108, %110, %112, %114, %116, %118, %120 in 1 : vector<2x32xf32>, vector<2x32xf32>, vector<2x32xf32>, vector<2x32xf32>, vector<2x32xf32>, vector<2x32xf32>, vector<2x32xf32>, vector<2x32xf32>, vector<2x32xf32>, vector<2x32xf32>, vector<2x32xf32>, vector<2x32xf32>, vector<2x32xf32>, vector<2x32xf32>, vector<2x32xf32>, vector<2x32xf32> -> vector<2x512xf32>
    %122 = arith.truncf %121 : vector<2x512xf32> to vector<2x512xbf16>
    %c0_18 = arith.constant 0 : index
    %c0_19 = arith.constant 0 : index
    %123 = vector.load %arg5[%c0_18, %c0_19] : memref<512x1024xbf16, #tpu.memory_space<vmem>>, vector<512x1024xbf16>
    %cst_20 = arith.constant dense<0.000000e+00> : vector<2x1024xf32>
    %124 = tpu.matmul %122, %123, %cst_20 {dimension_numbers = #tpu.dot_dimension_numbers<[1], [0], [0], [1], [0, 0, 1, 1], [], []>} : vector<2x512xbf16>, vector<512x1024xbf16>, vector<2x1024xf32> -> vector<2x1024xf32>
    %c0_21 = arith.constant 0 : index
    %c0_22 = arith.constant 0 : index
    %125 = vector.load %arg6[%c0_21, %c0_22] : memref<1x1024xf32, #tpu.memory_space<vmem>>, vector<1x1024xf32>
    %126 = vector.broadcast %125 : vector<1x1024xf32> to vector<2x1024xf32>
    %127 = arith.addf %124, %126 : vector<2x1024xf32>
    %cst_23 = arith.constant 0.000000e+00 : f32
    %128 = vector.broadcast %cst_23 : f32 to vector<2x1024xf32>
    %129 = arith.maximumf %127, %128 : vector<2x1024xf32>
    %130 = arith.truncf %129 : vector<2x1024xf32> to vector<2x1024xbf16>
    %c0_24 = arith.constant 0 : index
    %c0_25 = arith.constant 0 : index
    %131 = vector.load %arg7[%c0_24, %c0_25] : memref<1024x512xbf16, #tpu.memory_space<vmem>>, vector<1024x512xbf16>
    %cst_26 = arith.constant dense<0.000000e+00> : vector<2x512xf32>
    %132 = tpu.matmul %130, %131, %cst_26 {dimension_numbers = #tpu.dot_dimension_numbers<[1], [0], [0], [1], [0, 0, 1, 1], [], []>} : vector<2x1024xbf16>, vector<1024x512xbf16>, vector<2x512xf32> -> vector<2x512xf32>
    %c0_27 = arith.constant 0 : index
    %c0_28 = arith.constant 0 : index
    %133 = vector.load %arg8[%c0_27, %c0_28] : memref<1x512xf32, #tpu.memory_space<vmem>>, vector<1x512xf32>
    %134 = vector.broadcast %133 : vector<1x512xf32> to vector<2x512xf32>
    %135 = arith.addf %132, %134 : vector<2x512xf32>
    %cst_29 = arith.constant 0.000000e+00 : f32
    %136 = vector.broadcast %cst_29 : f32 to vector<2x512xf32>
    %137 = arith.maximumf %135, %136 : vector<2x512xf32>
    %138 = arith.truncf %137 : vector<2x512xf32> to vector<2x512xbf16>
    %c0_30 = arith.constant 0 : index
    %c0_31 = arith.constant 0 : index
    %139 = vector.load %arg9[%c0_30, %c0_31] : memref<512x128xbf16, #tpu.memory_space<vmem>>, vector<512x128xbf16>
    %cst_32 = arith.constant dense<0.000000e+00> : vector<2x128xf32>
    %140 = tpu.matmul %138, %139, %cst_32 {dimension_numbers = #tpu.dot_dimension_numbers<[1], [0], [0], [1], [0, 0, 1, 1], [], []>} : vector<2x512xbf16>, vector<512x128xbf16>, vector<2x128xf32> -> vector<2x128xf32>
    %c0_33 = arith.constant 0 : index
    %c0_34 = arith.constant 0 : index
    %141 = vector.load %arg10[%c0_33, %c0_34] : memref<1x128xf32, #tpu.memory_space<vmem>>, vector<1x128xf32>
    %142 = vector.broadcast %141 : vector<1x128xf32> to vector<2x128xf32>
    %143 = arith.addf %140, %142 : vector<2x128xf32>
    %cst_35 = arith.constant 0.000000e+00 : f32
    %144 = vector.broadcast %cst_35 : f32 to vector<2x128xf32>
    %145 = arith.maximumf %143, %144 : vector<2x128xf32>
    %146 = arith.truncf %145 : vector<2x128xf32> to vector<2x128xbf16>
    %c0_36 = arith.constant 0 : index
    %c0_37 = arith.constant 0 : index
    %147 = vector.load %arg11[%c0_36, %c0_37] : memref<128x1xbf16, #tpu.memory_space<vmem>>, vector<128x1xbf16>
    %cst_38 = arith.constant dense<0.000000e+00> : vector<2x1xf32>
    %148 = tpu.matmul %146, %147, %cst_38 {dimension_numbers = #tpu.dot_dimension_numbers<[1], [0], [0], [1], [0, 0, 1, 1], [], []>} : vector<2x128xbf16>, vector<128x1xbf16>, vector<2x1xf32> -> vector<2x1xf32>
    %c0_39 = arith.constant 0 : index
    %c0_40 = arith.constant 0 : index
    %149 = vector.load %arg12[%c0_39, %c0_40] : memref<1x1xf32, #tpu.memory_space<vmem>>, vector<1x1xf32>
    %150 = vector.broadcast %149 : vector<1x1xf32> to vector<2x1xf32>
    %151 = arith.addf %148, %150 : vector<2x1xf32>
    %c0_41 = arith.constant 0 : index
    %c0_42 = arith.constant 0 : index
    %152 = vector.load %arg13[%c0_41, %c0_42] : memref<2x1xf32, #tpu.memory_space<vmem>>, vector<2x1xf32>
    tpu.vector_store %arg13[%c0_41, %c0_42], %151 {strides = array<i32>} : memref<2x1xf32, #tpu.memory_space<vmem>>, vector<2x1xf32>,
    return
  }
}

</mosaic_0001>

<bundles_post_ra>
// kernel: convnet54_forward.1
= control target key start
LH: loop header
LB: loop body
LE: loop exit
PB: predicated region body
PF: predicated region fallthrough
CT: control target
= control target key end

     0   :  { %s21203_s0 = inlined_call_operand.vmem [shape: f32[2,16,16,4], index: 0, kind: input, shape index: {}]   ;;  %s21204_s1 = inlined_call_operand.vmem [shape: bf16[36,16], index: 1, kind: input, shape index: {}]   ;;  %s21205_s2 = inlined_call_operand.vmem [shape: f32[1,16], index: 2, kind: input, shape index: {}]   ;;  %s21206_s3 = inlined_call_operand.vmem [shape: bf16[144,32], index: 3, kind: input, shape index: {}]   ;;  %s21207_s4 = inlined_call_operand.vmem [shape: f32[1,32], index: 4, kind: input, shape index: {}]   ;;  %s21208_s5 = inlined_call_operand.hbm [shape: bf16[512,1024], index: 5, kind: input, shape index: {}]   ;;  %s21209_s6 = inlined_call_operand.vmem [shape: f32[1,1024], index: 6, kind: input, shape index: {}]   ;;  %s21210_s7 = inlined_call_operand.hbm [shape: bf16[1024,512], index: 7, kind: input, shape index: {}]   ;;  %s21211_s8 = inlined_call_operand.vmem [shape: f32[1,512], index: 8, kind: input, shape index: {}]   ;;  %s21212_s9 = inlined_call_operand.vmem [shape: bf16[512,128], index: 9, kind: input, shape index: {}]   ;;  %s21213_s10 = inlined_call_operand.vmem [shape: f32[1,128], index: 10, kind: input, shape index: {}]   ;;  %s21214_s11 = inlined_call_operand.vmem [shape: bf16[128,1], index: 11, kind: input, shape index: {}]   ;;  %s21215_s12 = inlined_call_operand.<no memory space> [shape: f32[1,1], index: 12, kind: input, shape index: {}]   ;;  %s21216_s13 = inlined_call_operand.vmem [shape: f32[2,1], index: 13, kind: output, shape index: {}]  }
   0x1   :  { %v18_v0 = vstv %s21215_s12 }
   0x2   :  { %19 = vst [vmem:[#allocation2] sm:$0x1] %v18_v0 }
   0x3   :  { %20 = vsyncpa [#allocation4], 0 }
   0x4   :  { %21 = vsyncpa [#allocation6], 0  ;;  %s16043_s27 = smov [#allocation3]   ;;  %s15995_s14 = scalar_lea.hbm %s21208_s5, 32768 }
   0x5   :  { %s37_s28 = sshll.u32 %s16043_s27, 4  ;;  %p15996_p0 = scmp.ne.s32.totalorder %s21208_s5, %s15995_s14  ;;  %s38_s28 = int_to_ptr.vmem [resolvable:$true] %s37_s28 }
   0x6   :  { %p15999_p1 = scmp.lt.u32.totalorder %s15995_s14, %s21208_s5 }
   0x8   :  { %p16001_p2 = pnand %p15999_p1, %p15996_p0 }
   0xa   :  { %16004 = shalt.err (!%p16001_p2)
}
   0xb   :  { %s16005_s12 = scalar_lea.vmem %s38_s28, 32768  ;;  %p16010_p4 = scmp.lt.s32.totalorder %s38_s28, %s38_s28 }
   0xc   :  { %p16006_p3 = scmp.ne.s32.totalorder %s38_s28, %s16005_s12  ;;  %p16011_p5 = scmp.lt.s32.totalorder %s16005_s12, %s16005_s12 }
   0xe   :  { %p16012_p6 = por %p16011_p5, %p16010_p4 }
  0x10   :  { %p16013_p7 = pnand %p16012_p6, %p16006_p3 }
  0x12   :  { %16016 = shalt.err (!%p16013_p7)
}
  0x13   :  { %s16044_s19 = smov 512   ;;  %s16045_s20 = smov 32  }
  0x14   :  { %43 = dma.hbm_to_vmem [thread:$0]  %s21208_s5, 32768, %s38_s28, [#allocation4], %s16044_s19, %s16044_s19, %s16045_s20  }
  0x15   :  { %s16046_s23 = smov [#allocation5]   ;;  %s16017_s27 = scalar_lea.hbm %s21210_s7, 32768 }
  0x16   :  { %s51_s24 = sshll.u32 %s16046_s23, 4  ;;  %p16018_p8 = scmp.ne.s32.totalorder %s21210_s7, %s16017_s27  ;;  %s52_s24 = int_to_ptr.vmem [resolvable:$true] %s51_s24 }
  0x17   :  { %p16021_p9 = scmp.lt.u32.totalorder %s16017_s27, %s21210_s7 }
  0x19   :  { %p16023_p10 = pnand %p16021_p9, %p16018_p8 }
  0x1b   :  { %16026 = shalt.err (!%p16023_p10)
}
  0x1c   :  { %s16027_s16 = scalar_lea.vmem %s52_s24, 32768  ;;  %p16032_p12 = scmp.lt.s32.totalorder %s52_s24, %s52_s24 }
  0x1d   :  { %p16028_p11 = scmp.ne.s32.totalorder %s52_s24, %s16027_s16  ;;  %p16033_p13 = scmp.lt.s32.totalorder %s16027_s16, %s16027_s16 }
  0x1f   :  { %p16034_p0 = por %p16033_p13, %p16032_p12 }
  0x21   :  { %p16035_p1 = pnand %p16034_p0, %p16028_p11 }
  0x23   :  { %16038 = shalt.err (!%p16035_p1)
}
  0x24   :  { %s16047_s5 = smov 256   ;;  %s16048_s28 = smov 16  }
  0x25   :  { %57 = dma.hbm_to_vmem [thread:$0]  %s21210_s7, 32768, %s52_s24, [#allocation6], %s16047_s5, %s16047_s5, %s16048_s28  }
  0x26   :  { %16039 = dma.done.wait [#allocation4], 32768  }
  0x27   :  { %16040 = vsyncadd [#allocation4], 4294934528 }
  0x28   :  { %16041 = dma.done.wait [#allocation6], 32768  }
  0x29   :  { %16042 = vsyncadd [#allocation6], 4294934528  ;;  %vm204_vm0 = vcmask 1040384   ;;  %v21217_v1 = vmov 0.0   ;;  %vm683_vm1 = vcmask 1045504   ;;  %vm21282_vm2 = vcmask 1046528  }
  0x2a   :  { %v16164_v2 = vrot.slane %v21217_v1, 7  ;;  %v77_v17 = vld [vmem:[%s21203_s0 + $0x10] sm:$0xff]  ;;  %v78_v18 = vld [vmem:[%s21203_s0 + $0x18] sm:$0xff]  ;;  %v75_v19 = vld [vmem:[%s21203_s0] sm:$0xff]  ;;  %s16050_s14 = smov 8   ;;  %s16051_s15 = smov 4  }
  0x2b   :  { %v210_v20 = vrot.slane %v77_v17, 7  ;;  %v211_v21 = vrot.slane %v78_v18, 7  ;;  %v76_v22 = vld [vmem:[%s21203_s0 + $0x8] sm:$0xff]  ;;  %v207_v23 = vrot.slane %v75_v19, 7  ;;  %v79_v24 = vld [vmem:[%s21203_s0 + $0x20] sm:$0xff]  ;;  %s16052_s16 = smov 12  }
  0x2c   :  { %v16168_v3 = vsel %vm204_vm0, 0.0, %v16164_v2  ;;  %v16172_v4 = vsel %vm204_vm0, %v16164_v2, 0.0  ;;  %v685_v5 = vrot.slane %v16164_v2, 2  ;;  %v529_v6 = vrot.slane %v16164_v2, 1  ;;  %v80_v25 = vld [vmem:[%s21203_s0 + $0x28] sm:$0xff]  ;;  %v15554_v63 = vld [vmem:[%s21204_s1] sm:$0xff]  }
  0x2d   :  { %21294 = vst [vmem:[#allocation9_spill] sm:$0xff] %v16168_v3  ;;  %21295 = vst [vmem:[#allocation10_spill] sm:$0xff] %v16172_v4  ;;  %v21219_v7 = vrot.slane %v16168_v3, 2  ;;  %v21220_v8 = vrot.slane %v16172_v4, 2  ;;  %v21221_v9 = vrot.slane %v16168_v3, 1  ;;  %v21222_v10 = vrot.slane %v16172_v4, 1  ;;  %13845 = vmatprep.subr.bf16.mxu0 %v15554_v63 }
  0x2e   :  { %v208_v26 = vrot.slane %v76_v22, 7  ;;  %v213_v27 = vrot.slane %v79_v24, 7  ;;  %v214_v28 = vrot.slane %v80_v25, 7  ;;  %v16219_v29 = vsel %vm204_vm0, %v210_v20, %v211_v21  ;;  %13846 = vmatpush3.bf16.msra.mxu0 %v15554_v63  ;;  %s16053_s12 = smov 20   ;;  %s16054_s19 = smov 24   ;;  %v81_v19 = vld [vmem:[%s21203_s0 + $0x30] sm:$0xff] }
  0x2f   :  { %v686_v11 = vsel %vm683_vm1, %v21219_v7, %v685_v5  ;;  %v688_v12 = vsel %vm683_vm1, %v685_v5, %v21220_v8  ;;  %v530_v13 = vsel %vm21282_vm2, %v21221_v9, %v529_v6  ;;  %v532_v14 = vsel %vm21282_vm2, %v529_v6, %v21222_v10  ;;  %s16055_s25 = smov 28  }
  0x30   :  { %v16192_v15 = vpack.i.bf16 %v688_v12, %v686_v11  ;;  %v16194_v16 = vpack.i.bf16 %v532_v14, %v530_v13  ;;  %v16222_v30 = vsel %vm204_vm0, 0.0, %v210_v20  ;;  %v16225_v31 = vsel %vm204_vm0, 0.0, %v207_v23  ;;  %v15555_v12 = vld [vmem:[%s21204_s1 + $0x8] sm:$0xff]   ;;  %v82_v20 = vld [vmem:[%s21203_s0 + $0x38] sm:$0xff] }
  0x31   :  { %v434_v32 = vsel %vm204_vm0, %v211_v21, 0.0  ;;  %v14024_v33 = vpack.i.bf16 %v16219_v29, %v16222_v30  ;;  %v16231_v34 = vsel %vm204_vm0, %v207_v23, %v208_v26  ;;  %v433_v35 = vsel %vm204_vm0, %v208_v26, 0.0  ;;  %13847 = vmatprep.subr.bf16.mxu0 %v15555_v12 }
  0x32   :  { %14015 = vrot.lane.b32.xlu1 %v16192_v15, %s16050_s14  ;;  %14010 = vrot.lane.b32.xlu0 %v16194_v16, %s16051_s15  ;;  %v689_v36 = vrot.slane %v16225_v31, 2  ;;  %v14019_v37 = vpack.i.bf16 %v16231_v34, %v16225_v31  ;;  %v690_v38 = vrot.slane %v16231_v34, 2  ;;  %v692_v39 = vrot.slane %v433_v35, 2 }
  0x33   :  { %v533_v40 = vrot.slane %v16225_v31, 1  ;;  %v534_v41 = vrot.slane %v16231_v34, 1  ;;  %v536_v42 = vrot.slane %v433_v35, 1  ;;  %v538_v43 = vrot.slane %v16222_v30, 1  ;;  %13848 = vmatpush3.bf16.msra.mxu0 %v15555_v12 }
  0x34   :  { %v539_v44 = vrot.slane %v16219_v29, 1  ;;  %v691_v45 = vsel %vm683_vm1, %v689_v36, %v690_v38  ;;  %v693_v46 = vsel %vm683_vm1, %v690_v38, %v692_v39  ;;  %v541_v47 = vrot.slane %v434_v32, 1  ;;  %v83_v39 = vld [vmem:[%s21203_s0 + $0x40] sm:$0xff] }
  0x35   :  { %v697_v48 = vrot.slane %v434_v32, 2  ;;  %v14034_v49 = vpack.i.bf16 %v693_v46, %v691_v45  ;;  %v535_v50 = vsel %vm21282_vm2, %v533_v40, %v534_v41  ;;  %v537_v51 = vsel %vm21282_vm2, %v534_v41, %v536_v42  ;;  %v84_v40 = vld [vmem:[%s21203_s0 + $0x48] sm:$0xff] }
  0x36   :  { %14025 = vrot.lane.b32.xlu1 %v14024_v33, %s16052_s16  ;;  %14020 = vrot.lane.b32.xlu0 %v14019_v37, %s16052_s16  ;;  %v540_v52 = vsel %vm21282_vm2, %v538_v43, %v539_v44  ;;  %v14029_v53 = vpack.i.bf16 %v537_v51, %v535_v50  ;;  %v542_v54 = vsel %vm21282_vm2, %v539_v44, %v541_v47  ;;  %v694_v55 = vrot.slane %v16222_v30, 2 }
  0x37   :  { %v14044_v56 = vpack.i.bf16 %v542_v54, %v540_v52  ;;  %v695_v57 = vrot.slane %v16219_v29, 2  ;;  %v16255_v58 = vsel %vm204_vm0, %v213_v27, %v214_v28  ;;  %v16258_v59 = vsel %vm204_vm0, 0.0, %v213_v27 }
  0x38   :  { %v435_v62 = vsel %vm204_vm0, %v214_v28, 0.0  ;;  %v544_v5 = vrot.slane %v16255_v58, 1  ;;  %v543_v6 = vrot.slane %v16258_v59, 1  ;;  %v14064_v13 = vpack.i.bf16 %v16255_v58, %v16258_v59 }
  0x39   :  { %v696_v60 = vsel %vm683_vm1, %v694_v55, %v695_v57  ;;  %v698_v61 = vsel %vm683_vm1, %v695_v57, %v697_v48  ;;  %v546_v11 = vrot.slane %v435_v62, 1  ;;  %v699_v21 = vrot.slane %v16258_v59, 2 }
  0x3a   :  { %14035 = vrot.lane.b32.xlu1 %v14034_v49, %s16050_s14  ;;  %14030 = vrot.lane.b32.xlu0 %v14029_v53, %s16051_s15  ;;  %v14054_v0 = vpack.i.bf16 %v698_v61, %v696_v60  ;;  %v545_v14 = vsel %vm21282_vm2, %v543_v6, %v544_v5  ;;  %v700_v22 = vrot.slane %v16255_v58, 2  ;;  %v702_v23 = vrot.slane %v435_v62, 2  ;;  %v85_v6 = vld [vmem:[%s21203_s0 + $0x50] sm:$0xff] }
  0x3b   :  { %v547_v17 = vsel %vm21282_vm2, %v544_v5, %v546_v11  ;;  %v216_v26 = vrot.slane %v81_v19, 7  ;;  %v217_v27 = vrot.slane %v82_v20, 7  ;;  %v219_v47 = vrot.slane %v83_v39, 7  ;;  %v86_v11 = vld [vmem:[%s21203_s0 + $0x58] sm:$0xff] }
  0x3c   :  { %v14074_v18 = vpack.i.bf16 %v547_v17, %v545_v14  ;;  %v701_v24 = vsel %vm683_vm1, %v699_v21, %v700_v22  ;;  %v703_v25 = vsel %vm683_vm1, %v700_v22, %v702_v23  ;;  %v220_v48 = vrot.slane %v84_v40, 7 }
  0x3d   :  { %v14089_v28 = vpack.i.bf16 %v703_v25, %v701_v24  ;;  %v16296_v32 = vsel %vm204_vm0, %v216_v26, %v217_v27  ;;  %v436_v35 = vsel %vm204_vm0, %v217_v27, 0.0  ;;  %vm3041_vm3 = vcmask 1041408  }
  0x3e   :  { %14045 = vrot.lane.b32.xlu1 %v14044_v56, %s16048_s28  ;;  %14040 = vrot.lane.b32.xlu0 %v14029_v53, %s16048_s28  ;;  %v549_v37 = vrot.slane %v16296_v32, 1  ;;  %v551_v38 = vrot.slane %v436_v35, 1  ;;  %v707_v42 = vrot.slane %v436_v35, 2  ;;  %v705_v46 = vrot.slane %v16296_v32, 2  ;;  %v87_v35 = vld [vmem:[%s21203_s0 + $0x60] sm:$0xff] }
  0x3f   :  { %v16325_v52 = vsel %vm204_vm0, %v219_v47, %v220_v48  ;;  %v16328_v53 = vsel %vm204_vm0, 0.0, %v219_v47  ;;  %v437_v54 = vsel %vm204_vm0, %v220_v48, 0.0  ;;  %v222_v20 = vrot.slane %v85_v6, 7 }
  0x40   :  { %v552_v44 = vsel %vm21282_vm2, %v549_v37, %v551_v38  ;;  %v708_v51 = vsel %vm683_vm1, %v705_v46, %v707_v42  ;;  %v554_v57 = vrot.slane %v16325_v52, 1  ;;  %v556_v60 = vrot.slane %v437_v54, 1 }
  0x41   :  { %v14144_v61 = vpack.i.bf16 %v16325_v52, %v16328_v53  ;;  %v709_v12 = vrot.slane %v16328_v53, 2  ;;  %v712_v14 = vrot.slane %v437_v54, 2  ;;  %v223_v21 = vrot.slane %v86_v11, 7 }
  0x42   :  { %14055 = vrot.lane.b32.xlu1 %v14054_v0, %s16053_s12  ;;  %14050 = vrot.lane.b32.xlu0 %v14034_v49, %s16053_s12  ;;  %v557_v63 = vsel %vm21282_vm2, %v554_v57, %v556_v60  ;;  %v16364_v24 = vsel %vm204_vm0, 0.0, %v222_v20  ;;  %vm2369_vm4 = vcmask 31744   ;;  %vm2432_vm5 = vcmask 64512  }
  0x43   :  { %v16361_v23 = vsel %vm204_vm0, %v222_v20, %v223_v21  ;;  %v438_v25 = vsel %vm204_vm0, %v223_v21, 0.0  ;;  %v714_v38 = vrot.slane %v16364_v24, 2  ;;  %v93_v21 = vld [vmem:[%s21203_s0 + $0x90] sm:$0xff]  ;;  %vm21283_vm6 = vcmask 97280  }
  0x44   :  { %v559_v27 = vrot.slane %v16361_v23, 1  ;;  %v715_v42 = vrot.slane %v16361_v23, 2  ;;  %vm2560_vm7 = vcmask 130048   ;;  %vm2625_vm8 = vcmask 162816  }
  0x45   :  { %vm2690_vm9 = vcmask 195584   ;;  %vm2755_vm10 = vcmask 228352   ;;  %vm2820_vm11 = vcmask 261120   ;;  %vm2944_vm12 = vcmask 293888  }
  0x46   :  { %14065 = vrot.lane.b32.xlu1 %v14064_v13, %s16054_s19  ;;  %14060 = vrot.lane.b32.xlu0 %v14024_v33, %s16054_s19  ;;  %v16299_v33 = vsel %vm204_vm0, 0.0, %v216_v26  ;;  %v558_v26 = vrot.slane %v16364_v24, 1  ;;  %vm6662_vm13 = vcmask 1041409   ;;  %vm21287_vm14 = vcmask 1042434  }
  0x47   :  { %v548_v36 = vrot.slane %v16299_v33, 1  ;;  %v14114_v41 = vpack.i.bf16 %v16296_v32, %v16299_v33  ;;  %v704_v45 = vrot.slane %v16299_v33, 2  ;;  %vm21286_vm15 = vcmask 1043459  }
  0x48   :  { %v560_v39 = vsel %vm21282_vm2, %v558_v26, %v559_v27  ;;  %v94_v26 = vld [vmem:[%s21203_s0 + $0x98] sm:$0xff] }
  0x49   :  { %v550_v43 = vsel %vm21282_vm2, %v548_v36, %v549_v37  ;;  %v706_v50 = vsel %vm683_vm1, %v704_v45, %v705_v46  ;;  %v88_v36 = vld [vmem:[%s21203_s0 + $0x68] sm:$0xff]  ;;  %v14194_v37 = vpack.i.bf16 %v16361_v23, %v16364_v24  ;;  %v716_v46 = vsel %vm683_vm1, %v714_v38, %v715_v42 }
  0x4a   :  { %14075 = vrot.lane.b32.xlu1 %v14074_v18, %s16055_s25  ;;  %14070 = vrot.lane.b32.xlu0 %v14044_v56, %s16055_s25  ;;  %v14124_v49 = vpack.i.bf16 %v552_v44, %v550_v43  ;;  %v14134_v55 = vpack.i.bf16 %v708_v51, %v706_v50  ;;  %v225_v43 = vrot.slane %v87_v35, 7  ;;  %v226_v44 = vrot.slane %v88_v36, 7 }
  0x4c   :  { %v16390_v48 = vsel %vm204_vm0, %v225_v43, %v226_v44  ;;  %v439_v50 = vsel %vm204_vm0, %v226_v44, 0.0 }
  0x4d   :  { %v720_v6 = vrot.slane %v16390_v48, 2  ;;  %v722_v11 = vrot.slane %v439_v50, 2 }
  0x4e   :  { %14085 = vrot.lane.b32.xlu1 %v14044_v56, %s16051_s15  ;;  %14080 = vrot.lane.b32.xlu0 %v14054_v0, %s16045_s20  ;;  %v553_v56 = vrot.slane %v16328_v53, 1 }
  0x50   :  { %v555_v62 = vsel %vm21282_vm2, %v553_v56, %v554_v57  ;;  %v566_v56 = vrot.slane %v439_v50, 1 }
  0x51   :  { %v14154_v5 = vpack.i.bf16 %v557_v63, %v555_v62  ;;  %v89_v62 = vld [vmem:[%s21203_s0 + $0x70] sm:$0xff]  ;;  %v90_v63 = vld [vmem:[%s21203_s0 + $0x78] sm:$0xff] }
  0x52   :  { %14095 = vrot.lane.b32.xlu1 %v14074_v18, %s16051_s15  ;;  %14090 = vrot.lane.b32.xlu0 %v14089_v28, %s16045_s20 }
  0x56   :  { %14105 = vrot.lane.b32.xlu1 %v14089_v28, %s16050_s14  ;;  %14100 = vrot.lane.b32.xlu0 %v14054_v0, %s16050_s14  ;;  %v15556_v0 = vld [vmem:[%s21204_s1 + $0x10] ss:$0 sps:$4 sm:$0x33]  }
  0x57   :  { %13987 = vmatprep.subr.msk.bf16.mxu0 %vm3041_vm3, %v15556_v0  ;;  %v3043_v17 = vsel %vm3041_vm3, %v15556_v0, 0  ;;  %vm21284_vm3 = vcmask 1044484  }
  0x58   :  { %13850 = vmatpush3.bf16.msra.mxu0 %v3043_v17 }
  0x5a   :  { %14115 = vrot.lane.b32.xlu1 %v14114_v41, %s16052_s16  ;;  %14110 = vrot.lane.b32.xlu0 %v14064_v13, %s16052_s16  ;;  %v710_v13 = vrot.slane %v16325_v52, 2 }
  0x5c   :  { %v713_v19 = vsel %vm683_vm1, %v710_v13, %v712_v14  ;;  %v91_v14 = vld [vmem:[%s21203_s0 + $0x80] sm:$0xff] }
  0x5e   :  { %14125 = vrot.lane.b32.xlu1 %v14124_v49, %s16048_s28  ;;  %14120 = vrot.lane.b32.xlu0 %v14074_v18, %s16048_s28  ;;  %v711_v18 = vsel %vm683_vm1, %v709_v12, %v710_v13  ;;  %v228_v12 = vrot.slane %v89_v62, 7  ;;  %v229_v13 = vrot.slane %v90_v63, 7 }
  0x5f   :  { %v14169_v22 = vpack.i.bf16 %v713_v19, %v711_v18  ;;  %v723_v18 = vsel %vm683_vm1, %v720_v6, %v722_v11  ;;  %v92_v19 = vld [vmem:[%s21203_s0 + $0x88] sm:$0xff] }
  0x60   :  { %v16433_v20 = vsel %vm204_vm0, 0.0, %v228_v12  ;;  %v232_v38 = vrot.slane %v92_v19, 7 }
  0x61   :  { %21296 = vst [vmem:[#allocation11_spill] sm:$0xff] %v16433_v20  ;;  %v568_v35 = vrot.slane %v16433_v20, 1  ;;  %v724_v44 = vrot.slane %v16433_v20, 2 }
  0x62   :  { %14135 = vrot.lane.b32.xlu1 %v14134_v55, %s16053_s12  ;;  %14130 = vrot.lane.b32.xlu0 %v14089_v28, %s16053_s12  ;;  %v561_v28 = vrot.slane %v438_v25, 1 }
  0x64   :  { %v562_v40 = vsel %vm21282_vm2, %v559_v27, %v561_v28  ;;  %v231_v28 = vrot.slane %v91_v14, 7 }
  0x65   :  { %v14204_v45 = vpack.i.bf16 %v562_v40, %v560_v39  ;;  %v234_v39 = vrot.slane %v93_v21, 7  ;;  %v95_v40 = vld [vmem:[%s21203_s0 + $0xa0] sm:$0xff] }
  0x66   :  { %14145 = vrot.lane.b32.xlu1 %v14144_v61, %s16054_s19  ;;  %14140 = vrot.lane.b32.xlu0 %v14114_v41, %s16054_s19  ;;  %v717_v41 = vrot.slane %v438_v25, 2  ;;  %v440_v25 = vsel %vm204_vm0, %v229_v13, 0.0  ;;  %v16466_v50 = vsel %vm204_vm0, %v231_v28, %v232_v38 }
  0x68   :  { %v718_v47 = vsel %vm683_vm1, %v715_v42, %v717_v41  ;;  %v96_v41 = vld [vmem:[%s21203_s0 + $0xa8] sm:$0xff]  ;;  %v16459_v42 = vsel %vm204_vm0, 0.0, %v231_v28 }
  0x69   :  { %v14214_v51 = vpack.i.bf16 %v718_v47, %v716_v46  ;;  %v729_v14 = vrot.slane %v16459_v42, 2 }
  0x6a   :  { %14155 = vrot.lane.b32.xlu1 %v14154_v5, %s16055_s25  ;;  %14150 = vrot.lane.b32.xlu0 %v14124_v49, %s16055_s25 }
  0x6e   :  { %14165 = vrot.lane.b32.xlu1 %v14124_v49, %s16051_s15  ;;  %14160 = vrot.lane.b32.xlu0 %v14134_v55, %s16045_s20  ;;  %v16393_v49 = vsel %vm204_vm0, 0.0, %v225_v43  ;;  %v235_v43 = vrot.slane %v94_v26, 7 }
  0x6f   :  { %v563_v54 = vrot.slane %v16393_v49, 1  ;;  %v16403_v57 = vpack.i.bf16 %v16390_v48, %v16393_v49 }
  0x70   :  { %v16478_v62 = vsel %vm204_vm0, %v234_v39, %v235_v43  ;;  %v442_v63 = vsel %vm204_vm0, %v235_v43, 0.0 }
  0x71   :  { %21299 = vst [vmem:[#allocation14_spill] sm:$0xff] %v16478_v62  ;;  %v581_v26 = vrot.slane %v442_v63, 1 }
  0x72   :  { %14175 = vrot.lane.b32.xlu1 %v14154_v5, %s16051_s15  ;;  %14170 = vrot.lane.b32.xlu0 %v14169_v22, %s16045_s20 }
  0x76   :  { %14185 = vrot.lane.b32.xlu1 %v14169_v22, %s16050_s14  ;;  %14180 = vrot.lane.b32.xlu0 %v14134_v55, %s16050_s14  ;;  %v564_v55 = vrot.slane %v16390_v48, 1 }
  0x78   :  { %v565_v60 = vsel %vm21282_vm2, %v563_v54, %v564_v55  ;;  %v441_v54 = vsel %vm204_vm0, %v232_v38, 0.0 }
  0x79   :  { %v732_v19 = vrot.slane %v441_v54, 2 }
  0x7a   :  { %14195 = vrot.lane.b32.xlu1 %v14194_v37, %s16052_s16  ;;  %14190 = vrot.lane.b32.xlu0 %v14144_v61, %s16052_s16  ;;  %v567_v61 = vsel %vm21282_vm2, %v564_v55, %v566_v56  ;;  %v727_v56 = vrot.slane %v440_v25, 2 }
  0x7b   :  { %v16416_v0 = vpack.i.bf16 %v567_v61, %v565_v60  ;;  %v573_v60 = vrot.slane %v16459_v42, 1  ;;  %v16474_v61 = vsel %vm204_vm0, 0.0, %v234_v39  ;;  %v735_v39 = vrot.slane %v16478_v62, 2 }
  0x7c   :  { %21298 = vst [vmem:[#allocation13_spill] sm:$0xff] %v16474_v61  ;;  %v734_v28 = vrot.slane %v16474_v61, 2 }
  0x7e   :  { %14205 = vrot.lane.b32.xlu1 %v14204_v45, %s16048_s28  ;;  %14200 = vrot.lane.b32.xlu0 %v14154_v5, %s16048_s28  ;;  %v719_v5 = vrot.slane %v16393_v49, 2 }
  0x80   :  { %v721_v17 = vsel %vm683_vm1, %v719_v5, %v720_v6  ;;  %v237_v5 = vrot.slane %v95_v40, 7  ;;  %v238_v6 = vrot.slane %v96_v41, 7 }
  0x81   :  { %v14249_v27 = vpack.i.bf16 %v723_v18, %v721_v17  ;;  %v730_v18 = vrot.slane %v16466_v50, 2 }
  0x82   :  { %14215 = vrot.lane.b32.xlu1 %v14214_v51, %s16053_s12  ;;  %14210 = vrot.lane.b32.xlu0 %v14169_v22, %s16053_s12  ;;  %v16440_v22 = vsel %vm204_vm0, %v228_v12, %v229_v13  ;;  %v574_v12 = vrot.slane %v16466_v50, 1  ;;  %v576_v13 = vrot.slane %v441_v54, 1  ;;  %v443_v40 = vsel %vm204_vm0, %v238_v6, 0.0  ;;  %v98_v54 = vld [vmem:[%s21203_s0 + $0xb8] sm:$0xff] }
  0x83   :  { %21297 = vst [vmem:[#allocation12_spill] sm:$0xff] %v16440_v22  ;;  %v569_v36 = vrot.slane %v16440_v22, 1  ;;  %v14274_v55 = vpack.i.bf16 %v16440_v22, %v16433_v20 }
  0x85   :  { %v570_v46 = vsel %vm21282_vm2, %v568_v35, %v569_v36  ;;  %v737_v35 = vrot.slane %v442_v63, 2  ;;  %v733_v63 = vsel %vm683_vm1, %v730_v18, %v732_v19 }
  0x86   :  { %14225 = vrot.lane.b32.xlu1 %v16403_v57, %s16054_s19  ;;  %14220 = vrot.lane.b32.xlu0 %v14194_v37, %s16054_s19  ;;  %v571_v37 = vrot.slane %v440_v25, 1  ;;  %v579_v25 = vrot.slane %v16478_v62, 1 }
  0x87   :  { %v738_v1 = vsel %vm683_vm1, %v735_v39, %v737_v35 }
  0x88   :  { %v572_v47 = vsel %vm21282_vm2, %v569_v36, %v571_v37  ;;  %v16493_v36 = vsel %vm204_vm0, %v237_v5, %v238_v6  ;;  %v16496_v37 = vsel %vm204_vm0, 0.0, %v237_v5  ;;  %v586_v6 = vrot.slane %v443_v40, 1 }
  0x89   :  { %v14284_v11 = vpack.i.bf16 %v572_v47, %v570_v46  ;;  %21300 = vst [vmem:[#allocation15_spill] sm:$0xff] %v16493_v36  ;;  %21301 = vst [vmem:[#allocation16_spill] sm:$0xff] %v16496_v37  ;;  %v583_v41 = vrot.slane %v16496_v37, 1  ;;  %v584_v43 = vrot.slane %v16493_v36, 1  ;;  %v582_v19 = vsel %vm21282_vm2, %v579_v25, %v581_v26 }
  0x8a   :  { %14235 = vrot.lane.b32.xlu1 %v16416_v0, %s16055_s25  ;;  %14230 = vrot.lane.b32.xlu0 %v14204_v45, %s16055_s25 }
  0x8e   :  { %14245 = vrot.lane.b32.xlu1 %v14204_v45, %s16051_s15  ;;  %14240 = vrot.lane.b32.xlu0 %v14214_v51, %s16045_s20  ;;  %v725_v45 = vrot.slane %v16440_v22, 2 }
  0x90   :  { %v726_v17 = vsel %vm683_vm1, %v724_v44, %v725_v45  ;;  %v728_v21 = vsel %vm683_vm1, %v725_v45, %v727_v56  ;;  %v575_v44 = vsel %vm21282_vm2, %v573_v60, %v574_v12  ;;  %v577_v45 = vsel %vm21282_vm2, %v574_v12, %v576_v13 }
  0x91   :  { %v16498_v38 = vpack.i.bf16 %v728_v21, %v726_v17  ;;  %v731_v60 = vsel %vm683_vm1, %v729_v14, %v730_v18  ;;  %v739_v12 = vrot.slane %v16496_v37, 2  ;;  %v241_v17 = vrot.slane %v98_v54, 7 }
  0x92   :  { %14255 = vrot.lane.b32.xlu1 %v16416_v0, %s16051_s15  ;;  %14250 = vrot.lane.b32.xlu0 %v14249_v27, %s16045_s20  ;;  %v16541_v21 = vpack.i.bf16 %v733_v63, %v731_v60  ;;  %v585_v60 = vsel %vm21282_vm2, %v583_v41, %v584_v43  ;;  %v587_v63 = vsel %vm21282_vm2, %v584_v43, %v586_v6 }
  0x93   :  { %v16567_v26 = vsel %vm204_vm0, %v241_v17, 0.0  ;;  %v16598_v43 = vpack.i.bf16 %v587_v63, %v585_v60 }
  0x96   :  { %14265 = vrot.lane.b32.xlu1 %v14249_v27, %s16050_s14  ;;  %14260 = vrot.lane.b32.xlu0 %v14214_v51, %s16050_s14  ;;  %v578_v51 = vrot.slane %v16474_v61, 1 }
  0x98   :  { %v580_v18 = vsel %vm21282_vm2, %v578_v51, %v579_v25 }
  0x9a   :  { %14275 = vrot.lane.b32.xlu1 %v14274_v55, %s16052_s16  ;;  %14270 = vrot.lane.b32.xlu0 %v16403_v57, %s16052_s16  ;;  %v16511_v57 = vpack.i.bf16 %v16466_v50, %v16459_v42 }
  0x9e   :  { %14285 = vrot.lane.b32.xlu1 %v14284_v11, %s16048_s28  ;;  %14280 = vrot.lane.b32.xlu0 %v16416_v0, %s16048_s28  ;;  %v97_v0 = vld [vmem:[%s21203_s0 + $0xb0] sm:$0xff] }
  0x9f   :  { %v240_v13 = vrot.slane %v97_v0, 7  ;;  %v16553_v0 = vld [vmem:[%s21203_s0 + $0xc0] sm:$0xff] }
  0xa0   :  { %v243_v41 = vrot.slane %v16553_v0, 7 }
  0xa1   :  { %v16561_v51 = vsel %vm204_vm0, %v240_v13, %v241_v17  ;;  %v16564_v25 = vsel %vm204_vm0, 0.0, %v240_v13 }
  0xa2   :  { %14295 = vrot.lane.b32.xlu1 %v16498_v38, %s16053_s12  ;;  %14290 = vrot.lane.b32.xlu0 %v14249_v27, %s16053_s12  ;;  %v16528_v27 = vpack.i.bf16 %v577_v45, %v575_v44  ;;  %v742_v44 = vrot.slane %v443_v40, 2  ;;  %v736_v45 = vsel %vm683_vm1, %v734_v28, %v735_v39  ;;  %v16558_v40 = vpack.i.bf16 %v16478_v62, %v16474_v61 }
  0xa3   :  { %21302 = vst [vmem:[#allocation17_spill] sm:$0xff] %v16564_v25  ;;  %v16571_v28 = vpack.i.bf16 %v582_v19, %v580_v18  ;;  %v16573_v35 = vpack.i.bf16 %v738_v1, %v736_v45  ;;  %v588_v1 = vrot.slane %v16564_v25, 1  ;;  %v589_v18 = vrot.slane %v16561_v51, 1  ;;  %v100_v45 = vld [vmem:[%s21203_s0 + $0xc8] sm:$0xff] }
  0xa4   :  { %v16516_v46 = vpop.permute.xlu1 %14015  ;;  %v16518_v47 = vpop.permute.xlu0 %14010  ;;  %v591_v19 = vrot.slane %v16567_v26, 1  ;;  %v16608_v0 = vpack.i.bf16 %v16561_v51, %v16564_v25  ;;  %v744_v63 = vrot.slane %v16564_v25, 2  ;;  %v16628_v25 = vsel %vm204_vm0, 0.0, %v243_v41 }
  0xa5   :  { %v14018_v4 = vunpack.i.h.bf16 %v16516_v46  ;;  %21303 = vst [vmem:[#allocation18_spill] sm:$0xff] %v16628_v25 }
  0xa6   :  { %14305 = vrot.lane.b32.xlu1 %v16511_v57, %s16054_s19  ;;  %14300 = vrot.lane.b32.xlu0 %v14274_v55, %s16054_s19  ;;  %v740_v55 = vrot.slane %v16493_v36, 2  ;;  %v16625_v60 = vsel %vm21282_vm2, %v589_v18, %v591_v19 }
  0xa8   :  { %v16531_v56 = vpop.permute.xlu1 %14025  ;;  %v16535_v5 = vpop.permute.xlu0 %14020  ;;  %v741_v13 = vsel %vm683_vm1, %v739_v12, %v740_v55  ;;  %v743_v17 = vsel %vm683_vm1, %v740_v55, %v742_v44  ;;  %v14013_v12 = vunpack.i.h.bf16 %v16518_v47  ;;  %v14012_v55 = vunpack.i.l.bf16 %v16518_v47 }
  0xa9   :  { %v16600_v6 = vpack.i.bf16 %v743_v17, %v741_v13  ;;  %v16617_v47 = vsel %vm21282_vm2, %v588_v1, %v589_v18  ;;  %v244_v17 = vrot.slane %v100_v45, 7  ;;  %v16633_v1 = vld [vmem:[%s21203_s0 + $0xd0] sm:$0xff]  ;;  %v14023_v19 = vunpack.i.h.bf16 %v16535_v5 }
  0xaa   :  { %14315 = vrot.lane.b32.xlu1 %v16528_v27, %s16055_s25  ;;  %14310 = vrot.lane.b32.xlu0 %v14284_v11, %s16055_s25  ;;  %v2371_v45 = vsel %vm2369_vm4, %v16164_v2, %v14013_v12  ;;  %v14022_v61 = vunpack.i.l.bf16 %v16535_v5 }
  0xab   :  { %v16660_v5 = vsel %vm204_vm0, %v244_v17, 0.0  ;;  %v16669_v20 = vsel %vm2432_vm5, %v2371_v45, %v14018_v4 }
  0xac   :  { %v16544_v14 = vpop.permute.xlu1 %14035  ;;  %v14031_v54 = vpop.permute.xlu0 %14030  ;;  %21307 = vst [vmem:[#allocation21_spill] sm:$0xff] %v16669_v20 }
  0xad   :  { %v14033_v8 = vunpack.i.h.bf16 %v14031_v54  ;;  %v14032_v9 = vunpack.i.l.bf16 %v14031_v54  ;;  %v14017_v54 = vunpack.i.l.bf16 %v16516_v46  ;;  %v2370_v46 = vsel %vm2369_vm4, %v16168_v3, %v14012_v55 }
  0xae   :  { %14325 = vrot.lane.b32.xlu1 %v14284_v11, %s16051_s15  ;;  %14320 = vrot.lane.b32.xlu0 %v16498_v38, %s16045_s20  ;;  %v16577_v11 = vpack.i.bf16 %v16493_v36, %v16496_v37  ;;  %v14037_v13 = vunpack.i.l.bf16 %v16544_v14  ;;  %v16657_v37 = vsel %vm204_vm0, %v243_v41, %v244_v17 }
  0xaf   :  { %v2373_v36 = vsel %vm2369_vm4, %v16231_v34, %v14033_v8  ;;  %v2372_v12 = vsel %vm2369_vm4, %v16225_v31, %v14032_v9  ;;  %21305 = vst [vmem:[#allocation19_spill] sm:$0xff] %v16657_v37  ;;  %v14028_v9 = vunpack.i.h.bf16 %v16531_v56  ;;  %v14027_v31 = vunpack.i.l.bf16 %v16531_v56 }
  0xb0   :  { %v16579_v39 = vpop.permute.xlu1 %14045  ;;  %v16585_v7 = vpop.permute.xlu0 %14040  ;;  %v16666_v34 = vsel %vm2432_vm5, %v2370_v46, %v14017_v54  ;;  %v2497_v56 = vsel %vm21283_vm6, %v16669_v20, %v14023_v19 }
  0xb1   :  { %21306 = vst [vmem:[#allocation20_spill] sm:$0xff] %v16666_v34  ;;  %v14043_v17 = vunpack.i.h.bf16 %v16585_v7  ;;  %v2496_v4 = vsel %vm21283_vm6, %v16666_v34, %v14022_v61 }
  0xb2   :  { %14335 = vrot.lane.b32.xlu1 %v16528_v27, %s16051_s15  ;;  %14330 = vrot.lane.b32.xlu0 %v16541_v21, %s16045_s20 }
  0xb4   :  { %v16604_v44 = vpop.permute.xlu1 %14055  ;;  %v16610_v10 = vpop.permute.xlu0 %14050 }
  0xb5   :  { %v14053_v54 = vunpack.i.h.bf16 %v16610_v10 }
  0xb6   :  { %14345 = vrot.lane.b32.xlu1 %v16541_v21, %s16050_s14  ;;  %14340 = vrot.lane.b32.xlu0 %v16498_v38, %s16050_s14  ;;  %v14038_v38 = vunpack.i.h.bf16 %v16544_v14  ;;  %v21304_v14 = vrot.slane %v16561_v51, 2 }
  0xb8   :  { %v16641_v18 = vpop.permute.xlu1 %14065  ;;  %v14061_v62 = vpop.permute.xlu0 %14060  ;;  %v16654_v55 = vsel %vm683_vm1, %v744_v63, %v21304_v14  ;;  %v2436_v41 = vsel %vm2432_vm5, %v2373_v36, %v14038_v38  ;;  %v2435_v63 = vsel %vm2432_vm5, %v2372_v12, %v14037_v13  ;;  %v14042_v14 = vunpack.i.l.bf16 %v16585_v7 }
  0xb9   :  { %v14048_v36 = vunpack.i.h.bf16 %v16579_v39  ;;  %v14047_v13 = vunpack.i.l.bf16 %v16579_v39  ;;  %v14063_v46 = vunpack.i.h.bf16 %v14061_v62  ;;  %v14062_v38 = vunpack.i.l.bf16 %v14061_v62 }
  0xba   :  { %14355 = vrot.lane.b32.xlu1 %v16558_v40, %s16052_s16  ;;  %14350 = vrot.lane.b32.xlu0 %v16511_v57, %s16052_s16  ;;  %v14052_v57 = vunpack.i.l.bf16 %v16610_v10  ;;  %v2498_v7 = vsel %vm21283_vm6, %v2435_v63, %v14027_v31  ;;  %v2499_v19 = vsel %vm21283_vm6, %v2436_v41, %v14028_v9  ;;  %v2562_v10 = vsel %vm2560_vm7, %v2497_v56, %v14043_v17 }
  0xbb   :  { %v2561_v34 = vsel %vm2560_vm7, %v2496_v4, %v14042_v14  ;;  %v14058_v39 = vunpack.i.h.bf16 %v16604_v44  ;;  %v14057_v62 = vunpack.i.l.bf16 %v16604_v44  ;;  %v2627_v31 = vsel %vm2625_vm8, %v2562_v10, %v14053_v54 }
  0xbc   :  { %v14076_v8 = vpop.permute.xlu1 %14075  ;;  %v14071_v45 = vpop.permute.xlu0 %14070  ;;  %v2626_v22 = vsel %vm2625_vm8, %v2561_v34, %v14052_v57  ;;  %v14068_v9 = vunpack.i.h.bf16 %v16641_v18  ;;  %v14067_v41 = vunpack.i.l.bf16 %v16641_v18  ;;  %v2692_v44 = vsel %vm2690_vm9, %v2627_v31, %v14063_v46  ;;  %v102_v34 = vld [vmem:[%s21203_s0 + $0xd8] sm:$0xff] }
  0xbd   :  { %v14073_v12 = vunpack.i.h.bf16 %v14071_v45  ;;  %v14072_v61 = vunpack.i.l.bf16 %v14071_v45  ;;  %v2691_v17 = vsel %vm2690_vm9, %v2626_v22, %v14062_v38  ;;  %v14078_v14 = vunpack.i.h.bf16 %v14076_v8 }
  0xbe   :  { %14365 = vrot.lane.b32.xlu1 %v16571_v28, %s16048_s28  ;;  %14360 = vrot.lane.b32.xlu0 %v16528_v27, %s16048_s28  ;;  %v14077_v56 = vunpack.i.l.bf16 %v14076_v8  ;;  %v2563_v54 = vsel %vm2560_vm7, %v2498_v7, %v14047_v13  ;;  %v2564_v57 = vsel %vm2560_vm7, %v2499_v19, %v14048_v36 }
  0xbf   :  { %v2756_v18 = vsel %vm2755_vm10, %v2691_v17, %v14072_v61  ;;  %v2757_v4 = vsel %vm2755_vm10, %v2692_v44, %v14073_v12  ;;  %v2628_v10 = vsel %vm2625_vm8, %v2563_v54, %v14057_v62  ;;  %v2629_v8 = vsel %vm2625_vm8, %v2564_v57, %v14058_v39 }
  0xc0   :  { %v16695_v20 = vpop.permute.xlu1 %14085  ;;  %v14081_v63 = vpop.permute.xlu0 %14080  ;;  %v2693_v61 = vsel %vm2690_vm9, %v2628_v10, %v14067_v41  ;;  %v2694_v12 = vsel %vm2690_vm9, %v2629_v8, %v14068_v9  ;;  %v21308_v39 = vrot.slane %v16567_v26, 2  ;;  %v21309_v62 = vrot.slane %v16561_v51, 2 }
  0xc1   :  { %v14083_v27 = vunpack.i.h.bf16 %v14081_v63  ;;  %v14082_v45 = vunpack.i.l.bf16 %v14081_v63  ;;  %v247_v63 = vrot.slane %v102_v34, 7  ;;  %v2758_v36 = vsel %vm2755_vm10, %v2693_v61, %v14077_v56 }
  0xc2   :  { %14375 = vrot.lane.b32.xlu1 %v16573_v35, %s16053_s12  ;;  %14370 = vrot.lane.b32.xlu0 %v16541_v21, %s16053_s12  ;;  %v2759_v19 = vsel %vm2755_vm10, %v2694_v12, %v14078_v14  ;;  %v748_v9 = vsel %vm683_vm1, %v21309_v62, %v21308_v39  ;;  %v593_v41 = vrot.slane %v16628_v25, 1  ;;  %v594_v26 = vrot.slane %v16657_v37, 1 }
  0xc3   :  { %v2821_v46 = vsel %vm2820_vm11, %v2756_v18, %v14082_v45  ;;  %v2822_v38 = vsel %vm2820_vm11, %v2757_v4, %v14083_v27  ;;  %v103_v27 = vld [vmem:[%s21203_s0 + $0xe0] sm:$0xff]  ;;  %v104_v45 = vld [vmem:[%s21203_s0 + $0xe8] sm:$0xff]  ;;  %v596_v34 = vrot.slane %v16660_v5, 1  ;;  %v21310_v18 = vrot.slane %v16633_v1, 7 }
  0xc4   :  { %v16714_v22 = vpop.permute.xlu1 %14095  ;;  %v14091_v31 = vpop.permute.xlu0 %14090  ;;  %v2885_v21 = vpack.c.bf16 %v2822_v38, %v2821_v46  ;;  %v446_v46 = vsel %vm204_vm0, %v247_v63, 0.0  ;;  %v249_v38 = vrot.slane %v103_v27, 7  ;;  %v250_v10 = vrot.slane %v104_v45, 7 }
  0xc5   :  { %v14093_v13 = vunpack.i.h.bf16 %v14091_v31  ;;  %v14092_v7 = vunpack.i.l.bf16 %v14091_v31  ;;  %v16752_v4 = vsel %vm204_vm0, 0.0, %v21310_v18  ;;  %v21312_v54 = vmov %v21310_v18 }
  0xc6   :  { %14385 = vrot.lane.b32.xlu1 %v16577_v11, %s16054_s19  ;;  %14380 = vrot.lane.b32.xlu0 %v16558_v40, %s16054_s19  ;;  %21311 = vst [vmem:[#allocation22_spill] sm:$0xff] %v16752_v4  ;;  %v16759_v57 = vsel %vm204_vm0, %v21312_v54, %v247_v63  ;;  %v16767_v8 = vpack.i.bf16 %v16625_v60, %v16617_v47  ;;  %v752_v60 = vrot.slane %v16660_v5, 2  ;;  %v754_v39 = vrot.slane %v16752_v4, 2 }
  0xc7   :  { %13851 = vmatprep.mubr.msk.bf16.mxu0 %vm2944_vm12, %v2885_v21  ;;  %v2823_v40 = vsel %vm2820_vm11, %v2758_v36, %v14092_v7  ;;  %v2824_v17 = vsel %vm2820_vm11, %v2759_v19, %v14093_v13  ;;  %21313 = vst [vmem:[#allocation23_spill] sm:$0xff] %v16759_v57  ;;  %v16770_v31 = vpack.i.bf16 %v748_v9, %v16654_v55  ;;  %v749_v21 = vrot.slane %v16628_v25, 2 }
  0xc8   :  { %v16743_v44 = vpop.permute.xlu1 %14105  ;;  %v16747_v14 = vpop.permute.xlu0 %14100  ;;  %v2886_v56 = vpack.c.bf16 %v2824_v17, %v2823_v40  ;;  %v16774_v1 = vpack.i.bf16 %v16657_v37, %v16628_v25  ;;  %v595_v61 = vsel %vm21282_vm2, %v593_v41, %v594_v26  ;;  %v597_v12 = vsel %vm21282_vm2, %v594_v26, %v596_v34 }
  0xc9   :  { %v750_v13 = vrot.slane %v16657_v37, 2  ;;  %v598_v55 = vrot.slane %v16752_v4, 1  ;;  %v599_v7 = vrot.slane %v16759_v57, 1  ;;  %v601_v36 = vrot.slane %v446_v46, 1 }
  0xca   :  { %14395 = vrot.lane.b32.xlu1 %v16598_v43, %s16055_s25  ;;  %14390 = vrot.lane.b32.xlu0 %v16571_v28, %s16055_s25  ;;  %v757_v19 = vrot.slane %v446_v46, 2  ;;  %v755_v62 = vrot.slane %v16759_v57, 2  ;;  %v16792_v9 = vsel %vm204_vm0, %v249_v38, %v250_v10  ;;  %v16795_v5 = vsel %vm204_vm0, 0.0, %v249_v38 }
  0xcb   :  { %13852 = vmatmul.mubr.msk.bf16.vlgmr.msra.gmra.mrb[0].mxu0 %vm2944_vm12, %v2886_v56  ;;  %21314 = vst [vmem:[#allocation24_spill] sm:$0xff] %v16795_v5  ;;  %v16800_v41 = vsel %vm204_vm0, %v250_v10, 0.0  ;;  %v16804_v45 = vpack.i.bf16 %v597_v12, %v595_v61  ;;  %v753_v40 = vsel %vm683_vm1, %v750_v13, %v752_v60  ;;  %v600_v26 = vsel %vm21282_vm2, %v598_v55, %v599_v7  ;;  %v16829_v61 = vld [vmem:[%s21203_s0 + $0xf8] sm:$0xff] }
  0xcc   :  { %v16777_v63 = vpop.permute.xlu1 %14115  ;;  %v16783_v47 = vpop.permute.xlu0 %14110  ;;  %v603_v34 = vrot.slane %v16795_v5, 1  ;;  %v604_v56 = vrot.slane %v16792_v9, 1  ;;  %v602_v18 = vsel %vm21282_vm2, %v599_v7, %v601_v36  ;;  %v756_v54 = vsel %vm683_vm1, %v754_v39, %v755_v62 }
  0xcd   :  { %v758_v46 = vsel %vm683_vm1, %v755_v62, %v757_v19  ;;  %v606_v38 = vrot.slane %v16800_v41, 1  ;;  %v14098_v12 = vunpack.i.h.bf16 %v16714_v22  ;;  %v16837_v55 = vpack.i.bf16 %v16759_v57, %v16752_v4 }
  0xce   :  { %14405 = vrot.lane.b32.xlu1 %v16571_v28, %s16051_s15  ;;  %14400 = vrot.lane.b32.xlu0 %v16573_v35, %s16045_s20  ;;  %v751_v28 = vsel %vm683_vm1, %v749_v21, %v750_v13  ;;  %v105_v21 = vld [vmem:[%s21203_s0 + $0xf0] sm:$0xff]  ;;  %v14097_v13 = vunpack.i.l.bf16 %v16714_v22  ;;  %v16839_v36 = vpack.i.bf16 %v602_v18, %v600_v26  ;;  %v16841_v19 = vpack.i.bf16 %v758_v46, %v756_v54 }
  0xcf   :  { %v16821_v10 = vpack.i.bf16 %v753_v40, %v751_v28  ;;  %v16844_v39 = vsel %vm21282_vm2, %v603_v34, %v604_v56  ;;  %v16849_v62 = vsel %vm21282_vm2, %v604_v56, %v606_v38  ;;  %v252_v28 = vrot.slane %v105_v21, 7 }
  0xd0   :  { %v16802_v27 = vpop.permute.xlu1 %14125  ;;  %v16808_v17 = vpop.permute.xlu0 %14120  ;;  %v14088_v4 = vunpack.i.h.bf16 %v16695_v20  ;;  %v14087_v26 = vunpack.i.l.bf16 %v16695_v20  ;;  %v14108_v18 = vunpack.i.h.bf16 %v16743_v44  ;;  %v14107_v34 = vunpack.i.l.bf16 %v16743_v44 }
  0xd1   :  { %v2377_v56 = vsel %vm2369_vm4, %v16255_v58, %v14098_v12  ;;  %v2376_v54 = vsel %vm2369_vm4, %v16258_v59, %v14097_v13  ;;  %v14103_v46 = vunpack.i.h.bf16 %v16747_v14  ;;  %v14102_v38 = vunpack.i.l.bf16 %v16747_v14 }
  0xd2   :  { %14415 = vrot.lane.b32.xlu1 %v16598_v43, %s16051_s15  ;;  %14410 = vrot.lane.b32.xlu0 %v16600_v6, %s16045_s20  ;;  %v14118_v20 = vunpack.i.h.bf16 %v16777_v63  ;;  %v14117_v22 = vunpack.i.l.bf16 %v16777_v63  ;;  %v14113_v58 = vunpack.i.h.bf16 %v16783_v47  ;;  %v14112_v12 = vunpack.i.l.bf16 %v16783_v47 }
  0xd3   :  { %v21315_v59 = vrot.slane %v16829_v61, 7  ;;  %v16881_v13 = vsel %vm204_vm0, 0.0, %v252_v28  ;;  %v2375_v63 = vsel %vm2369_vm4, %v16219_v29, %v14088_v4  ;;  %v2439_v40 = vsel %vm2432_vm5, %v2376_v54, %v14107_v34 }
  0xd4   :  { %v16833_v60 = vpop.permute.xlu1 %14135  ;;  %v14131_v7 = vpop.permute.xlu0 %14130  ;;  %v2440_v47 = vsel %vm2432_vm5, %v2377_v56, %v14108_v18  ;;  %v2438_v57 = vsel %vm2432_vm5, %v2375_v63, %v14103_v46  ;;  %v14122_v37 = vunpack.i.l.bf16 %v16808_v17  ;;  %v2502_v29 = vsel %vm21283_vm6, %v2439_v40, %v14117_v22 }
  0xd5   :  { %v16878_v14 = vsel %vm204_vm0, %v252_v28, %v21315_v59  ;;  %v14123_v28 = vunpack.i.h.bf16 %v16808_v17  ;;  %v14133_v4 = vunpack.i.h.bf16 %v14131_v7  ;;  %v14128_v46 = vunpack.i.h.bf16 %v16802_v27 }
  0xd6   :  { %14425 = vrot.lane.b32.xlu1 %v16600_v6, %s16050_s14  ;;  %14420 = vrot.lane.b32.xlu0 %v16573_v35, %s16050_s14  ;;  %v2374_v35 = vsel %vm2369_vm4, %v16222_v30, %v14087_v26  ;;  %v2503_v30 = vsel %vm21283_vm6, %v2440_v47, %v14118_v20  ;;  %v14132_v26 = vunpack.i.l.bf16 %v14131_v7  ;;  %v14127_v17 = vunpack.i.l.bf16 %v16802_v27 }
  0xd7   :  { %v2437_v59 = vsel %vm2432_vm5, %v2374_v35, %v14102_v38  ;;  %v14137_v20 = vunpack.i.l.bf16 %v16833_v60 }
  0xd8   :  { %v16865_v21 = vpop.permute.xlu1 %14145  ;;  %v14141_v44 = vpop.permute.xlu0 %14140  ;;  %v2500_v18 = vsel %vm21283_vm6, %v2437_v59, %v14112_v12 }
  0xd9   :  { %v14143_v56 = vunpack.i.h.bf16 %v14141_v44  ;;  %v14142_v54 = vunpack.i.l.bf16 %v14141_v44  ;;  %v2565_v7 = vsel %vm2560_vm7, %v2500_v18, %v14122_v37  ;;  %v14148_v27 = vunpack.i.h.bf16 %v16865_v21 }
  0xda   :  { %14435 = vrot.lane.b32.xlu1 %v16608_v0, %s16052_s16  ;;  %14430 = vrot.lane.b32.xlu0 %v16577_v11, %s16052_s16  ;;  %v2501_v11 = vsel %vm21283_vm6, %v2438_v57, %v14113_v58  ;;  %v14138_v57 = vunpack.i.h.bf16 %v16833_v60  ;;  %v2630_v35 = vsel %vm2625_vm8, %v2565_v7, %v14132_v26  ;;  %v14147_v12 = vunpack.i.l.bf16 %v16865_v21 }
  0xdb   :  { %v2566_v40 = vsel %vm2560_vm7, %v2501_v11, %v14123_v28  ;;  %v2567_v21 = vsel %vm2560_vm7, %v2502_v29, %v14127_v17 }
  0xdc   :  { %v14156_v25 = vpop.permute.xlu1 %14155  ;;  %v14151_v34 = vpop.permute.xlu0 %14150  ;;  %v2631_v58 = vsel %vm2625_vm8, %v2566_v40, %v14133_v4 }
  0xdd   :  { %v14153_v38 = vunpack.i.h.bf16 %v14151_v34  ;;  %v14152_v22 = vunpack.i.l.bf16 %v14151_v34  ;;  %v2696_v37 = vsel %vm2690_vm9, %v2631_v58, %v14143_v56  ;;  %v14158_v60 = vunpack.i.h.bf16 %v14156_v25 }
  0xde   :  { %14445 = vrot.lane.b32.xlu1 %v16767_v8, %s16048_s28  ;;  %14440 = vrot.lane.b32.xlu0 %v16598_v43, %s16048_s28  ;;  %v2695_v43 = vsel %vm2690_vm9, %v2630_v35, %v14142_v54  ;;  %v14157_v28 = vunpack.i.l.bf16 %v14156_v25  ;;  %v2568_v34 = vsel %vm2560_vm7, %v2503_v30, %v14128_v46  ;;  %v107_v25 = vld [vmem:[%s21203_s0 + $0x100] sm:$0xff]  ;;  %v108_v54 = vld [vmem:[%s21203_s0 + $0x108] sm:$0xff]  ;;  %v21316_v46 = vrot.slane %v16829_v61, 7 }
  0xdf   :  { %v2760_v26 = vsel %vm2755_vm10, %v2695_v43, %v14152_v22  ;;  %v2761_v4 = vsel %vm2755_vm10, %v2696_v37, %v14153_v38  ;;  %v2633_v29 = vsel %vm2625_vm8, %v2568_v34, %v14138_v57  ;;  %v255_v61 = vrot.slane %v107_v25, 7 }
  0xe0   :  { %v16909_v44 = vpop.permute.xlu1 %14165  ;;  %v14161_v63 = vpop.permute.xlu0 %14160  ;;  %v448_v38 = vsel %vm204_vm0, %v21316_v46, 0.0  ;;  %v2698_v7 = vsel %vm2690_vm9, %v2633_v29, %v14148_v27  ;;  %v256_v57 = vrot.slane %v108_v54, 7  ;;  %v16955_v43 = vpack.i.bf16 %v16792_v9, %v16795_v5  ;;  %v109_v29 = vld [vmem:[%s21203_s0 + $0x110] sm:$0xff] }
  0xe1   :  { %v14163_v47 = vunpack.i.h.bf16 %v14161_v63  ;;  %v14162_v59 = vunpack.i.l.bf16 %v14161_v63  ;;  %v16959_v37 = vpack.i.bf16 %v16849_v62, %v16844_v39  ;;  %v21319_v39 = vrot.slane %v16800_v41, 2 }
  0xe2   :  { %14455 = vrot.lane.b32.xlu1 %v16770_v31, %s16053_s12  ;;  %14450 = vrot.lane.b32.xlu0 %v16600_v6, %s16053_s12  ;;  %v2632_v6 = vsel %vm2625_vm8, %v2567_v21, %v14137_v20  ;;  %v2763_v20 = vsel %vm2755_vm10, %v2698_v7, %v14158_v60  ;;  %v844_v60 = vrot.slane %v16878_v14, 1  ;;  %v854_v25 = vrot.slane %v16878_v14, 2 }
  0xe3   :  { %v2825_v18 = vsel %vm2820_vm11, %v2760_v26, %v14162_v59  ;;  %v2826_v11 = vsel %vm2820_vm11, %v2761_v4, %v14163_v47  ;;  %v2697_v22 = vsel %vm2690_vm9, %v2632_v6, %v14147_v12  ;;  %v843_v59 = vrot.slane %v16881_v13, 1 }
  0xe4   :  { %v16927_v56 = vpop.permute.xlu1 %14175  ;;  %v14171_v17 = vpop.permute.xlu0 %14170  ;;  %v2887_v30 = vpack.c.bf16 %v2826_v11, %v2825_v18  ;;  %v2762_v58 = vsel %vm2755_vm10, %v2697_v22, %v14157_v28  ;;  %v846_v28 = vrot.slane %v448_v38, 1  ;;  %v21317_v26 = vrot.slane %v16792_v9, 2 }
  0xe5   :  { %v14173_v40 = vunpack.i.h.bf16 %v14171_v17  ;;  %v14172_v35 = vunpack.i.l.bf16 %v14171_v17  ;;  %v21318_v4 = vrot.slane %v16795_v5, 2  ;;  %v856_v18 = vrot.slane %v448_v38, 2 }
  0xe6   :  { %14465 = vrot.lane.b32.xlu1 %v16774_v1, %s16054_s19  ;;  %14460 = vrot.lane.b32.xlu0 %v16608_v0, %s16054_s19  ;;  %v21320_v62 = vmov %v21317_v26  ;;  %v853_v11 = vrot.slane %v16881_v13, 2  ;;  %v16983_v54 = vsel %vm204_vm0, %v255_v61, %v256_v57  ;;  %v16986_v6 = vsel %vm204_vm0, 0.0, %v255_v61 }
  0xe7   :  { %13855 = vmatprep.mubr.msk.bf16.mxu0 %vm2944_vm12, %v2887_v30  ;;  %v2828_v12 = vsel %vm2820_vm11, %v2763_v20, %v14173_v40  ;;  %v2827_v27 = vsel %vm2820_vm11, %v2762_v58, %v14172_v35  ;;  %v761_v21 = vsel %vm683_vm1, %v21318_v4, %v21317_v26  ;;  %v763_v34 = vsel %vm683_vm1, %v21320_v62, %v21319_v39  ;;  %v110_v30 = vld [vmem:[%s21203_s0 + $0x118] sm:$0xff] }
  0xe8   :  { %v16951_v63 = vpop.permute.xlu1 %14185  ;;  %v16961_v47 = vpop.permute.xlu0 %14180  ;;  %v2888_v0 = vpack.c.bf16 %v2828_v12, %v2827_v27  ;;  %v449_v41 = vsel %vm204_vm0, %v256_v57, 0.0  ;;  %v16999_v38 = vpack.i.bf16 %v763_v34, %v761_v21  ;;  %v845_v22 = vsel %vm21282_vm2, %v843_v59, %v844_v60 }
  0xe9   :  { %v847_v7 = vsel %vm21282_vm2, %v844_v60, %v846_v28  ;;  %v764_v40 = vrot.slane %v16986_v6, 2  ;;  %v765_v35 = vrot.slane %v16983_v54, 2  ;;  %v767_v58 = vrot.slane %v449_v41, 2 }
  0xea   :  { %14475 = vrot.lane.b32.xlu1 %v16804_v45, %s16055_s25  ;;  %14470 = vrot.lane.b32.xlu0 %v16767_v8, %s16055_s25  ;;  %v258_v20 = vrot.slane %v109_v29, 7  ;;  %v855_v61 = vsel %vm683_vm1, %v853_v11, %v854_v25  ;;  %v857_v57 = vsel %vm683_vm1, %v854_v25, %v856_v18  ;;  %v259_v12 = vrot.slane %v110_v30, 7  ;;  %v111_v18 = vld [vmem:[%s21203_s0 + $0x120] sm:$0xff]  ;;  %v17048_v11 = vld [vmem:[%s21203_s0 + $0x128] sm:$0xff] }
  0xeb   :  { %13856 = vmatmul.mubr.msk.bf16.gmra.mrb[4].mxu0 %vm2944_vm12, %v2888_v0  ;;  %v17015_v0 = vpack.i.bf16 %v16878_v14, %v16881_v13  ;;  %v608_v60 = vrot.slane %v16986_v6, 1  ;;  %v609_v28 = vrot.slane %v16983_v54, 1  ;;  %v611_v26 = vrot.slane %v449_v41, 1 }
  0xec   :  { %v16992_v17 = vpop.permute.xlu1 %14195  ;;  %v16997_v46 = vpop.permute.xlu0 %14190  ;;  %v17025_v4 = vpack.i.bf16 %v857_v57, %v855_v61  ;;  %v766_v21 = vsel %vm683_vm1, %v764_v40, %v765_v35  ;;  %v768_v39 = vsel %vm683_vm1, %v765_v35, %v767_v58  ;;  %v17030_v14 = vsel %vm204_vm0, 0.0, %v258_v20 }
  0xed   :  { %v17037_v62 = vsel %vm204_vm0, %v258_v20, %v259_v12  ;;  %v17040_v34 = vsel %vm204_vm0, %v259_v12, 0.0  ;;  %v14178_v25 = vunpack.i.h.bf16 %v16927_v56  ;;  %v14177_v41 = vunpack.i.l.bf16 %v16927_v56 }
  0xee   :  { %14485 = vrot.lane.b32.xlu1 %v16767_v8, %s16051_s15  ;;  %14480 = vrot.lane.b32.xlu0 %v16770_v31, %s16045_s20  ;;  %v17017_v8 = vpack.i.bf16 %v847_v7, %v845_v22  ;;  %v17056_v22 = vpack.i.bf16 %v768_v39, %v766_v21  ;;  %v17059_v7 = vsel %vm21282_vm2, %v608_v60, %v609_v28  ;;  %v261_v20 = vrot.slane %v111_v18, 7 }
  0xef   :  { %v17062_v40 = vsel %vm21282_vm2, %v609_v28, %v611_v26  ;;  %v21238_v61 = vrot.slane %v17048_v11, 7  ;;  %v14168_v57 = vunpack.i.h.bf16 %v16909_v44  ;;  %v14167_v12 = vunpack.i.l.bf16 %v16909_v44 }
  0xf0   :  { %v17011_v27 = vpop.permute.xlu1 %14205  ;;  %v17019_v59 = vpop.permute.xlu0 %14200  ;;  %v14188_v60 = vunpack.i.h.bf16 %v16951_v63  ;;  %v14187_v28 = vunpack.i.l.bf16 %v16951_v63  ;;  %v2381_v26 = vsel %vm2369_vm4, %v16325_v52, %v14178_v25  ;;  %v2380_v21 = vsel %vm2369_vm4, %v16328_v53, %v14177_v41 }
  0xf1   :  { %v14183_v39 = vunpack.i.h.bf16 %v16961_v47  ;;  %v14182_v18 = vunpack.i.l.bf16 %v16961_v47  ;;  %v14198_v44 = vunpack.i.h.bf16 %v16992_v17  ;;  %v14197_v56 = vunpack.i.l.bf16 %v16992_v17 }
  0xf2   :  { %14495 = vrot.lane.b32.xlu1 %v16804_v45, %s16051_s15  ;;  %14490 = vrot.lane.b32.xlu0 %v16821_v10, %s16045_s20  ;;  %v14193_v52 = vunpack.i.h.bf16 %v16997_v46  ;;  %v14192_v25 = vunpack.i.l.bf16 %v16997_v46  ;;  %v17095_v53 = vsel %vm204_vm0, %v261_v20, %v21238_v61  ;;  %v17098_v47 = vsel %vm204_vm0, 0.0, %v261_v20 }
  0xf3   :  { %21321 = vst [vmem:[#allocation25_spill] sm:$0xff] %v17095_v53  ;;  %21322 = vst [vmem:[#allocation26_spill] sm:$0xff] %v17098_v47  ;;  %v2379_v17 = vsel %vm2369_vm4, %v16296_v32, %v14168_v57  ;;  %v2378_v41 = vsel %vm2369_vm4, %v16299_v33, %v14167_v12  ;;  %v2443_v35 = vsel %vm2432_vm5, %v2380_v21, %v14187_v28  ;;  %v14203_v20 = vunpack.i.h.bf16 %v17019_v59 }
  0xf4   :  { %v17052_v29 = vpop.permute.xlu1 %14215  ;;  %v17054_v30 = vpop.permute.xlu0 %14210  ;;  %v2444_v46 = vsel %vm2432_vm5, %v2381_v26, %v14188_v60  ;;  %v2441_v58 = vsel %vm2432_vm5, %v2378_v41, %v14182_v18  ;;  %v14202_v61 = vunpack.i.l.bf16 %v17019_v59  ;;  %v2506_v32 = vsel %vm21283_vm6, %v2443_v35, %v14197_v56 }
  0xf5   :  { %v2507_v33 = vsel %vm21283_vm6, %v2444_v46, %v14198_v44  ;;  %v14213_v57 = vunpack.i.h.bf16 %v17054_v30  ;;  %v14212_v12 = vunpack.i.l.bf16 %v17054_v30  ;;  %v14208_v59 = vunpack.i.h.bf16 %v17011_v27 }
  0xf6   :  { %14505 = vrot.lane.b32.xlu1 %v16821_v10, %s16050_s14  ;;  %14500 = vrot.lane.b32.xlu0 %v16770_v31, %s16050_s14  ;;  %v2442_v31 = vsel %vm2432_vm5, %v2379_v17, %v14183_v39  ;;  %v14207_v35 = vunpack.i.l.bf16 %v17011_v27  ;;  %v14218_v18 = vunpack.i.h.bf16 %v17052_v29  ;;  %v14217_v44 = vunpack.i.l.bf16 %v17052_v29 }
  0xf7   :  { %v2505_v28 = vsel %vm21283_vm6, %v2442_v31, %v14193_v52 }
  0xf8   :  { %v17082_v13 = vpop.permute.xlu1 %14225  ;;  %v14221_v63 = vpop.permute.xlu0 %14220 }
  0xf9   :  { %v14223_v26 = vunpack.i.h.bf16 %v14221_v63  ;;  %v14222_v21 = vunpack.i.l.bf16 %v14221_v63  ;;  %v14228_v27 = vunpack.i.h.bf16 %v17082_v13 }
  0xfa   :  { %14515 = vrot.lane.b32.xlu1 %v16837_v55, %s16052_s16  ;;  %14510 = vrot.lane.b32.xlu0 %v16774_v1, %s16052_s16  ;;  %v2504_v1 = vsel %vm21283_vm6, %v2441_v58, %v14192_v25  ;;  %v2570_v58 = vsel %vm2560_vm7, %v2505_v28, %v14203_v20  ;;  %v14227_v25 = vunpack.i.l.bf16 %v17082_v13  ;;  %v2571_v13 = vsel %vm2560_vm7, %v2506_v32, %v14207_v35 }
  0xfb   :  { %v2569_v30 = vsel %vm2560_vm7, %v2504_v1, %v14202_v61  ;;  %v2635_v52 = vsel %vm2625_vm8, %v2570_v58, %v14213_v57 }
  0xfc   :  { %v14236_v5 = vpop.permute.xlu1 %14235  ;;  %v14231_v60 = vpop.permute.xlu0 %14230  ;;  %v2634_v31 = vsel %vm2625_vm8, %v2569_v30, %v14212_v12  ;;  %v2700_v61 = vsel %vm2690_vm9, %v2635_v52, %v14223_v26 }
  0xfd   :  { %v14233_v56 = vunpack.i.h.bf16 %v14231_v60  ;;  %v14232_v39 = vunpack.i.l.bf16 %v14231_v60  ;;  %v14238_v29 = vunpack.i.h.bf16 %v14236_v5  ;;  %v14237_v20 = vunpack.i.l.bf16 %v14236_v5  ;;  %v113_v5 = vld [vmem:[%s21203_s0 + $0x130] sm:$0xff] }
  0xfe   :  { %14525 = vrot.lane.b32.xlu1 %v16839_v36, %s16048_s28  ;;  %14520 = vrot.lane.b32.xlu0 %v16804_v45, %s16048_s28  ;;  %v2699_v45 = vsel %vm2690_vm9, %v2634_v31, %v14222_v21  ;;  %v2572_v60 = vsel %vm2560_vm7, %v2507_v33, %v14208_v59  ;;  %v114_v21 = vld [vmem:[%s21203_s0 + $0x138] sm:$0xff]  ;;  %v21323_v59 = vrot.slane %v17048_v11, 7  ;;  %v264_v11 = vrot.slane %v113_v5, 7 }
  0xff   :  { %v2764_v12 = vsel %vm2755_vm10, %v2699_v45, %v14232_v39  ;;  %v2765_v57 = vsel %vm2755_vm10, %v2700_v61, %v14233_v56  ;;  %v2637_v32 = vsel %vm2625_vm8, %v2572_v60, %v14218_v18  ;;  %v265_v18 = vrot.slane %v114_v21, 7 }
 0x100   :  { %v17128_v63 = vpop.permute.xlu1 %14245  ;;  %v14241_v17 = vpop.permute.xlu0 %14240  ;;  %v451_v56 = vsel %vm204_vm0, %v21323_v59, 0.0  ;;  %v2702_v30 = vsel %vm2690_vm9, %v2637_v32, %v14228_v27  ;;  %v17174_v45 = vpack.i.bf16 %v17062_v40, %v17059_v7  ;;  %v772_v61 = vrot.slane %v17040_v34, 2 }
 0x101   :  { %v14243_v41 = vunpack.i.h.bf16 %v14241_v17  ;;  %v14242_v46 = vunpack.i.l.bf16 %v14241_v17  ;;  %v21324_v7 = vrot.slane %v17037_v62, 1  ;;  %v21325_v40 = vrot.slane %v17030_v14, 1 }
 0x102   :  { %14535 = vrot.lane.b32.xlu1 %v16841_v19, %s16053_s12  ;;  %14530 = vrot.lane.b32.xlu0 %v16821_v10, %s16053_s12  ;;  %v2636_v10 = vsel %vm2625_vm8, %v2571_v13, %v14217_v44  ;;  %v2767_v44 = vsel %vm2755_vm10, %v2702_v30, %v14238_v29  ;;  %v618_v29 = vrot.slane %v17098_v47, 1  ;;  %v21326_v13 = vrot.slane %v17040_v34, 1 }
 0x103   :  { %v2829_v1 = vsel %vm2820_vm11, %v2764_v12, %v14242_v46  ;;  %v2830_v28 = vsel %vm2820_vm11, %v2765_v57, %v14243_v41  ;;  %v2701_v39 = vsel %vm2690_vm9, %v2636_v10, %v14227_v25  ;;  %v17187_v12 = vpack.i.bf16 %v17037_v62, %v17030_v14 }
 0x104   :  { %v17146_v26 = vpop.permute.xlu1 %14255  ;;  %v14251_v35 = vpop.permute.xlu0 %14250  ;;  %v2889_v33 = vpack.c.bf16 %v2830_v28, %v2829_v1  ;;  %v2766_v52 = vsel %vm2755_vm10, %v2701_v39, %v14237_v20  ;;  %v619_v20 = vrot.slane %v17095_v53, 1  ;;  %v615_v57 = vsel %vm21282_vm2, %v21325_v40, %v21324_v7 }
 0x105   :  { %v14253_v58 = vunpack.i.h.bf16 %v14251_v35  ;;  %v14252_v31 = vunpack.i.l.bf16 %v14251_v35  ;;  %v21327_v60 = vmov %v21324_v7  ;;  %v621_v28 = vrot.slane %v451_v56, 1 }
 0x106   :  { %14545 = vrot.lane.b32.xlu1 %v16955_v43, %s16054_s19  ;;  %14540 = vrot.lane.b32.xlu0 %v16837_v55, %s16054_s19  ;;  %v617_v1 = vsel %vm21282_vm2, %v21327_v60, %v21326_v13  ;;  %v21328_v5 = vrot.slane %v17037_v62, 2  ;;  %v21329_v21 = vrot.slane %v17030_v14, 2  ;;  %v17208_v32 = vsel %vm204_vm0, %v264_v11, %v265_v18 }
 0x107   :  { %13859 = vmatprep.mubr.msk.bf16.mxu0 %vm2944_vm12, %v2889_v33  ;;  %v2832_v25 = vsel %vm2820_vm11, %v2767_v44, %v14253_v58  ;;  %v2831_v27 = vsel %vm2820_vm11, %v2766_v52, %v14252_v31  ;;  %21330 = vst [vmem:[#allocation27_spill] sm:$0xff] %v17208_v32  ;;  %v17211_v34 = vsel %vm204_vm0, 0.0, %v264_v11  ;;  %v452_v35 = vsel %vm204_vm0, %v265_v18, 0.0  ;;  %v115_v52 = vld [vmem:[%s21203_s0 + $0x140] sm:$0xff]  ;;  %v116_v44 = vld [vmem:[%s21203_s0 + $0x148] sm:$0xff] }
 0x108   :  { %v17170_v17 = vpop.permute.xlu1 %14265  ;;  %v17177_v41 = vpop.permute.xlu0 %14260  ;;  %v2890_v46 = vpack.c.bf16 %v2832_v25, %v2831_v27  ;;  %v771_v10 = vsel %vm683_vm1, %v21329_v21, %v21328_v5  ;;  %21331 = vst [vmem:[#allocation28_spill] sm:$0xff] %v17211_v34  ;;  %v21332_v59 = vmov %v21328_v5  ;;  %v774_v30 = vrot.slane %v17098_v47, 2 }
 0x109   :  { %v773_v39 = vsel %vm683_vm1, %v21332_v59, %v772_v61  ;;  %v775_v58 = vrot.slane %v17095_v53, 2  ;;  %v777_v31 = vrot.slane %v451_v56, 2  ;;  %v17229_v18 = vpack.i.bf16 %v617_v1, %v615_v57 }
 0x10a   :  { %14555 = vrot.lane.b32.xlu1 %v16959_v37, %s16055_s25  ;;  %14550 = vrot.lane.b32.xlu0 %v16839_v36, %s16055_s25  ;;  %v620_v25 = vsel %vm21282_vm2, %v618_v29, %v619_v20  ;;  %v622_v27 = vsel %vm21282_vm2, %v619_v20, %v621_v28  ;;  %v623_v56 = vrot.slane %v17211_v34, 1  ;;  %v624_v61 = vrot.slane %v17208_v32, 1 }
 0x10b   :  { %13860 = vmatmul.mubr.msk.bf16.gmra.mrb[8].mxu0 %vm2944_vm12, %v2890_v46  ;;  %v626_v46 = vrot.slane %v452_v35, 1  ;;  %v17239_v7 = vpack.i.bf16 %v773_v39, %v771_v10  ;;  %v267_v40 = vrot.slane %v115_v52, 7  ;;  %v268_v57 = vrot.slane %v116_v44, 7 }
 0x10c   :  { %v17214_v33 = vpop.permute.xlu1 %14275  ;;  %v17227_v11 = vpop.permute.xlu0 %14270  ;;  %v17245_v29 = vpack.i.bf16 %v17095_v53, %v17098_v47  ;;  %v778_v20 = vsel %vm683_vm1, %v775_v58, %v777_v31  ;;  %v17251_v1 = vpack.i.bf16 %v622_v27, %v620_v25  ;;  %v779_v28 = vrot.slane %v17211_v34, 2 }
 0x10d   :  { %v780_v5 = vrot.slane %v17208_v32, 2  ;;  %v625_v21 = vsel %vm21282_vm2, %v623_v56, %v624_v61  ;;  %v627_v10 = vsel %vm21282_vm2, %v624_v61, %v626_v46  ;;  %v782_v59 = vrot.slane %v452_v35, 2 }
 0x10e   :  { %14565 = vrot.lane.b32.xlu1 %v16839_v36, %s16051_s15  ;;  %14560 = vrot.lane.b32.xlu0 %v16841_v19, %s16045_s20  ;;  %v776_v36 = vsel %vm683_vm1, %v774_v30, %v775_v58  ;;  %v17264_v30 = vsel %vm204_vm0, %v267_v40, %v268_v57  ;;  %v17267_v58 = vsel %vm204_vm0, 0.0, %v267_v40  ;;  %v14258_v31 = vunpack.i.h.bf16 %v17146_v26 }
 0x10f   :  { %v17261_v39 = vpack.i.bf16 %v778_v20, %v776_v36  ;;  %v14257_v52 = vunpack.i.l.bf16 %v17146_v26  ;;  %v17277_v35 = vpack.i.bf16 %v17208_v32, %v17211_v34  ;;  %v17279_v27 = vpack.i.bf16 %v627_v10, %v625_v21 }
 0x110   :  { %v17241_v13 = vpop.permute.xlu1 %14285  ;;  %v17249_v60 = vpop.permute.xlu0 %14280  ;;  %v17282_v56 = vsel %vm683_vm1, %v779_v28, %v780_v5  ;;  %v17287_v61 = vsel %vm683_vm1, %v780_v5, %v782_v59  ;;  %v17290_v26 = vsel %vm204_vm0, %v268_v57, 0.0  ;;  %v14248_v36 = vunpack.i.h.bf16 %v17128_v63  ;;  %v17303_v57 = vld [vmem:[%s21203_s0 + $0x150] sm:$0xff]  ;;  %v17308_v5 = vld [vmem:[%s21203_s0 + $0x158] sm:$0xff] }
 0x111   :  { %v14247_v20 = vunpack.i.l.bf16 %v17128_v63  ;;  %v14268_v28 = vunpack.i.h.bf16 %v17170_v17  ;;  %v14267_v21 = vunpack.i.l.bf16 %v17170_v17  ;;  %v2385_v63 = vsel %vm2369_vm4, %v16390_v48, %v14258_v31 }
 0x112   :  { %14575 = vrot.lane.b32.xlu1 %v16959_v37, %s16051_s15  ;;  %14570 = vrot.lane.b32.xlu0 %v16999_v38, %s16045_s20  ;;  %v2384_v10 = vsel %vm2369_vm4, %v16393_v49, %v14257_v52  ;;  %v14263_v17 = vunpack.i.h.bf16 %v17177_v41  ;;  %v14278_v55 = vunpack.i.h.bf16 %v17214_v33  ;;  %v14277_v46 = vunpack.i.l.bf16 %v17214_v33 }
 0x113   :  { %v14273_v48 = vunpack.i.h.bf16 %v17227_v11  ;;  %v14272_v31 = vunpack.i.l.bf16 %v17227_v11  ;;  %v2383_v52 = vsel %vm2369_vm4, %v16361_v23, %v14248_v36  ;;  %v2382_v33 = vsel %vm2369_vm4, %v16364_v24, %v14247_v20 }
 0x114   :  { %v17271_v44 = vpop.permute.xlu1 %14295  ;;  %v17273_v25 = vpop.permute.xlu0 %14290  ;;  %v2447_v34 = vsel %vm2432_vm5, %v2384_v10, %v14267_v21  ;;  %v2448_v32 = vsel %vm2432_vm5, %v2385_v63, %v14268_v28  ;;  %v2446_v11 = vsel %vm2432_vm5, %v2383_v52, %v14263_v17  ;;  %v14283_v49 = vunpack.i.h.bf16 %v17249_v60 }
 0x115   :  { %v2510_v23 = vsel %vm21283_vm6, %v2447_v34, %v14277_v46  ;;  %v2511_v24 = vsel %vm21283_vm6, %v2448_v32, %v14278_v55  ;;  %v14293_v36 = vunpack.i.h.bf16 %v17273_v25  ;;  %v14292_v20 = vunpack.i.l.bf16 %v17273_v25 }
 0x116   :  { %14585 = vrot.lane.b32.xlu1 %v16999_v38, %s16050_s14  ;;  %14580 = vrot.lane.b32.xlu0 %v16841_v19, %s16050_s14  ;;  %v14262_v19 = vunpack.i.l.bf16 %v17177_v41  ;;  %v14282_v41 = vunpack.i.l.bf16 %v17249_v60  ;;  %v2509_v21 = vsel %vm21283_vm6, %v2446_v11, %v14273_v48  ;;  %v14288_v60 = vunpack.i.h.bf16 %v17241_v13 }
 0x117   :  { %v14287_v34 = vunpack.i.l.bf16 %v17241_v13  ;;  %v14298_v25 = vunpack.i.h.bf16 %v17271_v44 }
 0x118   :  { %v17316_v59 = vpop.permute.xlu1 %14305  ;;  %v14301_v40 = vpop.permute.xlu0 %14300  ;;  %v2445_v47 = vsel %vm2432_vm5, %v2382_v33, %v14262_v19 }
 0x119   :  { %v14303_v63 = vunpack.i.h.bf16 %v14301_v40  ;;  %v14302_v10 = vunpack.i.l.bf16 %v14301_v40  ;;  %v14297_v40 = vunpack.i.l.bf16 %v17271_v44  ;;  %v14308_v13 = vunpack.i.h.bf16 %v17316_v59 }
 0x11a   :  { %14595 = vrot.lane.b32.xlu1 %v17015_v0, %s16052_s16  ;;  %14590 = vrot.lane.b32.xlu0 %v16955_v43, %s16052_s16  ;;  %v2508_v43 = vsel %vm21283_vm6, %v2445_v47, %v14272_v31  ;;  %v2574_v47 = vsel %vm2560_vm7, %v2509_v21, %v14283_v49  ;;  %v14307_v31 = vunpack.i.l.bf16 %v17316_v59  ;;  %v2575_v59 = vsel %vm2560_vm7, %v2510_v23, %v14287_v34 }
 0x11b   :  { %v2573_v32 = vsel %vm2560_vm7, %v2508_v43, %v14282_v41  ;;  %v2639_v48 = vsel %vm2625_vm8, %v2574_v47, %v14293_v36 }
 0x11c   :  { %v14316_v53 = vpop.permute.xlu1 %14315  ;;  %v14311_v28 = vpop.permute.xlu0 %14310  ;;  %v2638_v19 = vsel %vm2625_vm8, %v2573_v32, %v14292_v20  ;;  %v2704_v41 = vsel %vm2690_vm9, %v2639_v48, %v14303_v63  ;;  %v21335_v48 = vrot.slane %v17303_v57, 7  ;;  %v21341_v57 = vrot.slane %v17267_v58, 1 }
 0x11d   :  { %v14313_v46 = vunpack.i.h.bf16 %v14311_v28  ;;  %v14312_v55 = vunpack.i.l.bf16 %v14311_v28  ;;  %v14318_v44 = vunpack.i.h.bf16 %v14316_v53  ;;  %v14317_v11 = vunpack.i.l.bf16 %v14316_v53 }
 0x11e   :  { %14605 = vrot.lane.b32.xlu1 %v17017_v8, %s16048_s28  ;;  %14600 = vrot.lane.b32.xlu0 %v16959_v37, %s16048_s28  ;;  %v2703_v37 = vsel %vm2690_vm9, %v2638_v19, %v14302_v10  ;;  %v2576_v28 = vsel %vm2560_vm7, %v2511_v24, %v14288_v60  ;;  %v2640_v10 = vsel %vm2625_vm8, %v2575_v59, %v14297_v40  ;;  %v21334_v19 = vrot.slane %v17308_v5, 7 }
 0x11f   :  { %v2768_v20 = vsel %vm2755_vm10, %v2703_v37, %v14312_v55  ;;  %v2769_v36 = vsel %vm2755_vm10, %v2704_v41, %v14313_v46  ;;  %v2641_v53 = vsel %vm2625_vm8, %v2576_v28, %v14298_v25  ;;  %v785_v46 = vrot.slane %v17264_v30, 2 }
 0x120   :  { %v17356_v17 = vpop.permute.xlu1 %14325  ;;  %v14321_v52 = vpop.permute.xlu0 %14320  ;;  %v2706_v23 = vsel %vm2690_vm9, %v2641_v53, %v14308_v13  ;;  %v21333_v60 = vpack.i.bf16 %v16164_v2, %v16168_v3  ;;  %v787_v25 = vrot.slane %v17290_v26, 2  ;;  %v17396_v13 = vsel %vm204_vm0, %v21335_v48, %v21334_v19  ;;  %v119_v2 = vld [vmem:[%s21203_s0 + $0x160] sm:$0xff] }
 0x121   :  { %v14323_v49 = vunpack.i.h.bf16 %v14321_v52  ;;  %v14322_v33 = vunpack.i.l.bf16 %v14321_v52  ;;  %v2771_v40 = vsel %vm2755_vm10, %v2706_v23, %v14318_v44  ;;  %21336 = vst [vmem:[#allocation29_spill] sm:$0xff] %v17396_v13  ;;  %v21337_v41 = vmov %v21335_v48 }
 0x122   :  { %14615 = vrot.lane.b32.xlu1 %v17025_v4, %s16053_s12  ;;  %14610 = vrot.lane.b32.xlu0 %v16999_v38, %s16053_s12  ;;  %v2705_v38 = vsel %vm2690_vm9, %v2640_v10, %v14307_v31  ;;  %v120_v31 = vld [vmem:[%s21203_s0 + $0x168] sm:$0xff]  ;;  %v21340_v59 = vrot.slane %v17264_v30, 1  ;;  %v21342_v5 = vrot.slane %v17290_v26, 1  ;;  %v273_v10 = vrot.slane %v119_v2, 7  ;;  %v121_v2 = vld [vmem:[%s21203_s0 + $0x170] sm:$0xff] }
 0x123   :  { %v2833_v43 = vsel %vm2820_vm11, %v2768_v20, %v14322_v33  ;;  %v2834_v21 = vsel %vm2820_vm11, %v2769_v36, %v14323_v49  ;;  %v2770_v47 = vsel %vm2755_vm10, %v2705_v38, %v14317_v11  ;;  %v17411_v49 = vsel %vm204_vm0, 0.0, %v21337_v41 }
 0x124   :  { %v17374_v63 = vpop.permute.xlu1 %14335  ;;  %v14331_v55 = vpop.permute.xlu0 %14330  ;;  %v2891_v32 = vpack.c.bf16 %v2834_v21, %v2833_v43  ;;  %21338 = vst [vmem:[#allocation30_spill] sm:$0xff] %v17411_v49  ;;  %v21339_v33 = vmov %v21334_v19  ;;  %v17420_v36 = vpack.i.bf16 %v17287_v61, %v17282_v56  ;;  %v630_v28 = vsel %vm21282_vm2, %v21341_v57, %v21340_v59 }
 0x125   :  { %v14333_v34 = vunpack.i.h.bf16 %v14331_v55  ;;  %v14332_v24 = vunpack.i.l.bf16 %v14331_v55  ;;  %v454_v44 = vsel %vm204_vm0, %v21339_v33, 0.0  ;;  %v21343_v43 = vmov %v21340_v59 }
 0x126   :  { %14625 = vrot.lane.b32.xlu1 %v21333_v60, %s16054_s19  ;;  %14620 = vrot.lane.b32.xlu0 %v17015_v0, %s16054_s19  ;;  %v632_v21 = vsel %vm21282_vm2, %v21343_v43, %v21342_v5  ;;  %v274_v53 = vrot.slane %v120_v31, 7  ;;  %v633_v61 = vrot.slane %v17411_v49, 1  ;;  %v634_v55 = vrot.slane %v17396_v13, 1 }
 0x127   :  { %13863 = vmatprep.mubr.msk.bf16.mxu0 %vm2944_vm12, %v2891_v32  ;;  %v2836_v0 = vsel %vm2820_vm11, %v2771_v40, %v14333_v34  ;;  %v2835_v52 = vsel %vm2820_vm11, %v2770_v47, %v14332_v24  ;;  %v636_v26 = vrot.slane %v454_v44, 1  ;;  %v788_v38 = vsel %vm683_vm1, %v785_v46, %v787_v25 }
 0x128   :  { %v17406_v37 = vpop.permute.xlu1 %14345  ;;  %v17416_v11 = vpop.permute.xlu0 %14340  ;;  %v2892_v20 = vpack.c.bf16 %v2836_v0, %v2835_v52  ;;  %v792_v23 = vrot.slane %v454_v44, 2  ;;  %v789_v34 = vrot.slane %v17411_v49, 2  ;;  %v17451_v60 = vpack.i.bf16 %v17264_v30, %v17267_v58 }
 0x129   :  { %v17453_v47 = vpack.i.bf16 %v632_v21, %v630_v28  ;;  %v17458_v40 = vsel %vm204_vm0, %v273_v10, %v274_v53  ;;  %v635_v19 = vsel %vm21282_vm2, %v633_v61, %v634_v55  ;;  %v637_v48 = vsel %vm21282_vm2, %v634_v55, %v636_v26  ;;  %v21351_v26 = vld [vmem:[#allocation11_spill] sm:$0xff] }
 0x12a   :  { %14635 = vrot.lane.b32.xlu1 %v16194_v16, %s16055_s25  ;;  %14630 = vrot.lane.b32.xlu0 %v17017_v8, %s16055_s25  ;;  %v21344_v16 = vrot.slane %v17267_v58, 2  ;;  %v790_v8 = vrot.slane %v17396_v13, 2  ;;  %21345 = vst [vmem:[#allocation31_spill] sm:$0xff] %v17458_v40  ;;  %v17483_v41 = vpack.i.bf16 %v17396_v13, %v17411_v49  ;;  %v17486_v33 = vsel %vm204_vm0, %v274_v53, 0.0 }
 0x12b   :  { %13864 = vmatmul.mubr.msk.bf16.gmra.mrb[12].mxu0 %vm2944_vm12, %v2892_v20  ;;  %v21244_v20 = vrot.slane %v17458_v40, 1  ;;  %v17492_v59 = vpack.i.bf16 %v637_v48, %v635_v19  ;;  %v276_v57 = vrot.slane %v121_v2, 7  ;;  %v14338_v43 = vunpack.i.h.bf16 %v17374_v63 }
 0x12c   :  { %v786_v56 = vsel %vm683_vm1, %v21344_v16, %v785_v46  ;;  %v17442_v32 = vpop.permute.xlu1 %14355  ;;  %v17447_v24 = vpop.permute.xlu0 %14350  ;;  %v17461_v46 = vsel %vm204_vm0, 0.0, %v273_v10  ;;  %v791_v0 = vsel %vm683_vm1, %v789_v34, %v790_v8  ;;  %v14337_v21 = vunpack.i.l.bf16 %v17374_v63 }
 0x12d   :  { %21346 = vst [vmem:[#allocation32_spill] sm:$0xff] %v17461_v46  ;;  %v17465_v25 = vpack.i.bf16 %v788_v38, %v786_v56  ;;  %v638_v44 = vrot.slane %v17461_v46, 1  ;;  %v17504_v53 = vpack.i.bf16 %v17458_v40, %v17461_v46  ;;  %v14328_v63 = vunpack.i.h.bf16 %v17356_v17 }
 0x12e   :  { %14645 = vrot.lane.b32.xlu1 %v16192_v15, %s16045_s20  ;;  %14640 = vrot.lane.b32.xlu0 %v17025_v4, %s16045_s20  ;;  %v122_v15 = vld [vmem:[%s21203_s0 + $0x178] sm:$0xff]  ;;  %v793_v4 = vsel %vm683_vm1, %v790_v8, %v792_v23  ;;  %v17522_v34 = vsel %vm204_vm0, 0.0, %v276_v57  ;;  %v14327_v8 = vunpack.i.l.bf16 %v17356_v17  ;;  %v14348_v19 = vunpack.i.h.bf16 %v17406_v37 }
 0x12f   :  { %v277_v28 = vrot.slane %v122_v15, 7  ;;  %v17496_v5 = vpack.i.bf16 %v793_v4, %v791_v0  ;;  %v17510_v61 = vsel %vm21282_vm2, %v638_v44, %v21244_v20  ;;  %21348 = vst [vmem:[#allocation34_spill] sm:$0xff] %v17522_v34  ;;  %v14347_v48 = vunpack.i.l.bf16 %v17406_v37  ;;  %v17545_v37 = vld [vmem:[%s21203_s0 + $0x180] sm:$0xff] }
 0x130   :  { %v17475_v31 = vpop.permute.xlu1 %14365  ;;  %v17479_v52 = vpop.permute.xlu0 %14360  ;;  %v21349_v2 = vpack.i.bf16 %v16983_v54, %v16986_v6  ;;  %v2389_v0 = vsel %vm2369_vm4, %v16466_v50, %v14338_v43  ;;  %v2388_v4 = vsel %vm2369_vm4, %v16459_v42, %v14337_v21  ;;  %v14343_v17 = vunpack.i.h.bf16 %v17416_v11  ;;  %v21350_v43 = vld [vmem:[#allocation12_spill] sm:$0xff] }
 0x131   :  { %v17519_v23 = vsel %vm204_vm0, %v276_v57, %v277_v28  ;;  %v17532_v15 = vsel %vm204_vm0, %v277_v28, 0.0  ;;  %v14342_v44 = vunpack.i.l.bf16 %v17416_v11  ;;  %v14358_v28 = vunpack.i.h.bf16 %v17442_v32 }
 0x132   :  { %14655 = vrot.lane.b32.xlu1 %v17056_v22, %s16050_s14  ;;  %14650 = vrot.lane.b32.xlu0 %v17174_v45, %s16051_s15  ;;  %21347 = vst [vmem:[#allocation33_spill] sm:$0xff] %v17519_v23  ;;  %v2387_v21 = vsel %vm2369_vm4, %v21350_v43, %v14328_v63  ;;  %v14353_v11 = vunpack.i.h.bf16 %v17447_v24  ;;  %v14352_v55 = vunpack.i.l.bf16 %v17447_v24  ;;  %v2386_v20 = vsel %vm2369_vm4, %v21351_v26, %v14327_v8 }
 0x133   :  { %v2452_v16 = vsel %vm2432_vm5, %v2389_v0, %v14348_v19  ;;  %v2450_v63 = vsel %vm2432_vm5, %v2387_v21, %v14343_v17  ;;  %v2449_v43 = vsel %vm2432_vm5, %v2386_v20, %v14342_v44  ;;  %v14363_v24 = vunpack.i.h.bf16 %v17479_v52 }
 0x134   :  { %v17500_v10 = vpop.permute.xlu1 %14375  ;;  %v14371_v56 = vpop.permute.xlu0 %14370  ;;  %v14362_v42 = vunpack.i.l.bf16 %v17479_v52  ;;  %v2515_v8 = vsel %vm21283_vm6, %v2452_v16, %v14358_v28  ;;  %v14368_v20 = vunpack.i.h.bf16 %v17475_v31  ;;  %v14367_v52 = vunpack.i.l.bf16 %v17475_v31 }
 0x135   :  { %v14372_v19 = vunpack.i.l.bf16 %v14371_v56 }
 0x136   :  { %14665 = vrot.lane.b32.xlu1 %v17187_v12, %s16052_s16  ;;  %14660 = vrot.lane.b32.xlu0 %v21349_v2, %s16052_s16  ;;  %v14357_v2 = vunpack.i.l.bf16 %v17442_v32  ;;  %v2451_v32 = vsel %vm2432_vm5, %v2388_v4, %v14347_v48  ;;  %v14373_v48 = vunpack.i.h.bf16 %v14371_v56  ;;  %v2513_v4 = vsel %vm21283_vm6, %v2450_v63, %v14353_v11 }
 0x137   :  { %v2578_v56 = vsel %vm2560_vm7, %v2513_v4, %v14363_v24 }
 0x138   :  { %v17540_v57 = vpop.permute.xlu1 %14385  ;;  %v14381_v38 = vpop.permute.xlu0 %14380  ;;  %v2514_v26 = vsel %vm21283_vm6, %v2451_v32, %v14357_v2  ;;  %v2643_v11 = vsel %vm2625_vm8, %v2578_v56, %v14373_v48 }
 0x139   :  { %v14383_v50 = vunpack.i.h.bf16 %v14381_v38  ;;  %v14382_v17 = vunpack.i.l.bf16 %v14381_v38  ;;  %v14377_v38 = vunpack.i.l.bf16 %v17500_v10  ;;  %v14388_v31 = vunpack.i.h.bf16 %v17540_v57 }
 0x13a   :  { %14675 = vrot.lane.b32.xlu1 %v17229_v18, %s16048_s28  ;;  %14670 = vrot.lane.b32.xlu0 %v17174_v45, %s16048_s28  ;;  %v2512_v45 = vsel %vm21283_vm6, %v2449_v43, %v14352_v55  ;;  %v14378_v55 = vunpack.i.h.bf16 %v17500_v10  ;;  %v14387_v32 = vunpack.i.l.bf16 %v17540_v57  ;;  %v124_v10 = vld [vmem:[%s21203_s0 + $0x188] sm:$0xff] }
 0x13b   :  { %v2577_v16 = vsel %vm2560_vm7, %v2512_v45, %v14362_v42  ;;  %v2708_v42 = vsel %vm2690_vm9, %v2643_v11, %v14383_v50  ;;  %v2579_v50 = vsel %vm2560_vm7, %v2514_v26, %v14367_v52  ;;  %v2580_v45 = vsel %vm2560_vm7, %v2515_v8, %v14368_v20 }
 0x13c   :  { %v14396_v3 = vpop.permute.xlu1 %14395  ;;  %v14391_v0 = vpop.permute.xlu0 %14390  ;;  %v2642_v21 = vsel %vm2625_vm8, %v2577_v16, %v14372_v19  ;;  %v2644_v56 = vsel %vm2625_vm8, %v2579_v50, %v14377_v38  ;;  %v16056_v38 = vmov 1983009808  }
 0x13d   :  { %v14393_v44 = vunpack.i.h.bf16 %v14391_v0  ;;  %v14392_v2 = vunpack.i.l.bf16 %v14391_v0  ;;  %v14398_v19 = vunpack.i.h.bf16 %v14396_v3  ;;  %v14397_v48 = vunpack.i.l.bf16 %v14396_v3 }
 0x13e   :  { %14685 = vrot.lane.b32.xlu1 %v17239_v7, %s16053_s12  ;;  %14680 = vrot.lane.b32.xlu0 %v17056_v22, %s16053_s12  ;;  %v2707_v22 = vsel %vm2690_vm9, %v2642_v21, %v14382_v17  ;;  %v2645_v3 = vsel %vm2625_vm8, %v2580_v45, %v14378_v55  ;;  %v2709_v11 = vsel %vm2690_vm9, %v2644_v56, %v14387_v32  ;;  %v646_v55 = vrot.slane %v17532_v15, 1 }
 0x13f   :  { %v2772_v0 = vsel %vm2755_vm10, %v2707_v22, %v14392_v2  ;;  %v2773_v57 = vsel %vm2755_vm10, %v2708_v42, %v14393_v44  ;;  %v280_v44 = vrot.slane %v124_v10, 7  ;;  %v2774_v8 = vsel %vm2755_vm10, %v2709_v11, %v14397_v48 }
 0x140   :  { %v17582_v28 = vpop.permute.xlu1 %14405  ;;  %v14401_v63 = vpop.permute.xlu0 %14400  ;;  %v3400_v32 = vunpack.c.l.s4 %v16056_v38  ;;  %v21352_v42 = vrot.slane %v17486_v33, 1  ;;  %v3402_v10 = vlaneseq  ;;  %v21359_v56 = vrot.slane %v17461_v46, 2 }
 0x141   :  { %v14403_v43 = vunpack.i.h.bf16 %v14401_v63  ;;  %v14402_v24 = vunpack.i.l.bf16 %v14401_v63 }
 0x142   :  { %14695 = vrot.lane.b32.xlu1 %v17245_v29, %s16054_s19  ;;  %14690 = vrot.lane.b32.xlu0 %v17187_v12, %s16054_s19  ;;  %v2710_v12 = vsel %vm2690_vm9, %v2645_v3, %v14388_v31 }
 0x143   :  { %v2837_v4 = vsel %vm2820_vm11, %v2772_v0, %v14402_v24  ;;  %v2838_v17 = vsel %vm2820_vm11, %v2773_v57, %v14403_v43  ;;  %v2775_v20 = vsel %vm2755_vm10, %v2710_v12, %v14398_v19  ;;  %v21353_v43 = vrot.slane %v17458_v40, 1 }
 0x144   :  { %v17603_v16 = vpop.permute.xlu1 %14415  ;;  %v14411_v2 = vpop.permute.xlu0 %14410  ;;  %v2893_v21 = vpack.c.bf16 %v2838_v17, %v2837_v4  ;;  %v21354_v0 = vrot.slane %v17545_v37, 7  ;;  %v457_v4 = vsel %vm204_vm0, %v280_v44, 0.0  ;;  %v21358_v17 = vrot.slane %v17458_v40, 2 }
 0x145   :  { %v14413_v26 = vunpack.i.h.bf16 %v14411_v2  ;;  %v14412_v52 = vunpack.i.l.bf16 %v14411_v2  ;;  %v642_v24 = vsel %vm21282_vm2, %v21353_v43, %v21352_v42  ;;  %v802_v2 = vrot.slane %v17532_v15, 2 }
 0x146   :  { %14705 = vrot.lane.b32.xlu1 %v17251_v1, %s16055_s25  ;;  %14700 = vrot.lane.b32.xlu0 %v17229_v18, %s16055_s25  ;;  %v17631_v57 = vsel %vm204_vm0, %v21354_v0, %v280_v44  ;;  %v21356_v50 = vmov %v21354_v0  ;;  %v796_v3 = vsel %vm683_vm1, %v21359_v56, %v21358_v17  ;;  %v800_v37 = vrot.slane %v17519_v23, 2 }
 0x147   :  { %13867 = vmatprep.mubr.msk.bf16.mxu0 %vm2944_vm12, %v2893_v21  ;;  %v2840_v31 = vsel %vm2820_vm11, %v2775_v20, %v14413_v26  ;;  %v2839_v63 = vsel %vm2820_vm11, %v2774_v8, %v14412_v52  ;;  %21355 = vst [vmem:[#allocation12_spill] sm:$0xff] %v17631_v57  ;;  %v17636_v45 = vsel %vm204_vm0, 0.0, %v21356_v50  ;;  %v799_v21 = vrot.slane %v17522_v34, 2 }
 0x148   :  { %v17619_v22 = vpop.permute.xlu1 %14425  ;;  %v17626_v19 = vpop.permute.xlu0 %14420  ;;  %v2894_v48 = vpack.c.bf16 %v2840_v31, %v2839_v63  ;;  %21357 = vst [vmem:[#allocation11_spill] sm:$0xff] %v17636_v45  ;;  %v21360_v44 = vrot.slane %v17486_v33, 2  ;;  %v21362_v12 = vrot.slane %v17519_v23, 1  ;;  %v21363_v26 = vrot.slane %v17522_v34, 1 }
 0x149   :  { %v3401_v20 = vunpack.c.0.s8 %v3400_v32  ;;  %v17667_v31 = vshrl.u32 %v3402_v10, 7  ;;  %v648_v33 = vrot.slane %v17636_v45, 1  ;;  %v649_v63 = vrot.slane %v17631_v57, 1 }
 0x14a   :  { %14715 = vrot.lane.b32.xlu1 %v17229_v18, %s16051_s15  ;;  %14710 = vrot.lane.b32.xlu0 %v17239_v7, %s16045_s20  ;;  %v21361_v18 = vmov %v21358_v17  ;;  %v645_v15 = vsel %vm21282_vm2, %v21363_v26, %v21362_v12  ;;  %v21364_v52 = vmov %v21362_v12  ;;  %v651_v42 = vrot.slane %v457_v4, 1 }
 0x14b   :  { %13868 = vmatmul.mubr.msk.bf16.gmra.mrb[16].mxu0 %vm2944_vm12, %v2894_v48  ;;  %v798_v11 = vsel %vm683_vm1, %v21361_v18, %v21360_v44  ;;  %v647_v8 = vsel %vm21282_vm2, %v21364_v52, %v646_v55  ;;  %21365 = vst [vmem:[#allocation35_spill] sm:$0xff] %v17667_v31  ;;  %v17674_v48 = vpack.i.bf16 %v642_v24, %v17510_v61  ;;  %v125_v61 = vld [vmem:[%s21203_s0 + $0x190] sm:$0xff]  ;;  %v126_v24 = vld [vmem:[%s21203_s0 + $0x198] sm:$0xff]  ;;  %v804_v44 = vrot.slane %v17636_v45, 2 }
 0x14c   :  { %v17665_v38 = vpop.permute.xlu1 %14435  ;;  %v17671_v43 = vpop.permute.xlu0 %14430  ;;  %v17678_v0 = vpack.i.bf16 %v798_v11, %v796_v3  ;;  %v801_v55 = vsel %vm683_vm1, %v799_v21, %v800_v37  ;;  %v803_v32 = vsel %vm683_vm1, %v800_v37, %v802_v2  ;;  %v17686_v10 = vpack.i.bf16 %v17519_v23, %v17522_v34 }
 0x14d   :  { %v17688_v50 = vpack.i.bf16 %v647_v8, %v645_v15  ;;  %v17699_v56 = vsub.s32 %v3401_v20, %v17667_v31  ;;  %v650_v3 = vsel %vm21282_vm2, %v648_v33, %v649_v63  ;;  %v652_v2 = vsel %vm21282_vm2, %v649_v63, %v651_v42 }
 0x14e   :  { %14725 = vrot.lane.b32.xlu1 %v17251_v1, %s16051_s15  ;;  %14720 = vrot.lane.b32.xlu0 %v17261_v39, %s16045_s20  ;;  %v17705_v37 = vpack.i.bf16 %v803_v32, %v801_v55  ;;  %v805_v18 = vrot.slane %v17631_v57, 2  ;;  %v807_v11 = vrot.slane %v457_v4, 2  ;;  %v17713_v12 = vpack.i.bf16 %v17631_v57, %v17636_v45 }
 0x14f   :  { %v282_v26 = vrot.slane %v125_v61, 7  ;;  %v283_v15 = vrot.slane %v126_v24, 7  ;;  %v14417_v52 = vunpack.i.l.bf16 %v17603_v16  ;;  %v17718_v8 = vpack.i.bf16 %v652_v2, %v650_v3  ;;  %v21368_v24 = vld [vmem:[#allocation16_spill] sm:$0xff] }
 0x150   :  { %v17696_v17 = vpop.permute.xlu1 %14445  ;;  %v17703_v21 = vpop.permute.xlu0 %14440  ;;  %v14408_v20 = vunpack.i.h.bf16 %v17582_v28  ;;  %v14418_v4 = vunpack.i.h.bf16 %v17603_v16  ;;  %v14407_v63 = vunpack.i.l.bf16 %v17582_v28  ;;  %v17728_v55 = vsel %vm683_vm1, %v804_v44, %v805_v18 }
 0x151   :  { %v17731_v32 = vsel %vm683_vm1, %v805_v18, %v807_v11  ;;  %v17737_v61 = vsel %vm204_vm0, %v282_v26, %v283_v15  ;;  %v17740_v16 = vsel %vm204_vm0, 0.0, %v282_v26  ;;  %v17743_v28 = vsel %vm204_vm0, %v283_v15, 0.0  ;;  %v21369_v11 = vld [vmem:[#allocation14_spill] sm:$0xff]  ;;  %v21370_v26 = vld [vmem:[#allocation15_spill] sm:$0xff] }
 0x152   :  { %14735 = vrot.lane.b32.xlu1 %v17261_v39, %s16050_s14  ;;  %14730 = vrot.lane.b32.xlu0 %v17239_v7, %s16050_s14  ;;  %v14427_v7 = vunpack.i.l.bf16 %v17619_v22  ;;  %21366 = vst [vmem:[#allocation36_spill] sm:$0xff] %v17737_v61  ;;  %21367 = vst [vmem:[#allocation37_spill] sm:$0xff] %v17740_v16  ;;  %v2392_v3 = vsel %vm2369_vm4, %v21368_v24, %v14417_v52  ;;  %v14428_v2 = vunpack.i.h.bf16 %v17619_v22  ;;  %v14423_v44 = vunpack.i.h.bf16 %v17626_v19  ;;  %v21371_v22 = vld [vmem:[#allocation13_spill] sm:$0xff] }
 0x153   :  { %v14422_v18 = vunpack.i.l.bf16 %v17626_v19  ;;  %v2391_v45 = vsel %vm2369_vm4, %v21369_v11, %v14408_v20  ;;  %v2393_v57 = vsel %vm2369_vm4, %v21370_v26, %v14418_v4  ;;  %v14438_v15 = vunpack.i.h.bf16 %v17665_v38 }
 0x154   :  { %v17722_v33 = vpop.permute.xlu1 %14455  ;;  %v17725_v42 = vpop.permute.xlu0 %14450  ;;  %v14437_v34 = vunpack.i.l.bf16 %v17665_v38  ;;  %v2390_v24 = vsel %vm2369_vm4, %v21371_v22, %v14407_v63  ;;  %v14433_v19 = vunpack.i.h.bf16 %v17671_v43  ;;  %v14432_v23 = vunpack.i.l.bf16 %v17671_v43 }
 0x155   :  { %v2455_v20 = vsel %vm2432_vm5, %v2392_v3, %v14427_v7  ;;  %v2456_v63 = vsel %vm2432_vm5, %v2393_v57, %v14428_v2  ;;  %v2454_v26 = vsel %vm2432_vm5, %v2391_v45, %v14423_v44  ;;  %v2453_v43 = vsel %vm2432_vm5, %v2390_v24, %v14422_v18  ;;  %v127_v7 = vld [vmem:[%s21203_s0 + $0x1a0] sm:$0xff]  ;;  %v128_v2 = vld [vmem:[%s21203_s0 + $0x1a8] sm:$0xff] }
 0x156   :  { %14745 = vrot.lane.b32.xlu1 %v17277_v35, %s16052_s16  ;;  %14740 = vrot.lane.b32.xlu0 %v17245_v29, %s16052_s16  ;;  %v14447_v22 = vunpack.i.l.bf16 %v17696_v17  ;;  %v2518_v3 = vsel %vm21283_vm6, %v2455_v20, %v14437_v34  ;;  %v2519_v38 = vsel %vm21283_vm6, %v2456_v63, %v14438_v15  ;;  %v14443_v11 = vunpack.i.h.bf16 %v17703_v21 }
 0x157   :  { %v14442_v57 = vunpack.i.l.bf16 %v17703_v21  ;;  %v2516_v44 = vsel %vm21283_vm6, %v2453_v43, %v14432_v23  ;;  %v14453_v18 = vunpack.i.h.bf16 %v17725_v42  ;;  %v14452_v24 = vunpack.i.l.bf16 %v17725_v42 }
 0x158   :  { %v17758_v52 = vpop.permute.xlu1 %14465  ;;  %v14461_v29 = vpop.permute.xlu0 %14460  ;;  %v14448_v15 = vunpack.i.h.bf16 %v17696_v17  ;;  %v285_v21 = vrot.slane %v127_v7, 7  ;;  %v2583_v46 = vsel %vm2560_vm7, %v2518_v3, %v14447_v22  ;;  %v286_v23 = vrot.slane %v128_v2, 7 }
 0x159   :  { %v14463_v20 = vunpack.i.h.bf16 %v14461_v29  ;;  %v14462_v63 = vunpack.i.l.bf16 %v14461_v29  ;;  %v14458_v17 = vunpack.i.h.bf16 %v17722_v33  ;;  %v14457_v29 = vunpack.i.l.bf16 %v17722_v33 }
 0x15a   :  { %14755 = vrot.lane.b32.xlu1 %v17279_v27, %s16048_s28  ;;  %14750 = vrot.lane.b32.xlu0 %v17251_v1, %s16048_s28  ;;  %v2517_v1 = vsel %vm21283_vm6, %v2454_v26, %v14433_v19  ;;  %v2581_v19 = vsel %vm2560_vm7, %v2516_v44, %v14442_v57  ;;  %v14468_v7 = vunpack.i.h.bf16 %v17758_v52  ;;  %v14467_v3 = vunpack.i.l.bf16 %v17758_v52 }
 0x15b   :  { %v2582_v42 = vsel %vm2560_vm7, %v2517_v1, %v14443_v11  ;;  %v2646_v43 = vsel %vm2625_vm8, %v2581_v19, %v14452_v24  ;;  %v2584_v52 = vsel %vm2560_vm7, %v2519_v38, %v14448_v15  ;;  %v17821_v19 = vsel %vm204_vm0, %v285_v21, %v286_v23 }
 0x15c   :  { %v14476_v45 = vpop.permute.xlu1 %14475  ;;  %v14471_v34 = vpop.permute.xlu0 %14470  ;;  %v2647_v22 = vsel %vm2625_vm8, %v2582_v42, %v14453_v18  ;;  %v2711_v2 = vsel %vm2690_vm9, %v2646_v43, %v14462_v63  ;;  %21372 = vst [vmem:[#allocation16_spill] sm:$0xff] %v17821_v19  ;;  %v17826_v43 = vsel %vm204_vm0, 0.0, %v285_v21  ;;  %v21374_v21 = vrot.slane %v17737_v61, 1 }
 0x15d   :  { %v14473_v4 = vunpack.i.h.bf16 %v14471_v34  ;;  %v14472_v40 = vunpack.i.l.bf16 %v14471_v34  ;;  %v2712_v57 = vsel %vm2690_vm9, %v2647_v22, %v14463_v20  ;;  %v14478_v33 = vunpack.i.h.bf16 %v14476_v45  ;;  %21373 = vst [vmem:[#allocation14_spill] sm:$0xff] %v17826_v43 }
 0x15e   :  { %14765 = vrot.lane.b32.xlu1 %v17420_v36, %s16053_s12  ;;  %14760 = vrot.lane.b32.xlu0 %v17261_v39, %s16053_s12  ;;  %v14477_v1 = vunpack.i.l.bf16 %v14476_v45  ;;  %v2648_v45 = vsel %vm2625_vm8, %v2583_v46, %v14457_v29 }
 0x15f   :  { %v2776_v24 = vsel %vm2755_vm10, %v2711_v2, %v14472_v40  ;;  %v2777_v18 = vsel %vm2755_vm10, %v2712_v57, %v14473_v4  ;;  %v2649_v40 = vsel %vm2625_vm8, %v2584_v52, %v14458_v17  ;;  %v21375_v17 = vrot.slane %v17740_v16, 1 }
 0x160   :  { %v17801_v26 = vpop.permute.xlu1 %14485  ;;  %v14481_v39 = vpop.permute.xlu0 %14480  ;;  %v2714_v38 = vsel %vm2690_vm9, %v2649_v40, %v14468_v7  ;;  %v459_v7 = vsel %vm204_vm0, %v286_v23, 0.0  ;;  %v658_v23 = vrot.slane %v17826_v43, 1  ;;  %v815_v40 = vrot.slane %v17821_v19, 2 }
 0x161   :  { %v14483_v11 = vunpack.i.h.bf16 %v14481_v39  ;;  %v14482_v44 = vunpack.i.l.bf16 %v14481_v39  ;;  %v2779_v46 = vsel %vm2755_vm10, %v2714_v38, %v14478_v33  ;;  %v655_v29 = vsel %vm21282_vm2, %v21375_v17, %v21374_v21 }
 0x162   :  { %14775 = vrot.lane.b32.xlu1 %v17451_v60, %s16054_s19  ;;  %14770 = vrot.lane.b32.xlu0 %v17277_v35, %s16054_s19  ;;  %v2713_v35 = vsel %vm2690_vm9, %v2648_v45, %v14467_v3  ;;  %v814_v45 = vrot.slane %v17826_v43, 2  ;;  %v14488_v17 = vunpack.i.h.bf16 %v17801_v26 }
 0x163   :  { %v2841_v34 = vsel %vm2820_vm11, %v2776_v24, %v14482_v44  ;;  %v2842_v20 = vsel %vm2820_vm11, %v2777_v18, %v14483_v11  ;;  %v2778_v39 = vsel %vm2755_vm10, %v2713_v35, %v14477_v1  ;;  %v809_v11 = vrot.slane %v17740_v16, 2 }
 0x164   :  { %v17818_v63 = vpop.permute.xlu1 %14495  ;;  %v14491_v42 = vpop.permute.xlu0 %14490  ;;  %v2895_v4 = vpack.c.bf16 %v2842_v20, %v2841_v34  ;;  %v810_v44 = vrot.slane %v17737_v61, 2  ;;  %v21376_v24 = vrot.slane %v17743_v28, 1  ;;  %v21377_v18 = vmov %v21374_v21 }
 0x165   :  { %v14493_v15 = vunpack.i.h.bf16 %v14491_v42  ;;  %v14492_v22 = vunpack.i.l.bf16 %v14491_v42  ;;  %v659_v34 = vrot.slane %v17821_v19, 1  ;;  %v661_v20 = vrot.slane %v459_v7, 1 }
 0x166   :  { %14785 = vrot.lane.b32.xlu1 %v17453_v47, %s16055_s25  ;;  %14780 = vrot.lane.b32.xlu0 %v17279_v27, %s16055_s25  ;;  %v657_v52 = vsel %vm21282_vm2, %v21377_v18, %v21376_v24  ;;  %v817_v42 = vrot.slane %v459_v7, 2  ;;  %v811_v38 = vsel %vm683_vm1, %v809_v11, %v810_v44  ;;  %v816_v7 = vsel %vm683_vm1, %v814_v45, %v815_v40 }
 0x167   :  { %13871 = vmatprep.mubr.msk.bf16.mxu0 %vm2944_vm12, %v2895_v4  ;;  %v2844_v3 = vsel %vm2820_vm11, %v2779_v46, %v14493_v15  ;;  %v2843_v2 = vsel %vm2820_vm11, %v2778_v39, %v14492_v22  ;;  %v17867_v4 = vpack.i.bf16 %v17731_v32, %v17728_v55  ;;  %v21378_v15 = vrot.slane %v17743_v28, 2  ;;  %v129_v39 = vld [vmem:[%s21203_s0 + $0x1b0] sm:$0xff]  ;;  %v130_v55 = vld [vmem:[%s21203_s0 + $0x1b8] sm:$0xff] }
 0x168   :  { %v17845_v57 = vpop.permute.xlu1 %14505  ;;  %v17849_v33 = vpop.permute.xlu0 %14500  ;;  %v2896_v1 = vpack.c.bf16 %v2844_v3, %v2843_v2  ;;  %v17887_v46 = vpack.i.bf16 %v657_v52, %v655_v29  ;;  %v660_v21 = vsel %vm21282_vm2, %v658_v23, %v659_v34  ;;  %v662_v28 = vsel %vm21282_vm2, %v659_v34, %v661_v20 }
 0x169   :  { %v813_v22 = vsel %vm683_vm1, %v810_v44, %v21378_v15  ;;  %v818_v3 = vsel %vm683_vm1, %v815_v40, %v817_v42  ;;  %v14497_v2 = vunpack.i.l.bf16 %v17818_v63  ;;  %v288_v11 = vrot.slane %v129_v39, 7 }
 0x16a   :  { %14795 = vrot.lane.b32.xlu1 %v17279_v27, %s16051_s15  ;;  %14790 = vrot.lane.b32.xlu0 %v17420_v36, %s16045_s20  ;;  %v17873_v27 = vpack.i.bf16 %v17737_v61, %v17740_v16  ;;  %v17899_v29 = vpack.i.bf16 %v813_v22, %v811_v38  ;;  %v289_v44 = vrot.slane %v130_v55, 7  ;;  %v17906_v18 = vpack.i.bf16 %v17821_v19, %v17826_v43 }
 0x16b   :  { %13872 = vmatmul.mubr.msk.bf16.gmra.mrb[20].mxu0 %vm2944_vm12, %v2896_v1  ;;  %v14498_v1 = vunpack.i.h.bf16 %v17818_v63  ;;  %v14487_v52 = vunpack.i.l.bf16 %v17801_v26  ;;  %v17911_v34 = vpack.i.bf16 %v662_v28, %v660_v21  ;;  %v17913_v20 = vpack.i.bf16 %v818_v3, %v816_v7  ;;  %v21379_v63 = vld [vmem:[#allocation18_spill] sm:$0xff] }
 0x16c   :  { %v17869_v35 = vpop.permute.xlu1 %14515  ;;  %v17885_v32 = vpop.permute.xlu0 %14510  ;;  %v2395_v45 = vsel %vm2369_vm4, %v16561_v51, %v14488_v17  ;;  %v14507_v40 = vunpack.i.l.bf16 %v17845_v57  ;;  %v2396_v42 = vsel %vm2369_vm4, %v21379_v63, %v14497_v2  ;;  %v14508_v38 = vunpack.i.h.bf16 %v17845_v57  ;;  %v21382_v51 = vld [vmem:[#allocation19_spill] sm:$0xff]  ;;  %v21383_v17 = vld [vmem:[#allocation17_spill] sm:$0xff] }
 0x16d   :  { %v17926_v26 = vsel %vm204_vm0, %v288_v11, %v289_v44  ;;  %v17929_v15 = vsel %vm204_vm0, 0.0, %v288_v11  ;;  %v2397_v22 = vsel %vm2369_vm4, %v21382_v51, %v14498_v1  ;;  %v14503_v39 = vunpack.i.h.bf16 %v17849_v33  ;;  %v132_v63 = vld [vmem:[%s21203_s0 + $0x1c8] sm:$0xff] }
 0x16e   :  { %14805 = vrot.lane.b32.xlu1 %v17453_v47, %s16051_s15  ;;  %14800 = vrot.lane.b32.xlu0 %v17465_v25, %s16045_s20  ;;  %21380 = vst [vmem:[#allocation15_spill] sm:$0xff] %v17926_v26  ;;  %21381 = vst [vmem:[#allocation13_spill] sm:$0xff] %v17929_v15  ;;  %v14502_v55 = vunpack.i.l.bf16 %v17849_v33  ;;  %v17938_v57 = vsel %vm204_vm0, %v289_v44, 0.0  ;;  %v2459_v7 = vsel %vm2432_vm5, %v2396_v42, %v14507_v40  ;;  %v663_v33 = vrot.slane %v17929_v15, 1  ;;  %v131_v40 = vld [vmem:[%s21203_s0 + $0x1c0] sm:$0xff] }
 0x16f   :  { %v17947_v3 = vpack.i.bf16 %v17926_v26, %v17929_v15  ;;  %v664_v2 = vrot.slane %v17926_v26, 1  ;;  %v2460_v11 = vsel %vm2432_vm5, %v2397_v22, %v14508_v38  ;;  %v14518_v44 = vunpack.i.h.bf16 %v17869_v35 }
 0x170   :  { %v17902_v24 = vpop.permute.xlu1 %14525  ;;  %v17909_v23 = vpop.permute.xlu0 %14520  ;;  %v14517_v1 = vunpack.i.l.bf16 %v17869_v35  ;;  %v2458_v42 = vsel %vm2432_vm5, %v2395_v45, %v14503_v39  ;;  %v14513_v51 = vunpack.i.h.bf16 %v17885_v32  ;;  %v14512_v35 = vunpack.i.l.bf16 %v17885_v32 }
 0x171   :  { %v819_v61 = vrot.slane %v17929_v15, 2  ;;  %v820_v43 = vrot.slane %v17926_v26, 2  ;;  %v17976_v45 = vsel %vm21282_vm2, %v663_v33, %v664_v2  ;;  %v822_v39 = vrot.slane %v17938_v57, 2 }
 0x172   :  { %14815 = vrot.lane.b32.xlu1 %v17465_v25, %s16050_s14  ;;  %14810 = vrot.lane.b32.xlu0 %v17420_v36, %s16050_s14  ;;  %v2394_v36 = vsel %vm2369_vm4, %v21383_v17, %v14487_v52  ;;  %v666_v52 = vrot.slane %v17938_v57, 1  ;;  %v14522_v17 = vunpack.i.l.bf16 %v17909_v23  ;;  %v291_v32 = vrot.slane %v131_v40, 7 }
 0x173   :  { %v2457_v38 = vsel %vm2432_vm5, %v2394_v36, %v14502_v55  ;;  %v292_v55 = vrot.slane %v132_v63, 7  ;;  %v2522_v36 = vsel %vm21283_vm6, %v2459_v7, %v14517_v1  ;;  %v2523_v19 = vsel %vm21283_vm6, %v2460_v11, %v14518_v44 }
 0x174   :  { %v17935_v21 = vpop.permute.xlu1 %14535  ;;  %v14531_v28 = vpop.permute.xlu0 %14530  ;;  %v14523_v49 = vunpack.i.h.bf16 %v17909_v23  ;;  %v17985_v15 = vsel %vm21282_vm2, %v664_v2, %v666_v52  ;;  %v2520_v26 = vsel %vm21283_vm6, %v2457_v38, %v14512_v35  ;;  %v2521_v33 = vsel %vm21283_vm6, %v2458_v42, %v14513_v51 }
 0x175   :  { %v14533_v13 = vunpack.i.h.bf16 %v14531_v28  ;;  %v14532_v57 = vunpack.i.l.bf16 %v14531_v28  ;;  %v14528_v63 = vunpack.i.h.bf16 %v17902_v24  ;;  %v2585_v11 = vsel %vm2560_vm7, %v2520_v26, %v14522_v17 }
 0x176   :  { %14825 = vrot.lane.b32.xlu1 %v17483_v41, %s16052_s16  ;;  %14820 = vrot.lane.b32.xlu0 %v17451_v60, %s16052_s16  ;;  %v14527_v60 = vunpack.i.l.bf16 %v17902_v24  ;;  %v17993_v44 = vsel %vm683_vm1, %v819_v61, %v820_v43  ;;  %v17998_v1 = vsel %vm204_vm0, %v291_v32, %v292_v55  ;;  %v18001_v28 = vsel %vm204_vm0, 0.0, %v291_v32 }
 0x177   :  { %21384 = vst [vmem:[#allocation18_spill] sm:$0xff] %v17998_v1  ;;  %21385 = vst [vmem:[#allocation19_spill] sm:$0xff] %v18001_v28  ;;  %v2586_v24 = vsel %vm2560_vm7, %v2521_v33, %v14523_v49  ;;  %v14538_v52 = vunpack.i.h.bf16 %v17935_v21  ;;  %v14537_v61 = vunpack.i.l.bf16 %v17935_v21  ;;  %v18015_v17 = vsel %vm204_vm0, %v292_v55, 0.0 }
 0x178   :  { %v17967_v22 = vpop.permute.xlu1 %14545  ;;  %v14541_v16 = vpop.permute.xlu0 %14540  ;;  %v2587_v7 = vsel %vm2560_vm7, %v2522_v36, %v14527_v60  ;;  %v2651_v38 = vsel %vm2625_vm8, %v2586_v24, %v14533_v13  ;;  %v668_v32 = vrot.slane %v18001_v28, 1 }
 0x179   :  { %v14542_v2 = vunpack.i.l.bf16 %v14541_v16  ;;  %v14548_v51 = vunpack.i.h.bf16 %v17967_v22  ;;  %v14547_v60 = vunpack.i.l.bf16 %v17967_v22 }
 0x17a   :  { %14835 = vrot.lane.b32.xlu1 %v17492_v59, %s16048_s28  ;;  %14830 = vrot.lane.b32.xlu0 %v17453_v47, %s16048_s28  ;;  %v14543_v47 = vunpack.i.h.bf16 %v14541_v16  ;;  %v2650_v16 = vsel %vm2625_vm8, %v2585_v11, %v14532_v57 }
 0x17b   :  { %v2715_v21 = vsel %vm2690_vm9, %v2650_v16, %v14542_v2  ;;  %v671_v16 = vrot.slane %v18015_v17, 1 }
 0x17c   :  { %v14556_v40 = vpop.permute.xlu1 %14555  ;;  %v14551_v23 = vpop.permute.xlu0 %14550  ;;  %v2716_v36 = vsel %vm2690_vm9, %v2651_v38, %v14543_v47  ;;  %v2652_v38 = vsel %vm2625_vm8, %v2587_v7, %v14537_v61 }
 0x17d   :  { %v14553_v26 = vunpack.i.h.bf16 %v14551_v23  ;;  %v14552_v42 = vunpack.i.l.bf16 %v14551_v23  ;;  %v14558_v57 = vunpack.i.h.bf16 %v14556_v40  ;;  %v14557_v11 = vunpack.i.l.bf16 %v14556_v40 }
 0x17e   :  { %14845 = vrot.lane.b32.xlu1 %v17496_v5, %s16053_s12  ;;  %14840 = vrot.lane.b32.xlu0 %v17465_v25, %s16053_s12  ;;  %v669_v25 = vrot.slane %v17998_v1, 1  ;;  %v2588_v23 = vsel %vm2560_vm7, %v2523_v19, %v14528_v63 }
 0x17f   :  { %v2780_v22 = vsel %vm2755_vm10, %v2715_v21, %v14552_v42  ;;  %v2781_v55 = vsel %vm2755_vm10, %v2716_v36, %v14553_v26  ;;  %v2653_v40 = vsel %vm2625_vm8, %v2588_v23, %v14538_v52  ;;  %v823_v26 = vsel %vm683_vm1, %v820_v43, %v822_v39 }
 0x180   :  { %v18011_v35 = vpop.permute.xlu1 %14565  ;;  %v14561_v49 = vpop.permute.xlu0 %14560  ;;  %v2717_v21 = vsel %vm2690_vm9, %v2652_v38, %v14547_v60  ;;  %v18044_v43 = vsub.s32 0, %v17667_v31  ;;  %v670_v39 = vsel %vm21282_vm2, %v668_v32, %v669_v25  ;;  %v672_v60 = vsel %vm21282_vm2, %v669_v25, %v671_v16 }
 0x181   :  { %v14563_v33 = vunpack.i.h.bf16 %v14561_v49  ;;  %v14562_v13 = vunpack.i.l.bf16 %v14561_v49  ;;  %v2782_v36 = vsel %vm2755_vm10, %v2717_v21, %v14557_v11  ;;  %v14568_v7 = vunpack.i.h.bf16 %v18011_v35 }
 0x182   :  { %14855 = vrot.lane.b32.xlu1 %v17504_v53, %s16054_s19  ;;  %14850 = vrot.lane.b32.xlu0 %v17483_v41, %s16054_s19  ;;  %v2718_v41 = vsel %vm2690_vm9, %v2653_v40, %v14548_v51  ;;  %v18057_v32 = vpack.i.bf16 %v17985_v15, %v17976_v45  ;;  %v18065_v25 = vpack.i.bf16 %v823_v26, %v17993_v44  ;;  %v134_v15 = vld [vmem:[%s21203_s0 + $0x1d8] sm:$0xff] }
 0x183   :  { %v2845_v2 = vsel %vm2820_vm11, %v2780_v22, %v14562_v13  ;;  %v2846_v47 = vsel %vm2820_vm11, %v2781_v55, %v14563_v33  ;;  %v2783_v33 = vsel %vm2755_vm10, %v2718_v41, %v14558_v57  ;;  %v824_v22 = vrot.slane %v18001_v28, 2  ;;  %v21386_v45 = vld [vmem:[#allocation23_spill] sm:$0xff]  ;;  %v21387_v26 = vld [vmem:[#allocation24_spill] sm:$0xff] }
 0x184   :  { %v14576_v24 = vpop.permute.xlu1 %14575  ;;  %v14571_v49 = vpop.permute.xlu0 %14570  ;;  %v2897_v42 = vpack.c.bf16 %v2846_v47, %v2845_v2  ;;  %v825_v55 = vrot.slane %v17998_v1, 2  ;;  %v827_v2 = vrot.slane %v18015_v17, 2  ;;  %v14567_v47 = vunpack.i.l.bf16 %v18011_v35 }
 0x185   :  { %v14573_v19 = vunpack.i.h.bf16 %v14571_v49  ;;  %v14572_v63 = vunpack.i.l.bf16 %v14571_v49  ;;  %v14578_v13 = vunpack.i.h.bf16 %v14576_v24  ;;  %v14577_v23 = vunpack.i.l.bf16 %v14576_v24 }
 0x186   :  { %14865 = vrot.lane.b32.xlu1 %v17674_v48, %s16055_s25  ;;  %14860 = vrot.lane.b32.xlu0 %v17492_v59, %s16055_s25  ;;  %v18069_v24 = vpack.i.bf16 %v17998_v1, %v18001_v28  ;;  %v2399_v35 = vsel %vm2369_vm4, %v21386_v45, %v14568_v7  ;;  %v18079_v16 = vpack.i.bf16 %v672_v60, %v670_v39 }
 0x187   :  { %13875 = vmatprep.mubr.msk.bf16.mxu0 %vm2944_vm12, %v2897_v42  ;;  %v2848_v52 = vsel %vm2820_vm11, %v2783_v33, %v14573_v19  ;;  %v2847_v61 = vsel %vm2820_vm11, %v2782_v36, %v14572_v63  ;;  %v2401_v44 = vsel %vm2369_vm4, %v16792_v9, %v14578_v13  ;;  %v826_v42 = vsel %vm683_vm1, %v824_v22, %v825_v55  ;;  %v21388_v36 = vld [vmem:[#allocation22_spill] sm:$0xff] }
 0x188   :  { %v14586_v51 = vpop.permute.xlu1 %14585  ;;  %v14581_v57 = vpop.permute.xlu0 %14580  ;;  %v2898_v11 = vpack.c.bf16 %v2848_v52, %v2847_v61  ;;  %v2400_v21 = vsel %vm2369_vm4, %v21387_v26, %v14577_v23  ;;  %v828_v41 = vsel %vm683_vm1, %v825_v55, %v827_v2  ;;  %v295_v63 = vrot.slane %v134_v15, 7 }
 0x189   :  { %v14588_v38 = vunpack.i.h.bf16 %v14586_v51  ;;  %v14587_v40 = vunpack.i.l.bf16 %v14586_v51  ;;  %v2398_v33 = vsel %vm2369_vm4, %v21388_v36, %v14567_v47  ;;  %v14583_v39 = vunpack.i.h.bf16 %v14581_v57 }
 0x18a   :  { %14875 = vrot.lane.b32.xlu1 %v17492_v59, %s16051_s15  ;;  %14870 = vrot.lane.b32.xlu0 %v17496_v5, %s16045_s20  ;;  %v133_v59 = vld [vmem:[%s21203_s0 + $0x1d0] sm:$0xff]  ;;  %v14582_v9 = vunpack.i.l.bf16 %v14581_v57  ;;  %v18095_v22 = vpack.i.bf16 %v828_v41, %v826_v42  ;;  %v462_v23 = vsel %vm204_vm0, %v295_v63, 0.0 }
 0x18b   :  { %13876 = vmatmul.mubr.msk.bf16.gmra.mrb[24].mxu0 %vm2944_vm12, %v2898_v11  ;;  %v294_v19 = vrot.slane %v133_v59, 7  ;;  %v2463_v51 = vsel %vm2432_vm5, %v2400_v21, %v14587_v40  ;;  %v2464_v60 = vsel %vm2432_vm5, %v2401_v44, %v14588_v38  ;;  %v2462_v2 = vsel %vm2432_vm5, %v2399_v35, %v14583_v39 }
 0x18c   :  { %v14596_v17 = vpop.permute.xlu1 %14595  ;;  %v14591_v49 = vpop.permute.xlu0 %14590  ;;  %v2461_v47 = vsel %vm2432_vm5, %v2398_v33, %v14582_v9  ;;  %v676_v35 = vrot.slane %v462_v23, 1  ;;  %v832_v33 = vrot.slane %v462_v23, 2 }
 0x18d   :  { %v14598_v7 = vunpack.i.h.bf16 %v14596_v17  ;;  %v14597_v52 = vunpack.i.l.bf16 %v14596_v17  ;;  %v14592_v13 = vunpack.i.l.bf16 %v14591_v49  ;;  %v18100_v55 = vsel %vm204_vm0, %v294_v19, %v295_v63 }
 0x18e   :  { %14885 = vrot.lane.b32.xlu1 %v17674_v48, %s16051_s15  ;;  %14880 = vrot.lane.b32.xlu0 %v17678_v0, %s16045_s20  ;;  %21389 = vst [vmem:[#allocation17_spill] sm:$0xff] %v18100_v55  ;;  %v18103_v57 = vsel %vm204_vm0, 0.0, %v294_v19  ;;  %v14593_v59 = vunpack.i.h.bf16 %v14591_v49  ;;  %v674_v26 = vrot.slane %v18100_v55, 1  ;;  %v830_v49 = vrot.slane %v18100_v55, 2 }
 0x18f   :  { %21390 = vst [vmem:[#allocation23_spill] sm:$0xff] %v18103_v57  ;;  %v2526_v15 = vsel %vm21283_vm6, %v2463_v51, %v14597_v52  ;;  %v2527_v45 = vsel %vm21283_vm6, %v2464_v60, %v14598_v7  ;;  %v2524_v38 = vsel %vm21283_vm6, %v2461_v47, %v14592_v13  ;;  %v673_v42 = vrot.slane %v18103_v57, 1 }
 0x190   :  { %v14606_v61 = vpop.permute.xlu1 %14605  ;;  %v14601_v11 = vpop.permute.xlu0 %14600  ;;  %v2525_v19 = vsel %vm21283_vm6, %v2462_v2, %v14593_v59  ;;  %v18124_v36 = vpack.i.bf16 %v18100_v55, %v18103_v57 }
 0x191   :  { %v14607_v17 = vunpack.i.l.bf16 %v14606_v61  ;;  %v14608_v21 = vunpack.i.h.bf16 %v14606_v61  ;;  %v14602_v41 = vunpack.i.l.bf16 %v14601_v11  ;;  %v14603_v63 = vunpack.i.h.bf16 %v14601_v11 }
 0x192   :  { %14895 = vrot.lane.b32.xlu1 %v17678_v0, %s16050_s14  ;;  %14890 = vrot.lane.b32.xlu0 %v17496_v5, %s16050_s14  ;;  %v829_v5 = vrot.slane %v18103_v57, 2  ;;  %v675_v13 = vsel %vm21282_vm2, %v673_v42, %v674_v26  ;;  %v677_v11 = vsel %vm21282_vm2, %v674_v26, %v676_v35  ;;  %v18149_v26 = vld [vmem:[%s21205_s2] ss:$0 sm:$0xff]  ;;  %vm6670_vm2 = vcmask 1045509  }
 0x193   :  { %v2591_v39 = vsel %vm2560_vm7, %v2526_v15, %v14607_v17  ;;  %v2589_v2 = vsel %vm2560_vm7, %v2524_v38, %v14602_v41  ;;  %v18151_v35 = vpack.i.bf16 %v677_v11, %v675_v13 }
 0x194   :  { %v14616_v44 = vpop.permute.xlu1 %14615  ;;  %v14611_v40 = vpop.permute.xlu0 %14610  ;;  %v831_v23 = vsel %vm683_vm1, %v829_v5, %v830_v49 }
 0x195   :  { %v14618_v9 = vunpack.i.h.bf16 %v14616_v44  ;;  %v14617_v7 = vunpack.i.l.bf16 %v14616_v44  ;;  %v14613_v61 = vunpack.i.h.bf16 %v14611_v40  ;;  %v14612_v51 = vunpack.i.l.bf16 %v14611_v40  ;;  %21393 = vst [vmem:[#allocation38_spill] sm:$0xff] %v18151_v35 }
 0x196   :  { %14905 = vrot.lane.b32.xlu1 %v17686_v10, %s16052_s16  ;;  %14900 = vrot.lane.b32.xlu0 %v17504_v53, %s16052_s16  ;;  %v2592_v53 = vsel %vm2560_vm7, %v2527_v45, %v14608_v21  ;;  %v833_v44 = vsel %vm683_vm1, %v830_v49, %v832_v33  ;;  %v2590_v45 = vsel %vm2560_vm7, %v2525_v19, %v14603_v63 }
 0x197   :  { %v2656_v38 = vsel %vm2625_vm8, %v2591_v39, %v14617_v7  ;;  %v2657_v40 = vsel %vm2625_vm8, %v2592_v53, %v14618_v9  ;;  %v2654_v21 = vsel %vm2625_vm8, %v2589_v2, %v14612_v51  ;;  %v18165_v39 = vpack.i.bf16 %v833_v44, %v831_v23 }
 0x198   :  { %v18127_v52 = vpop.permute.xlu1 %14625  ;;  %v14621_v60 = vpop.permute.xlu0 %14620 }
 0x199   :  { %21391 = vst [vmem:[#allocation24_spill] sm:$0xff] %v18127_v52  ;;  %v21263_v47 = vunpack.i.l.bf16 %v18127_v52  ;;  %v21264_v59 = vunpack.i.h.bf16 %v18127_v52  ;;  %v14623_v15 = vunpack.i.h.bf16 %v14621_v60  ;;  %v14622_v17 = vunpack.i.l.bf16 %v14621_v60  ;;  %21394 = vst [vmem:[#allocation39_spill] sm:$0xff] %v18165_v39 }
 0x19a   :  { %14915 = vrot.lane.b32.xlu1 %v17688_v50, %s16048_s28  ;;  %14910 = vrot.lane.b32.xlu0 %v17674_v48, %s16048_s28  ;;  %v2655_v48 = vsel %vm2625_vm8, %v2590_v45, %v14613_v61 }
 0x19b   :  { %v2721_v19 = vsel %vm2690_vm9, %v2656_v38, %v21263_v47  ;;  %v2722_v9 = vsel %vm2690_vm9, %v2657_v40, %v21264_v59  ;;  %v2719_v7 = vsel %vm2690_vm9, %v2654_v21, %v14622_v17  ;;  %v18172_v61 = vsel %vm2690_vm9, %v2655_v48, %v14623_v15 }
 0x19c   :  { %v18144_v42 = vpop.permute.xlu1 %14635  ;;  %v18157_v49 = vpop.permute.xlu0 %14630 }
 0x19d   :  { %21392 = vst [vmem:[#allocation22_spill] sm:$0xff] %v18144_v42  ;;  %v21261_v41 = vunpack.i.h.bf16 %v18144_v42  ;;  %v21262_v5 = vunpack.i.l.bf16 %v18144_v42  ;;  %v14632_v63 = vunpack.i.l.bf16 %v18157_v49  ;;  %v14633_v53 = vunpack.i.h.bf16 %v18157_v49 }
 0x19e   :  { %v13853_v33 = vpop.f32.mrb[0].mxu0  ;;  %14925 = vrot.lane.b32.xlu1 %v17705_v37, %s16053_s12  ;;  %14920 = vrot.lane.b32.xlu0 %v17678_v0, %s16053_s12 }
 0x19f   :  { %v3088_v51 = vadd.f32 %v13853_v33, %v18149_v26  ;;  %v3079_v60 = vpop.f32.mrb[1].mxu0  ;;  %v18180_v13 = vsel %vm2755_vm10, %v2721_v19, %v21262_v5  ;;  %v18185_v11 = vsel %vm2755_vm10, %v2722_v9, %v21261_v41  ;;  %v18192_v0 = vsel %vm2755_vm10, %v2719_v7, %v14632_v63 }
 0x1a0   :  { %v3080_v2 = vadd.f32 %v18149_v26, %v3079_v60  ;;  %v13854_v23 = vpop.f32.mrb[2].mxu0  ;;  %v18189_v15 = vpop.permute.xlu1 %14645 }
 0x1a1   :  { %21395 = vst [vmem:[#allocation40_spill] sm:$0xff] %v18189_v15  ;;  %v3432_v17 = vcombine.high %v3088_v51, %v3088_v51  ;;  %v3439_v44 = vrot.slane %v3088_v51, %v17699_v56  ;;  %v3091_v45 = vadd.f32 %v13854_v23, %v18149_v26  ;;  %v18196_v38 = vpop.permute.xlu0 %14640  ;;  %v18198_v40 = vpop.f32.mrb[3].mxu0 }
 0x1a2   :  { %v3398_v21 = vcombine.high %v3080_v2, %v3080_v2  ;;  %v3405_v48 = vrot.slane %v3080_v2, %v17699_v56  ;;  %14935 = vrot.lane.b32.xlu1 %v17713_v12, %s16054_s19  ;;  %14930 = vrot.lane.b32.xlu0 %v17686_v10, %s16054_s19 }
 0x1a3   :  { %v3446_v63 = vrot.slane %v3432_v17, %v17699_v56  ;;  %v3447_v33 = vcombine.high %v3439_v44, %v3439_v44  ;;  %v12873_v9 = vrot.slane %v3439_v44, 9  ;;  %v3449_v7 = vcombine.high %v3091_v45, %v3091_v45 }
 0x1a4   :  { %v3412_v51 = vrot.slane %v3398_v21, %v17699_v56  ;;  %v3413_v60 = vcombine.high %v3405_v48, %v3405_v48  ;;  %v12865_v23 = vrot.slane %v3405_v48, 9  ;;  %v3456_v2 = vrot.slane %v3091_v45, %v17699_v56  ;;  %v18210_v41 = vpop.permute.xlu1 %14655 }
 0x1a5   :  { %v3448_v5 = vcombine.high %v3446_v63, %v3446_v63  ;;  %v12874_v47 = vrot.slane %v3447_v33, 9  ;;  %v12875_v59 = vrot.slane %v3446_v63, 9  ;;  %v5518_v49 = vmax.f32 %v3439_v44, %v12873_v9  ;;  %v18212_v17 = vpop.permute.xlu0 %14650 }
 0x1a6   :  { %v3414_v19 = vcombine.high %v3412_v51, %v3412_v51  ;;  %v12866_v31 = vrot.slane %v3413_v60, 9  ;;  %v12867_v42 = vrot.slane %v3412_v51, 9  ;;  %v5510_v52 = vmax.f32 %v3405_v48, %v12865_v23  ;;  %14945 = vrot.lane.b32.xlu1 %v17718_v8, %s16055_s25  ;;  %14940 = vrot.lane.b32.xlu0 %v17688_v50, %s16055_s25 }
 0x1a7   :  { %v12876_v10 = vrot.slane %v3448_v5, 9  ;;  %v5519_v21 = vmax.f32 %v3447_v33, %v12874_v47  ;;  %v5520_v45 = vmax.f32 %v3446_v63, %v12875_v59  ;;  %v18217_v57 = vrot.slane %v3449_v7, %v17699_v56 }
 0x1a8   :  { %v12868_v44 = vrot.slane %v3414_v19, 9  ;;  %v5511_v9 = vmax.f32 %v3413_v60, %v12866_v31  ;;  %v5512_v55 = vmax.f32 %v3412_v51, %v12867_v42  ;;  %v5766_v28 = vmax.f32 %v5510_v52, %v5518_v49  ;;  %v18221_v1 = vpop.permute.xlu1 %14665 }
 0x1a9   :  { %v5521_v48 = vmax.f32 %v3448_v5, %v12876_v10  ;;  %v3464_v23 = vcombine.high %v3456_v2, %v3456_v2  ;;  %v18225_v39 = vcombine.high %v18217_v57, %v18217_v57  ;;  %v12877_v47 = vrot.slane %v3456_v2, 9  ;;  %v18227_v59 = vpop.permute.xlu0 %14660 }
 0x1aa   :  { %v5513_v63 = vmax.f32 %v3414_v19, %v12868_v44  ;;  %v5767_v33 = vmax.f32 %v5511_v9, %v5519_v21  ;;  %v5768_v7 = vmax.f32 %v5512_v55, %v5520_v45  ;;  %v5894_v35 = vmax.f32 %v5766_v28, 0.0  ;;  %14955 = vrot.lane.b32.xlu1 %v17688_v50, %s16051_s15  ;;  %14950 = vrot.lane.b32.xlu0 %v17705_v37, %s16045_s20 }
 0x1ab   :  { %v2785_v31 = vsel %vm2755_vm10, %v18172_v61, %v14633_v53  ;;  %v12878_v52 = vrot.slane %v3464_v23, 9  ;;  %v12879_v42 = vrot.slane %v18217_v57, 9  ;;  %v14643_v5 = vunpack.i.h.bf16 %v18196_v38 }
 0x1ac   :  { %v5769_v49 = vmax.f32 %v5513_v63, %v5521_v48  ;;  %v5895_v51 = vmax.f32 %v5767_v33, 0.0  ;;  %v5896_v19 = vmax.f32 %v5768_v7, 0.0  ;;  %v12880_v55 = vrot.slane %v18225_v39, 9  ;;  %v18238_v28 = vpop.permute.xlu1 %14675 }
 0x1ad   :  { %v6153_v50 = vrot.slane %v5894_v35, %v18044_v43  ;;  %v18241_v60 = vmax.f32 %v3456_v2, %v12877_v47  ;;  %v18243_v61 = vmax.f32 %v3464_v23, %v12878_v52  ;;  %v21396_v53 = vunpack.i.l.bf16 %v18189_v15  ;;  %v18249_v21 = vpop.permute.xlu0 %14670 }
 0x1ae   :  { %v5897_v45 = vmax.f32 %v5769_v49, 0.0  ;;  %v6157_v44 = vrot.slane %v5895_v51, %v18044_v43  ;;  %v6161_v9 = vrot.slane %v5896_v19, %v18044_v43  ;;  %v21397_v48 = vunpack.i.h.bf16 %v18189_v15  ;;  %14965 = vrot.lane.b32.xlu1 %v17718_v8, %s16051_s15  ;;  %14960 = vrot.lane.b32.xlu0 %v17867_v4, %s16045_s20 }
 0x1af   :  { %v2851_v10 = vsel %vm2820_vm11, %v18180_v13, %v21396_v53  ;;  %v14642_v2 = vunpack.i.l.bf16 %v18196_v38  ;;  %v2850_v23 = vsel %vm2820_vm11, %v2785_v31, %v14643_v5  ;;  %v3083_v13 = vadd.f32 %v18149_v26, %v18198_v40 }
 0x1b0   :  { %v2852_v35 = vsel %vm2820_vm11, %v18185_v11, %v21397_v48  ;;  %v14658_v47 = vunpack.i.h.bf16 %v18210_v41  ;;  %v6165_v63 = vrot.slane %v5897_v45, %v18044_v43  ;;  %v6663_v33 = vsel %vm6662_vm13, %v6157_v44, %v6153_v50  ;;  %v18270_v52 = vpop.permute.xlu1 %14685 }
 0x1b1   :  { %v14657_v11 = vunpack.i.l.bf16 %v18210_v41  ;;  %v14653_v7 = vunpack.i.h.bf16 %v18212_v17  ;;  %v6665_v38 = vsel %vm21287_vm14, %v6161_v9, %v6663_v33  ;;  %v2849_v40 = vsel %vm2820_vm11, %v18192_v0, %v14642_v2  ;;  %v18276_v49 = vpop.permute.xlu0 %14680 }
 0x1b2   :  { %v3415_v31 = vcombine.high %v3083_v13, %v3083_v13  ;;  %v3422_v5 = vrot.slane %v3083_v13, %v17699_v56  ;;  %v6667_v51 = vsel %vm21286_vm15, %v6165_v63, %v6665_v38  ;;  %v14652_v19 = vunpack.i.l.bf16 %v18212_v17  ;;  %14975 = vrot.lane.b32.xlu1 %v17867_v4, %s16050_s14  ;;  %14970 = vrot.lane.b32.xlu0 %v17705_v37, %s16050_s14 }
 0x1b3   :  { %v2403_v41 = vsel %vm2369_vm4, %v16983_v54, %v14653_v7  ;;  %v2899_v50 = vpack.c.bf16 %v2850_v23, %v2849_v40  ;;  %v2900_v44 = vpack.c.bf16 %v2852_v35, %v2851_v10  ;;  %v5524_v9 = vmax.f32 %v18217_v57, %v12879_v42 }
 0x1b4   :  { %v3429_v53 = vrot.slane %v3415_v31, %v17699_v56  ;;  %v3430_v0 = vcombine.high %v3422_v5, %v3422_v5  ;;  %v12869_v45 = vrot.slane %v3422_v5, 9  ;;  %v2402_v48 = vsel %vm2369_vm4, %v16986_v6, %v14652_v19  ;;  %v18293_v2 = vpop.permute.xlu1 %14695 }
 0x1b5   :  { %13879 = vmatprep.mubr.msk.bf16.mxu0 %vm2944_vm12, %v2899_v50  ;;  %v14668_v54 = vunpack.i.h.bf16 %v18221_v1  ;;  %v14667_v17 = vunpack.i.l.bf16 %v18221_v1  ;;  %v18296_v37 = vpop.permute.xlu0 %14690  ;;  %v5525_v57 = vmax.f32 %v18225_v39, %v12880_v55  ;;  %v2465_v6 = vsel %vm2432_vm5, %v2402_v48, %v14657_v11  ;;  %v21401_v48 = vld [vmem:[#allocation20_spill] sm:$0xff] }
 0x1b6   :  { %v3431_v23 = vcombine.high %v3429_v53, %v3429_v53  ;;  %v12870_v13 = vrot.slane %v3430_v0, 9  ;;  %v12871_v63 = vrot.slane %v3429_v53, 9  ;;  %v5514_v10 = vmax.f32 %v3422_v5, %v12869_v45  ;;  %13880 = vmatmul.mubr.msk.bf16.gmra.mrb[28].mxu0 %vm2944_vm12, %v2900_v44  ;;  %14985 = vrot.lane.b32.xlu1 %v17873_v27, %s16052_s16 }
 0x1b7   :  { %v2466_v42 = vsel %vm2432_vm5, %v2403_v41, %v14658_v47  ;;  %v14663_v35 = vunpack.i.h.bf16 %v18227_v59  ;;  %14980 = vrot.lane.b32.xlu0 %v17713_v12, %s16052_s16  ;;  %v2530_v40 = vsel %vm21283_vm6, %v2465_v6, %v14667_v17  ;;  %v14662_v55 = vunpack.i.l.bf16 %v18227_v59 }
 0x1b8   :  { %v12872_v1 = vrot.slane %v3431_v23, 9  ;;  %v5515_v33 = vmax.f32 %v3430_v0, %v12870_v13  ;;  %v5516_v7 = vmax.f32 %v3429_v53, %v12871_v63  ;;  %v5770_v38 = vmax.f32 %v5514_v10, %v18241_v60  ;;  %v18311_v11 = vpop.permute.xlu1 %14705  ;;  %v21398_v60 = vld [vmem:[#allocation21_spill] sm:$0xff] }
 0x1b9   :  { %v2531_v39 = vsel %vm21283_vm6, %v2466_v42, %v14668_v54  ;;  %v14678_v47 = vunpack.i.h.bf16 %v18238_v28  ;;  %v18314_v50 = vpop.permute.xlu0 %14700  ;;  %v2529_v12 = vsel %vm21283_vm6, %v21398_v60, %v14663_v35  ;;  %v14677_v53 = vunpack.i.l.bf16 %v18238_v28 }
 0x1ba   :  { %v5517_v31 = vmax.f32 %v3431_v23, %v12872_v1  ;;  %v5771_v5 = vmax.f32 %v5515_v33, %v18243_v61  ;;  %v5772_v41 = vmax.f32 %v5516_v7, %v5524_v9  ;;  %v5898_v19 = vmax.f32 %v5770_v38, 0.0  ;;  %14995 = vrot.lane.b32.xlu1 %v17887_v46, %s16048_s28 }
 0x1bb   :  { %v14673_v0 = vunpack.i.h.bf16 %v18249_v21  ;;  %v14672_v59 = vunpack.i.l.bf16 %v18249_v21  ;;  %14990 = vrot.lane.b32.xlu0 %v17718_v8, %s16048_s28  ;;  %v2528_v28 = vsel %vm21283_vm6, %v21401_v48, %v14662_v55  ;;  %v2595_v54 = vsel %vm2560_vm7, %v2530_v40, %v14677_v53 }
 0x1bc   :  { %v5773_v45 = vmax.f32 %v5517_v31, %v5525_v57  ;;  %v18323_v44 = vmax.f32 %v5771_v5, 0.0  ;;  %v18325_v61 = vmax.f32 %v5772_v41, 0.0  ;;  %v6169_v9 = vrot.slane %v5898_v19, %v18044_v43  ;;  %v14716_v23 = vpop.permute.xlu1 %14715 }
 0x1bd   :  { %v2596_v21 = vsel %vm2560_vm7, %v2531_v39, %v14678_v47  ;;  %v14688_v17 = vunpack.i.h.bf16 %v18270_v52  ;;  %v2593_v10 = vsel %vm2560_vm7, %v2528_v28, %v14672_v59  ;;  %v2594_v57 = vsel %vm2560_vm7, %v2529_v12, %v14673_v0  ;;  %v14711_v8 = vpop.permute.xlu0 %14710 }
 0x1be   :  { %21399 = vst [vmem:[#allocation21_spill] sm:$0xff] %v18323_v44  ;;  %21400 = vst [vmem:[#allocation41_spill] sm:$0xff] %v18325_v61  ;;  %v18335_v13 = vmax.f32 %v5773_v45, 0.0  ;;  %v18338_v63 = vsel %vm21284_vm3, %v6169_v9, %v6667_v51  ;;  %v14687_v42 = vunpack.i.l.bf16 %v18270_v52  ;;  %v14683_v35 = vunpack.i.h.bf16 %v18276_v49  ;;  %v13857_v33 = vpop.f32.mrb[4].mxu0  ;;  %15005 = vrot.lane.b32.xlu1 %v17899_v29, %s16053_s12 }
 0x1bf   :  { %v14682_v1 = vunpack.i.l.bf16 %v18276_v49  ;;  %v14698_v7 = vunpack.i.h.bf16 %v18293_v2  ;;  %v14697_v38 = vunpack.i.l.bf16 %v18293_v2  ;;  %v14693_v40 = vunpack.i.h.bf16 %v18296_v37  ;;  %15000 = vrot.lane.b32.xlu0 %v17867_v4, %s16053_s12  ;;  %v3095_v52 = vpop.f32.mrb[5].mxu0 }
 0x1c0   :  { %21402 = vst [vmem:[#allocation20_spill] sm:$0xff] %v18335_v13  ;;  %v2660_v39 = vsel %vm2625_vm8, %v2595_v54, %v14687_v42  ;;  %v2661_v55 = vsel %vm2625_vm8, %v2596_v21, %v14688_v17  ;;  %v14692_v47 = vunpack.i.l.bf16 %v18296_v37  ;;  %v13858_v31 = vpop.f32.mrb[6].mxu0  ;;  %v18361_v5 = vpop.permute.xlu1 %14725  ;;  %v2659_v41 = vsel %vm2625_vm8, %v2594_v57, %v14683_v35 }
 0x1c1   :  { %v2658_v2 = vsel %vm2625_vm8, %v2593_v10, %v14682_v1  ;;  %v2725_v19 = vsel %vm2690_vm9, %v2660_v39, %v14697_v38  ;;  %v14708_v4 = vunpack.i.h.bf16 %v18311_v11  ;;  %v18367_v60 = vpop.permute.xlu0 %14720  ;;  %v18369_v12 = vpop.f32.mrb[7].mxu0  ;;  %v2726_v53 = vsel %vm2690_vm9, %v2661_v55, %v14698_v7 }
 0x1c2   :  { %v14707_v0 = vunpack.i.l.bf16 %v18311_v11  ;;  %v14703_v37 = vunpack.i.h.bf16 %v18314_v50  ;;  %v14702_v59 = vunpack.i.l.bf16 %v18314_v50  ;;  %15015 = vrot.lane.b32.xlu1 %v17906_v18, %s16054_s19  ;;  %v2724_v45 = vsel %vm2690_vm9, %v2659_v41, %v14693_v40 }
 0x1c3   :  { %v14718_v9 = vunpack.i.h.bf16 %v14716_v23  ;;  %v14717_v48 = vunpack.i.l.bf16 %v14716_v23  ;;  %v14713_v28 = vunpack.i.h.bf16 %v14711_v8  ;;  %15010 = vrot.lane.b32.xlu0 %v17873_v27, %s16054_s19  ;;  %v2723_v54 = vsel %vm2690_vm9, %v2658_v2, %v14692_v47 }
 0x1c4   :  { %v18382_v21 = vsel %vm2755_vm10, %v2725_v19, %v14707_v0  ;;  %v18385_v11 = vsel %vm2755_vm10, %v2726_v53, %v14708_v4  ;;  %v14712_v50 = vunpack.i.l.bf16 %v14711_v8  ;;  %v18387_v17 = vpop.permute.xlu1 %14735  ;;  %v2788_v10 = vsel %vm2755_vm10, %v2723_v54, %v14702_v59 }
 0x1c5   :  { %v2789_v57 = vsel %vm2755_vm10, %v2724_v45, %v14703_v37  ;;  %v18393_v23 = vsel %vm2369_vm4, %v17037_v62, %v14718_v9  ;;  %v3104_v27 = vadd.f32 %v13857_v33, %v18149_v26  ;;  %v18396_v42 = vpop.permute.xlu0 %14730  ;;  %v18400_v35 = vsel %vm2369_vm4, %v17030_v14, %v14717_v48 }
 0x1c6   :  { %v18403_v8 = vsel %vm2820_vm11, %v2789_v57, %v14713_v28  ;;  %v3096_v1 = vadd.f32 %v18149_v26, %v3095_v52  ;;  %v3107_v7 = vadd.f32 %v13858_v31, %v18149_v26  ;;  %15025 = vrot.lane.b32.xlu1 %v17911_v34, %s16055_s25  ;;  %v18410_v62 = vsel %vm2820_vm11, %v2788_v10, %v14712_v50 }
 0x1c7   :  { %v3500_v33 = vcombine.high %v3104_v27, %v3104_v27  ;;  %v3507_v38 = vrot.slane %v3104_v27, %v17699_v56  ;;  %v14728_v40 = vunpack.i.h.bf16 %v18361_v5  ;;  %15020 = vrot.lane.b32.xlu0 %v17887_v46, %s16055_s25  ;;  %v14723_v55 = vunpack.i.h.bf16 %v18367_v60 }
 0x1c8   :  { %v3466_v14 = vcombine.high %v3096_v1, %v3096_v1  ;;  %v3473_v39 = vrot.slane %v3096_v1, %v17699_v56  ;;  %v3517_v52 = vcombine.high %v3107_v7, %v3107_v7  ;;  %v18418_v47 = vpop.permute.xlu1 %14745  ;;  %v3524_v19 = vrot.slane %v3107_v7, %v17699_v56 }
 0x1c9   :  { %v3514_v31 = vrot.slane %v3500_v33, %v17699_v56  ;;  %v3515_v2 = vcombine.high %v3507_v38, %v3507_v38  ;;  %v12889_v41 = vrot.slane %v3507_v38, 9  ;;  %v18422_v4 = vpop.permute.xlu0 %14740 }
 0x1ca   :  { %v3480_v53 = vrot.slane %v3466_v14, %v17699_v56  ;;  %v3481_v0 = vcombine.high %v3473_v39, %v3473_v39  ;;  %v12881_v37 = vrot.slane %v3473_v39, 9  ;;  %v3531_v59 = vrot.slane %v3517_v52, %v17699_v56  ;;  %15035 = vrot.lane.b32.xlu1 %v17913_v20, %s16045_s20 }
 0x1cb   :  { %v3516_v45 = vcombine.high %v3514_v31, %v3514_v31  ;;  %v12890_v9 = vrot.slane %v3515_v2, 9  ;;  %v12891_v48 = vrot.slane %v3514_v31, 9  ;;  %v5534_v28 = vmax.f32 %v3507_v38, %v12889_v41  ;;  %15030 = vrot.lane.b32.xlu0 %v17899_v29, %s16045_s20 }
 0x1cc   :  { %v3482_v54 = vcombine.high %v3480_v53, %v3480_v53  ;;  %v12882_v50 = vrot.slane %v3481_v0, 9  ;;  %v12883_v10 = vrot.slane %v3480_v53, 9  ;;  %v5526_v57 = vmax.f32 %v3473_v39, %v12881_v37  ;;  %v18430_v27 = vpop.permute.xlu1 %14755 }
 0x1cd   :  { %v12892_v1 = vrot.slane %v3516_v45, 9  ;;  %v5535_v7 = vmax.f32 %v3515_v2, %v12890_v9  ;;  %v5536_v33 = vmax.f32 %v3514_v31, %v12891_v48  ;;  %v3532_v14 = vcombine.high %v3524_v19, %v3524_v19  ;;  %v18432_v52 = vpop.permute.xlu0 %14750 }
 0x1ce   :  { %v12884_v49 = vrot.slane %v3482_v54, 9  ;;  %v5527_v51 = vmax.f32 %v3481_v0, %v12882_v50  ;;  %v5528_v6 = vmax.f32 %v3480_v53, %v12883_v10  ;;  %v5774_v15 = vmax.f32 %v5526_v57, %v5534_v28  ;;  %15045 = vrot.lane.b32.xlu1 %v17911_v34, %s16051_s15  ;;  %v21403_v53 = vld [vmem:[#allocation25_spill] sm:$0xff] }
 0x1cf   :  { %v5537_v38 = vmax.f32 %v3516_v45, %v12892_v1  ;;  %v3533_v41 = vcombine.high %v3531_v59, %v3531_v59  ;;  %v12893_v13 = vrot.slane %v3524_v19, 9  ;;  %v12894_v61 = vrot.slane %v3532_v14, 9  ;;  %15040 = vrot.lane.b32.xlu0 %v17887_v46, %s16051_s15 }
 0x1d0   :  { %v5529_v39 = vmax.f32 %v3482_v54, %v12884_v49  ;;  %v5775_v2 = vmax.f32 %v5527_v51, %v5535_v7  ;;  %v5776_v31 = vmax.f32 %v5528_v6, %v5536_v33  ;;  %v5902_v37 = vmax.f32 %v5774_v15, 0.0  ;;  %v18438_v9 = vpop.permute.xlu1 %14765 }
 0x1d1   :  { %v12895_v48 = vrot.slane %v3531_v59, 9  ;;  %v12896_v0 = vrot.slane %v3533_v41, 9  ;;  %v2407_v28 = vsel %vm2369_vm4, %v21403_v53, %v14728_v40  ;;  %v14727_v50 = vunpack.i.l.bf16 %v18361_v5  ;;  %v18443_v45 = vpop.permute.xlu0 %14760 }
 0x1d2   :  { %v5777_v10 = vmax.f32 %v5529_v39, %v5537_v38  ;;  %v5903_v57 = vmax.f32 %v5775_v2, 0.0  ;;  %v5904_v1 = vmax.f32 %v5776_v31, 0.0  ;;  %v18445_v44 = vmax.f32 %v3524_v19, %v12893_v13  ;;  %15055 = vrot.lane.b32.xlu1 %v17913_v20, %s16050_s14 }
 0x1d3   :  { %v6185_v46 = vrot.slane %v5902_v37, %v18044_v43  ;;  %v18450_v15 = vmax.f32 %v3532_v14, %v12894_v61  ;;  %v18452_v6 = vmax.f32 %v3531_v59, %v12895_v48  ;;  %v14722_v51 = vunpack.i.l.bf16 %v18367_v60  ;;  %15050 = vrot.lane.b32.xlu0 %v17899_v29, %s16050_s14 }
 0x1d4   :  { %v5905_v49 = vmax.f32 %v5777_v10, 0.0  ;;  %v6189_v5 = vrot.slane %v5903_v57, %v18044_v43  ;;  %v6193_v13 = vrot.slane %v5904_v1, %v18044_v43  ;;  %v2856_v40 = vsel %vm2820_vm11, %v18385_v11, %v14723_v55  ;;  %v18461_v19 = vpop.permute.xlu1 %14775 }
 0x1d5   :  { %v2855_v61 = vsel %vm2820_vm11, %v18382_v21, %v14722_v51  ;;  %v3099_v59 = vadd.f32 %v18149_v26, %v18369_v12  ;;  %v2901_v60 = vpack.c.bf16 %v18403_v8, %v18410_v62  ;;  %v14738_v29 = vunpack.i.h.bf16 %v18387_v17  ;;  %v18470_v54 = vpop.permute.xlu0 %14770  ;;  %v21404_v21 = vld [vmem:[#allocation26_spill] sm:$0xff] }
 0x1d6   :  { %v6197_v7 = vrot.slane %v5905_v49, %v18044_v43  ;;  %v6676_v33 = vsel %vm6662_vm13, %v6189_v5, %v6185_v46  ;;  %v14737_v11 = vunpack.i.l.bf16 %v18387_v17  ;;  %v14733_v55 = vunpack.i.h.bf16 %v18396_v42  ;;  %15065 = vrot.lane.b32.xlu1 %v17947_v3, %s16052_s16 }
 0x1d7   :  { %v6677_v12 = vsel %vm21287_vm14, %v6193_v13, %v6676_v33  ;;  %v2406_v8 = vsel %vm2369_vm4, %v21404_v21, %v14727_v50  ;;  %v3483_v62 = vcombine.high %v3099_v59, %v3099_v59  ;;  %v3490_v14 = vrot.slane %v3099_v59, %v17699_v56  ;;  %13883 = vmatprep.mubr.msk.bf16.mxu0 %vm2944_vm12, %v2901_v60 }
 0x1d8   :  { %v5541_v38 = vmax.f32 %v3533_v41, %v12896_v0  ;;  %v6678_v39 = vsel %vm21286_vm15, %v6197_v7, %v6677_v12  ;;  %v2470_v17 = vsel %vm2432_vm5, %v2407_v28, %v14738_v29  ;;  %v14732_v2 = vunpack.i.l.bf16 %v18396_v42  ;;  %15060 = vrot.lane.b32.xlu0 %v17906_v18, %s16052_s16  ;;  %v18488_v31 = vpop.permute.xlu1 %14785 }
 0x1d9   :  { %v3497_v37 = vrot.slane %v3483_v62, %v17699_v56  ;;  %v3498_v48 = vcombine.high %v3490_v14, %v3490_v14  ;;  %v12885_v53 = vrot.slane %v3490_v14, 9  ;;  %v2902_v50 = vpack.c.bf16 %v2856_v40, %v2855_v61  ;;  %v18491_v10 = vpop.permute.xlu0 %14780 }
 0x1da   :  { %v2469_v41 = vsel %vm2432_vm5, %v2406_v8, %v14737_v11  ;;  %v2468_v0 = vsel %vm2432_vm5, %v18393_v23, %v14733_v55  ;;  %v14748_v28 = vunpack.i.h.bf16 %v18418_v47  ;;  %v14747_v42 = vunpack.i.l.bf16 %v18418_v47  ;;  %15075 = vrot.lane.b32.xlu1 %v18057_v32, %s16048_s28 }
 0x1db   :  { %v3499_v18 = vcombine.high %v3497_v37, %v3497_v37  ;;  %v12886_v57 = vrot.slane %v3498_v48, 9  ;;  %v12887_v1 = vrot.slane %v3497_v37, 9  ;;  %v5530_v46 = vmax.f32 %v3490_v14, %v12885_v53  ;;  %13884 = vmatmul.mubr.msk.bf16.gmra.mrb[32].mxu0 %vm2944_vm12, %v2902_v50 }
 0x1dc   :  { %v2467_v51 = vsel %vm2432_vm5, %v18400_v35, %v14732_v2  ;;  %v2534_v49 = vsel %vm21283_vm6, %v2469_v41, %v14747_v42  ;;  %v14743_v23 = vunpack.i.h.bf16 %v18422_v4  ;;  %v14742_v5 = vunpack.i.l.bf16 %v18422_v4  ;;  %15070 = vrot.lane.b32.xlu0 %v17911_v34, %s16048_s28  ;;  %v18508_v47 = vpop.permute.xlu1 %14795 }
 0x1dd   :  { %v12888_v13 = vrot.slane %v3499_v18, 9  ;;  %v5531_v40 = vmax.f32 %v3498_v48, %v12886_v57  ;;  %v5532_v61 = vmax.f32 %v3497_v37, %v12887_v1  ;;  %v5778_v59 = vmax.f32 %v5530_v46, %v18445_v44  ;;  %v18511_v60 = vpop.permute.xlu0 %14790 }
 0x1de   :  { %v2535_v35 = vsel %vm21283_vm6, %v2470_v17, %v14748_v28  ;;  %v14758_v29 = vunpack.i.h.bf16 %v18430_v27  ;;  %v14757_v7 = vunpack.i.l.bf16 %v18430_v27  ;;  %v14753_v4 = vunpack.i.h.bf16 %v18432_v52  ;;  %v18517_v33 = vpop.f32.mrb[8].mxu0  ;;  %15085 = vrot.lane.b32.xlu1 %v18065_v25, %s16053_s12 }
 0x1df   :  { %v5533_v34 = vmax.f32 %v3499_v18, %v12888_v13  ;;  %v5779_v11 = vmax.f32 %v5531_v40, %v18450_v15  ;;  %v5780_v44 = vmax.f32 %v5532_v61, %v18452_v6  ;;  %v5906_v55 = vmax.f32 %v5778_v59, 0.0  ;;  %v3111_v12 = vpop.f32.mrb[9].mxu0 }
 0x1e0   :  { %v2532_v21 = vsel %vm21283_vm6, %v2467_v51, %v14742_v5  ;;  %v2533_v8 = vsel %vm21283_vm6, %v2468_v0, %v14743_v23  ;;  %v2599_v27 = vsel %vm2560_vm7, %v2534_v49, %v14757_v7  ;;  %v14752_v62 = vunpack.i.l.bf16 %v18432_v52  ;;  %15080 = vrot.lane.b32.xlu0 %v17913_v20, %s16053_s12  ;;  %v13862_v14 = vpop.f32.mrb[10].mxu0  ;;  %v18529_v17 = vpop.permute.xlu1 %14805 }
 0x1e1   :  { %v5781_v2 = vmax.f32 %v5533_v34, %v5541_v38  ;;  %v18531_v15 = vmax.f32 %v5779_v11, 0.0  ;;  %v18533_v6 = vmax.f32 %v5780_v44, 0.0  ;;  %v6201_v37 = vrot.slane %v5906_v55, %v18044_v43  ;;  %v18536_v48 = vpop.permute.xlu0 %14800  ;;  %v18538_v53 = vpop.f32.mrb[11].mxu0 }
 0x1e2   :  { %v2600_v50 = vsel %vm2560_vm7, %v2535_v35, %v14758_v29  ;;  %v14768_v52 = vunpack.i.h.bf16 %v18438_v9  ;;  %v14767_v20 = vunpack.i.l.bf16 %v18438_v9  ;;  %v14763_v41 = vunpack.i.h.bf16 %v18443_v45  ;;  %15095 = vrot.lane.b32.xlu1 %v18069_v24, %s16054_s19 }
 0x1e3   :  { %v18546_v38 = vmax.f32 %v5781_v2, 0.0  ;;  %v18549_v0 = vsel %vm21284_vm3, %v6201_v37, %v6678_v39  ;;  %v2597_v28 = vsel %vm2560_vm7, %v2532_v21, %v14752_v62  ;;  %v2598_v42 = vsel %vm2560_vm7, %v2533_v8, %v14753_v4 }
 0x1e4   :  { %v6205_v18 = vrot.slane %v18531_v15, %v18044_v43  ;;  %v6209_v9 = vrot.slane %v18533_v6, %v18044_v43  ;;  %v2664_v57 = vsel %vm2625_vm8, %v2599_v27, %v14767_v20  ;;  %v14762_v1 = vunpack.i.l.bf16 %v18443_v45  ;;  %15090 = vrot.lane.b32.xlu0 %v17947_v3, %s16054_s19  ;;  %v18561_v46 = vpop.permute.xlu1 %14815  ;;  %v21406_v20 = vld [vmem:[#allocation28_spill] sm:$0xff] }
 0x1e5   :  { %v2665_v39 = vsel %vm2625_vm8, %v2600_v50, %v14768_v52  ;;  %v14778_v51 = vunpack.i.h.bf16 %v18461_v19  ;;  %v14777_v49 = vunpack.i.l.bf16 %v18461_v19  ;;  %v14773_v23 = vunpack.i.h.bf16 %v18470_v54  ;;  %v18567_v5 = vpop.permute.xlu0 %14810 }
 0x1e6   :  { %v2663_v13 = vsel %vm2625_vm8, %v2598_v42, %v14763_v41  ;;  %v14772_v40 = vunpack.i.l.bf16 %v18470_v54  ;;  %v14788_v45 = vunpack.i.h.bf16 %v18488_v31  ;;  %v14787_v3 = vunpack.i.l.bf16 %v18488_v31  ;;  %15105 = vrot.lane.b32.xlu1 %v18079_v16, %s16055_s25 }
 0x1e7   :  { %v2662_v19 = vsel %vm2625_vm8, %v2597_v28, %v14762_v1  ;;  %v2729_v59 = vsel %vm2690_vm9, %v2664_v57, %v14777_v49  ;;  %v14783_v35 = vunpack.i.h.bf16 %v18491_v10  ;;  %v2730_v29 = vsel %vm2690_vm9, %v2665_v39, %v14778_v51 }
 0x1e8   :  { %v2727_v54 = vsel %vm2690_vm9, %v2662_v19, %v14772_v40  ;;  %v2728_v7 = vsel %vm2690_vm9, %v2663_v13, %v14773_v23  ;;  %v14782_v31 = vunpack.i.l.bf16 %v18491_v10  ;;  %15100 = vrot.lane.b32.xlu0 %v18057_v32, %s16055_s25  ;;  %v18586_v4 = vpop.permute.xlu1 %14825  ;;  %v18589_v34 = vsel %vm2755_vm10, %v2729_v59, %v14787_v3 }
 0x1e9   :  { %v14798_v11 = vunpack.i.h.bf16 %v18508_v47  ;;  %v14797_v44 = vunpack.i.l.bf16 %v18508_v47  ;;  %v14793_v55 = vunpack.i.h.bf16 %v18511_v60  ;;  %v18594_v21 = vpop.permute.xlu0 %14820  ;;  %v18597_v8 = vsel %vm2755_vm10, %v2730_v29, %v14788_v45  ;;  %v21405_v47 = vld [vmem:[#allocation27_spill] sm:$0xff] }
 0x1ea   :  { %v2793_v10 = vsel %vm2755_vm10, %v2728_v7, %v14783_v35  ;;  %v3120_v27 = vadd.f32 %v18517_v33, %v18149_v26  ;;  %v3112_v62 = vadd.f32 %v18149_v26, %v3111_v12  ;;  %15115 = vrot.lane.b32.xlu1 %v18057_v32, %s16051_s15  ;;  %v2792_v2 = vsel %vm2755_vm10, %v2727_v54, %v14782_v31 }
 0x1eb   :  { %v18608_v37 = vsel %vm2369_vm4, %v21405_v47, %v14798_v11  ;;  %v14792_v50 = vunpack.i.l.bf16 %v18511_v60  ;;  %v3123_v52 = vadd.f32 %v13862_v14, %v18149_v26  ;;  %v18614_v41 = vsel %vm2369_vm4, %v21406_v20, %v14797_v44 }
 0x1ec   :  { %v3568_v33 = vcombine.high %v3120_v27, %v3120_v27  ;;  %v3575_v12 = vrot.slane %v3120_v27, %v17699_v56  ;;  %v3534_v28 = vcombine.high %v3112_v62, %v3112_v62  ;;  %15110 = vrot.lane.b32.xlu0 %v18065_v25, %s16045_s20  ;;  %v18619_v32 = vpop.permute.xlu1 %14835  ;;  %v18622_v42 = vsel %vm2820_vm11, %v2793_v10, %v14793_v55 }
 0x1ed   :  { %v3541_v60 = vrot.slane %v3112_v62, %v17699_v56  ;;  %v3585_v57 = vcombine.high %v3123_v52, %v3123_v52  ;;  %v3592_v14 = vrot.slane %v3123_v52, %v17699_v56  ;;  %v18626_v1 = vpop.permute.xlu0 %14830  ;;  %v2857_v61 = vsel %vm2820_vm11, %v2792_v2, %v14792_v50 }
 0x1ee   :  { %v3582_v39 = vrot.slane %v3568_v33, %v17699_v56  ;;  %v3583_v51 = vcombine.high %v3575_v12, %v3575_v12  ;;  %v12905_v49 = vrot.slane %v3575_v12, 9  ;;  %v3548_v23 = vrot.slane %v3534_v28, %v17699_v56  ;;  %15125 = vrot.lane.b32.xlu1 %v18079_v16, %s16051_s15 }
 0x1ef   :  { %v3549_v13 = vcombine.high %v3541_v60, %v3541_v60  ;;  %v12897_v40 = vrot.slane %v3541_v60, 9  ;;  %v18633_v45 = vrot.slane %v3585_v57, %v17699_v56  ;;  %v3600_v3 = vcombine.high %v3592_v14, %v3592_v14 }
 0x1f0   :  { %v3584_v19 = vcombine.high %v3582_v39, %v3582_v39  ;;  %v12906_v59 = vrot.slane %v3583_v51, 9  ;;  %v12907_v35 = vrot.slane %v3582_v39, 9  ;;  %v5550_v29 = vmax.f32 %v3575_v12, %v12905_v49  ;;  %15120 = vrot.lane.b32.xlu0 %v18095_v22, %s16045_s20  ;;  %v18641_v47 = vpop.permute.xlu1 %14845 }
 0x1f1   :  { %v3550_v54 = vcombine.high %v3548_v23, %v3548_v23  ;;  %v12898_v7 = vrot.slane %v3549_v13, 9  ;;  %v12899_v31 = vrot.slane %v3548_v23, 9  ;;  %v5542_v11 = vmax.f32 %v3541_v60, %v12897_v40  ;;  %v18637_v44 = vpop.permute.xlu0 %14840 }
 0x1f2   :  { %v12908_v55 = vrot.slane %v3584_v19, 9  ;;  %v5551_v10 = vmax.f32 %v3583_v51, %v12906_v59  ;;  %v5552_v27 = vmax.f32 %v3582_v39, %v12907_v35  ;;  %v3601_v62 = vcombine.high %v18633_v45, %v18633_v45  ;;  %15135 = vrot.lane.b32.xlu1 %v18095_v22, %s16050_s14 }
 0x1f3   :  { %v12900_v52 = vrot.slane %v3550_v54, 9  ;;  %v5543_v20 = vmax.f32 %v3549_v13, %v12898_v7  ;;  %v5544_v33 = vmax.f32 %v3548_v23, %v12899_v31  ;;  %v5782_v12 = vmax.f32 %v5542_v11, %v5550_v29 }
 0x1f4   :  { %v5553_v28 = vmax.f32 %v3584_v19, %v12908_v55  ;;  %v12909_v57 = vrot.slane %v3592_v14, 9  ;;  %v12910_v60 = vrot.slane %v3600_v3, 9  ;;  %v14808_v49 = vunpack.i.h.bf16 %v18529_v17  ;;  %15130 = vrot.lane.b32.xlu0 %v18065_v25, %s16050_s14  ;;  %v18663_v55 = vpop.permute.xlu1 %14855 }
 0x1f5   :  { %v5545_v39 = vmax.f32 %v3550_v54, %v12900_v52  ;;  %v5783_v51 = vmax.f32 %v5543_v20, %v5551_v10  ;;  %v5784_v40 = vmax.f32 %v5544_v33, %v5552_v27  ;;  %v5910_v59 = vmax.f32 %v5782_v12, 0.0  ;;  %v18648_v35 = vpop.permute.xlu0 %14850 }
 0x1f6   :  { %v12911_v13 = vrot.slane %v18633_v45, 9  ;;  %v12912_v23 = vrot.slane %v3601_v62, 9  ;;  %v18652_v29 = vmax.f32 %v3592_v14, %v12909_v57  ;;  %15145 = vrot.lane.b32.xlu1 %v18124_v36, %s16052_s16  ;;  %v18656_v25 = vmax.f32 %v3600_v3, %v12910_v60 }
 0x1f7   :  { %v5785_v19 = vmax.f32 %v5545_v39, %v5553_v28  ;;  %v5911_v7 = vmax.f32 %v5783_v51, 0.0  ;;  %v5912_v31 = vmax.f32 %v5784_v40, 0.0  ;;  %v6217_v54 = vrot.slane %v5910_v59, %v18044_v43 }
 0x1f8   :  { %v2411_v11 = vsel %vm2369_vm4, %v17264_v30, %v14808_v49  ;;  %v14807_v2 = vunpack.i.l.bf16 %v18529_v17  ;;  %v14803_v50 = vunpack.i.h.bf16 %v18536_v48  ;;  %15140 = vrot.lane.b32.xlu0 %v18069_v24, %s16052_s16  ;;  %v14802_v27 = vunpack.i.l.bf16 %v18536_v48  ;;  %v21407_v24 = vld [vmem:[#allocation38_spill] sm:$0xff]  ;;  %v18697_v59 = vpop.permute.xlu1 %14865 }
 0x1f9   :  { %v5913_v14 = vmax.f32 %v5785_v19, 0.0  ;;  %v6221_v10 = vrot.slane %v5911_v7, %v18044_v43  ;;  %v6225_v3 = vrot.slane %v5912_v31, %v18044_v43  ;;  %v3115_v17 = vadd.f32 %v18149_v26, %v18538_v53  ;;  %v18677_v33 = vpop.permute.xlu0 %14860 }
 0x1fa   :  { %v2410_v52 = vsel %vm2369_vm4, %v17267_v58, %v14807_v2  ;;  %v2860_v30 = vsel %vm2820_vm11, %v18597_v8, %v14803_v50  ;;  %v2903_v20 = vpack.c.bf16 %v18622_v42, %v2857_v61  ;;  %15155 = vrot.lane.b32.xlu1 %v21407_v24, %s16048_s28  ;;  %v2859_v58 = vsel %vm2820_vm11, %v18589_v34, %v14802_v27 }
 0x1fb   :  { %v6229_v12 = vrot.slane %v5913_v14, %v18044_v43  ;;  %v6683_v48 = vsel %vm6662_vm13, %v6221_v10, %v6217_v54  ;;  %v14818_v28 = vunpack.i.h.bf16 %v18561_v46  ;;  %v3551_v57 = vcombine.high %v3115_v17, %v3115_v17 }
 0x1fc   :  { %v6684_v8 = vsel %vm21287_vm14, %v6225_v3, %v6683_v48  ;;  %v3558_v26 = vrot.slane %v3115_v17, %v17699_v56  ;;  %13887 = vmatprep.mubr.msk.bf16.mxu0 %vm2944_vm12, %v2903_v20  ;;  %v14817_v53 = vunpack.i.l.bf16 %v18561_v46  ;;  %15150 = vrot.lane.b32.xlu0 %v18079_v16, %s16048_s28  ;;  %v5556_v61 = vmax.f32 %v18633_v45, %v12911_v13  ;;  %v21408_v46 = vld [vmem:[#allocation39_spill] sm:$0xff] }
 0x1fd   :  { %v6685_v42 = vsel %vm21286_vm15, %v6229_v12, %v6684_v8  ;;  %v14813_v34 = vunpack.i.h.bf16 %v18567_v5  ;;  %v14812_v60 = vunpack.i.l.bf16 %v18567_v5  ;;  %v5557_v49 = vmax.f32 %v3601_v62, %v12912_v23  ;;  %v18708_v2 = vpop.permute.xlu0 %14870  ;;  %v14876_v8 = vpop.permute.xlu1 %14875 }
 0x1fe   :  { %v3565_v39 = vrot.slane %v3551_v57, %v17699_v56  ;;  %v3566_v51 = vcombine.high %v3558_v26, %v3558_v26  ;;  %v12901_v40 = vrot.slane %v3558_v26, 9  ;;  %v18699_v19 = vpop.f32.mrb[12].mxu0  ;;  %15165 = vrot.lane.b32.xlu1 %v21408_v46, %s16053_s12  ;;  %v2473_v16 = vsel %vm2432_vm5, %v2410_v52, %v14817_v53 }
 0x1ff   :  { %v2474_v45 = vsel %vm2432_vm5, %v2411_v11, %v14818_v28  ;;  %v2904_v13 = vpack.c.bf16 %v2860_v30, %v2859_v58  ;;  %v14828_v7 = vunpack.i.h.bf16 %v18586_v4  ;;  %v18706_v5 = vpop.f32.mrb[13].mxu0  ;;  %v2472_v14 = vsel %vm2432_vm5, %v18608_v37, %v14813_v34 }
 0x200   :  { %v3567_v62 = vcombine.high %v3565_v39, %v3565_v39  ;;  %v12902_v23 = vrot.slane %v3566_v51, 9  ;;  %v12903_v31 = vrot.slane %v3565_v39, 9  ;;  %v5546_v54 = vmax.f32 %v3558_v26, %v12901_v40  ;;  %15160 = vrot.lane.b32.xlu0 %v18095_v22, %s16053_s12  ;;  %v18712_v50 = vpop.f32.mrb[14].mxu0 }
 0x201   :  { %v2471_v11 = vsel %vm2432_vm5, %v18614_v41, %v14812_v60  ;;  %13888 = vmatmul.mubr.msk.bf16.gmra.mrb[36].mxu0 %vm2944_vm12, %v2904_v13  ;;  %v14827_v10 = vunpack.i.l.bf16 %v18586_v4  ;;  %v14822_v3 = vunpack.i.l.bf16 %v18594_v21  ;;  %v18721_v27 = vpop.f32.mrb[15].mxu0  ;;  %v2539_v37 = vsel %vm21283_vm6, %v2474_v45, %v14828_v7 }
 0x202   :  { %v12904_v52 = vrot.slane %v3567_v62, 9  ;;  %v5547_v30 = vmax.f32 %v3566_v51, %v12902_v23  ;;  %v5548_v17 = vmax.f32 %v3565_v39, %v12903_v31  ;;  %v5786_v22 = vmax.f32 %v5546_v54, %v18652_v29  ;;  %v18734_v51 = vpop.permute.xlu0 %14880 }
 0x203   :  { %v2538_v20 = vsel %vm21283_vm6, %v2473_v16, %v14827_v10  ;;  %v14823_v12 = vunpack.i.h.bf16 %v18594_v21  ;;  %v14838_v41 = vunpack.i.h.bf16 %v18619_v32  ;;  %v2536_v57 = vsel %vm21283_vm6, %v2471_v11, %v14822_v3  ;;  %v18751_v11 = vpop.permute.xlu1 %14885 }
 0x204   :  { %v5549_v48 = vmax.f32 %v3567_v62, %v12904_v52  ;;  %v5787_v4 = vmax.f32 %v5547_v30, %v18656_v25  ;;  %v5788_v58 = vmax.f32 %v5548_v17, %v5556_v61  ;;  %v5914_v28 = vmax.f32 %v5786_v22, 0.0  ;;  %15170 = vrot.lane.b32.xlu0 %v18124_v36, %s16054_s19 }
 0x205   :  { %v14837_v26 = vunpack.i.l.bf16 %v18619_v32  ;;  %v14833_v29 = vunpack.i.h.bf16 %v18626_v1  ;;  %v14832_v53 = vunpack.i.l.bf16 %v18626_v1  ;;  %v2537_v25 = vsel %vm21283_vm6, %v2472_v14, %v14823_v12 }
 0x206   :  { %v5789_v34 = vmax.f32 %v5549_v48, %v5557_v49  ;;  %v5915_v60 = vmax.f32 %v5787_v4, 0.0  ;;  %v5916_v39 = vmax.f32 %v5788_v58, 0.0  ;;  %v6233_v21 = vrot.slane %v5914_v28, %v18044_v43  ;;  %v18761_v22 = vpop.permute.xlu0 %14890 }
 0x207   :  { %v2603_v61 = vsel %vm2560_vm7, %v2538_v20, %v14837_v26  ;;  %v2604_v40 = vsel %vm2560_vm7, %v2539_v37, %v14838_v41  ;;  %v14848_v16 = vunpack.i.h.bf16 %v18641_v47  ;;  %v2601_v1 = vsel %vm2560_vm7, %v2536_v57, %v14832_v53  ;;  %v21409_v53 = vld [vmem:[#allocation29_spill] sm:$0xff] }
 0x208   :  { %v5917_v32 = vmax.f32 %v5789_v34, 0.0  ;;  %v6686_v45 = vsel %vm21284_vm3, %v6233_v21, %v6685_v42  ;;  %v2602_v49 = vsel %vm2560_vm7, %v2537_v25, %v14833_v29  ;;  %v6237_v13 = vrot.slane %v5915_v60, %v18044_v43  ;;  %v21410_v21 = vld [vmem:[#allocation30_spill] sm:$0xff]  ;;  %15180 = vrot.lane.b32.xlu0 %v21407_v24, %s16055_s25 }
 0x209   :  { %v14847_v7 = vunpack.i.l.bf16 %v18641_v47  ;;  %v14843_v62 = vunpack.i.h.bf16 %v18637_v44  ;;  %v14842_v23 = vunpack.i.l.bf16 %v18637_v44  ;;  %vm21288_vm6 = vcmask 1046534  }
 0x20a   :  { %v6241_v31 = vrot.slane %v5916_v39, %v18044_v43  ;;  %v14858_v54 = vunpack.i.h.bf16 %v18663_v55  ;;  %v14857_v42 = vunpack.i.l.bf16 %v18663_v55  ;;  %v14853_v14 = vunpack.i.h.bf16 %v18648_v35  ;;  %v18790_v39 = vpop.permute.xlu1 %14895 }
 0x20b   :  { %vm21285_vm3 = vcmask 1047559   ;;  %v6245_v10 = vrot.slane %v5917_v32, %v18044_v43  ;;  %v2668_v47 = vsel %vm2625_vm8, %v2603_v61, %v14847_v7  ;;  %v2669_v3 = vsel %vm2625_vm8, %v2604_v40, %v14848_v16 }
 0x20c   :  { %v14852_v44 = vunpack.i.l.bf16 %v18648_v35  ;;  %v2666_v52 = vsel %vm2625_vm8, %v2601_v1, %v14842_v23  ;;  %v2667_v30 = vsel %vm2625_vm8, %v2602_v49, %v14843_v62  ;;  %v2733_v17 = vsel %vm2690_vm9, %v2668_v47, %v14857_v42  ;;  %v18810_v49 = vpop.permute.xlu0 %14900  ;;  %15190 = vrot.lane.b32.xlu0 %v21408_v46, %s16045_s20 }
 0x20d   :  { %v14868_v55 = vunpack.i.h.bf16 %v18697_v59  ;;  %v2734_v20 = vsel %vm2690_vm9, %v2669_v3, %v14858_v54  ;;  %v14867_v37 = vunpack.i.l.bf16 %v18697_v59  ;;  %v14863_v12 = vunpack.i.h.bf16 %v18677_v33 }
 0x20e   :  { %v14862_v41 = vunpack.i.l.bf16 %v18677_v33  ;;  %v2731_v35 = vsel %vm2690_vm9, %v2666_v52, %v14852_v44  ;;  %v2732_v48 = vsel %vm2690_vm9, %v2667_v30, %v14853_v14  ;;  %v14878_v4 = vunpack.i.h.bf16 %v14876_v8  ;;  %v18820_v44 = vpop.permute.xlu1 %14905 }
 0x20f   :  { %v14877_v58 = vunpack.i.l.bf16 %v14876_v8  ;;  %v18770_v28 = vsel %vm2755_vm10, %v2733_v17, %v14867_v37  ;;  %v18773_v57 = vsel %vm2755_vm10, %v2734_v20, %v14868_v55  ;;  %v14873_v59 = vunpack.i.h.bf16 %v18708_v2  ;;  %v18786_v8 = vld [vmem:[%s21205_s2] ss:$0 sm:$0xff] }
 0x210   :  { %v2796_v26 = vsel %vm2755_vm10, %v2731_v35, %v14862_v41  ;;  %v2797_v29 = vsel %vm2755_vm10, %v2732_v48, %v14863_v12  ;;  %v18780_v33 = vsel %vm2369_vm4, %v21409_v53, %v14878_v4  ;;  %v14872_v34 = vunpack.i.l.bf16 %v18708_v2  ;;  %v18825_v12 = vpop.permute.xlu0 %14910 }
 0x211   :  { %v3136_v60 = vadd.f32 %v18786_v8, %v18699_v19  ;;  %v18794_v25 = vsel %vm2369_vm4, %v21410_v21, %v14877_v58  ;;  %v3128_v61 = vadd.f32 %v18786_v8, %v18706_v5  ;;  %v6680_v2 = vsel %vm6670_vm2, %v6205_v18, %v18549_v0 }
 0x212   :  { %v6687_v40 = vsel %vm6670_vm2, %v6237_v13, %v6686_v45  ;;  %v6681_v32 = vsel %vm21288_vm6, %v6209_v9, %v6680_v2  ;;  %v21411_v15 = vrot.slane %v18546_v38, %v18044_v43 }
 0x213   :  { %v3636_v16 = vcombine.high %v3136_v60, %v3136_v60  ;;  %v3643_v19 = vrot.slane %v3136_v60, %v17699_v56  ;;  %v6688_v1 = vsel %vm21288_vm6, %v6241_v31, %v6687_v40  ;;  %v3602_v5 = vcombine.high %v3128_v61, %v3128_v61 }
 0x214   :  { %v3609_v7 = vrot.slane %v3128_v61, %v17699_v56  ;;  %v6682_v0 = vsel %vm21285_vm3, %v21411_v15, %v6681_v32  ;;  %v6689_v18 = vsel %vm21285_vm3, %v6245_v10, %v6688_v1  ;;  %v18840_v32 = vsel %vm2820_vm11, %v2797_v29, %v14873_v59  ;;  %v18854_v29 = vpop.permute.xlu0 %14920 }
 0x215   :  { %v3650_v45 = vrot.slane %v3636_v16, %v17699_v56  ;;  %v3651_v13 = vcombine.high %v3643_v19, %v3643_v19  ;;  %v12921_v6 = vrot.slane %v3643_v19, 9  ;;  %v6782_v62 = vrot.slane %v6682_v0, 7 }
 0x216   :  { %v3616_v9 = vrot.slane %v3602_v5, %v17699_v56  ;;  %v3617_v23 = vcombine.high %v3609_v7, %v3609_v7  ;;  %v12913_v31 = vrot.slane %v3609_v7, 9  ;;  %v6783_v54 = vrot.slane %v6689_v18, 7 }
 0x217   :  { %v3652_v42 = vcombine.high %v3650_v45, %v3650_v45  ;;  %v12922_v14 = vrot.slane %v3651_v13, 9  ;;  %v12923_v47 = vrot.slane %v3650_v45, 9  ;;  %v5566_v3 = vmax.f32 %v3643_v19, %v12921_v6 }
 0x218   :  { %v3618_v38 = vcombine.high %v3616_v9, %v3616_v9  ;;  %v12914_v52 = vrot.slane %v3617_v23, 9  ;;  %v12915_v30 = vrot.slane %v3616_v9, 9  ;;  %v5558_v10 = vmax.f32 %v3609_v7, %v12913_v31  ;;  %v18844_v7 = vpop.permute.xlu1 %14915 }
 0x219   :  { %v12924_v17 = vrot.slane %v3652_v42, 9  ;;  %v5567_v55 = vmax.f32 %v3651_v13, %v12922_v14  ;;  %v5568_v20 = vmax.f32 %v3650_v45, %v12923_v47  ;;  %v18823_v37 = vsel %vm204_vm0, 0.0, %v6782_v62 }
 0x21a   :  { %v12916_v41 = vrot.slane %v3618_v38, 9  ;;  %v5559_v35 = vmax.f32 %v3617_v23, %v12914_v52  ;;  %v5560_v48 = vmax.f32 %v3616_v9, %v12915_v30  ;;  %v5790_v4 = vmax.f32 %v5558_v10, %v5566_v3 }
 0x21b   :  { %v5569_v58 = vmax.f32 %v3652_v42, %v12924_v17  ;;  %v18828_v53 = vsel %vm204_vm0, 0.0, %v6783_v54  ;;  %v18831_v60 = vsel %vm204_vm0, %v6782_v62, 0.0  ;;  %v18834_v21 = vsel %vm204_vm0, %v6783_v54, 0.0 }
 0x21c   :  { %v5561_v61 = vmax.f32 %v3618_v38, %v12916_v41  ;;  %v5791_v2 = vmax.f32 %v5559_v35, %v5567_v55  ;;  %v5792_v40 = vmax.f32 %v5560_v48, %v5568_v20  ;;  %v5918_v16 = vmax.f32 %v5790_v4, 0.0  ;;  %v21412_v4 = vld [vmem:[#allocation31_spill] sm:$0xff] }
 0x21d   :  { %v18837_v19 = vsel %vm2820_vm11, %v2796_v26, %v14872_v34  ;;  %v6920_v1 = vrot.slane %v18823_v37, 2  ;;  %v6921_v5 = vrot.slane %v18831_v60, 2  ;;  %v6923_v26 = vrot.slane %v18828_v53, 2 }
 0x21e   :  { %v5793_v15 = vmax.f32 %v5561_v61, %v5569_v58  ;;  %v5919_v0 = vmax.f32 %v5791_v2, 0.0  ;;  %v5920_v18 = vmax.f32 %v5792_v40, 0.0  ;;  %v6249_v45 = vrot.slane %v5918_v16, %v18044_v43  ;;  %v18856_v6 = vpop.f32.mrb[16].mxu0  ;;  %v21413_v61 = vld [vmem:[#allocation32_spill] sm:$0xff] }
 0x21f   :  { %v18848_v13 = vsel %vm683_vm1, %v6920_v1, %v6921_v5  ;;  %v6924_v34 = vrot.slane %v18834_v21, 2  ;;  %v3139_v59 = vadd.f32 %v18786_v8, %v18712_v50  ;;  %v14888_v31 = vunpack.i.h.bf16 %v18751_v11  ;;  %v18861_v54 = vpop.f32.mrb[17].mxu0 }
 0x220   :  { %v5921_v62 = vmax.f32 %v5793_v15, 0.0  ;;  %v6253_v9 = vrot.slane %v5919_v0, %v18044_v43  ;;  %v6257_v23 = vrot.slane %v5920_v18, %v18044_v43  ;;  %v14887_v50 = vunpack.i.l.bf16 %v18751_v11  ;;  %v18868_v3 = vpop.f32.mrb[18].mxu0  ;;  %v18879_v11 = vpop.permute.xlu1 %14925  ;;  %v135_v0 = vld [vmem:[%s21203_s0 + $0x1e0] sm:$0xff] }
 0x221   :  { %v18864_v42 = vsel %vm683_vm1, %v6923_v26, %v6924_v34  ;;  %v3653_v14 = vcombine.high %v3139_v59, %v3139_v59  ;;  %v3660_v47 = vrot.slane %v3139_v59, %v17699_v56  ;;  %v18875_v17 = vpop.f32.mrb[19].mxu0  ;;  %v2415_v58 = vsel %vm2369_vm4, %v21412_v4, %v14888_v31  ;;  %v18893_v18 = vpop.permute.xlu0 %14930 }
 0x222   :  { %v6261_v38 = vrot.slane %v5921_v62, %v18044_v43  ;;  %v6690_v52 = vsel %vm6662_vm13, %v6253_v9, %v6249_v45  ;;  %v7430_v10 = vpack.c.bf16 %v18864_v42, %v18848_v13  ;;  %v2414_v2 = vsel %vm2369_vm4, %v21413_v61, %v14887_v50 }
 0x223   :  { %v6691_v55 = vsel %vm21287_vm14, %v6257_v23, %v6690_v52  ;;  %v3667_v20 = vrot.slane %v3653_v14, %v17699_v56  ;;  %v3668_v41 = vcombine.high %v3660_v47, %v3660_v47  ;;  %v12925_v35 = vrot.slane %v3660_v47, 9 }
 0x224   :  { %13131 = vmatprep.mubr.msk.bf16.mxu1 %vm2560_vm7, %v7430_v10  ;;  %v3131_v40 = vadd.f32 %v18786_v8, %v18721_v27  ;;  %v14883_v15 = vunpack.i.h.bf16 %v18734_v51  ;;  %v14882_v26 = vunpack.i.l.bf16 %v18734_v51  ;;  %v136_v27 = vld [vmem:[%s21203_s0 + $0x1e8] sm:$0xff]  ;;  %v6692_v31 = vsel %vm21286_vm15, %v6261_v38, %v6691_v55  ;;  %v18904_v4 = vpop.permute.xlu1 %14935 }
 0x225   :  { %v3669_v16 = vcombine.high %v3667_v20, %v3667_v20  ;;  %v12926_v1 = vrot.slane %v3668_v41, 9  ;;  %v12927_v5 = vrot.slane %v3667_v20, 9  ;;  %v5570_v45 = vmax.f32 %v3660_v47, %v12925_v35 }
 0x226   :  { %v3619_v34 = vcombine.high %v3131_v40, %v3131_v40  ;;  %v3626_v59 = vrot.slane %v3131_v40, %v17699_v56  ;;  %v297_v10 = vrot.slane %v135_v0, 7  ;;  %v298_v35 = vrot.slane %v136_v27, 7 }
 0x227   :  { %v12928_v62 = vrot.slane %v3669_v16, 9  ;;  %v5571_v9 = vmax.f32 %v3668_v41, %v12926_v1  ;;  %v5572_v23 = vmax.f32 %v3667_v20, %v12927_v5  ;;  %v2905_v51 = vpack.c.bf16 %v18840_v32, %v18837_v19  ;;  %v18917_v32 = vpop.permute.xlu0 %14940 }
 0x228   :  { %v3633_v14 = vrot.slane %v3619_v34, %v17699_v56  ;;  %v3634_v50 = vcombine.high %v3626_v59, %v3626_v59  ;;  %v12917_v52 = vrot.slane %v3626_v59, 9  ;;  %v18907_v20 = vsel %vm204_vm0, %v297_v10, %v298_v35 }
 0x229   :  { %v5573_v47 = vmax.f32 %v3669_v16, %v12928_v62  ;;  %21414 = vst [vmem:[#allocation25_spill] sm:$0xff] %v18907_v20  ;;  %v18910_v38 = vsel %vm204_vm0, 0.0, %v297_v10  ;;  %13891 = vmatprep.mubr.msk.bf16.mxu0 %vm2944_vm12, %v2905_v51  ;;  %v14898_v55 = vunpack.i.h.bf16 %v18790_v39  ;;  %v14897_v19 = vunpack.i.l.bf16 %v18790_v39 }
 0x22a   :  { %v3635_v61 = vcombine.high %v3633_v14, %v3633_v14  ;;  %v12918_v40 = vrot.slane %v3634_v50, 9  ;;  %v12919_v48 = vrot.slane %v3633_v14, 9  ;;  %v5562_v30 = vmax.f32 %v3626_v59, %v12917_v52  ;;  %21415 = vst [vmem:[#allocation26_spill] sm:$0xff] %v18910_v38 }
 0x22b   :  { %v2864_v0 = vsel %vm2820_vm11, %v18773_v57, %v14883_v15  ;;  %v2863_v34 = vsel %vm2820_vm11, %v18770_v28, %v14882_v26  ;;  %v18925_v36 = vpack.i.bf16 %v18907_v20, %v18910_v38  ;;  %v2477_v59 = vsel %vm2432_vm5, %v2414_v2, %v14897_v19  ;;  %v18934_v15 = vpop.permute.xlu1 %14945  ;;  %v18939_v10 = vpop.permute.xlu0 %14950 }
 0x22c   :  { %v12920_v41 = vrot.slane %v3635_v61, 9  ;;  %v5563_v16 = vmax.f32 %v3634_v50, %v12918_v40  ;;  %v5564_v1 = vmax.f32 %v3633_v14, %v12919_v48  ;;  %v5794_v5 = vmax.f32 %v5562_v30, %v5570_v45 }
 0x22d   :  { %15175 = vrot.lane.b32.xlu1 %v18925_v36, %s16054_s19  ;;  %v2478_v30 = vsel %vm2432_vm5, %v2415_v58, %v14898_v55  ;;  %v14893_v57 = vunpack.i.h.bf16 %v18761_v22  ;;  %v463_v48 = vsel %vm204_vm0, %v298_v35, 0.0  ;;  %v678_v28 = vrot.slane %v18910_v38, 1 }
 0x22e   :  { %v5565_v27 = vmax.f32 %v3635_v61, %v12920_v41  ;;  %v5795_v39 = vmax.f32 %v5563_v16, %v5571_v9  ;;  %v5796_v62 = vmax.f32 %v5564_v1, %v5572_v23  ;;  %v5922_v52 = vmax.f32 %v5794_v5, 0.0 }
 0x22f   :  { %v14892_v23 = vunpack.i.l.bf16 %v18761_v22  ;;  %v679_v14 = vrot.slane %v18907_v20, 1  ;;  %v681_v50 = vrot.slane %v463_v48, 1  ;;  %vm21416_vm3 = vcmask 1044484  }
 0x230   :  { %v5797_v45 = vmax.f32 %v5565_v27, %v5573_v47  ;;  %v5923_v26 = vmax.f32 %v5795_v39, 0.0  ;;  %v5924_v2 = vmax.f32 %v5796_v62, 0.0  ;;  %v6265_v9 = vrot.slane %v5922_v52, %v18044_v43  ;;  %v18965_v27 = vpop.permute.xlu1 %14955 }
 0x231   :  { %vm21417_vm15 = vcmask 1046528   ;;  %v2906_v22 = vpack.c.bf16 %v2864_v0, %v2863_v34  ;;  %v14908_v55 = vunpack.i.h.bf16 %v18820_v44  ;;  %v2476_v41 = vsel %vm2432_vm5, %v18780_v33, %v14893_v57  ;;  %v18976_v57 = vpop.permute.xlu0 %14960 }
 0x232   :  { %v18941_v58 = vmax.f32 %v5797_v45, 0.0  ;;  %v6269_v35 = vrot.slane %v5923_v26, %v18044_v43  ;;  %v6273_v51 = vrot.slane %v5924_v2, %v18044_v43  ;;  %v6693_v61 = vsel %vm21416_vm3, %v6265_v9, %v6692_v31  ;;  %vm21418_vm14 = vmmov %vm21417_vm15 }
 0x233   :  { %v680_v47 = vsel %vm21417_vm15, %v678_v28, %v679_v14  ;;  %v682_v40 = vsel %vm21418_vm14, %v679_v14, %v681_v50  ;;  %v14907_v1 = vunpack.i.l.bf16 %v18820_v44  ;;  %v2475_v5 = vsel %vm2432_vm5, %v18794_v25, %v14892_v23  ;;  %13892 = vmatmul.mubr.msk.bf16.gmra.mrb[40].mxu0 %vm2944_vm12, %v2906_v22 }
 0x234   :  { %v6694_v19 = vsel %vm6670_vm2, %v6269_v35, %v6693_v61  ;;  %v18954_v16 = vpack.i.bf16 %v682_v40, %v680_v47  ;;  %v14903_v0 = vunpack.i.h.bf16 %v18810_v49  ;;  %v14902_v34 = vunpack.i.l.bf16 %v18810_v49  ;;  %v19002_v61 = vpop.permute.xlu1 %14965 }
 0x235   :  { %v18958_v31 = vsel %vm21288_vm6, %v6273_v51, %v6694_v19  ;;  %v14918_v44 = vunpack.i.h.bf16 %v18844_v7  ;;  %vm21419_vm14 = vcmask 97280   ;;  %v14917_v62 = vunpack.i.l.bf16 %v18844_v7 }
 0x236   :  { %15185 = vrot.lane.b32.xlu1 %v18954_v16, %s16055_s25  ;;  %v2542_v39 = vsel %vm21419_vm14, %v2477_v59, %v14907_v1  ;;  %vm21420_vm15 = vmmov %vm21419_vm14  ;;  %v14913_v52 = vunpack.i.h.bf16 %v18825_v12  ;;  %v14912_v45 = vunpack.i.l.bf16 %v18825_v12  ;;  %v834_v26 = vrot.slane %v18910_v38, 2 }
 0x237   :  { %v2543_v25 = vsel %vm21420_vm15, %v2478_v30, %v14908_v55  ;;  %vm21421_vm3 = vmmov %vm21419_vm14  ;;  %v835_v30 = vrot.slane %v18907_v20, 2  ;;  %v837_v7 = vrot.slane %v463_v48, 2  ;;  %v2607_v2 = vsel %vm2560_vm7, %v2542_v39, %v14917_v62  ;;  %v138_v48 = vld [vmem:[%s21203_s0 + $0x1f8] sm:$0xff] }
 0x238   :  { %v2540_v49 = vsel %vm21421_vm3, %v2475_v5, %v14902_v34  ;;  %vm21422_vm6 = vmmov %vm21421_vm3  ;;  %v2608_v59 = vsel %vm2560_vm7, %v2543_v25, %v14918_v44  ;;  %v14928_v9 = vunpack.i.h.bf16 %v18879_v11  ;;  %v14927_v23 = vunpack.i.l.bf16 %v18879_v11 }
 0x239   :  { %v2541_v28 = vsel %vm21422_vm6, %v2476_v41, %v14903_v0  ;;  %v14923_v14 = vunpack.i.h.bf16 %v18854_v29  ;;  %v836_v50 = vsel %vm683_vm1, %v834_v26, %v835_v30  ;;  %v838_v35 = vsel %vm683_vm1, %v835_v30, %v837_v7  ;;  %v19012_v41 = vpop.permute.xlu0 %14970  ;;  %v19035_v30 = vpop.permute.xlu1 %14975 }
 0x23a   :  { %15195 = vrot.lane.b32.xlu1 %v21407_v24, %s16051_s15  ;;  %v2606_v12 = vsel %vm2560_vm7, %v2541_v28, %v14913_v52  ;;  %v14922_v51 = vunpack.i.l.bf16 %v18854_v29  ;;  %v137_v24 = vld [vmem:[%s21203_s0 + $0x1f0] sm:$0xff]  ;;  %v2605_v11 = vsel %vm2560_vm7, %v2540_v49, %v14912_v45  ;;  %v19005_v47 = vpack.i.bf16 %v838_v35, %v836_v50  ;;  %s16057_s0 = smov 48  }
 0x23b   :  { %v2672_v40 = vsel %vm2625_vm8, %v2607_v2, %v14927_v23  ;;  %v2673_v22 = vsel %vm2625_vm8, %v2608_v59, %v14928_v9  ;;  %v2671_v29 = vsel %vm2625_vm8, %v2606_v12, %v14923_v14  ;;  %v14938_v55 = vunpack.i.h.bf16 %v18904_v4 }
 0x23c   :  { %v14937_v19 = vunpack.i.l.bf16 %v18904_v4  ;;  %15200 = vrot.lane.b32.xlu0 %v19005_v47, %s16045_s20  ;;  %v14932_v1 = vunpack.i.l.bf16 %v18893_v18  ;;  %v300_v5 = vrot.slane %v137_v24, 7  ;;  %v301_v0 = vrot.slane %v138_v48, 7 }
 0x23d   :  { %v2670_v34 = vsel %vm2625_vm8, %v2605_v11, %v14922_v51  ;;  %v14933_v39 = vunpack.i.h.bf16 %v18893_v18  ;;  %v14948_v4 = vunpack.i.h.bf16 %v18934_v15  ;;  %v2738_v62 = vsel %vm2690_vm9, %v2673_v22, %v14938_v55  ;;  %v19054_v24 = vpop.permute.xlu0 %14980 }
 0x23e   :  { %15205 = vrot.lane.b32.xlu1 %v18954_v16, %s16051_s15  ;;  %v2737_v44 = vsel %vm2690_vm9, %v2672_v40, %v14937_v19  ;;  %v19023_v25 = vpop.f32.mrb[20].mxu0  ;;  %v302_v52 = vsel %vm204_vm0, %v300_v5, %v301_v0  ;;  %v431_v49 = vsel %vm204_vm0, 0.0, %v300_v5  ;;  %v2735_v45 = vsel %vm2690_vm9, %v2670_v34, %v14932_v1  ;;  %s16059_s15 = smov 80  }
 0x23f   :  { %v19028_v28 = vpop.f32.mrb[21].mxu0  ;;  %v19031_v26 = vpack.i.bf16 %v302_v52, %v431_v49  ;;  %v14947_v59 = vunpack.i.l.bf16 %v18934_v15  ;;  %v14943_v18 = vunpack.i.h.bf16 %v18917_v32  ;;  %v14942_v2 = vunpack.i.l.bf16 %v18917_v32 }
 0x240   :  { %21423 = vst [vmem:[#allocation27_spill] sm:$0xff] %v19028_v28  ;;  %v19037_v7 = vpop.f32.mrb[22].mxu0  ;;  %15210 = vrot.lane.b32.xlu0 %v21408_v46, %s16050_s14  ;;  %v464_v9 = vsel %vm204_vm0, %v301_v0, 0.0  ;;  %v848_v23 = vrot.slane %v431_v49, 1  ;;  %v849_v14 = vrot.slane %v302_v52, 1  ;;  %v2736_v15 = vsel %vm2690_vm9, %v2671_v29, %v14933_v39  ;;  %v21428_v0 = vld [vmem:[#allocation33_spill] sm:$0xff]  ;;  %v19078_v39 = vpop.permute.xlu1 %14985 }
 0x241   :  { %21424 = vst [vmem:[#allocation28_spill] sm:$0xff] %v19037_v7  ;;  %v19045_v12 = vpop.f32.mrb[23].mxu0  ;;  %v19049_v50 = vsel %vm2755_vm10, %v2737_v44, %v14947_v59  ;;  %v19052_v35 = vsel %vm2755_vm10, %v2738_v62, %v14948_v4  ;;  %v851_v51 = vrot.slane %v464_v9, 1  ;;  %v2801_v46 = vsel %vm2755_vm10, %v2736_v15, %v14943_v18  ;;  %v21429_v44 = vld [vmem:[#allocation34_spill] sm:$0xff] }
 0x242   :  { %15215 = vrot.lane.b32.xlu1 %v19005_v47, %s16050_s14  ;;  %21425 = vst [vmem:[#allocation38_spill] sm:$0xff] %v19045_v12  ;;  %vm21426_vm6 = vcmask 1046528   ;;  %v861_v48 = vrot.slane %v464_v9, 2  ;;  %v14958_v11 = vunpack.i.h.bf16 %v18965_v27  ;;  %v14957_v22 = vunpack.i.l.bf16 %v18965_v27  ;;  %s16058_s14 = smov 64  }
 0x243   :  { %v850_v32 = vsel %vm21426_vm6, %v848_v23, %v849_v14  ;;  %vm21427_vm14 = vmmov %vm21426_vm6  ;;  %v14953_v29 = vunpack.i.h.bf16 %v18939_v10  ;;  %v14952_v55 = vunpack.i.l.bf16 %v18939_v10  ;;  %v2800_v19 = vsel %vm2755_vm10, %v2735_v45, %v14942_v2  ;;  %v19091_v2 = vpop.permute.xlu0 %14990 }
 0x244   :  { %v852_v40 = vsel %vm21427_vm14, %v849_v14, %v851_v51  ;;  %15220 = vrot.lane.b32.xlu0 %v18925_v36, %s16052_s16  ;;  %v858_v5 = vrot.slane %v431_v49, 2  ;;  %v19070_v34 = vsel %vm2369_vm4, %v21428_v0, %v14958_v11  ;;  %v19074_v27 = vsel %vm2369_vm4, %v21429_v44, %v14957_v22 }
 0x245   :  { %v15234_v1 = vpack.i.bf16 %v852_v40, %v850_v32  ;;  %v3152_v10 = vadd.f32 %v18786_v8, %v18856_v6  ;;  %v19081_v4 = vsel %vm2820_vm11, %v2800_v19, %v14952_v55  ;;  %v859_v36 = vrot.slane %v302_v52, 2 }
 0x246   :  { %15225 = vrot.lane.b32.xlu1 %v19031_v26, %s16052_s16  ;;  %v3144_v62 = vadd.f32 %v18786_v8, %v18861_v54  ;;  %v3155_v49 = vadd.f32 %v18786_v8, %v18868_v3  ;;  %v19088_v45 = vsel %vm2820_vm11, %v2801_v46, %v14953_v29  ;;  %v14968_v3 = vunpack.i.h.bf16 %v19002_v61  ;;  %v19105_v29 = vpop.permute.xlu1 %14995  ;;  %s16060_s16 = smov 96  }
 0x247   :  { %v3704_v59 = vcombine.high %v3152_v10, %v3152_v10  ;;  %v3711_v18 = vrot.slane %v3152_v10, %v17699_v56  ;;  %v860_v6 = vsel %vm683_vm1, %v858_v5, %v859_v36  ;;  %v862_v54 = vsel %vm683_vm1, %v859_v36, %v861_v48 }
 0x248   :  { %15230 = vrot.lane.b32.xlu0 %v18954_v16, %s16048_s28  ;;  %v3670_v52 = vcombine.high %v3144_v62, %v3144_v62  ;;  %v19100_v15 = vpack.i.bf16 %v862_v54, %v860_v6  ;;  %v3677_v51 = vrot.slane %v3144_v62, %v17699_v56  ;;  %v3721_v32 = vcombine.high %v3155_v49, %v3155_v49 }
 0x249   :  { %v3718_v9 = vrot.slane %v3704_v59, %v17699_v56  ;;  %v3719_v23 = vcombine.high %v3711_v18, %v3711_v18  ;;  %v12937_v14 = vrot.slane %v3711_v18, 9  ;;  %v3728_v16 = vrot.slane %v3155_v49, %v17699_v56  ;;  %v19112_v49 = vpop.permute.xlu0 %15000 }
 0x24a   :  { %15235 = vrot.lane.b32.xlu1 %v15234_v1, %s16048_s28  ;;  %v3684_v46 = vrot.slane %v3670_v52, %v17699_v56  ;;  %v3685_v55 = vcombine.high %v3677_v51, %v3677_v51  ;;  %v12929_v5 = vrot.slane %v3677_v51, 9  ;;  %v3735_v62 = vrot.slane %v3721_v32, %v17699_v56 }
 0x24b   :  { %v3720_v11 = vcombine.high %v3718_v9, %v3718_v9  ;;  %v12938_v40 = vrot.slane %v3719_v23, 9  ;;  %v12939_v22 = vrot.slane %v3718_v9, 9  ;;  %v5582_v48 = vmax.f32 %v3711_v18, %v12937_v14 }
 0x24c   :  { %15240 = vrot.lane.b32.xlu0 %v19005_v47, %s16053_s12  ;;  %v3686_v19 = vcombine.high %v3684_v46, %v3684_v46  ;;  %v12931_v0 = vrot.slane %v3684_v46, 9  ;;  %v12930_v59 = vrot.slane %v3685_v55, 9  ;;  %v5574_v6 = vmax.f32 %v3677_v51, %v12929_v5 }
 0x24d   :  { %v12940_v44 = vrot.slane %v3720_v11, 9  ;;  %v5583_v10 = vmax.f32 %v3719_v23, %v12938_v40  ;;  %v5584_v36 = vmax.f32 %v3718_v9, %v12939_v22  ;;  %v3736_v14 = vcombine.high %v3728_v16, %v3728_v16  ;;  %v19116_v22 = vpop.permute.xlu1 %15005 }
 0x24e   :  { %15245 = vrot.lane.b32.xlu1 %v19100_v15, %s16053_s12  ;;  %v12932_v18 = vrot.slane %v3686_v19, 9  ;;  %v5576_v54 = vmax.f32 %v3684_v46, %v12931_v0  ;;  %v3737_v33 = vcombine.high %v3735_v62, %v3735_v62  ;;  %v12941_v38 = vrot.slane %v3728_v16, 9  ;;  %s16061_s12 = smov 112  }
 0x24f   :  { %v5585_v52 = vmax.f32 %v3720_v11, %v12940_v44  ;;  %v5575_v47 = vmax.f32 %v3685_v55, %v12930_v59  ;;  %v5798_v12 = vmax.f32 %v5574_v6, %v5582_v48  ;;  %v12942_v23 = vrot.slane %v3736_v14, 9 }
 0x250   :  { %v5577_v20 = vmax.f32 %v3686_v19, %v12932_v18  ;;  %v5800_v7 = vmax.f32 %v5576_v54, %v5584_v36  ;;  %v12943_v9 = vrot.slane %v3735_v62, 9  ;;  %v12944_v40 = vrot.slane %v3737_v33, 9  ;;  %v19123_v19 = vpop.permute.xlu0 %15010  ;;  %15250 = vrot.lane.b32.xlu0 %v19031_v26, %s16054_s19 }
 0x251   :  { %v14967_v32 = vunpack.i.l.bf16 %v19002_v61  ;;  %v5799_v28 = vmax.f32 %v5575_v47, %v5583_v10  ;;  %v5926_v46 = vmax.f32 %v5798_v12, 0.0  ;;  %v5586_v5 = vmax.f32 %v3728_v16, %v12941_v38  ;;  %v21430_v61 = vld [vmem:[#allocation12_spill] sm:$0xff] }
 0x252   :  { %15255 = vrot.lane.b32.xlu1 %v15234_v1, %s16055_s25  ;;  %v5801_v51 = vmax.f32 %v5577_v20, %v5585_v52  ;;  %v5928_v11 = vmax.f32 %v5800_v7, 0.0  ;;  %v19118_v0 = vmax.f32 %v3736_v14, %v12942_v23  ;;  %v19120_v55 = vmax.f32 %v3735_v62, %v12943_v9 }
 0x253   :  { %v14963_v48 = vunpack.i.h.bf16 %v18976_v57  ;;  %v5927_v1 = vmax.f32 %v5799_v28, 0.0  ;;  %v19125_v36 = vmax.f32 %v3737_v33, %v12944_v40  ;;  %v2419_v59 = vsel %vm2369_vm4, %v21430_v61, %v14968_v3  ;;  %v21431_v28 = vld [vmem:[#allocation11_spill] sm:$0xff] }
 0x254   :  { %v5929_v44 = vmax.f32 %v5801_v51, 0.0  ;;  %v6281_v20 = vrot.slane %v5926_v46, %v18044_v43  ;;  %v6289_v7 = vrot.slane %v5928_v11, %v18044_v43  ;;  %v14962_v38 = vunpack.i.l.bf16 %v18976_v57  ;;  %v19143_v57 = vpop.permute.xlu1 %15015  ;;  %v19155_v23 = vpop.permute.xlu0 %15020  ;;  %15260 = vrot.lane.b32.xlu0 %v19100_v15, %s16045_s20 }
 0x255   :  { %v3147_v12 = vadd.f32 %v18786_v8, %v18875_v17  ;;  %v6285_v16 = vrot.slane %v5927_v1, %v18044_v43  ;;  %v2907_v33 = vpack.c.bf16 %v19088_v45, %v19081_v4  ;;  %v2418_v62 = vsel %vm2369_vm4, %v21431_v28, %v14967_v32  ;;  %v21434_v1 = vld [vmem:[#allocation21_spill] sm:$0xff] }
 0x256   :  { %v6293_v10 = vrot.slane %v5929_v44, %v18044_v43  ;;  %v2868_v3 = vsel %vm2820_vm11, %v19052_v35, %v14963_v48  ;;  %v2867_v54 = vsel %vm2820_vm11, %v19049_v50, %v14962_v38  ;;  %v14978_v4 = vunpack.i.h.bf16 %v19035_v30 }
 0x257   :  { %v3687_v18 = vcombine.high %v3147_v12, %v3147_v12  ;;  %v3694_v6 = vrot.slane %v3147_v12, %v17699_v56  ;;  %v6697_v17 = vsel %vm6662_vm13, %v6285_v16, %v6281_v20  ;;  %13895 = vmatprep.mubr.msk.bf16.mxu0 %vm2944_vm12, %v2907_v33  ;;  %v14977_v45 = vunpack.i.l.bf16 %v19035_v30 }
 0x258   :  { %vm21432_vm15 = vcmask 1042434   ;;  %vm21433_vm3 = vcmask 1043459   ;;  %v14973_v26 = vunpack.i.h.bf16 %v19012_v41  ;;  %v14972_v40 = vunpack.i.l.bf16 %v19012_v41  ;;  %v19167_v16 = vpop.permute.xlu1 %15025  ;;  %v19186_v15 = vpop.permute.xlu0 %15030 }
 0x259   :  { %v6698_v35 = vsel %vm21432_vm15, %v6289_v7, %v6697_v17  ;;  %v3701_v52 = vrot.slane %v3687_v18, %v17699_v56  ;;  %v3702_v14 = vcombine.high %v3694_v6, %v3694_v6  ;;  %v12933_v47 = vrot.slane %v3694_v6, 9 }
 0x25a   :  { %v6699_v9 = vsel %vm21433_vm3, %v6293_v10, %v6698_v35  ;;  %v2481_v50 = vsel %vm2432_vm5, %v2418_v62, %v14977_v45  ;;  %v2482_v11 = vsel %vm2432_vm5, %v2419_v59, %v14978_v4  ;;  %v2908_v48 = vpack.c.bf16 %v2868_v3, %v2867_v54  ;;  %v21436_v59 = vld [vmem:[#allocation41_spill] sm:$0xff]  ;;  %v21439_v4 = vld [vmem:[#allocation20_spill] sm:$0xff] }
 0x25b   :  { %v3703_v32 = vcombine.high %v3701_v52, %v3701_v52  ;;  %v12934_v51 = vrot.slane %v3702_v14, 9  ;;  %v12935_v46 = vrot.slane %v3701_v52, 9  ;;  %v5578_v30 = vmax.f32 %v3694_v6, %v12933_v47  ;;  %v21444_v47 = vld [vmem:[#allocation9_spill] sm:$0xff] }
 0x25c   :  { %v21435_v44 = vrot.slane %v21434_v1, %v18044_v43  ;;  %v2480_v10 = vsel %vm2432_vm5, %v19070_v34, %v14973_v26  ;;  %13896 = vmatmul.mubr.msk.bf16.gmra.mrb[44].mxu0 %vm2944_vm12, %v2908_v48  ;;  %v21437_v33 = vrot.slane %v21436_v59, %v18044_v43  ;;  %vm21438_vm6 = vcmask 1046534  }
 0x25d   :  { %v12936_v20 = vrot.slane %v3703_v32, 9  ;;  %v5579_v7 = vmax.f32 %v3702_v14, %v12934_v51  ;;  %v5580_v38 = vmax.f32 %v3701_v52, %v12935_v46  ;;  %v5802_v12 = vmax.f32 %v5578_v30, %v5586_v5  ;;  %v21442_v52 = vld [vmem:[#allocation10_spill] sm:$0xff] }
 0x25e   :  { %v6671_v61 = vsel %vm6670_vm2, %v21435_v44, %v18338_v63  ;;  %v19169_v41 = vpop.f32.mrb[24].mxu0  ;;  %v6877_v28 = vrot.slane %v18823_v37, 1  ;;  %v14988_v5 = vunpack.i.h.bf16 %v19078_v39  ;;  %v2479_v54 = vsel %vm2432_vm5, %v19074_v27, %v14972_v40 }
 0x25f   :  { %v6673_v63 = vsel %vm21438_vm6, %v21437_v33, %v6671_v61  ;;  %v19182_v62 = vpop.f32.mrb[25].mxu0  ;;  %v5581_v3 = vmax.f32 %v3703_v32, %v12936_v20  ;;  %v5803_v18 = vmax.f32 %v5579_v7, %v19118_v0  ;;  %v5804_v34 = vmax.f32 %v5580_v38, %v19120_v55  ;;  %v19217_v38 = vpop.permute.xlu1 %15035 }
 0x260   :  { %v5930_v6 = vmax.f32 %v5802_v12, 0.0  ;;  %v19188_v17 = vpop.f32.mrb[26].mxu0  ;;  %v21440_v45 = vrot.slane %v21439_v4, %v18044_v43  ;;  %vm21441_vm14 = vcmask 1047559   ;;  %v21443_v14 = vrot.slane %v21442_v52, 1 }
 0x261   :  { %v21445_v26 = vrot.slane %v21444_v47, 1  ;;  %vm21446_vm15 = vcmask 1046528   ;;  %v14987_v55 = vunpack.i.l.bf16 %v19078_v39  ;;  %v19204_v32 = vpop.f32.mrb[27].mxu0  ;;  %v5805_v51 = vmax.f32 %v5581_v3, %v19125_v36 }
 0x262   :  { %v6675_v35 = vsel %vm21441_vm14, %v21440_v45, %v6673_v63  ;;  %v5931_v46 = vmax.f32 %v5803_v18, 0.0  ;;  %v5932_v27 = vmax.f32 %v5804_v34, 0.0  ;;  %v6297_v40 = vrot.slane %v5930_v6, %v18044_v43  ;;  %vm21448_vm3 = vmmov %vm21446_vm15 }
 0x263   :  { %v19201_v0 = vsel %vm21446_vm15, %v21445_v26, %v21443_v14  ;;  %v6781_v30 = vrot.slane %v6675_v35, 7  ;;  %v21447_v48 = vrot.slane %v18831_v60, 1  ;;  %vm21449_vm6 = vcmask 97280  }
 0x264   :  { %v2547_v44 = vsel %vm21449_vm6, %v2482_v11, %v14988_v5  ;;  %v14982_v61 = vunpack.i.l.bf16 %v19054_v24  ;;  %v6301_v20 = vrot.slane %v5931_v46, %v18044_v43  ;;  %vm21450_vm14 = vcmask 1044484   ;;  %vm21451_vm15 = vmmov %vm21449_vm6 }
 0x265   :  { %v6879_v1 = vsel %vm21448_vm3, %v6877_v28, %v21447_v48  ;;  %v6700_v39 = vsel %vm21450_vm14, %v6297_v40, %v6699_v9  ;;  %v2546_v7 = vsel %vm21451_vm15, %v2481_v50, %v14987_v55  ;;  %v14983_v36 = vunpack.i.h.bf16 %v19054_v24  ;;  %vm21452_vm3 = vmmov %vm21449_vm6  ;;  %v19229_v28 = vpop.permute.xlu0 %15040  ;;  %v19255_v40 = vpop.permute.xlu1 %15045 }
 0x266   :  { %v19219_v12 = vmax.f32 %v5805_v51, 0.0  ;;  %v6305_v60 = vrot.slane %v5932_v27, %v18044_v43  ;;  %v19223_v59 = vsel %vm204_vm0, 0.0, %v6781_v30  ;;  %v6829_v11 = vsel %vm204_vm0, %v6781_v30, 0.0  ;;  %vm21458_vm15 = vmmov %vm21452_vm3 }
 0x267   :  { %v6701_v33 = vsel %vm6670_vm2, %v6301_v20, %v6700_v39  ;;  %v6874_v63 = vrot.slane %v19223_v59, 1  ;;  %v6875_v9 = vrot.slane %v6829_v11, 1  ;;  %v2544_v50 = vsel %vm21452_vm3, %v2479_v54, %v14982_v61 }
 0x268   :  { %vm21453_vm6 = vcmask 1046534   ;;  %v21454_v5 = vrot.slane %v21442_v52, 2  ;;  %v21455_v3 = vrot.slane %v21444_v47, 2  ;;  %v6917_v34 = vrot.slane %v19223_v59, 2 }
 0x269   :  { %v19232_v24 = vsel %vm21453_vm6, %v6305_v60, %v6701_v33  ;;  %v6918_v6 = vrot.slane %v6829_v11, 2  ;;  %vm21457_vm14 = vcmask 1046528   ;;  %v2545_v45 = vsel %vm21458_vm15, %v2480_v10, %v14983_v36  ;;  %v19267_v11 = vpop.permute.xlu0 %15050 }
 0x26a   :  { %v19239_v18 = vsel %vm683_vm1, %v21455_v3, %v21454_v5  ;;  %v6876_v4 = vsel %vm21457_vm14, %v6874_v63, %v6875_v9  ;;  %v14998_v54 = vunpack.i.h.bf16 %v19105_v29  ;;  %v14997_v35 = vunpack.i.l.bf16 %v19105_v29  ;;  %vm21460_vm3 = vmmov %vm21457_vm14 }
 0x26b   :  { %21456 = vst [vmem:[#allocation39_spill] sm:$0xff] %v19239_v18  ;;  %v15279_v14 = vpack.i.bf16 %v6879_v1, %v6876_v4  ;;  %v15264_v26 = vpack.i.bf16 %v6876_v4, %v19201_v0  ;;  %v6919_v52 = vsel %vm683_vm1, %v6917_v34, %v6918_v6  ;;  %v14993_v55 = vunpack.i.h.bf16 %v19091_v2  ;;  %vm21464_vm14 = vmmov %vm21460_vm3 }
 0x26c   :  { %v6309_v51 = vrot.slane %v19219_v12, %v18044_v43  ;;  %v15284_v46 = vpack.i.bf16 %v18848_v13, %v6919_v52  ;;  %v15269_v27 = vpack.i.bf16 %v6919_v52, %v19239_v18  ;;  %v15274_v10 = vpack.i.bf16 %v18823_v37, %v19223_v59 }
 0x26d   :  { %15265 = vrot.lane.b32.xlu1 %v15264_v26, %s16048_s28  ;;  %v2611_v29 = vsel %vm2560_vm7, %v2546_v7, %v14997_v35  ;;  %v14992_v30 = vunpack.i.l.bf16 %v19091_v2  ;;  %v15008_v48 = vunpack.i.h.bf16 %v19116_v22  ;;  %v15007_v61 = vunpack.i.l.bf16 %v19116_v22 }
 0x26e   :  { %15270 = vrot.lane.b32.xlu0 %v15269_v27, %s16045_s20  ;;  %v2612_v20 = vsel %vm2560_vm7, %v2547_v44, %v14998_v54  ;;  %v15003_v39 = vunpack.i.h.bf16 %v19112_v49  ;;  %v15002_v36 = vunpack.i.l.bf16 %v19112_v49  ;;  %v6880_v60 = vrot.slane %v18828_v53, 1 }
 0x26f   :  { %v2609_v7 = vsel %vm2560_vm7, %v2544_v50, %v14992_v30  ;;  %v2610_v2 = vsel %vm2560_vm7, %v2545_v45, %v14993_v55  ;;  %v15289_v33 = vpack.i.bf16 %v18828_v53, %v18823_v37  ;;  %v15018_v22 = vunpack.i.h.bf16 %v19143_v57  ;;  %v19291_v45 = vpop.permute.xlu1 %15055 }
 0x270   :  { %v2676_v63 = vsel %vm2625_vm8, %v2611_v29, %v15007_v61  ;;  %v2677_v44 = vsel %vm2625_vm8, %v2612_v20, %v15008_v48  ;;  %v21459_v9 = vrot.slane %v18834_v21, 1  ;;  %v15017_v5 = vunpack.i.l.bf16 %v19143_v57 }
 0x271   :  { %15275 = vrot.lane.b32.xlu1 %v15274_v10, %s16057_s0  ;;  %v2674_v50 = vsel %vm2625_vm8, %v2609_v7, %v15002_v36  ;;  %v15013_v34 = vunpack.i.h.bf16 %v19123_v19  ;;  %v15012_v6 = vunpack.i.l.bf16 %v19123_v19  ;;  %v2675_v21 = vsel %vm2625_vm8, %v2610_v2, %v15003_v39  ;;  %v19306_v10 = vpop.permute.xlu0 %15060 }
 0x272   :  { %v19279_v49 = vsel %vm21460_vm3, %v6880_v60, %v21459_v9  ;;  %15280 = vrot.lane.b32.xlu0 %v15279_v14, %s16058_s14  ;;  %v2742_v4 = vsel %vm2690_vm9, %v2677_v44, %v15018_v22  ;;  %v15028_v57 = vunpack.i.h.bf16 %v19167_v16  ;;  %v2741_v54 = vsel %vm2690_vm9, %v2676_v63, %v15017_v5 }
 0x273   :  { %v15294_v3 = vpack.i.bf16 %v19279_v49, %v6879_v1  ;;  %v15304_v1 = vpack.i.bf16 %v18864_v42, %v18848_v13  ;;  %v15027_v35 = vunpack.i.l.bf16 %v19167_v16  ;;  %v15023_v19 = vunpack.i.h.bf16 %v19155_v23  ;;  %v19333_v2 = vpop.permute.xlu1 %15065 }
 0x274   :  { %v2739_v26 = vsel %vm2690_vm9, %v2674_v50, %v15012_v6  ;;  %v15022_v14 = vunpack.i.l.bf16 %v19155_v23  ;;  %v21461_v52 = vrot.slane %v18941_v58, %v18044_v43  ;;  %vm21462_vm6 = vcmask 1047559  }
 0x275   :  { %v15038_v27 = vunpack.i.h.bf16 %v19217_v38  ;;  %15285 = vrot.lane.b32.xlu1 %v15284_v46, %s16059_s15  ;;  %v2740_v13 = vsel %vm2690_vm9, %v2675_v21, %v15013_v34  ;;  %v2807_v16 = vsel %vm2755_vm10, %v2742_v4, %v15028_v57  ;;  %v15037_v23 = vunpack.i.l.bf16 %v19217_v38  ;;  %vm21465_vm15 = vmmov %vm21462_vm6  ;;  %v19353_v34 = vpop.permute.xlu0 %15070 }
 0x276   :  { %v6696_v55 = vsel %vm21462_vm6, %v21461_v52, %v18958_v31  ;;  %15290 = vrot.lane.b32.xlu0 %v15289_v33, %s16060_s16  ;;  %v2806_v58 = vsel %vm2755_vm10, %v2741_v54, %v15027_v35  ;;  %v2804_v31 = vsel %vm2755_vm10, %v2739_v26, %v15022_v14  ;;  %v19316_v30 = vsel %vm2755_vm10, %v2740_v13, %v15023_v19 }
 0x277   :  { %v6784_v29 = vrot.slane %v6696_v55, 7  ;;  %v19319_v48 = vsel %vm2820_vm11, %v2807_v16, %v15038_v27  ;;  %v15033_v38 = vunpack.i.h.bf16 %v19186_v15  ;;  %v3168_v20 = vadd.f32 %v18786_v8, %v19023_v25  ;;  %v21463_v25 = vld [vmem:[#allocation27_spill] sm:$0xff]  ;;  %v19368_v55 = vpop.permute.xlu1 %15075 }
 0x278   :  { %v19330_v60 = vsel %vm2820_vm11, %v2806_v58, %v15037_v23  ;;  %v15032_v7 = vunpack.i.l.bf16 %v19186_v15  ;;  %v3160_v44 = vadd.f32 %v18786_v8, %v21463_v25  ;;  %v19351_v50 = vsel %vm21465_vm15, %v6309_v51, %v19232_v24 }
 0x279   :  { %v19322_v46 = vsel %vm204_vm0, 0.0, %v6784_v29  ;;  %v6832_v61 = vsel %vm204_vm0, %v6784_v29, 0.0  ;;  %15295 = vrot.lane.b32.xlu1 %v15294_v3, %s16061_s12  ;;  %v3772_v22 = vcombine.high %v3168_v20, %v3168_v20  ;;  %v3779_v63 = vrot.slane %v3168_v20, %v17699_v56  ;;  %v19375_v20 = vpop.permute.xlu0 %15080 }
 0x27a   :  { %v6883_v39 = vrot.slane %v19322_v46, 1  ;;  %v6884_v36 = vrot.slane %v6832_v61, 1  ;;  %v15309_v33 = vpack.i.bf16 %v19322_v46, %v18828_v53  ;;  %15300 = vrot.lane.b32.xlu0 %v15294_v3, %s16048_s28  ;;  %v6926_v15 = vrot.slane %v19322_v46, 2 }
 0x27b   :  { %v6927_v5 = vrot.slane %v6832_v61, 2  ;;  %v3786_v3 = vrot.slane %v3772_v22, %v17699_v56  ;;  %v3787_v6 = vcombine.high %v3779_v63, %v3779_v63  ;;  %v12953_v21 = vrot.slane %v3779_v63, 9 }
 0x27c   :  { %v19343_v9 = vsel %vm21464_vm14, %v6883_v39, %v6884_v36  ;;  %v3738_v4 = vcombine.high %v3160_v44, %v3160_v44  ;;  %v3745_v57 = vrot.slane %v3160_v44, %v17699_v56  ;;  %v6785_v12 = vrot.slane %v19351_v50, 7  ;;  %v19382_v36 = vld [vmem:[%s21205_s2] ss:$0 sm:$0xff] }
 0x27d   :  { %v15314_v8 = vpack.i.bf16 %v19343_v9, %v19279_v49  ;;  %v19360_v54 = vsel %vm683_vm1, %v6926_v15, %v6927_v5  ;;  %15305 = vrot.lane.b32.xlu1 %v15304_v1, %s16045_s20  ;;  %v3788_v24 = vcombine.high %v3786_v3, %v3786_v3  ;;  %v12954_v51 = vrot.slane %v3787_v6, 9 }
 0x27e   :  { %v12955_v35 = vrot.slane %v3786_v3, 9  ;;  %v5598_v19 = vmax.f32 %v3779_v63, %v12953_v21  ;;  %15310 = vrot.lane.b32.xlu0 %v15309_v33, %s16057_s0  ;;  %v3752_v49 = vrot.slane %v3738_v4, %v17699_v56  ;;  %v3753_v26 = vcombine.high %v3745_v57, %v3745_v57  ;;  %v21466_v33 = vld [vmem:[#allocation28_spill] sm:$0xff] }
 0x27f   :  { %v12945_v14 = vrot.slane %v3745_v57, 9  ;;  %v15319_v52 = vpack.i.bf16 %v19360_v54, %v18864_v42  ;;  %v12956_v27 = vrot.slane %v3788_v24, 9  ;;  %v5599_v13 = vmax.f32 %v3787_v6, %v12954_v51 }
 0x280   :  { %v5600_v16 = vmax.f32 %v3786_v3, %v12955_v35  ;;  %v19373_v1 = vsel %vm204_vm0, 0.0, %v6785_v12  ;;  %v3754_v29 = vcombine.high %v3752_v49, %v3752_v49  ;;  %v12946_v23 = vrot.slane %v3753_v26, 9 }
 0x281   :  { %v12947_v58 = vrot.slane %v3752_v49, 9  ;;  %v5590_v61 = vmax.f32 %v3745_v57, %v12945_v14  ;;  %15315 = vrot.lane.b32.xlu1 %v15314_v8, %s16058_s14  ;;  %v2869_v42 = vsel %vm2820_vm11, %v2804_v31, %v15032_v7  ;;  %v5601_v39 = vmax.f32 %v3788_v24, %v12956_v27  ;;  %v19393_v24 = vpop.permute.xlu1 %15085  ;;  %v21467_v14 = vld [vmem:[#allocation16_spill] sm:$0xff]  ;;  %v19400_v27 = vpop.permute.xlu0 %15090 }
 0x282   :  { %v3171_v22 = vadd.f32 %v19382_v36, %v21466_v33  ;;  %v15048_v63 = vunpack.i.h.bf16 %v19255_v40  ;;  %v12948_v25 = vrot.slane %v3754_v29, 9  ;;  %v5591_v44 = vmax.f32 %v3753_v26, %v12946_v23  ;;  %15320 = vrot.lane.b32.xlu0 %v15319_v52, %s16059_s15 }
 0x283   :  { %v5592_v15 = vmax.f32 %v3752_v49, %v12947_v58  ;;  %v5806_v5 = vmax.f32 %v5590_v61, %v5598_v19  ;;  %v2870_v31 = vsel %vm2820_vm11, %v19316_v30, %v15033_v38  ;;  %v15324_v7 = vpack.i.bf16 %v19373_v1, %v19322_v46 }
 0x284   :  { %v3789_v8 = vcombine.high %v3171_v22, %v3171_v22  ;;  %v3796_v3 = vrot.slane %v3171_v22, %v17699_v56  ;;  %v5593_v6 = vmax.f32 %v3754_v29, %v12948_v25  ;;  %v5807_v21 = vmax.f32 %v5591_v44, %v5599_v13  ;;  %v21468_v44 = vld [vmem:[#allocation14_spill] sm:$0xff] }
 0x285   :  { %v5808_v4 = vmax.f32 %v5592_v15, %v5600_v16  ;;  %v5934_v57 = vmax.f32 %v5806_v5, 0.0  ;;  %15325 = vrot.lane.b32.xlu1 %v15324_v7, %s16060_s16  ;;  %v15047_v30 = vunpack.i.l.bf16 %v19255_v40  ;;  %v2423_v52 = vsel %vm2369_vm4, %v21467_v14, %v15048_v63 }
 0x286   :  { %v3803_v51 = vrot.slane %v3789_v8, %v17699_v56  ;;  %v3804_v35 = vcombine.high %v3796_v3, %v3796_v3  ;;  %v12957_v19 = vrot.slane %v3796_v3, 9  ;;  %v5809_v38 = vmax.f32 %v5593_v6, %v5601_v39  ;;  %v21469_v8 = vld [vmem:[#allocation38_spill] sm:$0xff] }
 0x287   :  { %v5935_v49 = vmax.f32 %v5807_v21, 0.0  ;;  %v5936_v26 = vmax.f32 %v5808_v4, 0.0  ;;  %v6313_v13 = vrot.slane %v5934_v57, %v18044_v43  ;;  %v15043_v40 = vunpack.i.h.bf16 %v19229_v28  ;;  %v19412_v21 = vpop.permute.xlu1 %15095 }
 0x288   :  { %v3805_v16 = vcombine.high %v3803_v51, %v3803_v51  ;;  %v12958_v29 = vrot.slane %v3804_v35, 9  ;;  %v12959_v23 = vrot.slane %v3803_v51, 9  ;;  %v5937_v58 = vmax.f32 %v5809_v38, 0.0  ;;  %v21471_v38 = vld [vmem:[#allocation36_spill] sm:$0xff] }
 0x289   :  { %v6317_v61 = vrot.slane %v5935_v49, %v18044_v43  ;;  %v6321_v33 = vrot.slane %v5936_v26, %v18044_v43  ;;  %v5602_v22 = vmax.f32 %v3796_v3, %v12957_v19  ;;  %v2422_v63 = vsel %vm2369_vm4, %v21468_v44, %v15047_v30  ;;  %v19414_v4 = vpop.f32.mrb[28].mxu0 }
 0x28a   :  { %v12960_v39 = vrot.slane %v3805_v16, 9  ;;  %v5603_v25 = vmax.f32 %v3804_v35, %v12958_v29  ;;  %v6325_v15 = vrot.slane %v5937_v58, %v18044_v43  ;;  %v5604_v7 = vmax.f32 %v3803_v51, %v12959_v23  ;;  %v19420_v30 = vpop.f32.mrb[29].mxu0 }
 0x28b   :  { %v6704_v5 = vsel %vm6662_vm13, %v6317_v61, %v6313_v13  ;;  %v3163_v6 = vadd.f32 %v19382_v36, %v21469_v8  ;;  %vm21470_vm3 = vcmask 1042434   ;;  %v2421_v3 = vsel %vm2369_vm4, %v21471_v38, %v15043_v40  ;;  %v19427_v13 = vpop.permute.xlu0 %15100  ;;  %v19429_v29 = vpop.f32.mrb[30].mxu0  ;;  %v21473_v40 = vld [vmem:[#allocation37_spill] sm:$0xff] }
 0x28c   :  { %v6705_v57 = vsel %vm21470_vm3, %v6321_v33, %v6704_v5  ;;  %v15042_v35 = vunpack.i.l.bf16 %v19229_v28  ;;  %v2909_v19 = vpack.c.bf16 %v2870_v31, %v2869_v42  ;;  %vm21472_vm6 = vcmask 1043459   ;;  %v19436_v58 = vpop.f32.mrb[31].mxu0 }
 0x28d   :  { %v3755_v49 = vcombine.high %v3163_v6, %v3163_v6  ;;  %v3762_v51 = vrot.slane %v3163_v6, %v17699_v56  ;;  %v6706_v26 = vsel %vm21472_vm6, %v6325_v15, %v6705_v57  ;;  %v6833_v14 = vsel %vm204_vm0, %v6785_v12, 0.0 }
 0x28e   :  { %13899 = vmatprep.mubr.msk.bf16.mxu0 %vm2944_vm12, %v2909_v19  ;;  %v6886_v28 = vrot.slane %v19373_v1, 1  ;;  %v6887_v42 = vrot.slane %v6833_v14, 1  ;;  %v2910_v31 = vpack.c.bf16 %v19319_v48, %v19330_v60  ;;  %v15058_v23 = vunpack.i.h.bf16 %v19291_v45 }
 0x28f   :  { %v5605_v61 = vmax.f32 %v3805_v16, %v12960_v39  ;;  %v3769_v50 = vrot.slane %v3755_v49, %v17699_v56  ;;  %v3770_v12 = vcombine.high %v3762_v51, %v3762_v51  ;;  %v12949_v33 = vrot.slane %v3762_v51, 9  ;;  %v19447_v39 = vpop.permute.xlu1 %15105 }
 0x290   :  { %v2420_v44 = vsel %vm2369_vm4, %v21473_v40, %v15042_v35  ;;  %v19442_v15 = vsel %vm21464_vm14, %v6886_v28, %v6887_v42  ;;  %13900 = vmatmul.mubr.msk.bf16.gmra.mrb[48].mxu0 %vm2944_vm12, %v2910_v31  ;;  %v15057_v5 = vunpack.i.l.bf16 %v19291_v45  ;;  %v2486_v48 = vsel %vm2432_vm5, %v2423_v52, %v15058_v23  ;;  %v19453_v45 = vpop.permute.xlu0 %15110 }
 0x291   :  { %v3771_v60 = vcombine.high %v3769_v50, %v3769_v50  ;;  %v12950_v8 = vrot.slane %v3770_v12, 9  ;;  %v12951_v6 = vrot.slane %v3769_v50, 9  ;;  %v5594_v16 = vmax.f32 %v3762_v51, %v12949_v33 }
 0x292   :  { %v15329_v57 = vpack.i.bf16 %v19442_v15, %v19343_v9  ;;  %v15053_v38 = vunpack.i.h.bf16 %v19267_v11  ;;  %v15052_v35 = vunpack.i.l.bf16 %v19267_v11  ;;  %v2485_v52 = vsel %vm2432_vm5, %v2422_v63, %v15057_v5 }
 0x293   :  { %v12952_v19 = vrot.slane %v3771_v60, 9  ;;  %v5595_v49 = vmax.f32 %v3770_v12, %v12950_v8  ;;  %v5596_v28 = vmax.f32 %v3769_v50, %v12951_v6  ;;  %v5810_v42 = vmax.f32 %v5594_v16, %v5602_v22  ;;  %v19467_v16 = vpop.permute.xlu1 %15115 }
 0x294   :  { %15330 = vrot.lane.b32.xlu0 %v15329_v57, %s16061_s12  ;;  %15335 = vrot.lane.b32.xlu1 %v15329_v57, %s16048_s28  ;;  %v6929_v51 = vrot.slane %v19373_v1, 2  ;;  %v6930_v31 = vrot.slane %v6833_v14, 2  ;;  %v15068_v9 = vunpack.i.h.bf16 %v19333_v2  ;;  %v2483_v50 = vsel %vm2432_vm5, %v2420_v44, %v15052_v35 }
 0x295   :  { %v5597_v23 = vmax.f32 %v3771_v60, %v12952_v19  ;;  %v5811_v33 = vmax.f32 %v5595_v49, %v5603_v25  ;;  %v5812_v11 = vmax.f32 %v5596_v28, %v5604_v7  ;;  %v5938_v40 = vmax.f32 %v5810_v42, 0.0  ;;  %v19477_v19 = vpop.permute.xlu0 %15120 }
 0x296   :  { %v19462_v22 = vsel %vm683_vm1, %v6929_v51, %v6930_v31  ;;  %v15067_v12 = vunpack.i.l.bf16 %v19333_v2  ;;  %v15063_v8 = vunpack.i.h.bf16 %v19306_v10  ;;  %v2484_v25 = vsel %vm2432_vm5, %v2421_v3, %v15053_v38 }
 0x297   :  { %v5813_v6 = vmax.f32 %v5597_v23, %v5605_v61  ;;  %v5939_v63 = vmax.f32 %v5811_v33, 0.0  ;;  %v5940_v5 = vmax.f32 %v5812_v11, 0.0  ;;  %v6329_v14 = vrot.slane %v5938_v40, %v18044_v43  ;;  %v19496_v40 = vpop.permute.xlu1 %15125 }
 0x298   :  { %v15339_v7 = vpack.i.bf16 %v19462_v22, %v19360_v54  ;;  %vm21474_vm15 = vcmask 97280   ;;  %v15062_v60 = vunpack.i.l.bf16 %v19306_v10  ;;  %vm21475_vm3 = vcmask 1044484  }
 0x299   :  { %v2551_v44 = vsel %vm21474_vm15, %v2486_v48, %v15068_v9  ;;  %v5941_v57 = vmax.f32 %v5813_v6, 0.0  ;;  %v6333_v2 = vrot.slane %v5939_v63, %v18044_v43  ;;  %v6707_v61 = vsel %vm21475_vm3, %v6329_v14, %v6706_v26  ;;  %vm21476_vm6 = vmmov %vm21474_vm15  ;;  %v19506_v14 = vpop.permute.xlu0 %15130 }
 0x29a   :  { %v2550_v35 = vsel %vm21476_vm6, %v2485_v52, %v15067_v12  ;;  %v6337_v49 = vrot.slane %v5940_v5, %v18044_v43  ;;  %15340 = vrot.lane.b32.xlu0 %v15339_v7, %s16045_s20  ;;  %v15078_v3 = vunpack.i.h.bf16 %v19368_v55  ;;  %v15077_v38 = vunpack.i.l.bf16 %v19368_v55  ;;  %vm21477_vm14 = vmmov %vm21476_vm6 }
 0x29b   :  { %v15073_v48 = vunpack.i.h.bf16 %v19353_v34  ;;  %v6708_v10 = vsel %vm6670_vm2, %v6333_v2, %v6707_v61  ;;  %v2548_v28 = vsel %vm21477_vm14, %v2483_v50, %v15062_v60  ;;  %vm21478_vm15 = vmmov %vm21476_vm6  ;;  %v15072_v42 = vunpack.i.l.bf16 %v19353_v34 }
 0x29c   :  { %v2549_v26 = vsel %vm21478_vm15, %v2484_v25, %v15063_v8  ;;  %v6341_v52 = vrot.slane %v5941_v57, %v18044_v43  ;;  %vm21479_vm3 = vcmask 1046534   ;;  %v2615_v31 = vsel %vm2560_vm7, %v2550_v35, %v15077_v38 }
 0x29d   :  { %v6709_v51 = vsel %vm21479_vm3, %v6337_v49, %v6708_v10  ;;  %v15088_v9 = vunpack.i.h.bf16 %v19393_v24  ;;  %v2616_v55 = vsel %vm2560_vm7, %v2551_v44, %v15078_v3  ;;  %v2614_v23 = vsel %vm2560_vm7, %v2549_v26, %v15073_v48 }
 0x29e   :  { %v15087_v33 = vunpack.i.l.bf16 %v19393_v24  ;;  %v15083_v11 = vunpack.i.h.bf16 %v19375_v20  ;;  %v15082_v34 = vunpack.i.l.bf16 %v19375_v20  ;;  %v15098_v50 = vunpack.i.h.bf16 %v19412_v21 }
 0x29f   :  { %v15097_v12 = vunpack.i.l.bf16 %v19412_v21  ;;  %v15093_v8 = vunpack.i.h.bf16 %v19400_v27  ;;  %v2613_v6 = vsel %vm2560_vm7, %v2548_v28, %v15072_v42  ;;  %v15092_v5 = vunpack.i.l.bf16 %v19400_v27  ;;  %v19525_v28 = vpop.permute.xlu1 %15135 }
 0x2a0   :  { %v2680_v63 = vsel %vm2625_vm8, %v2615_v31, %v15087_v33  ;;  %v15108_v24 = vunpack.i.h.bf16 %v19447_v39  ;;  %v2681_v25 = vsel %vm2625_vm8, %v2616_v55, %v15088_v9  ;;  %v2678_v20 = vsel %vm2625_vm8, %v2613_v6, %v15082_v34  ;;  %v19541_v55 = vpop.permute.xlu0 %15140 }
 0x2a1   :  { %v2679_v7 = vsel %vm2625_vm8, %v2614_v23, %v15083_v11  ;;  %v2745_v21 = vsel %vm2690_vm9, %v2680_v63, %v15097_v12  ;;  %v2746_v44 = vsel %vm2690_vm9, %v2681_v25, %v15098_v50  ;;  %v15107_v57 = vunpack.i.l.bf16 %v19447_v39 }
 0x2a2   :  { %v2744_v60 = vsel %vm2690_vm9, %v2679_v7, %v15093_v8  ;;  %v15103_v27 = vunpack.i.h.bf16 %v19427_v13  ;;  %v2743_v2 = vsel %vm2690_vm9, %v2678_v20, %v15092_v5  ;;  %v19518_v61 = vsel %vm2755_vm10, %v2746_v44, %v15108_v24 }
 0x2a3   :  { %v15102_v35 = vunpack.i.l.bf16 %v19427_v13  ;;  %vm21480_vm6 = vcmask 1047559   ;;  %v15118_v38 = vunpack.i.h.bf16 %v19467_v16  ;;  %v15117_v48 = vunpack.i.l.bf16 %v19467_v16  ;;  %v19560_v7 = vpop.permute.xlu1 %15145 }
 0x2a4   :  { %v6710_v49 = vsel %vm21480_vm6, %v6341_v52, %v6709_v51  ;;  %v15113_v10 = vunpack.i.h.bf16 %v19453_v45  ;;  %v19528_v39 = vsel %vm2755_vm10, %v2745_v21, %v15107_v57  ;;  %v2809_v42 = vsel %vm2755_vm10, %v2744_v60, %v15103_v27 }
 0x2a5   :  { %v6786_v3 = vrot.slane %v6710_v49, 7  ;;  %v2808_v26 = vsel %vm2755_vm10, %v2743_v2, %v15102_v35  ;;  %v15112_v13 = vunpack.i.l.bf16 %v19453_v45  ;;  %v3184_v31 = vadd.f32 %v19382_v36, %v19169_v41  ;;  %v19565_v49 = vpop.permute.xlu0 %15150 }
 0x2a6   :  { %v2874_v51 = vsel %vm2820_vm11, %v2809_v42, %v15113_v10  ;;  %v3176_v9 = vadd.f32 %v19382_v36, %v19182_v62  ;;  %v3187_v6 = vadd.f32 %v19382_v36, %v19188_v17  ;;  %vm21482_vm14 = vcmask 1046528  }
 0x2a7   :  { %v19534_v52 = vsel %vm204_vm0, 0.0, %v6786_v3  ;;  %v2873_v33 = vsel %vm2820_vm11, %v2808_v26, %v15112_v13  ;;  %v19547_v45 = vsel %vm204_vm0, %v6786_v3, 0.0  ;;  %v3840_v50 = vcombine.high %v3184_v31, %v3184_v31 }
 0x2a8   :  { %21481 = vst [vmem:[#allocation29_spill] sm:$0xff] %v19534_v52  ;;  %v15344_v23 = vpack.i.bf16 %v19534_v52, %v19373_v1  ;;  %v6889_v11 = vrot.slane %v19534_v52, 1  ;;  %v2911_v34 = vpack.c.bf16 %v2874_v51, %v2873_v33  ;;  %v3847_v12 = vrot.slane %v3184_v31, %v17699_v56 }
 0x2a9   :  { %v3806_v41 = vcombine.high %v3176_v9, %v3176_v9  ;;  %v3813_v62 = vrot.slane %v3176_v9, %v17699_v56  ;;  %v6890_v8 = vrot.slane %v19547_v45, 1  ;;  %v6932_v63 = vrot.slane %v19534_v52, 2 }
 0x2aa   :  { %15345 = vrot.lane.b32.xlu1 %v15344_v23, %s16057_s0  ;;  %v3854_v5 = vrot.slane %v3840_v50, %v17699_v56  ;;  %v3855_v24 = vcombine.high %v3847_v12, %v3847_v12  ;;  %v12969_v25 = vrot.slane %v3847_v12, 9  ;;  %13903 = vmatprep.mubr.msk.bf16.mxu0 %vm2944_vm12, %v2911_v34  ;;  %v3857_v57 = vcombine.high %v3187_v6, %v3187_v6 }
 0x2ab   :  { %v3820_v20 = vrot.slane %v3806_v41, %v17699_v56  ;;  %v3821_v21 = vcombine.high %v3813_v62, %v3813_v62  ;;  %v12961_v44 = vrot.slane %v3813_v62, 9  ;;  %v19563_v60 = vsel %vm21482_vm14, %v6889_v11, %v6890_v8 }
 0x2ac   :  { %v3856_v27 = vcombine.high %v3854_v5, %v3854_v5  ;;  %v12970_v17 = vrot.slane %v3855_v24, 9  ;;  %v12971_v2 = vrot.slane %v3854_v5, 9  ;;  %v5614_v35 = vmax.f32 %v3847_v12, %v12969_v25 }
 0x2ad   :  { %v3822_v3 = vcombine.high %v3820_v20, %v3820_v20  ;;  %v12962_v10 = vrot.slane %v3821_v21, 9  ;;  %v12963_v26 = vrot.slane %v3820_v20, 9  ;;  %v5606_v42 = vmax.f32 %v3813_v62, %v12961_v44  ;;  %v19573_v62 = vpop.permute.xlu1 %15155 }
 0x2ae   :  { %v12972_v13 = vrot.slane %v3856_v27, 9  ;;  %v5615_v51 = vmax.f32 %v3855_v24, %v12970_v17  ;;  %v5616_v31 = vmax.f32 %v3854_v5, %v12971_v2  ;;  %v15349_v9 = vpack.i.bf16 %v19563_v60, %v19442_v15  ;;  %v19575_v2 = vpop.permute.xlu0 %15160 }
 0x2af   :  { %v12964_v23 = vrot.slane %v3822_v3, 9  ;;  %v5607_v33 = vmax.f32 %v3821_v21, %v12962_v10  ;;  %v5608_v11 = vmax.f32 %v3820_v20, %v12963_v26  ;;  %v5814_v34 = vmax.f32 %v5606_v42, %v5614_v35 }
 0x2b0   :  { %v5617_v50 = vmax.f32 %v3856_v27, %v12972_v13  ;;  %15350 = vrot.lane.b32.xlu0 %v15349_v9, %s16058_s14  ;;  %v3864_v12 = vrot.slane %v3187_v6, %v17699_v56  ;;  %v3871_v41 = vrot.slane %v3857_v57, %v17699_v56  ;;  %v6933_v8 = vrot.slane %v19547_v45, 2  ;;  %v19577_v27 = vpop.f32.mrb[32].mxu0  ;;  %v21483_v6 = vld [vmem:[#allocation15_spill] sm:$0xff] }
 0x2b1   :  { %v5609_v24 = vmax.f32 %v3822_v3, %v12964_v23  ;;  %v5815_v5 = vmax.f32 %v5607_v33, %v5615_v51  ;;  %v5816_v25 = vmax.f32 %v5608_v11, %v5616_v31  ;;  %v5942_v44 = vmax.f32 %v5814_v34, 0.0  ;;  %v21484_v3 = vld [vmem:[#allocation13_spill] sm:$0xff]  ;;  %v19588_v31 = vpop.f32.mrb[33].mxu0 }
 0x2b2   :  { %v3872_v15 = vcombine.high %v3864_v12, %v3864_v12  ;;  %v3873_v17 = vcombine.high %v3871_v41, %v3871_v41  ;;  %v12973_v21 = vrot.slane %v3864_v12, 9  ;;  %v12975_v20 = vrot.slane %v3871_v41, 9  ;;  %v19595_v11 = vpop.f32.mrb[34].mxu0 }
 0x2b3   :  { %v2425_v57 = vsel %vm2369_vm4, %v21483_v6, %v15118_v38  ;;  %v5817_v45 = vmax.f32 %v5609_v24, %v5617_v50  ;;  %v5943_v35 = vmax.f32 %v5815_v5, 0.0  ;;  %v5944_v10 = vmax.f32 %v5816_v25, 0.0  ;;  %v19602_v24 = vpop.permute.xlu1 %15165  ;;  %v19604_v5 = vpop.f32.mrb[35].mxu0 }
 0x2b4   :  { %v2424_v26 = vsel %vm2369_vm4, %v21484_v3, %v15117_v48  ;;  %v6345_v42 = vrot.slane %v5942_v44, %v18044_v43  ;;  %v12974_v13 = vrot.slane %v3872_v15, 9  ;;  %v12976_v51 = vrot.slane %v3873_v17, 9 }
 0x2b5   :  { %v5945_v9 = vmax.f32 %v5817_v45, 0.0  ;;  %v6349_v23 = vrot.slane %v5943_v35, %v18044_v43  ;;  %v6353_v33 = vrot.slane %v5944_v10, %v18044_v43  ;;  %v19593_v38 = vsel %vm683_vm1, %v6932_v63, %v6933_v8  ;;  %v19617_v45 = vpop.permute.xlu0 %15170  ;;  %v21487_v35 = vld [vmem:[#allocation19_spill] sm:$0xff] }
 0x2b6   :  { %v5618_v16 = vmax.f32 %v3864_v12, %v12973_v21  ;;  %v19597_v34 = vmax.f32 %v3871_v41, %v12975_v20  ;;  %v15354_v48 = vpack.i.bf16 %v19593_v38, %v19462_v22  ;;  %v15128_v50 = vunpack.i.h.bf16 %v19496_v40  ;;  %v21486_v41 = vld [vmem:[#allocation18_spill] sm:$0xff] }
 0x2b7   :  { %v6357_v25 = vrot.slane %v5945_v9, %v18044_v43  ;;  %v6711_v44 = vsel %vm6662_vm13, %v6349_v23, %v6345_v42  ;;  %v15127_v63 = vunpack.i.l.bf16 %v19496_v40  ;;  %v15123_v8 = vunpack.i.h.bf16 %v19477_v19 }
 0x2b8   :  { %vm21485_vm15 = vcmask 1042434   ;;  %15355 = vrot.lane.b32.xlu1 %v15354_v48, %s16059_s15  ;;  %v2427_v21 = vsel %vm2369_vm4, %v21486_v41, %v15128_v50  ;;  %v15122_v20 = vunpack.i.l.bf16 %v19477_v19  ;;  %v3179_v6 = vadd.f32 %v19382_v36, %v19204_v32 }
 0x2b9   :  { %v6712_v12 = vsel %vm21485_vm15, %v6353_v33, %v6711_v44  ;;  %v2426_v10 = vsel %vm2369_vm4, %v21487_v35, %v15127_v63  ;;  %v2876_v40 = vsel %vm2820_vm11, %v19518_v61, %v15123_v8  ;;  %vm21488_vm3 = vcmask 1043459  }
 0x2ba   :  { %v6713_v3 = vsel %vm21488_vm3, %v6357_v25, %v6712_v12  ;;  %v15138_v42 = vunpack.i.h.bf16 %v19525_v28  ;;  %v2875_v9 = vsel %vm2820_vm11, %v19528_v39, %v15122_v20  ;;  %v3823_v23 = vcombine.high %v3179_v6, %v3179_v6  ;;  %v19632_v12 = vpop.permute.xlu1 %15175 }
 0x2bb   :  { %v3830_v19 = vrot.slane %v3179_v6, %v17699_v56  ;;  %v15137_v32 = vunpack.i.l.bf16 %v19525_v28  ;;  %v5619_v33 = vmax.f32 %v3872_v15, %v12974_v13  ;;  %v2912_v48 = vpack.c.bf16 %v2876_v40, %v2875_v9 }
 0x2bc   :  { %v15133_v50 = vunpack.i.h.bf16 %v19506_v14  ;;  %v15132_v44 = vunpack.i.l.bf16 %v19506_v14  ;;  %v5621_v63 = vmax.f32 %v3873_v17, %v12976_v51  ;;  %v3837_v61 = vrot.slane %v3823_v23, %v17699_v56  ;;  %v19639_v51 = vpop.permute.xlu0 %15180 }
 0x2bd   :  { %v3838_v25 = vcombine.high %v3830_v19, %v3830_v19  ;;  %v12965_v8 = vrot.slane %v3830_v19, 9  ;;  %v2489_v39 = vsel %vm2432_vm5, %v2426_v10, %v15137_v32  ;;  %v2490_v41 = vsel %vm2432_vm5, %v2427_v21, %v15138_v42  ;;  %13904 = vmatmul.mubr.msk.bf16.gmra.mrb[52].mxu0 %vm2944_vm12, %v2912_v48 }
 0x2be   :  { %v15148_v28 = vunpack.i.h.bf16 %v19560_v7  ;;  %v15147_v15 = vunpack.i.l.bf16 %v19560_v7  ;;  %v3839_v13 = vcombine.high %v3837_v61, %v3837_v61  ;;  %v12967_v14 = vrot.slane %v3837_v61, 9 }
 0x2bf   :  { %v12966_v20 = vrot.slane %v3838_v25, 9  ;;  %v5610_v17 = vmax.f32 %v3830_v19, %v12965_v8  ;;  %v2488_v6 = vsel %vm2432_vm5, %v2425_v57, %v15133_v50  ;;  %v2487_v35 = vsel %vm2432_vm5, %v2424_v26, %v15132_v44  ;;  %v15186_v44 = vpop.permute.xlu1 %15185 }
 0x2c0   :  { %v15143_v10 = vunpack.i.h.bf16 %v19541_v55  ;;  %v15142_v21 = vunpack.i.l.bf16 %v19541_v55  ;;  %v12968_v40 = vrot.slane %v3839_v13, 9  ;;  %v5612_v9 = vmax.f32 %v3837_v61, %v12967_v14 }
 0x2c1   :  { %v5611_v42 = vmax.f32 %v3838_v25, %v12966_v20  ;;  %v5818_v23 = vmax.f32 %v5610_v17, %v5618_v16  ;;  %vm21489_vm6 = vcmask 97280   ;;  %v15158_v19 = vunpack.i.h.bf16 %v19573_v62 }
 0x2c2   :  { %v2554_v7 = vsel %vm21489_vm6, %v2489_v39, %v15147_v15  ;;  %vm21490_vm14 = vmmov %vm21489_vm6  ;;  %v15157_v48 = vunpack.i.l.bf16 %v19573_v62  ;;  %v5613_v8 = vmax.f32 %v3839_v13, %v12968_v40  ;;  %v5820_v26 = vmax.f32 %v5612_v9, %v19597_v34  ;;  %v19655_v62 = vpop.permute.xlu0 %15190 }
 0x2c3   :  { %v2555_v32 = vsel %vm21490_vm14, %v2490_v41, %v15148_v28  ;;  %v5819_v57 = vmax.f32 %v5611_v42, %v5619_v33  ;;  %v5946_v50 = vmax.f32 %v5818_v23, 0.0  ;;  %vm21491_vm15 = vmmov %vm21489_vm6  ;;  %v15153_v16 = vunpack.i.h.bf16 %v19565_v49  ;;  %v19672_v23 = vpop.permute.xlu1 %15195 }
 0x2c4   :  { %v2552_v55 = vsel %vm21491_vm15, %v2487_v35, %v15142_v21  ;;  %vm21492_vm3 = vmmov %vm21489_vm6  ;;  %v15152_v61 = vunpack.i.l.bf16 %v19565_v49  ;;  %v5821_v39 = vmax.f32 %v5613_v8, %v5621_v63  ;;  %v5948_v28 = vmax.f32 %v5820_v26, 0.0 }
 0x2c5   :  { %v2553_v25 = vsel %vm21492_vm3, %v2488_v6, %v15143_v10  ;;  %v5947_v41 = vmax.f32 %v5819_v57, 0.0  ;;  %v6361_v15 = vrot.slane %v5946_v50, %v18044_v43  ;;  %v2619_v33 = vsel %vm2560_vm7, %v2554_v7, %v15157_v48 }
 0x2c6   :  { %v2620_v34 = vsel %vm2560_vm7, %v2555_v32, %v15158_v19  ;;  %v15168_v13 = vunpack.i.h.bf16 %v19602_v24  ;;  %v15167_v20 = vunpack.i.l.bf16 %v19602_v24  ;;  %v5949_v14 = vmax.f32 %v5821_v39, 0.0  ;;  %v19681_v26 = vpop.permute.xlu0 %15200 }
 0x2c7   :  { %v6365_v17 = vrot.slane %v5947_v41, %v18044_v43  ;;  %vm21493_vm6 = vcmask 1044484   ;;  %v2617_v63 = vsel %vm2560_vm7, %v2552_v55, %v15152_v61  ;;  %v6369_v6 = vrot.slane %v5948_v28, %v18044_v43 }
 0x2c8   :  { %v6714_v49 = vsel %vm21493_vm6, %v6361_v15, %v6713_v3  ;;  %v2618_v35 = vsel %vm2560_vm7, %v2553_v25, %v15153_v16  ;;  %v15163_v10 = vunpack.i.h.bf16 %v19575_v2  ;;  %v15162_v21 = vunpack.i.l.bf16 %v19575_v2 }
 0x2c9   :  { %v6715_v40 = vsel %vm6670_vm2, %v6365_v17, %v6714_v49  ;;  %v2684_v42 = vsel %vm2625_vm8, %v2619_v33, %v15167_v20  ;;  %v15178_v24 = vunpack.i.h.bf16 %v19632_v12  ;;  %v15177_v9 = vunpack.i.l.bf16 %v19632_v12 }
 0x2ca   :  { %v6373_v3 = vrot.slane %v5949_v14, %v18044_v43  ;;  %vm21494_vm14 = vcmask 1046534   ;;  %v2685_v32 = vsel %vm2625_vm8, %v2620_v34, %v15168_v13  ;;  %v15173_v19 = vunpack.i.h.bf16 %v19617_v45 }
 0x2cb   :  { %v6716_v7 = vsel %vm21494_vm14, %v6369_v6, %v6715_v40  ;;  %v2682_v2 = vsel %vm2625_vm8, %v2617_v63, %v15162_v21  ;;  %v2683_v48 = vsel %vm2625_vm8, %v2618_v35, %v15163_v10  ;;  %v15172_v8 = vunpack.i.l.bf16 %v19617_v45  ;;  %v19709_v10 = vpop.permute.xlu0 %15210 }
 0x2cc   :  { %v15188_v57 = vunpack.i.h.bf16 %v15186_v44  ;;  %v2749_v12 = vsel %vm2690_vm9, %v2684_v42, %v15177_v9  ;;  %v15187_v50 = vunpack.i.l.bf16 %v15186_v44  ;;  %v15183_v55 = vunpack.i.h.bf16 %v19639_v51 }
 0x2cd   :  { %v15182_v25 = vunpack.i.l.bf16 %v19639_v51  ;;  %v2750_v16 = vsel %vm2690_vm9, %v2685_v32, %v15178_v24  ;;  %v2748_v61 = vsel %vm2690_vm9, %v2683_v48, %v15173_v19  ;;  %v3200_v39 = vadd.f32 %v19382_v36, %v19414_v4  ;;  %v19702_v4 = vpop.permute.xlu1 %15205 }
 0x2ce   :  { %v3192_v45 = vadd.f32 %v19382_v36, %v19420_v30  ;;  %v2747_v41 = vsel %vm2690_vm9, %v2682_v2, %v15172_v8  ;;  %v19694_v28 = vsel %vm2755_vm10, %v2749_v12, %v15187_v50  ;;  %v19697_v44 = vsel %vm2755_vm10, %v2750_v16, %v15188_v57 }
 0x2cf   :  { %vm21495_vm15 = vcmask 1047559   ;;  %v3908_v15 = vcombine.high %v3200_v39, %v3200_v39  ;;  %v3915_v33 = vrot.slane %v3200_v39, %v17699_v56  ;;  %v2812_v30 = vsel %vm2755_vm10, %v2747_v41, %v15182_v25 }
 0x2d0   :  { %v6717_v51 = vsel %vm21495_vm15, %v6373_v3, %v6716_v7  ;;  %v3874_v34 = vcombine.high %v3192_v45, %v3192_v45  ;;  %v3881_v13 = vrot.slane %v3192_v45, %v17699_v56  ;;  %v2813_v20 = vsel %vm2755_vm10, %v2748_v61, %v15183_v55 }
 0x2d1   :  { %v6787_v14 = vrot.slane %v6717_v51, 7  ;;  %v3922_v49 = vrot.slane %v3908_v15, %v17699_v56  ;;  %v3923_v63 = vcombine.high %v3915_v33, %v3915_v33  ;;  %v12985_v6 = vrot.slane %v3915_v33, 9  ;;  %v19717_v25 = vpop.permute.xlu1 %15215 }
 0x2d2   :  { %v3888_v35 = vrot.slane %v3874_v34, %v17699_v56  ;;  %v3889_v21 = vcombine.high %v3881_v13, %v3881_v13  ;;  %v12977_v40 = vrot.slane %v3881_v13, 9  ;;  %v15193_v24 = vunpack.i.h.bf16 %v19655_v62  ;;  %v19723_v34 = vpop.permute.xlu0 %15220 }
 0x2d3   :  { %v19712_v42 = vsel %vm204_vm0, 0.0, %v6787_v14  ;;  %v3924_v9 = vcombine.high %v3922_v49, %v3922_v49  ;;  %v12986_v3 = vrot.slane %v3923_v63, 9  ;;  %v12987_v7 = vrot.slane %v3922_v49, 9 }
 0x2d4   :  { %v5630_v32 = vmax.f32 %v3915_v33, %v12985_v6  ;;  %v3890_v19 = vcombine.high %v3888_v35, %v3888_v35  ;;  %v12978_v2 = vrot.slane %v3889_v21, 9  ;;  %v12979_v48 = vrot.slane %v3888_v35, 9 }
 0x2d5   :  { %v5622_v8 = vmax.f32 %v3881_v13, %v12977_v40  ;;  %v12988_v57 = vrot.slane %v3924_v9, 9  ;;  %v5631_v12 = vmax.f32 %v3923_v63, %v12986_v3  ;;  %v5632_v50 = vmax.f32 %v3922_v49, %v12987_v7 }
 0x2d6   :  { %v15359_v55 = vpack.i.bf16 %v19712_v42, %v19534_v52  ;;  %v12980_v16 = vrot.slane %v3890_v19, 9  ;;  %v5623_v61 = vmax.f32 %v3889_v21, %v12978_v2  ;;  %v5624_v39 = vmax.f32 %v3888_v35, %v12979_v48  ;;  %v19739_v48 = vpop.permute.xlu1 %15225 }
 0x2d7   :  { %v5822_v45 = vmax.f32 %v5622_v8, %v5630_v32  ;;  %v5633_v41 = vmax.f32 %v3924_v9, %v12988_v57  ;;  %v15192_v15 = vunpack.i.l.bf16 %v19655_v62  ;;  %v2878_v33 = vsel %vm2820_vm11, %v2813_v20, %v15193_v24  ;;  %v19733_v62 = vpop.f32.mrb[36].mxu0 }
 0x2d8   :  { %15360 = vrot.lane.b32.xlu0 %v15359_v55, %s16060_s16  ;;  %v5625_v13 = vmax.f32 %v3890_v19, %v12980_v16  ;;  %v5823_v49 = vmax.f32 %v5623_v61, %v5631_v12  ;;  %v5824_v63 = vmax.f32 %v5624_v39, %v5632_v50  ;;  %v3203_v35 = vadd.f32 %v19382_v36, %v19429_v29  ;;  %v19736_v32 = vpop.f32.mrb[37].mxu0  ;;  %v19751_v39 = vpop.permute.xlu0 %15230 }
 0x2d9   :  { %v5950_v6 = vmax.f32 %v5822_v45, 0.0  ;;  %v2877_v40 = vsel %vm2820_vm11, %v2812_v30, %v15192_v15  ;;  %v3195_v21 = vadd.f32 %v19382_v36, %v19436_v58  ;;  %v19731_v9 = vsel %vm204_vm0, %v6787_v14, 0.0  ;;  %v19741_v36 = vpop.f32.mrb[38].mxu0 }
 0x2da   :  { %v5825_v20 = vmax.f32 %v5625_v13, %v5633_v41  ;;  %v5951_v24 = vmax.f32 %v5823_v49, 0.0  ;;  %v5952_v3 = vmax.f32 %v5824_v63, 0.0  ;;  %v2913_v19 = vpack.c.bf16 %v2878_v33, %v2877_v40  ;;  %v19746_v12 = vpop.f32.mrb[39].mxu0 }
 0x2db   :  { %v6377_v7 = vrot.slane %v5950_v6, %v18044_v43  ;;  %v3925_v30 = vcombine.high %v3203_v35, %v3203_v35  ;;  %v3932_v2 = vrot.slane %v3203_v35, %v17699_v56  ;;  %v3891_v29 = vcombine.high %v3195_v21, %v3195_v21 }
 0x2dc   :  { %v5953_v58 = vmax.f32 %v5825_v20, 0.0  ;;  %v6381_v14 = vrot.slane %v5951_v24, %v18044_v43  ;;  %v6385_v8 = vrot.slane %v5952_v3, %v18044_v43  ;;  %v3898_v57 = vrot.slane %v3195_v21, %v17699_v56  ;;  %13907 = vmatprep.mubr.msk.bf16.mxu0 %vm2944_vm12, %v2913_v19 }
 0x2dd   :  { %v3939_v50 = vrot.slane %v3925_v30, %v17699_v56  ;;  %v3940_v55 = vcombine.high %v3932_v2, %v3932_v2  ;;  %v12989_v16 = vrot.slane %v3932_v2, 9  ;;  %v3905_v61 = vrot.slane %v3891_v29, %v17699_v56  ;;  %v19756_v29 = vpop.permute.xlu1 %15235 }
 0x2de   :  { %v6389_v45 = vrot.slane %v5953_v58, %v18044_v43  ;;  %v6718_v41 = vsel %vm6662_vm13, %v6381_v14, %v6377_v7  ;;  %v3906_v15 = vcombine.high %v3898_v57, %v3898_v57  ;;  %v12981_v33 = vrot.slane %v3898_v57, 9 }
 0x2df   :  { %vm21496_vm3 = vcmask 1042434   ;;  %v3941_v49 = vcombine.high %v3939_v50, %v3939_v50  ;;  %v12990_v63 = vrot.slane %v3940_v55, 9  ;;  %v12991_v6 = vrot.slane %v3939_v50, 9 }
 0x2e0   :  { %v6719_v13 = vsel %vm21496_vm3, %v6385_v8, %v6718_v41  ;;  %v5634_v40 = vmax.f32 %v3932_v2, %v12989_v16  ;;  %v3907_v35 = vcombine.high %v3905_v61, %v3905_v61  ;;  %v12982_v21 = vrot.slane %v3906_v15, 9  ;;  %v19761_v16 = vpop.permute.xlu0 %15240 }
 0x2e1   :  { %v12983_v20 = vrot.slane %v3905_v61, 9  ;;  %v12992_v24 = vrot.slane %v3941_v49, 9  ;;  %v5635_v3 = vmax.f32 %v3940_v55, %v12990_v63  ;;  %v5636_v19 = vmax.f32 %v3939_v50, %v12991_v6 }
 0x2e2   :  { %v5626_v30 = vmax.f32 %v3898_v57, %v12981_v33  ;;  %v12984_v58 = vrot.slane %v3907_v35, 9  ;;  %v5627_v51 = vmax.f32 %v3906_v15, %v12982_v21  ;;  %vm21497_vm6 = vcmask 1043459  }
 0x2e3   :  { %v5628_v7 = vmax.f32 %v3905_v61, %v12983_v20  ;;  %v6720_v14 = vsel %vm21497_vm6, %v6389_v45, %v6719_v13  ;;  %v5637_v17 = vmax.f32 %v3941_v49, %v12992_v24  ;;  %v6892_v41 = vrot.slane %v19712_v42, 1  ;;  %v21500_v13 = vld [vmem:[#allocation17_spill] sm:$0xff]  ;;  %v19782_v24 = vpop.permute.xlu1 %15245 }
 0x2e4   :  { %v5826_v8 = vmax.f32 %v5626_v30, %v5634_v40  ;;  %v6893_v2 = vrot.slane %v19731_v9, 1  ;;  %v5629_v52 = vmax.f32 %v3907_v35, %v12984_v58  ;;  %v5827_v18 = vmax.f32 %v5627_v51, %v5635_v3  ;;  %v21502_v35 = vld [vmem:[#allocation23_spill] sm:$0xff] }
 0x2e5   :  { %v5828_v55 = vmax.f32 %v5628_v7, %v5636_v19  ;;  %v15208_v57 = vunpack.i.h.bf16 %v19702_v4  ;;  %vm21498_vm14 = vcmask 1046528   ;;  %v15207_v61 = vunpack.i.l.bf16 %v19702_v4 }
 0x2e6   :  { %v5954_v50 = vmax.f32 %v5826_v8, 0.0  ;;  %v19765_v33 = vsel %vm21498_vm14, %v6892_v41, %v6893_v2  ;;  %v15203_v45 = vunpack.i.h.bf16 %v19681_v26  ;;  %v21499_v15 = vunpack.i.h.bf16 %v19672_v23  ;;  %v15251_v8 = vpop.permute.xlu0 %15250 }
 0x2e7   :  { %v5829_v63 = vmax.f32 %v5629_v52, %v5637_v17  ;;  %v5955_v6 = vmax.f32 %v5827_v18, 0.0  ;;  %v15364_v51 = vpack.i.bf16 %v19765_v33, %v19563_v60  ;;  %v21501_v40 = vunpack.i.l.bf16 %v19672_v23  ;;  %v21503_v52 = vld [vmem:[#allocation25_spill] sm:$0xff]  ;;  %v21504_v17 = vld [vmem:[#allocation26_spill] sm:$0xff] }
 0x2e8   :  { %v2429_v49 = vsel %vm2369_vm4, %v21500_v13, %v21499_v15  ;;  %v19779_v20 = vmax.f32 %v5828_v55, 0.0  ;;  %v6393_v4 = vrot.slane %v5954_v50, %v18044_v43  ;;  %v2431_v18 = vsel %vm2369_vm4, %v21503_v52, %v15208_v57 }
 0x2e9   :  { %v2428_v21 = vsel %vm2369_vm4, %v21502_v35, %v21501_v40  ;;  %v6397_v3 = vrot.slane %v5955_v6, %v18044_v43  ;;  %15365 = vrot.lane.b32.xlu1 %v15364_v51, %s16061_s12  ;;  %v2430_v60 = vsel %vm2369_vm4, %v21504_v17, %v15207_v61  ;;  %v2880_v23 = vsel %vm2820_vm11, %v19697_v44, %v15203_v45  ;;  %v15256_v6 = vpop.permute.xlu1 %15255 }
 0x2ea   :  { %vm21505_vm15 = vcmask 1044484   ;;  %15370 = vrot.lane.b32.xlu0 %v15364_v51, %s16048_s28  ;;  %v15202_v30 = vunpack.i.l.bf16 %v19681_v26  ;;  %v6935_v58 = vrot.slane %v19712_v42, 2  ;;  %v6936_v7 = vrot.slane %v19731_v9, 2 }
 0x2eb   :  { %v6721_v19 = vsel %vm21505_vm15, %v6393_v4, %v6720_v14  ;;  %v19797_v41 = vmax.f32 %v5829_v63, 0.0  ;;  %v15218_v55 = vunpack.i.h.bf16 %v19717_v25  ;;  %v15217_v44 = vunpack.i.l.bf16 %v19717_v25  ;;  %v15557_v25 = vld [vmem:[%s21206_s3] sm:$0xff]  }
 0x2ec   :  { %v19800_v2 = vsel %vm6670_vm2, %v6397_v3, %v6721_v19  ;;  %v2879_v14 = vsel %vm2820_vm11, %v19694_v28, %v15202_v30  ;;  %v19807_v57 = vsel %vm683_vm1, %v6935_v58, %v6936_v7  ;;  %v15213_v26 = vunpack.i.h.bf16 %v19709_v10 }
 0x2ed   :  { %v15212_v9 = vunpack.i.l.bf16 %v19709_v10  ;;  %v2914_v50 = vpack.c.bf16 %v2880_v23, %v2879_v14  ;;  %v15374_v61 = vpack.i.bf16 %v19807_v57, %v19593_v38  ;;  %v2493_v45 = vsel %vm2432_vm5, %v2430_v60, %v15217_v44  ;;  %v15558_v60 = vld [vmem:[%s21206_s3 + $0x8] sm:$0xff]  }
 0x2ee   :  { %v2494_v15 = vsel %vm2432_vm5, %v2431_v18, %v15218_v55  ;;  %v2492_v28 = vsel %vm2432_vm5, %v2429_v49, %v15213_v26  ;;  %v15228_v63 = vunpack.i.h.bf16 %v19739_v48  ;;  %v15227_v10 = vunpack.i.l.bf16 %v19739_v48  ;;  %v15261_v18 = vpop.permute.xlu0 %15260 }
 0x2ef   :  { %v2491_v13 = vsel %vm2432_vm5, %v2428_v21, %v15212_v9  ;;  %15375 = vrot.lane.b32.xlu1 %v15374_v61, %s16045_s20  ;;  %13908 = vmatmul.mubr.msk.bf16.gmra.mrb[56].mxu0 %vm2944_vm12, %v2914_v50  ;;  %v15223_v51 = vunpack.i.h.bf16 %v19723_v34  ;;  %v15222_v40 = vunpack.i.l.bf16 %v19723_v34  ;;  %v15238_v35 = vunpack.i.h.bf16 %v19756_v29  ;;  %v19848_v61 = vpop.permute.xlu1 %15265 }
 0x2f0   :  { %v16062_v4 = vmov 0   ;;  %vm21506_vm4 = vcmask 97280   ;;  %v15237_v21 = vunpack.i.l.bf16 %v19756_v29  ;;  %v15233_v3 = vunpack.i.h.bf16 %v19751_v39 }
 0x2f1   :  { %7548 = vmatprep.subr.bf16.mxu1 %v16062_v4  ;;  %v2559_v49 = vsel %vm21506_vm4, %v2494_v15, %v15228_v63  ;;  %v15232_v52 = vunpack.i.l.bf16 %v19751_v39  ;;  %vm21507_vm5 = vmmov %vm21506_vm4  ;;  %v15248_v30 = vunpack.i.h.bf16 %v19782_v24  ;;  %v15247_v58 = vunpack.i.l.bf16 %v19782_v24  ;;  %v15559_v24 = vld [vmem:[%s21206_s3 + $0x10] sm:$0xff]  }
 0x2f2   :  { %7549 = vmatpush1.bf16.msra.mxu1 %v15557_v25  ;;  %v2558_v48 = vsel %vm21507_vm5, %v2493_v45, %v15227_v10  ;;  %vm21508_vm3 = vmmov %vm21506_vm4  ;;  %v2624_v23 = vsel %vm2560_vm7, %v2559_v49, %v15238_v35  ;;  %v15243_v7 = vunpack.i.h.bf16 %v19761_v16  ;;  %v15242_v55 = vunpack.i.l.bf16 %v19761_v16  ;;  %v19863_v63 = vpop.permute.xlu0 %15270 }
 0x2f3   :  { %v2556_v17 = vsel %vm21508_vm3, %v2491_v13, %v15222_v40  ;;  %vm21509_vm6 = vmmov %vm21508_vm3  ;;  %7550 = vmatprep.subr.bf16.mxu1 %v16062_v4  ;;  %v2623_v29 = vsel %vm2560_vm7, %v2558_v48, %v15237_v21  ;;  %v15258_v44 = vunpack.i.h.bf16 %v15256_v6  ;;  %v2689_v14 = vsel %vm2625_vm8, %v2624_v23, %v15248_v30 }
 0x2f4   :  { %v2557_v34 = vsel %vm21509_vm6, %v2492_v28, %v15223_v51  ;;  %v2621_v39 = vsel %vm2560_vm7, %v2556_v17, %v15232_v52  ;;  %v15257_v26 = vunpack.i.l.bf16 %v15256_v6  ;;  %v15253_v9 = vunpack.i.h.bf16 %v15251_v8  ;;  %v21510_v6 = vld [vmem:[#allocation24_spill] sm:$0xff] }
 0x2f5   :  { %v2622_v19 = vsel %vm2560_vm7, %v2557_v34, %v15233_v3  ;;  %v15252_v50 = vunpack.i.l.bf16 %v15251_v8  ;;  %v6401_v45 = vrot.slane %v19779_v20, %v18044_v43  ;;  %v2688_v15 = vsel %vm2625_vm8, %v2623_v29, %v15247_v58  ;;  %v19891_v34 = vld [vmem:[%s21205_s2] ss:$0 sm:$0xff]  ;;  %v19902_v58 = vpop.permute.xlu1 %15275 }
 0x2f6   :  { %7551 = vmatpush1.bf16.msra.mxu1 %v15558_v60  ;;  %v2686_v16 = vsel %vm2625_vm8, %v2621_v39, %v15242_v55  ;;  %v2687_v25 = vsel %vm2625_vm8, %v2622_v19, %v15243_v7  ;;  %v6405_v28 = vrot.slane %v19797_v41, %v18044_v43  ;;  %v15263_v13 = vunpack.i.h.bf16 %v15261_v18 }
 0x2f7   :  { %7552 = vmatprep.subr.bf16.mxu1 %v16062_v4  ;;  %v2751_v8 = vsel %vm2690_vm9, %v2686_v16, %v15252_v50  ;;  %v2752_v20 = vsel %vm2690_vm9, %v2687_v25, %v15253_v9  ;;  %v21511_v10 = vunpack.i.h.bf16 %v21510_v6  ;;  %v15262_v40 = vunpack.i.l.bf16 %v15261_v18  ;;  %v15560_v18 = vld [vmem:[%s21206_s3 + $0x18] sm:$0xff]   ;;  %v15561_v50 = vld [vmem:[%s21206_s3 + $0x20] sm:$0xff]  }
 0x2f8   :  { %v2817_v35 = vsel %vm2755_vm10, %v2752_v20, %v15258_v44  ;;  %vm21512_vm8 = vcmask 1046534   ;;  %v21513_v49 = vunpack.i.l.bf16 %v21510_v6  ;;  %v2816_v3 = vsel %vm2755_vm10, %v2751_v8, %v15257_v26 }
 0x2f9   :  { %v19868_v51 = vsel %vm2690_vm9, %v2689_v14, %v21511_v10  ;;  %v6723_v41 = vsel %vm21512_vm8, %v6401_v45, %v19800_v2  ;;  %v2882_v52 = vsel %vm2820_vm11, %v2817_v35, %v15263_v13  ;;  %vm21514_vm14 = vcmask 1047559  }
 0x2fa   :  { %v19876_v21 = vsel %vm2690_vm9, %v2688_v15, %v21513_v49  ;;  %v19881_v48 = vsel %vm21514_vm14, %v6405_v28, %v6723_v41  ;;  %7553 = vmatpush1.bf16.msra.mxu1 %v15559_v24  ;;  %v2881_v17 = vsel %vm2820_vm11, %v2816_v3, %v15262_v40  ;;  %v3216_v60 = vadd.f32 %v19891_v34, %v19577_v27  ;;  %v19927_v3 = vpop.permute.xlu1 %15285 }
 0x2fb   :  { %v6788_v2 = vrot.slane %v19881_v48, 7  ;;  %v3208_v23 = vadd.f32 %v19891_v34, %v19588_v31  ;;  %7554 = vmatprep.subr.bf16.mxu1 %v16062_v4  ;;  %v2915_v29 = vpack.c.bf16 %v2882_v52, %v2881_v17  ;;  %v15268_v39 = vunpack.i.h.bf16 %v19848_v61 }
 0x2fc   :  { %v15267_v19 = vunpack.i.l.bf16 %v19848_v61  ;;  %v3219_v30 = vadd.f32 %v19891_v34, %v19595_v11  ;;  %v3976_v27 = vcombine.high %v3216_v60, %v3216_v60  ;;  %v3983_v31 = vrot.slane %v3216_v60, %v17699_v56  ;;  %v19915_v11 = vpop.permute.xlu0 %15280 }
 0x2fd   :  { %v19907_v7 = vsel %vm204_vm0, 0.0, %v6788_v2  ;;  %v3942_v55 = vcombine.high %v3208_v23, %v3208_v23  ;;  %v3949_v14 = vrot.slane %v3208_v23, %v17699_v56  ;;  %13911 = vmatprep.mubr.msk.bf16.mxu0 %vm2944_vm12, %v2915_v29  ;;  %v15562_v23 = vld [vmem:[%s21206_s3 + $0x28] sm:$0xff]   ;;  %v15273_v48 = vunpack.i.h.bf16 %v19863_v63 }
 0x2fe   :  { %v15379_v44 = vpack.i.bf16 %v19907_v7, %v19712_v42  ;;  %v3993_v26 = vcombine.high %v3219_v30, %v3219_v30  ;;  %v4000_v9 = vrot.slane %v3219_v30, %v17699_v56  ;;  %7555 = vmatpush1.bf16.msra.mxu1 %v15560_v18  ;;  %v3990_v61 = vrot.slane %v3976_v27, %v17699_v56 }
 0x2ff   :  { %v3991_v45 = vcombine.high %v3983_v31, %v3983_v31  ;;  %v13001_v24 = vrot.slane %v3983_v31, 9  ;;  %v3956_v15 = vrot.slane %v3942_v55, %v17699_v56  ;;  %7556 = vmatprep.subr.bf16.mxu1 %v16062_v4  ;;  %v3957_v16 = vcombine.high %v3949_v14, %v3949_v14 }
 0x300   :  { %15380 = vrot.lane.b32.xlu0 %v15379_v44, %s16057_s0  ;;  %v12993_v25 = vrot.slane %v3949_v14, 9  ;;  %v19925_v28 = vrot.slane %v3993_v26, %v17699_v56  ;;  %v4008_v8 = vcombine.high %v4000_v9, %v4000_v9  ;;  %v3992_v20 = vcombine.high %v3990_v61, %v3990_v61  ;;  %v19935_v55 = vpop.permute.xlu0 %15290 }
 0x301   :  { %v13002_v13 = vrot.slane %v3991_v45, 9  ;;  %v13003_v6 = vrot.slane %v3990_v61, 9  ;;  %v5646_v10 = vmax.f32 %v3983_v31, %v13001_v24  ;;  %v3958_v40 = vcombine.high %v3956_v15, %v3956_v15 }
 0x302   :  { %v12994_v35 = vrot.slane %v3957_v16, 9  ;;  %v12995_v41 = vrot.slane %v3956_v15, 9  ;;  %v5638_v49 = vmax.f32 %v3949_v14, %v12993_v25  ;;  %7557 = vmatpush1.bf16.msra.mxu1 %v15561_v50  ;;  %v13004_v52 = vrot.slane %v3992_v20, 9 }
 0x303   :  { %v5647_v18 = vmax.f32 %v3991_v45, %v13002_v13  ;;  %v5648_v17 = vmax.f32 %v3990_v61, %v13003_v6  ;;  %v4009_v60 = vcombine.high %v19925_v28, %v19925_v28  ;;  %v12996_v29 = vrot.slane %v3958_v40, 9  ;;  %7558 = vmatprep.subr.bf16.mxu1 %v16062_v4 }
 0x304   :  { %v5639_v30 = vmax.f32 %v3957_v16, %v12994_v35  ;;  %v5640_v27 = vmax.f32 %v3956_v15, %v12995_v41  ;;  %v5830_v31 = vmax.f32 %v5638_v49, %v5646_v10  ;;  %v7315_v44 = vsel %vm2560_vm7, %v19223_v59, %v15268_v39  ;;  %v15563_v59 = vld [vmem:[%s21206_s3 + $0x30] sm:$0xff]   ;;  %v19950_v35 = vpop.permute.xlu1 %15295 }
 0x305   :  { %v5649_v14 = vmax.f32 %v3992_v20, %v13004_v52  ;;  %v13005_v26 = vrot.slane %v4000_v9, 9  ;;  %v13006_v50 = vrot.slane %v4008_v8, 9  ;;  %v5641_v61 = vmax.f32 %v3958_v40, %v12996_v29 }
 0x306   :  { %v5831_v45 = vmax.f32 %v5639_v30, %v5647_v18  ;;  %v5832_v24 = vmax.f32 %v5640_v27, %v5648_v17  ;;  %v5958_v25 = vmax.f32 %v5830_v31, 0.0  ;;  %v7314_v13 = vsel %vm2560_vm7, %v21444_v47, %v15267_v19  ;;  %7559 = vmatpush1.bf16.msra.mxu1 %v15562_v23  ;;  %v19961_v23 = vpop.permute.xlu0 %15300 }
 0x307   :  { %v13007_v15 = vrot.slane %v19925_v28, 9  ;;  %v13008_v16 = vrot.slane %v4009_v60, 9  ;;  %v19942_v6 = vmax.f32 %v4000_v9, %v13005_v26  ;;  %v5833_v39 = vmax.f32 %v5641_v61, %v5649_v14  ;;  %7560 = vmatprep.subr.bf16.mxu1 %v16062_v4 }
 0x308   :  { %v5959_v20 = vmax.f32 %v5831_v45, 0.0  ;;  %v5960_v10 = vmax.f32 %v5832_v24, 0.0  ;;  %v19947_v40 = vmax.f32 %v4008_v8, %v13006_v50  ;;  %v6409_v19 = vrot.slane %v5958_v25, %v18044_v43 }
 0x309   :  { %v6836_v9 = vsel %vm204_vm0, %v6788_v2, 0.0  ;;  %v6963_v41 = vrot.slane %v19907_v7, 1  ;;  %v3211_v49 = vadd.f32 %v19891_v34, %v19604_v5  ;;  %v5961_v52 = vmax.f32 %v5833_v39, 0.0  ;;  %v15564_v5 = vld [vmem:[%s21206_s3 + $0x38] sm:$0xff]  }
 0x30a   :  { %v6413_v18 = vrot.slane %v5959_v20, %v18044_v43  ;;  %v6417_v8 = vrot.slane %v5960_v10, %v18044_v43  ;;  %v6964_v17 = vrot.slane %v6836_v9, 1  ;;  %v15272_v2 = vunpack.i.l.bf16 %v19863_v63  ;;  %7561 = vmatpush1.bf16.msra.mxu1 %v15563_v59  ;;  %v19982_v20 = vpop.permute.xlu1 %15305 }
 0x30b   :  { %v3959_v29 = vcombine.high %v3211_v49, %v3211_v49  ;;  %v3966_v30 = vrot.slane %v3211_v49, %v17699_v56  ;;  %v6421_v27 = vrot.slane %v5961_v52, %v18044_v43  ;;  %vm21515_vm9 = vcmask 1046528   ;;  %7562 = vmatprep.subr.bf16.mxu1 %v16062_v4  ;;  %v19988_v52 = vpop.f32.mrb[40].mxu0 }
 0x30c   :  { %v6725_v31 = vsel %vm6662_vm13, %v6413_v18, %v6409_v19  ;;  %v19972_v14 = vsel %vm21515_vm9, %v6963_v41, %v6964_v17  ;;  %v6969_v26 = vrot.slane %v19907_v7, 2  ;;  %vm21516_vm15 = vcmask 1042434   ;;  %v19996_v18 = vpop.permute.xlu0 %15310 }
 0x30d   :  { %v6726_v50 = vsel %vm21516_vm15, %v6417_v8, %v6725_v31  ;;  %v15384_v63 = vpack.i.bf16 %v19972_v14, %v19765_v33  ;;  %v3973_v61 = vrot.slane %v3959_v29, %v17699_v56  ;;  %v3974_v45 = vcombine.high %v3966_v30, %v3966_v30  ;;  %v15565_v33 = vld [vmem:[%s21206_s3 + $0x40] sm:$0xff]   ;;  %vm21525_vm14 = vmmov %vm21516_vm15 }
 0x30e   :  { %v5652_v24 = vmax.f32 %v19925_v28, %v13007_v15  ;;  %v5653_v25 = vmax.f32 %v4009_v60, %v13008_v16  ;;  %v12997_v59 = vrot.slane %v3966_v30, 9  ;;  %vm21517_vm4 = vcmask 1043459   ;;  %7563 = vmatpush1.bf16.msra.mxu1 %v15564_v5 }
 0x30f   :  { %v6727_v39 = vsel %vm21517_vm4, %v6421_v27, %v6726_v50  ;;  %15385 = vrot.lane.b32.xlu1 %v15384_v63, %s16058_s14  ;;  %v3975_v10 = vcombine.high %v3973_v61, %v3973_v61  ;;  %v12998_v19 = vrot.slane %v3974_v45, 9  ;;  %v12999_v41 = vrot.slane %v3973_v61, 9  ;;  %7564 = vmatprep.subr.bf16.mxu1 %v16062_v4  ;;  %v21518_v50 = vld [vmem:[#allocation22_spill] sm:$0xff]  ;;  %vm21526_vm9 = vmmov %vm21517_vm4 }
 0x310   :  { %v6970_v49 = vrot.slane %v6836_v9, 2  ;;  %v5642_v28 = vmax.f32 %v3966_v30, %v12997_v59  ;;  %v19991_v60 = vsel %vm2820_vm11, %v7314_v13, %v15272_v2  ;;  %v7330_v15 = vsel %vm2820_vm11, %v7315_v44, %v15273_v48  ;;  %v19998_v9 = vpop.f32.mrb[41].mxu0 }
 0x311   :  { %v15277_v16 = vunpack.i.l.bf16 %v19902_v58  ;;  %v13000_v8 = vrot.slane %v3975_v10, 9  ;;  %v5643_v17 = vmax.f32 %v3974_v45, %v12998_v19  ;;  %v5644_v29 = vmax.f32 %v3973_v61, %v12999_v41  ;;  %v20003_v30 = vpop.f32.mrb[42].mxu0  ;;  %v21521_v45 = vld [vmem:[#allocation40_spill] sm:$0xff] }
 0x312   :  { %v20001_v5 = vsel %vm683_vm1, %v6969_v26, %v6970_v49  ;;  %v5834_v13 = vmax.f32 %v5642_v28, %v19942_v6  ;;  %vm7344_vm5 = vcmask 392192   ;;  %v15278_v4 = vunpack.i.h.bf16 %v19902_v58  ;;  %v20009_v48 = vpop.f32.mrb[43].mxu0  ;;  %7565 = vmatpush1.bf16.msra.mxu1 %v15565_v33 }
 0x313   :  { %v15389_v44 = vpack.i.bf16 %v20001_v5, %v19807_v57  ;;  %v5645_v2 = vmax.f32 %v3975_v10, %v13000_v8  ;;  %v5835_v27 = vmax.f32 %v5643_v17, %v19947_v40  ;;  %v5836_v31 = vmax.f32 %v5644_v29, %v5652_v24  ;;  %v20026_v24 = vpop.permute.xlu1 %15315 }
 0x314   :  { %v21519_v63 = vunpack.i.l.bf16 %v21518_v50  ;;  %v5962_v61 = vmax.f32 %v5834_v13, 0.0  ;;  %v21520_v6 = vunpack.i.h.bf16 %v21518_v50  ;;  %v21522_v59 = vunpack.i.l.bf16 %v21521_v45 }
 0x315   :  { %15390 = vrot.lane.b32.xlu0 %v15389_v44, %s16059_s15  ;;  %v15394_v40 = vpack.i.bf16 %v21444_v47, %v19907_v7  ;;  %v5837_v19 = vmax.f32 %v5645_v2, %v5653_v25  ;;  %v7345_v41 = vsel %vm7344_vm5, %v19991_v60, %v15277_v16  ;;  %v21523_v49 = vunpack.i.h.bf16 %v21521_v45  ;;  %v15321_v7 = vpop.permute.xlu0 %15320 }
 0x316   :  { %v2818_v26 = vsel %vm2755_vm10, %v19876_v21, %v21519_v63  ;;  %v2819_v58 = vsel %vm2755_vm10, %v19868_v51, %v21520_v6  ;;  %v20028_v21 = vmax.f32 %v5835_v27, 0.0  ;;  %v6425_v51 = vrot.slane %v5962_v61, %v18044_v43 }
 0x317   :  { %v2883_v10 = vsel %vm2820_vm11, %v2818_v26, %v21522_v59  ;;  %v2884_v33 = vsel %vm2820_vm11, %v2819_v58, %v21523_v49  ;;  %15395 = vrot.lane.b32.xlu1 %v15394_v40, %s16060_s16  ;;  %v15399_v47 = vpack.i.bf16 %v19201_v0, %v19972_v14  ;;  %vm7361_vm10 = vcmask 523264  }
 0x318   :  { %v2916_v28 = vpack.c.bf16 %v2884_v33, %v2883_v10  ;;  %v20039_v25 = vmax.f32 %v5836_v31, 0.0  ;;  %v20041_v8 = vmax.f32 %v5837_v19, 0.0  ;;  %v7346_v16 = vsel %vm7344_vm5, %v7330_v15, %v15278_v4 }
 0x319   :  { %v15283_v17 = vunpack.i.h.bf16 %v19915_v11  ;;  %vm21524_vm3 = vcmask 1044484   ;;  %15400 = vrot.lane.b32.xlu0 %v15399_v47, %s16061_s12  ;;  %v15282_v13 = vunpack.i.l.bf16 %v19915_v11  ;;  %vm7378_vm6 = vcmask 654336   ;;  %v15326_v11 = vpop.permute.xlu1 %15325  ;;  %v15331_v45 = vpop.permute.xlu0 %15330 }
 0x31a   :  { %v20046_v29 = vsel %vm21524_vm3, %v6425_v51, %v6727_v39  ;;  %13912 = vmatmul.mubr.msk.bf16.gmra.mrb[60].mxu0 %vm2944_vm12, %v2916_v28  ;;  %v15288_v0 = vunpack.i.h.bf16 %v19927_v3  ;;  %v6429_v14 = vrot.slane %v20028_v21, %v18044_v43  ;;  %v15287_v15 = vunpack.i.l.bf16 %v19927_v3  ;;  %vm21527_vm15 = vmmov %vm21524_vm3 }
 0x31b   :  { %v7363_v44 = vsel %vm7361_vm10, %v7346_v16, %v15283_v17  ;;  %vm7395_vm8 = vcmask 785408   ;;  %v7362_v39 = vsel %vm7361_vm10, %v7345_v41, %v15282_v13  ;;  %v15293_v2 = vunpack.i.h.bf16 %v19935_v55 }
 0x31c   :  { %v7380_v4 = vsel %vm7378_vm6, %v7363_v44, %v15288_v0  ;;  %v15292_v27 = vunpack.i.l.bf16 %v19935_v55  ;;  %v7379_v31 = vsel %vm7378_vm6, %v7362_v39, %v15287_v15  ;;  %v15298_v50 = vunpack.i.h.bf16 %v19950_v35 }
 0x31d   :  { %v15297_v63 = vunpack.i.l.bf16 %v19950_v35  ;;  %v15303_v26 = vunpack.i.h.bf16 %v19961_v23  ;;  %v7397_v61 = vsel %vm7395_vm8, %v7380_v4, %v15293_v2  ;;  %v15302_v6 = vunpack.i.l.bf16 %v19961_v23  ;;  %v15336_v47 = vpop.permute.xlu1 %15335 }
 0x31e   :  { %v7396_v3 = vsel %vm7395_vm8, %v7379_v31, %v15292_v27  ;;  %v15308_v58 = vunpack.i.h.bf16 %v19982_v20  ;;  %v15307_v59 = vunpack.i.l.bf16 %v19982_v20  ;;  %vm7412_vm12 = vcmask 916480  }
 0x31f   :  { %v7317_v55 = vsel %vm2560_vm7, %v18828_v53, %v15303_v26  ;;  %v15313_v10 = vunpack.i.h.bf16 %v19996_v18  ;;  %v7316_v35 = vsel %vm2560_vm7, %v18823_v37, %v15302_v6  ;;  %v7413_v19 = vsel %vm7412_vm12, %v7396_v3, %v15297_v63 }
 0x320   :  { %v7332_v40 = vsel %vm2820_vm11, %v7317_v55, %v15308_v58  ;;  %v7414_v23 = vsel %vm7412_vm12, %v7397_v61, %v15298_v50  ;;  %v7331_v41 = vsel %vm2820_vm11, %v7316_v35, %v15307_v59  ;;  %v15312_v33 = vunpack.i.l.bf16 %v19996_v18 }
 0x321   :  { %v7429_v49 = vpack.c.bf16 %v7414_v23, %v7413_v19  ;;  %v7348_v53 = vsel %vm7344_vm5, %v7332_v40, %v15313_v10  ;;  %v15318_v20 = vunpack.i.h.bf16 %v20026_v24  ;;  %v15317_v51 = vunpack.i.l.bf16 %v20026_v24  ;;  %v15341_v24 = vpop.permute.xlu0 %15340 }
 0x322   :  { %v7432_v37 = vpack.c.bf16 %v19462_v22, %v19360_v54  ;;  %v15323_v28 = vunpack.i.h.bf16 %v15321_v7  ;;  %v7347_v16 = vsel %vm7344_vm5, %v7331_v41, %v15312_v33  ;;  %v15322_v17 = vunpack.i.l.bf16 %v15321_v7 }
 0x323   :  { %7581 = vmatmul.mubr.bf16.vlgmr.msra.gmra.mrb[0].mxu1 %v7429_v49  ;;  %v15328_v13 = vunpack.i.h.bf16 %v15326_v11  ;;  %v15327_v0 = vunpack.i.l.bf16 %v15326_v11  ;;  %v7364_v44 = vsel %vm7361_vm10, %v7347_v16, %v15317_v51  ;;  %v7365_v18 = vsel %vm7361_vm10, %v7348_v53, %v15318_v20 }
 0x324   :  { %13132 = vmatprep.mubr.msk.bf16.mxu1 %vm2560_vm7, %v7432_v37  ;;  %v15333_v15 = vunpack.i.h.bf16 %v15331_v45  ;;  %v15332_v39 = vunpack.i.l.bf16 %v15331_v45  ;;  %v7381_v4 = vsel %vm7378_vm6, %v7364_v44, %v15322_v17  ;;  %v7382_v54 = vsel %vm7378_vm6, %v7365_v18, %v15323_v28 }
 0x325   :  { %v15338_v22 = vunpack.i.h.bf16 %v15336_v47  ;;  %v15337_v2 = vunpack.i.l.bf16 %v15336_v47  ;;  %v6433_v7 = vrot.slane %v20039_v25, %v18044_v43  ;;  %v6437_v27 = vrot.slane %v20041_v8, %v18044_v43 }
 0x326   :  { %v7398_v11 = vsel %vm7395_vm8, %v7381_v4, %v15327_v0  ;;  %v7399_v31 = vsel %vm7395_vm8, %v7382_v54, %v15328_v13  ;;  %v15343_v50 = vunpack.i.h.bf16 %v15341_v24  ;;  %v15342_v63 = vunpack.i.l.bf16 %v15341_v24 }
 0x327   :  { %v3232_v26 = vadd.f32 %v19891_v34, %v19733_v62  ;;  %v3224_v3 = vadd.f32 %v19891_v34, %v19736_v32  ;;  %v7319_v61 = vsel %vm2560_vm7, %v19373_v1, %v15338_v22  ;;  %v7318_v6 = vsel %vm2560_vm7, %v19322_v46, %v15337_v2 }
 0x328   :  { %v7415_v58 = vsel %vm7412_vm12, %v7398_v11, %v15332_v39  ;;  %v7416_v45 = vsel %vm7412_vm12, %v7399_v31, %v15333_v15  ;;  %v3235_v32 = vadd.f32 %v19891_v34, %v19741_v36  ;;  %v7434_v1 = vpack.c.bf16 %v19807_v57, %v19593_v38 }
 0x329   :  { %v4044_v55 = vcombine.high %v3232_v26, %v3232_v26  ;;  %v4051_v59 = vrot.slane %v3232_v26, %v17699_v56  ;;  %v4010_v10 = vcombine.high %v3224_v3, %v3224_v3  ;;  %v4017_v35 = vrot.slane %v3224_v3, %v17699_v56 }
 0x32a   :  { %v7431_v62 = vpack.c.bf16 %v7416_v45, %v7415_v58  ;;  %v3227_v46 = vadd.f32 %v19891_v34, %v19746_v12  ;;  %v4061_v53 = vcombine.high %v3235_v32, %v3235_v32  ;;  %v4068_v20 = vrot.slane %v3235_v32, %v17699_v56  ;;  %v15346_v32 = vpop.permute.xlu1 %15345 }
 0x32b   :  { %v4058_v40 = vrot.slane %v4044_v55, %v17699_v56  ;;  %v4059_v19 = vcombine.high %v4051_v59, %v4051_v59  ;;  %v13017_v23 = vrot.slane %v4051_v59, 9  ;;  %v4024_v41 = vrot.slane %v4010_v10, %v17699_v56 }
 0x32c   :  { %v4025_v49 = vcombine.high %v4017_v35, %v4017_v35  ;;  %v13009_v33 = vrot.slane %v4017_v35, 9  ;;  %7589 = vmatmul.mubr.bf16.gmra.mrb[4].mxu1 %v7431_v62  ;;  %v4075_v0 = vrot.slane %v4061_v53, %v17699_v56  ;;  %v4076_v4 = vcombine.high %v4068_v20, %v4068_v20 }
 0x32d   :  { %v4060_v51 = vcombine.high %v4058_v40, %v4058_v40  ;;  %v13018_v36 = vrot.slane %v4059_v19, 9  ;;  %v13019_v37 = vrot.slane %v4058_v40, 9  ;;  %v5662_v28 = vmax.f32 %v4051_v59, %v13017_v23  ;;  %13133 = vmatprep.mubr.msk.bf16.mxu1 %vm2560_vm7, %v7434_v1  ;;  %v15351_v1 = vpop.permute.xlu0 %15350 }
 0x32e   :  { %v4026_v38 = vcombine.high %v4024_v41, %v4024_v41  ;;  %v13010_v12 = vrot.slane %v4025_v49, 9  ;;  %v13011_v57 = vrot.slane %v4024_v41, 9  ;;  %v5654_v47 = vmax.f32 %v4017_v35, %v13009_v33 }
 0x32f   :  { %v13020_v16 = vrot.slane %v4060_v51, 9  ;;  %v5663_v17 = vmax.f32 %v4059_v19, %v13018_v36  ;;  %v5664_v13 = vmax.f32 %v4058_v40, %v13019_v37  ;;  %v4077_v54 = vcombine.high %v4075_v0, %v4075_v0 }
 0x330   :  { %v13012_v44 = vrot.slane %v4026_v38, 9  ;;  %v5655_v18 = vmax.f32 %v4025_v49, %v13010_v12  ;;  %v5656_v15 = vmax.f32 %v4024_v41, %v13011_v57  ;;  %v5838_v39 = vmax.f32 %v5654_v47, %v5662_v28 }
 0x331   :  { %v5665_v24 = vmax.f32 %v4060_v51, %v13020_v16  ;;  %v13021_v22 = vrot.slane %v4068_v20, 9  ;;  %v7333_v3 = vsel %vm2820_vm11, %v7318_v6, %v15342_v63  ;;  %v7334_v58 = vsel %vm2820_vm11, %v7319_v61, %v15343_v50 }
 0x332   :  { %v5657_v2 = vmax.f32 %v4026_v38, %v13012_v44  ;;  %v5839_v11 = vmax.f32 %v5655_v18, %v5663_v17  ;;  %v5840_v31 = vmax.f32 %v5656_v15, %v5664_v13  ;;  %v5966_v26 = vmax.f32 %v5838_v39, 0.0  ;;  %v20130_v44 = vpop.permute.xlu1 %15355 }
 0x333   :  { %v13022_v45 = vrot.slane %v4076_v4, 9  ;;  %v13023_v55 = vrot.slane %v4075_v0, 9  ;;  %v13024_v62 = vrot.slane %v4077_v54, 9  ;;  %v5666_v19 = vmax.f32 %v4068_v20, %v13021_v22 }
 0x334   :  { %v5841_v59 = vmax.f32 %v5657_v2, %v5665_v24  ;;  %v5967_v10 = vmax.f32 %v5839_v11, 0.0  ;;  %v5968_v35 = vmax.f32 %v5840_v31, 0.0  ;;  %v6441_v40 = vrot.slane %v5966_v26, %v18044_v43  ;;  %v20137_v11 = vpop.f32.mrb[44].mxu0 }
 0x335   :  { %v5667_v23 = vmax.f32 %v4076_v4, %v13022_v45  ;;  %v4027_v41 = vcombine.high %v3227_v46, %v3227_v46  ;;  %v4034_v50 = vrot.slane %v3227_v46, %v17699_v56  ;;  %v15348_v6 = vunpack.i.h.bf16 %v15346_v32 }
 0x336   :  { %v5969_v49 = vmax.f32 %v5841_v59, 0.0  ;;  %v6445_v33 = vrot.slane %v5967_v10, %v18044_v43  ;;  %v6449_v63 = vrot.slane %v5968_v35, %v18044_v43  ;;  %v15347_v53 = vunpack.i.l.bf16 %v15346_v32 }
 0x337   :  { %v4041_v61 = vrot.slane %v4027_v41, %v17699_v56  ;;  %v15353_v51 = vunpack.i.h.bf16 %v15351_v1  ;;  %v4042_v28 = vcombine.high %v4034_v50, %v4034_v50  ;;  %v13013_v20 = vrot.slane %v4034_v50, 9 }
 0x338   :  { %v6453_v36 = vrot.slane %v5969_v49, %v18044_v43  ;;  %v6732_v37 = vsel %vm6662_vm13, %v6445_v33, %v6441_v40  ;;  %v5668_v12 = vmax.f32 %v4075_v0, %v13023_v55  ;;  %v5669_v16 = vmax.f32 %v4077_v54, %v13024_v62  ;;  %v20142_v55 = vpop.f32.mrb[45].mxu0 }
 0x339   :  { %v6733_v38 = vsel %vm21525_vm14, %v6449_v63, %v6732_v37  ;;  %v4043_v57 = vcombine.high %v4041_v61, %v4041_v61  ;;  %v13015_v47 = vrot.slane %v4041_v61, 9  ;;  %v13014_v17 = vrot.slane %v4042_v28, 9  ;;  %v20148_v35 = vpop.f32.mrb[46].mxu0 }
 0x33a   :  { %v5658_v13 = vmax.f32 %v4034_v50, %v13013_v20  ;;  %v6734_v46 = vsel %vm21526_vm9, %v6453_v36, %v6733_v38  ;;  %v7350_v39 = vsel %vm7344_vm5, %v7334_v58, %v15348_v6  ;;  %v15352_v24 = vunpack.i.l.bf16 %v15351_v1 }
 0x33b   :  { %v13016_v18 = vrot.slane %v4043_v57, 9  ;;  %v5660_v15 = vmax.f32 %v4041_v61, %v13015_v47  ;;  %v5659_v4 = vmax.f32 %v4042_v28, %v13014_v17  ;;  %v7349_v2 = vsel %vm7344_vm5, %v7333_v3, %v15347_v53 }
 0x33c   :  { %v5842_v22 = vmax.f32 %v5658_v13, %v5666_v19  ;;  %v20135_v0 = vsel %vm7361_vm10, %v7350_v39, %v15353_v51  ;;  %v15358_v26 = vunpack.i.h.bf16 %v20130_v44  ;;  %v3248_v45 = vadd.f32 %v19891_v34, %v19988_v52  ;;  %v20151_v19 = vpop.f32.mrb[47].mxu0 }
 0x33d   :  { %v5661_v54 = vmax.f32 %v4043_v57, %v13016_v18  ;;  %v5844_v31 = vmax.f32 %v5660_v15, %v5668_v12  ;;  %v5843_v58 = vmax.f32 %v5659_v4, %v5667_v23  ;;  %v20145_v10 = vsel %vm7361_vm10, %v7349_v2, %v15352_v24 }
 0x33e   :  { %v5970_v59 = vmax.f32 %v5842_v22, 0.0  ;;  %v15357_v3 = vunpack.i.l.bf16 %v20130_v44  ;;  %v4112_v1 = vcombine.high %v3248_v45, %v3248_v45  ;;  %v4119_v40 = vrot.slane %v3248_v45, %v17699_v56 }
 0x33f   :  { %v5845_v62 = vmax.f32 %v5661_v54, %v5669_v16  ;;  %v5972_v32 = vmax.f32 %v5844_v31, 0.0  ;;  %v5971_v41 = vmax.f32 %v5843_v58, 0.0  ;;  %v3240_v23 = vadd.f32 %v19891_v34, %v19998_v9 }
 0x340   :  { %v6457_v52 = vrot.slane %v5970_v59, %v18044_v43  ;;  %v6729_v49 = vsel %vm6670_vm2, %v6429_v14, %v20046_v29  ;;  %v4126_v50 = vrot.slane %v4112_v1, %v17699_v56  ;;  %v4127_v61 = vcombine.high %v4119_v40, %v4119_v40 }
 0x341   :  { %v5973_v33 = vmax.f32 %v5845_v62, 0.0  ;;  %v6465_v63 = vrot.slane %v5972_v32, %v18044_v43  ;;  %v6461_v6 = vrot.slane %v5971_v41, %v18044_v43  ;;  %v13033_v51 = vrot.slane %v4119_v40, 9 }
 0x342   :  { %v6735_v53 = vsel %vm21527_vm15, %v6457_v52, %v6734_v46  ;;  %v4078_v36 = vcombine.high %v3240_v23, %v3240_v23  ;;  %v4128_v37 = vcombine.high %v4126_v50, %v4126_v50  ;;  %v13034_v28 = vrot.slane %v4127_v61, 9 }
 0x343   :  { %v6469_v9 = vrot.slane %v5973_v33, %v18044_v43  ;;  %v13035_v20 = vrot.slane %v4126_v50, 9  ;;  %v6736_v21 = vsel %vm6670_vm2, %v6461_v6, %v6735_v53  ;;  %v5678_v29 = vmax.f32 %v4119_v40, %v13033_v51 }
 0x344   :  { %v4085_v14 = vrot.slane %v3240_v23, %v17699_v56  ;;  %v4092_v38 = vrot.slane %v4078_v36, %v17699_v56  ;;  %v13036_v12 = vrot.slane %v4128_v37, 9  ;;  %v5679_v57 = vmax.f32 %v4127_v61, %v13034_v28 }
 0x345   :  { %v5680_v47 = vmax.f32 %v4126_v50, %v13035_v20  ;;  %vm21528_vm4 = vcmask 1046534   ;;  %vm21529_vm3 = vcmask 1047559   ;;  %v3251_v4 = vadd.f32 %v19891_v34, %v20003_v30 }
 0x346   :  { %v6730_v16 = vsel %vm21528_vm4, %v6433_v7, %v6729_v49  ;;  %v4093_v17 = vcombine.high %v4085_v14, %v4085_v14  ;;  %v4094_v13 = vcombine.high %v4092_v38, %v4092_v38  ;;  %v13025_v46 = vrot.slane %v4085_v14, 9  ;;  %vm21530_vm14 = vmmov %vm21528_vm4 }
 0x347   :  { %v13027_v18 = vrot.slane %v4092_v38, 9  ;;  %v5681_v15 = vmax.f32 %v4128_v37, %v13036_v12  ;;  %v6731_v39 = vsel %vm21529_vm3, %v6437_v27, %v6730_v16  ;;  %v6737_v24 = vsel %vm21530_vm14, %v6465_v63, %v6736_v21  ;;  %vm21531_vm9 = vmmov %vm21529_vm3 }
 0x348   :  { %v13026_v22 = vrot.slane %v4093_v17, 9  ;;  %v13028_v2 = vrot.slane %v4094_v13, 9  ;;  %v5670_v25 = vmax.f32 %v4085_v14, %v13025_v46  ;;  %v6738_v7 = vsel %vm21531_vm9, %v6469_v9, %v6737_v24 }
 0x349   :  { %v5672_v54 = vmax.f32 %v4092_v38, %v13027_v18  ;;  %v6789_v31 = vrot.slane %v6731_v39, 7  ;;  %v4129_v45 = vcombine.high %v3251_v4, %v3251_v4  ;;  %v4136_v58 = vrot.slane %v3251_v4, %v17699_v56 }
 0x34a   :  { %v5671_v59 = vmax.f32 %v4093_v17, %v13026_v22  ;;  %v5673_v62 = vmax.f32 %v4094_v13, %v13028_v2  ;;  %v5846_v8 = vmax.f32 %v5670_v25, %v5678_v29  ;;  %v6790_v27 = vrot.slane %v6738_v7, 7  ;;  %v15361_v4 = vpop.permute.xlu0 %15360 }
 0x34b   :  { %v5848_v32 = vmax.f32 %v5672_v54, %v5680_v47  ;;  %v20183_v1 = vsel %vm204_vm0, 0.0, %v6789_v31  ;;  %v6837_v30 = vsel %vm204_vm0, %v6789_v31, 0.0  ;;  %v4143_v40 = vrot.slane %v4129_v45, %v17699_v56 }
 0x34c   :  { %v5847_v41 = vmax.f32 %v5671_v59, %v5679_v57  ;;  %v5849_v52 = vmax.f32 %v5673_v62, %v5681_v15  ;;  %v5974_v23 = vmax.f32 %v5846_v8, 0.0  ;;  %v20188_v33 = vsel %vm204_vm0, 0.0, %v6790_v27 }
 0x34d   :  { %v5976_v49 = vmax.f32 %v5848_v32, 0.0  ;;  %v6838_v63 = vsel %vm204_vm0, %v6790_v27, 0.0  ;;  %v6938_v50 = vrot.slane %v20183_v1, 2  ;;  %v6939_v61 = vrot.slane %v6837_v30, 2 }
 0x34e   :  { %v5975_v6 = vmax.f32 %v5847_v41, 0.0  ;;  %v5977_v53 = vmax.f32 %v5849_v52, 0.0  ;;  %v6473_v51 = vrot.slane %v5974_v23, %v18044_v43  ;;  %v6941_v37 = vrot.slane %v20188_v33, 2 }
 0x34f   :  { %v6481_v36 = vrot.slane %v5976_v49, %v18044_v43  ;;  %v6940_v9 = vsel %vm683_vm1, %v6938_v50, %v6939_v61  ;;  %v6942_v28 = vrot.slane %v6838_v63, 2  ;;  %v6895_v20 = vrot.slane %v20183_v1, 1 }
 0x350   :  { %v6477_v21 = vrot.slane %v5975_v6, %v18044_v43  ;;  %v6485_v29 = vrot.slane %v5977_v53, %v18044_v43  ;;  %v6896_v14 = vrot.slane %v6837_v30, 1  ;;  %v6898_v38 = vrot.slane %v20188_v33, 1 }
 0x351   :  { %v20201_v12 = vsel %vm683_vm1, %v6941_v37, %v6942_v28  ;;  %v6899_v57 = vrot.slane %v6838_v63, 1  ;;  %v4144_v47 = vcombine.high %v4136_v58, %v4136_v58  ;;  %v4145_v16 = vcombine.high %v4143_v40, %v4143_v40 }
 0x352   :  { %v6739_v17 = vsel %vm6662_vm13, %v6477_v21, %v6473_v51  ;;  %v15424_v13 = vpack.i.bf16 %v20201_v12, %v6940_v9  ;;  %vm21532_vm15 = vcmask 1046528   ;;  %vm21533_vm4 = vcmask 1042434  }
 0x353   :  { %v6897_v46 = vsel %vm21532_vm15, %v6895_v20, %v6896_v14  ;;  %v6740_v18 = vsel %vm21533_vm4, %v6481_v36, %v6739_v17  ;;  %vm21534_vm3 = vmmov %vm21532_vm15  ;;  %v13037_v39 = vrot.slane %v4136_v58, 9  ;;  %v13038_v24 = vrot.slane %v4144_v47, 9 }
 0x354   :  { %v20208_v15 = vsel %vm21534_vm3, %v6898_v38, %v6899_v57  ;;  %15410 = vrot.lane.b32.xlu0 %v15424_v13, %s16045_s20  ;;  %v13039_v2 = vrot.slane %v4143_v40, 9  ;;  %v13040_v25 = vrot.slane %v4145_v16, 9  ;;  %v7383_v54 = vsel %vm7378_vm6, %v20145_v10, %v15357_v3 }
 0x355   :  { %v15419_v22 = vpack.i.bf16 %v20208_v15, %v6897_v46  ;;  %v7384_v7 = vsel %vm7378_vm6, %v20135_v0, %v15358_v26  ;;  %v3243_v31 = vadd.f32 %v19891_v34, %v20009_v48  ;;  %vm21535_vm14 = vcmask 1043459   ;;  %v21536_v48 = vld [vmem:[#allocation39_spill] sm:$0xff] }
 0x356   :  { %v6741_v45 = vsel %vm21535_vm14, %v6485_v29, %v6740_v18  ;;  %v5682_v59 = vmax.f32 %v4136_v58, %v13037_v39  ;;  %v5683_v62 = vmax.f32 %v4144_v47, %v13038_v24  ;;  %v5684_v8 = vmax.f32 %v4143_v40, %v13039_v2 }
 0x357   :  { %15405 = vrot.lane.b32.xlu1 %v15419_v22, %s16048_s28  ;;  %v15363_v32 = vunpack.i.h.bf16 %v15361_v4  ;;  %v5685_v27 = vmax.f32 %v4145_v16, %v13040_v25  ;;  %v4095_v30 = vcombine.high %v3243_v31, %v3243_v31  ;;  %v4102_v10 = vrot.slane %v3243_v31, %v17699_v56 }
 0x358   :  { %v15414_v44 = vpack.i.bf16 %v20188_v33, %v20183_v1  ;;  %15420 = vrot.lane.b32.xlu0 %v15419_v22, %s16058_s14  ;;  %v15362_v0 = vunpack.i.l.bf16 %v15361_v4  ;;  %v7436_v26 = vpack.c.bf16 %v21536_v48, %v20001_v5  ;;  %v3264_v3 = vadd.f32 %v19891_v34, %v20137_v11 }
 0x359   :  { %v3256_v58 = vadd.f32 %v19891_v34, %v20142_v55  ;;  %v4109_v40 = vrot.slane %v4095_v30, %v17699_v56  ;;  %v4110_v41 = vcombine.high %v4102_v10, %v4102_v10  ;;  %v13029_v52 = vrot.slane %v4102_v10, 9 }
 0x35a   :  { %v7401_v23 = vsel %vm7395_vm8, %v7384_v7, %v15363_v32  ;;  %v4180_v49 = vcombine.high %v3264_v3, %v3264_v3  ;;  %v4187_v63 = vrot.slane %v3264_v3, %v17699_v56  ;;  %v20240_v61 = vadd.f32 %v19891_v34, %v20148_v35 }
 0x35b   :  { %15415 = vrot.lane.b32.xlu1 %v15414_v44, %s16057_s0  ;;  %v4146_v50 = vcombine.high %v3256_v58, %v3256_v58  ;;  %v4111_v11 = vcombine.high %v4109_v40, %v4109_v40  ;;  %v13030_v6 = vrot.slane %v4110_v41, 9  ;;  %v13031_v53 = vrot.slane %v4109_v40, 9  ;;  %v15366_v46 = vpop.permute.xlu1 %15365 }
 0x35c   :  { %v5674_v55 = vmax.f32 %v4102_v10, %v13029_v52  ;;  %v7400_v51 = vsel %vm7395_vm8, %v7383_v54, %v15362_v0  ;;  %v4194_v36 = vrot.slane %v4180_v49, %v17699_v56  ;;  %v4195_v9 = vcombine.high %v4187_v63, %v4187_v63  ;;  %v15371_v24 = vpop.permute.xlu0 %15370 }
 0x35d   :  { %v4153_v37 = vrot.slane %v3256_v58, %v17699_v56  ;;  %v13032_v28 = vrot.slane %v4111_v11, 9  ;;  %v5675_v20 = vmax.f32 %v4110_v41, %v13030_v6  ;;  %v5676_v21 = vmax.f32 %v4109_v40, %v13031_v53  ;;  %v21538_v41 = vld [vmem:[#allocation29_spill] sm:$0xff] }
 0x35e   :  { %v5850_v29 = vmax.f32 %v5674_v55, %v5682_v59  ;;  %v4196_v14 = vcombine.high %v4194_v36, %v4194_v36  ;;  %v13049_v34 = vrot.slane %v4187_v63, 9  ;;  %v13050_v35 = vrot.slane %v4195_v9, 9 }
 0x35f   :  { %15425 = vrot.lane.b32.xlu1 %v15424_v13, %s16059_s15  ;;  %v4160_v38 = vrot.slane %v4146_v50, %v17699_v56  ;;  %v5677_v57 = vmax.f32 %v4111_v11, %v13032_v28  ;;  %v5851_v47 = vmax.f32 %v5675_v20, %v5683_v62  ;;  %v5852_v16 = vmax.f32 %v5676_v21, %v5684_v8 }
 0x360   :  { %v5978_v17 = vmax.f32 %v5850_v29, 0.0  ;;  %v15368_v18 = vunpack.i.h.bf16 %v15366_v46  ;;  %v15367_v39 = vunpack.i.l.bf16 %v15366_v46  ;;  %v13051_v4 = vrot.slane %v4194_v36, 9 }
 0x361   :  { %v13052_v22 = vrot.slane %v4196_v14, 9  ;;  %v5853_v2 = vmax.f32 %v5677_v57, %v5685_v27  ;;  %v5979_v25 = vmax.f32 %v5851_v47, 0.0  ;;  %v5980_v54 = vmax.f32 %v5852_v16, 0.0 }
 0x362   :  { %v6489_v13 = vrot.slane %v5978_v17, %v18044_v43  ;;  %v15373_v7 = vunpack.i.h.bf16 %v15371_v24  ;;  %v15372_v31 = vunpack.i.l.bf16 %v15371_v24  ;;  %v7417_v59 = vsel %vm7412_vm12, %v7400_v51, %v15367_v39 }
 0x363   :  { %v7418_v32 = vsel %vm7412_vm12, %v7401_v23, %v15368_v18  ;;  %v5981_v62 = vmax.f32 %v5853_v2, 0.0  ;;  %v6493_v8 = vrot.slane %v5979_v25, %v18044_v43  ;;  %vm21537_vm9 = vcmask 1044484   ;;  %v15376_v23 = vpop.permute.xlu1 %15375  ;;  %v13901_v57 = vpop.f32.mrb[48].mxu0 }
 0x364   :  { %v6742_v30 = vsel %vm21537_vm9, %v6489_v13, %v6741_v45  ;;  %v5694_v10 = vmax.f32 %v4187_v63, %v13049_v34  ;;  %v6497_v44 = vrot.slane %v5980_v54, %v18044_v43  ;;  %v7321_v27 = vsel %vm2560_vm7, %v19712_v42, %v15373_v7 }
 0x365   :  { %v7433_v0 = vpack.c.bf16 %v7418_v32, %v7417_v59  ;;  %v5695_v3 = vmax.f32 %v4195_v9, %v13050_v35  ;;  %v6501_v58 = vrot.slane %v5981_v62, %v18044_v43  ;;  %v6743_v40 = vsel %vm6670_vm2, %v6493_v8, %v6742_v30 }
 0x366   :  { %v7320_v52 = vsel %vm2560_vm7, %v21538_v41, %v15372_v31  ;;  %v4161_v49 = vcombine.high %v4153_v37, %v4153_v37  ;;  %vm21539_vm15 = vcmask 1046534   ;;  %v5696_v45 = vmax.f32 %v4194_v36, %v13051_v4  ;;  %v20295_v41 = vld [vmem:[%s21205_s2] ss:$0 sm:$0xff] }
 0x367   :  { %v6744_v50 = vsel %vm21539_vm15, %v6497_v44, %v6743_v40  ;;  %7597 = vmatmul.mubr.bf16.gmra.mrb[8].mxu1 %v7433_v0  ;;  %v5697_v63 = vmax.f32 %v4196_v14, %v13052_v22  ;;  %v4162_v11 = vcombine.high %v4160_v38, %v4160_v38  ;;  %vm21540_vm4 = vcmask 1047559  }
 0x368   :  { %v6745_v6 = vsel %vm21540_vm4, %v6501_v58, %v6744_v50  ;;  %13134 = vmatprep.mubr.msk.bf16.mxu1 %vm2560_vm7, %v7436_v26  ;;  %v13041_v42 = vrot.slane %v4153_v37, 9  ;;  %v13042_v53 = vrot.slane %v4161_v49, 9  ;;  %v13043_v55 = vrot.slane %v4160_v38, 9 }
 0x369   :  { %v15378_v51 = vunpack.i.h.bf16 %v15376_v23  ;;  %v15377_v9 = vunpack.i.l.bf16 %v15376_v23  ;;  %v6791_v28 = vrot.slane %v6745_v6, 7  ;;  %v13044_v20 = vrot.slane %v4162_v11, 9 }
 0x36a   :  { %v5686_v21 = vmax.f32 %v4153_v37, %v13041_v42  ;;  %v5687_v29 = vmax.f32 %v4161_v49, %v13042_v53  ;;  %v5688_v34 = vmax.f32 %v4160_v38, %v13043_v55  ;;  %v4197_v36 = vcombine.high %v20240_v61, %v20240_v61  ;;  %v3271_v38 = vpop.f32.mrb[49].mxu0 }
 0x36b   :  { %v20268_v14 = vsel %vm204_vm0, 0.0, %v6791_v28  ;;  %v5689_v35 = vmax.f32 %v4162_v11, %v13044_v20  ;;  %v6839_v5 = vsel %vm204_vm0, %v6791_v28, 0.0  ;;  %v4204_v26 = vrot.slane %v20240_v61, %v17699_v56  ;;  %v13902_v4 = vpop.f32.mrb[50].mxu0 }
 0x36c   :  { %v15429_v47 = vpack.i.bf16 %v20268_v14, %v20188_v33  ;;  %v5854_v16 = vmax.f32 %v5686_v21, %v5694_v10  ;;  %v5855_v37 = vmax.f32 %v5687_v29, %v5695_v3  ;;  %v5856_v17 = vmax.f32 %v5688_v34, %v5696_v45  ;;  %v3274_v54 = vpop.f32.mrb[51].mxu0 }
 0x36d   :  { %v5857_v46 = vmax.f32 %v5689_v35, %v5697_v63  ;;  %v6901_v18 = vrot.slane %v20268_v14, 1  ;;  %v6902_v39 = vrot.slane %v6839_v5, 1  ;;  %v4211_v24 = vrot.slane %v4197_v36, %v17699_v56 }
 0x36e   :  { %15430 = vrot.lane.b32.xlu0 %v15429_v47, %s16060_s16  ;;  %v5982_v22 = vmax.f32 %v5854_v16, 0.0  ;;  %v5983_v2 = vmax.f32 %v5855_v37, 0.0  ;;  %v5984_v61 = vmax.f32 %v5856_v17, 0.0  ;;  %v4212_v25 = vcombine.high %v4204_v26, %v4204_v26 }
 0x36f   :  { %v5985_v13 = vmax.f32 %v5857_v46, 0.0  ;;  %v20279_v7 = vsel %vm21534_vm3, %v6901_v18, %v6902_v39  ;;  %v4213_v31 = vcombine.high %v4211_v24, %v4211_v24  ;;  %v13053_v59 = vrot.slane %v4204_v26, 9 }
 0x370   :  { %v6505_v32 = vrot.slane %v5982_v22, %v18044_v43  ;;  %v6509_v62 = vrot.slane %v5983_v2, %v18044_v43  ;;  %v6513_v8 = vrot.slane %v5984_v61, %v18044_v43  ;;  %v15434_v30 = vpack.i.bf16 %v20279_v7, %v20208_v15 }
 0x371   :  { %v6517_v10 = vrot.slane %v5985_v13, %v18044_v43  ;;  %v13054_v44 = vrot.slane %v4212_v25, 9  ;;  %v13055_v0 = vrot.slane %v4211_v24, 9  ;;  %v13056_v3 = vrot.slane %v4213_v31, 9 }
 0x372   :  { %v7336_v58 = vsel %vm2820_vm11, %v7321_v27, %v15378_v51  ;;  %v6746_v40 = vsel %vm6662_vm13, %v6509_v62, %v6505_v32  ;;  %15435 = vrot.lane.b32.xlu1 %v15434_v30, %s16061_s12  ;;  %7010 = vrot.lane.b32.xlu0 %v20279_v7, %s16048_s28  ;;  %v3259_v15 = vadd.f32 %v20295_v41, %v20151_v19  ;;  %v6944_v23 = vrot.slane %v20268_v14, 2  ;;  %v15381_v21 = vpop.permute.xlu0 %15380 }
 0x373   :  { %v7335_v49 = vsel %vm2820_vm11, %v7320_v52, %v15377_v9  ;;  %vm21541_vm14 = vcmask 1042434   ;;  %v5698_v50 = vmax.f32 %v4204_v26, %v13053_v59  ;;  %v5699_v45 = vmax.f32 %v4212_v25, %v13054_v44 }
 0x374   :  { %v6747_v27 = vsel %vm21541_vm14, %v6513_v8, %v6746_v40  ;;  %v4163_v63 = vcombine.high %v3259_v15, %v3259_v15  ;;  %v4170_v11 = vrot.slane %v3259_v15, %v17699_v56  ;;  %vm21542_vm9 = vcmask 1043459  }
 0x375   :  { %v6748_v6 = vsel %vm21542_vm9, %v6517_v10, %v6747_v27  ;;  %v6945_v42 = vrot.slane %v6839_v5, 2  ;;  %v5700_v53 = vmax.f32 %v4211_v24, %v13055_v0  ;;  %v5701_v55 = vmax.f32 %v4213_v31, %v13056_v3 }
 0x376   :  { %v3280_v51 = vadd.f32 %v20295_v41, %v13901_v57  ;;  %v3272_v19 = vadd.f32 %v20295_v41, %v3271_v38  ;;  %v4177_v28 = vrot.slane %v4163_v63, %v17699_v56  ;;  %v4178_v20 = vcombine.high %v4170_v11, %v4170_v11 }
 0x377   :  { %v13045_v52 = vrot.slane %v4170_v11, 9  ;;  %v20308_v9 = vsel %vm683_vm1, %v6944_v23, %v6945_v42  ;;  %v20315_v36 = vadd.f32 %v20295_v41, %v13902_v4  ;;  %v20318_v35 = vadd.f32 %v20295_v41, %v3274_v54 }
 0x378   :  { %v7438_v29 = vpack.c.bf16 %v20308_v9, %v20201_v12  ;;  %7055 = vrot.lane.b32.xlu1 %v20308_v9, %s16045_s20  ;;  %v4248_v34 = vcombine.high %v3280_v51, %v3280_v51  ;;  %v4179_v5 = vcombine.high %v4177_v28, %v4177_v28  ;;  %v13046_v26 = vrot.slane %v4178_v20, 9 }
 0x379   :  { %v13047_v57 = vrot.slane %v4177_v28, 9  ;;  %v5690_v47 = vmax.f32 %v4170_v11, %v13045_v52  ;;  %v15383_v16 = vunpack.i.h.bf16 %v15381_v21  ;;  %v15382_v37 = vunpack.i.l.bf16 %v15381_v21 }
 0x37a   :  { %v4255_v17 = vrot.slane %v3280_v51, %v17699_v56  ;;  %v4262_v38 = vrot.slane %v4248_v34, %v17699_v56  ;;  %v13048_v46 = vrot.slane %v4179_v5, 9  ;;  %v5691_v18 = vmax.f32 %v4178_v20, %v13046_v26 }
 0x37b   :  { %v5692_v39 = vmax.f32 %v4177_v28, %v13047_v57  ;;  %v5858_v24 = vmax.f32 %v5690_v47, %v5698_v50  ;;  %v7351_v59 = vsel %vm7344_vm5, %v7335_v49, %v15382_v37  ;;  %v7352_v32 = vsel %vm7344_vm5, %v7336_v58, %v15383_v16 }
 0x37c   :  { %v4263_v22 = vcombine.high %v4255_v17, %v4255_v17  ;;  %v4264_v4 = vcombine.high %v4262_v38, %v4262_v38  ;;  %v13065_v2 = vrot.slane %v4255_v17, 9  ;;  %v13067_v61 = vrot.slane %v4262_v38, 9 }
 0x37d   :  { %v5693_v25 = vmax.f32 %v4179_v5, %v13048_v46  ;;  %v5859_v54 = vmax.f32 %v5691_v18, %v5699_v45  ;;  %v5860_v13 = vmax.f32 %v5692_v39, %v5700_v53  ;;  %v5986_v31 = vmax.f32 %v5858_v24, 0.0 }
 0x37e   :  { %v13066_v62 = vrot.slane %v4263_v22, 9  ;;  %v13068_v8 = vrot.slane %v4264_v4, 9  ;;  %v5710_v3 = vmax.f32 %v4255_v17, %v13065_v2  ;;  %v5712_v40 = vmax.f32 %v4262_v38, %v13067_v61 }
 0x37f   :  { %v5861_v30 = vmax.f32 %v5693_v25, %v5701_v55  ;;  %v5987_v10 = vmax.f32 %v5859_v54, 0.0  ;;  %v5988_v44 = vmax.f32 %v5860_v13, 0.0  ;;  %v6521_v0 = vrot.slane %v5986_v31, %v18044_v43 }
 0x380   :  { %v4214_v15 = vcombine.high %v3272_v19, %v3272_v19  ;;  %v4221_v23 = vrot.slane %v3272_v19, %v17699_v56  ;;  %vm21543_vm15 = vcmask 1044484   ;;  %v5711_v49 = vmax.f32 %v4263_v22, %v13066_v62 }
 0x381   :  { %v5989_v27 = vmax.f32 %v5861_v30, 0.0  ;;  %v6525_v50 = vrot.slane %v5987_v10, %v18044_v43  ;;  %v6749_v45 = vsel %vm21543_vm15, %v6521_v0, %v6748_v6  ;;  %v6529_v58 = vrot.slane %v5988_v44, %v18044_v43  ;;  %v15386_v34 = vpop.permute.xlu1 %15385 }
 0x382   :  { %v4228_v63 = vrot.slane %v4214_v15, %v17699_v56  ;;  %v4229_v11 = vcombine.high %v4221_v23, %v4221_v23  ;;  %v13057_v42 = vrot.slane %v4221_v23, 9  ;;  %v4265_v51 = vcombine.high %v20315_v36, %v20315_v36 }
 0x383   :  { %v6533_v53 = vrot.slane %v5989_v27, %v18044_v43  ;;  %v6750_v55 = vsel %vm6670_vm2, %v6525_v50, %v6749_v45  ;;  %v20336_v19 = vrot.slane %v20315_v36, %v17699_v56  ;;  %vm21544_vm4 = vcmask 1046534  }
 0x384   :  { %v6751_v6 = vsel %vm21544_vm4, %v6529_v58, %v6750_v55  ;;  %v4230_v28 = vcombine.high %v4228_v63, %v4228_v63  ;;  %v13058_v20 = vrot.slane %v4229_v11, 9  ;;  %v13059_v52 = vrot.slane %v4228_v63, 9 }
 0x385   :  { %vm21545_vm3 = vcmask 1047559   ;;  %v5713_v5 = vmax.f32 %v4264_v4, %v13068_v8  ;;  %v5702_v26 = vmax.f32 %v4221_v23, %v13057_v42  ;;  %v4231_v57 = vcombine.high %v20318_v35, %v20318_v35 }
 0x386   :  { %v6752_v21 = vsel %vm21545_vm3, %v6533_v53, %v6751_v6  ;;  %v15388_v16 = vunpack.i.h.bf16 %v15386_v34  ;;  %v15387_v37 = vunpack.i.l.bf16 %v15386_v34  ;;  %v13060_v17 = vrot.slane %v4230_v28, 9 }
 0x387   :  { %v6792_v47 = vrot.slane %v6752_v21, 7  ;;  %v5703_v38 = vmax.f32 %v4229_v11, %v13058_v20  ;;  %v5704_v36 = vmax.f32 %v4228_v63, %v13059_v52  ;;  %v5862_v46 = vmax.f32 %v5702_v26, %v5710_v3  ;;  %v15391_v13 = vpop.permute.xlu0 %15390 }
 0x388   :  { %v4279_v18 = vrot.slane %v4265_v51, %v17699_v56  ;;  %v7368_v22 = vsel %vm7361_vm10, %v7351_v59, %v15387_v37  ;;  %v4280_v4 = vcombine.high %v20336_v19, %v20336_v19  ;;  %v7369_v25 = vsel %vm7361_vm10, %v7352_v32, %v15388_v16 }
 0x389   :  { %v20344_v39 = vsel %vm204_vm0, 0.0, %v6792_v47  ;;  %v20347_v24 = vsel %vm204_vm0, %v6792_v47, 0.0  ;;  %v5705_v54 = vmax.f32 %v4230_v28, %v13060_v17  ;;  %v5863_v31 = vmax.f32 %v5703_v38, %v5711_v49  ;;  %v20362_v15 = vpop.permute.xlu1 %15395 }
 0x38a   :  { %v6947_v2 = vrot.slane %v20344_v39, 2  ;;  %v6948_v61 = vrot.slane %v20347_v24, 2  ;;  %v5864_v62 = vmax.f32 %v5704_v36, %v5712_v40  ;;  %v5990_v8 = vmax.f32 %v5862_v46, 0.0 }
 0x38b   :  { %v15439_v30 = vpack.i.bf16 %v20344_v39, %v20268_v14  ;;  %v15393_v59 = vunpack.i.h.bf16 %v15391_v13  ;;  %v15392_v44 = vunpack.i.l.bf16 %v15391_v13  ;;  %v5865_v0 = vmax.f32 %v5705_v54, %v5713_v5  ;;  %v20370_v63 = vpop.permute.xlu0 %15400 }
 0x38c   :  { %v20358_v10 = vsel %vm683_vm1, %v6947_v2, %v6948_v61  ;;  %v5991_v32 = vmax.f32 %v5863_v31, 0.0  ;;  %v5992_v23 = vmax.f32 %v5864_v62, 0.0  ;;  %v4281_v40 = vcombine.high %v4279_v18, %v4279_v18 }
 0x38d   :  { %v15449_v3 = vpack.i.bf16 %v20358_v10, %v20308_v9  ;;  %15440 = vrot.lane.b32.xlu0 %v15439_v30, %s16057_s0  ;;  %v7385_v27 = vsel %vm7378_vm6, %v7368_v22, %v15392_v44  ;;  %v15398_v50 = vunpack.i.h.bf16 %v20362_v15  ;;  %v15397_v45 = vunpack.i.l.bf16 %v20362_v15 }
 0x38e   :  { %v6537_v49 = vrot.slane %v5990_v8, %v18044_v43  ;;  %v7386_v58 = vsel %vm7378_vm6, %v7369_v25, %v15393_v59  ;;  %v5993_v11 = vmax.f32 %v5865_v0, 0.0  ;;  %v6541_v42 = vrot.slane %v5991_v32, %v18044_v43 }
 0x38f   :  { %v6545_v53 = vrot.slane %v5992_v23, %v18044_v43  ;;  %v7402_v55 = vsel %vm7395_vm8, %v7385_v27, %v15397_v45  ;;  %v7403_v51 = vsel %vm7395_vm8, %v7386_v58, %v15398_v50  ;;  %v15403_v6 = vunpack.i.h.bf16 %v20370_v63 }
 0x390   :  { %v15402_v28 = vunpack.i.l.bf16 %v20370_v63  ;;  %v6549_v20 = vrot.slane %v5993_v11, %v18044_v43  ;;  %v6753_v52 = vsel %vm6662_vm13, %v6541_v42, %v6537_v49  ;;  %v13069_v21 = vrot.slane %v20336_v19, 9 }
 0x391   :  { %15450 = vrot.lane.b32.xlu0 %v15449_v3, %s16059_s15  ;;  %v6754_v34 = vsel %vm21541_vm14, %v6545_v53, %v6753_v52  ;;  %v13071_v5 = vrot.slane %v4279_v18, 9  ;;  %v6905_v47 = vrot.slane %v20347_v24, 1  ;;  %v13070_v16 = vrot.slane %v4280_v4, 9  ;;  %v13905_v3 = vpop.f32.mrb[52].mxu0 }
 0x392   :  { %v7419_v26 = vsel %vm7412_vm12, %v7402_v55, %v15402_v28  ;;  %v7420_v37 = vsel %vm7412_vm12, %v7403_v51, %v15403_v6  ;;  %v4238_v17 = vrot.slane %v20318_v35, %v17699_v56  ;;  %v13072_v38 = vrot.slane %v4281_v40, 9  ;;  %v3287_v9 = vpop.f32.mrb[53].mxu0 }
 0x393   :  { %v7435_v36 = vpack.c.bf16 %v7420_v37, %v7419_v26  ;;  %v4245_v46 = vrot.slane %v4231_v57, %v17699_v56  ;;  %v6755_v22 = vsel %vm21542_vm9, %v6549_v20, %v6754_v34  ;;  %v5714_v2 = vmax.f32 %v20336_v19, %v13069_v21 }
 0x394   :  { %v4246_v61 = vcombine.high %v4238_v17, %v4238_v17  ;;  %v13061_v25 = vrot.slane %v4238_v17, 9  ;;  %v6904_v24 = vrot.slane %v20344_v39, 1  ;;  %v5716_v54 = vmax.f32 %v4279_v18, %v13071_v5 }
 0x395   :  { %7605 = vmatmul.mubr.bf16.gmra.mrb[12].mxu1 %v7435_v36  ;;  %v4247_v13 = vcombine.high %v4245_v46, %v4245_v46  ;;  %v13063_v31 = vrot.slane %v4245_v46, 9  ;;  %v5715_v62 = vmax.f32 %v4280_v4, %v13070_v16  ;;  %vm21546_vm15 = vcmask 1046528  }
 0x396   :  { %v13062_v8 = vrot.slane %v4246_v61, 9  ;;  %v5706_v30 = vmax.f32 %v4238_v17, %v13061_v25  ;;  %13135 = vmatprep.mubr.msk.bf16.mxu1 %vm2560_vm7, %v7438_v29  ;;  %v20401_v35 = vsel %vm21546_vm15, %v6904_v24, %v6905_v47  ;;  %v5717_v19 = vmax.f32 %v4281_v40, %v13072_v38  ;;  %v13906_v40 = vpop.f32.mrb[54].mxu0  ;;  %vm21550_vm9 = vmmov %vm21546_vm15 }
 0x397   :  { %v13064_v57 = vrot.slane %v4247_v13, 9  ;;  %v5708_v59 = vmax.f32 %v4245_v46, %v13063_v31  ;;  %v15444_v18 = vpack.i.bf16 %v20401_v35, %v20279_v7  ;;  %v3296_v12 = vadd.f32 %v20295_v41, %v13905_v3  ;;  %v3290_v11 = vpop.f32.mrb[55].mxu0 }
 0x398   :  { %v5707_v44 = vmax.f32 %v4246_v61, %v13062_v8  ;;  %v5866_v0 = vmax.f32 %v5706_v30, %v5714_v2  ;;  %v3288_v27 = vadd.f32 %v20295_v41, %v3287_v9  ;;  %vm21547_vm4 = vcmask 1044484  }
 0x399   :  { %v5709_v4 = vmax.f32 %v4247_v13, %v13064_v57  ;;  %v5868_v32 = vmax.f32 %v5708_v59, %v5716_v54  ;;  %15445 = vrot.lane.b32.xlu1 %v15444_v18, %s16058_s14  ;;  %v4316_v58 = vcombine.high %v3296_v12, %v3296_v12  ;;  %v4323_v7 = vrot.slane %v3296_v12, %v17699_v56 }
 0x39a   :  { %v5867_v29 = vmax.f32 %v5707_v44, %v5715_v62  ;;  %v5994_v23 = vmax.f32 %v5866_v0, 0.0  ;;  %v4282_v55 = vcombine.high %v3288_v27, %v3288_v27  ;;  %v4289_v51 = vrot.slane %v3288_v27, %v17699_v56 }
 0x39b   :  { %v5869_v45 = vmax.f32 %v5709_v4, %v5717_v19  ;;  %v5996_v49 = vmax.f32 %v5868_v32, 0.0  ;;  %v4330_v52 = vrot.slane %v4316_v58, %v17699_v56  ;;  %v4331_v21 = vcombine.high %v4323_v7, %v4323_v7 }
 0x39c   :  { %v5995_v42 = vmax.f32 %v5867_v29, 0.0  ;;  %v6553_v53 = vrot.slane %v5994_v23, %v18044_v43  ;;  %v13081_v26 = vrot.slane %v4323_v7, 9  ;;  %v4296_v47 = vrot.slane %v4282_v55, %v17699_v56 }
 0x39d   :  { %v5997_v28 = vmax.f32 %v5869_v45, 0.0  ;;  %v6561_v20 = vrot.slane %v5996_v49, %v18044_v43  ;;  %v4332_v37 = vcombine.high %v4330_v52, %v4330_v52  ;;  %v13082_v17 = vrot.slane %v4331_v21, 9 }
 0x39e   :  { %v6557_v34 = vrot.slane %v5995_v42, %v18044_v43  ;;  %v6756_v5 = vsel %vm21547_vm4, %v6553_v53, %v6755_v22  ;;  %v13083_v38 = vrot.slane %v4330_v52, 9  ;;  %v5726_v46 = vmax.f32 %v4323_v7, %v13081_v26 }
 0x39f   :  { %v6565_v16 = vrot.slane %v5997_v28, %v18044_v43  ;;  %v4297_v2 = vcombine.high %v4289_v51, %v4289_v51  ;;  %v4298_v61 = vcombine.high %v4296_v47, %v4296_v47  ;;  %vm21548_vm3 = vcmask 1046534  }
 0x3a0   :  { %v6757_v36 = vsel %vm6670_vm2, %v6557_v34, %v6756_v5  ;;  %v13084_v24 = vrot.slane %v4332_v37, 9  ;;  %v5727_v54 = vmax.f32 %v4331_v21, %v13082_v17  ;;  %v5728_v13 = vmax.f32 %v4330_v52, %v13083_v38 }
 0x3a1   :  { %v6758_v25 = vsel %vm21548_vm3, %v6561_v20, %v6757_v36  ;;  %vm21549_vm14 = vcmask 1047559   ;;  %v13073_v31 = vrot.slane %v4289_v51, 9  ;;  %v13074_v62 = vrot.slane %v4297_v2, 9 }
 0x3a2   :  { %v6759_v22 = vsel %vm21549_vm14, %v6565_v16, %v6758_v25  ;;  %v13075_v8 = vrot.slane %v4296_v47, 9  ;;  %v5729_v19 = vmax.f32 %v4332_v37, %v13084_v24  ;;  %v13076_v57 = vrot.slane %v4298_v61, 9 }
 0x3a3   :  { %v6793_v30 = vrot.slane %v6759_v22, 7  ;;  %v3299_v59 = vadd.f32 %v20295_v41, %v13906_v40  ;;  %v5718_v18 = vmax.f32 %v4289_v51, %v13073_v31  ;;  %v5719_v44 = vmax.f32 %v4297_v2, %v13074_v62 }
 0x3a4   :  { %v5720_v0 = vmax.f32 %v4296_v47, %v13075_v8  ;;  %v5721_v32 = vmax.f32 %v4298_v61, %v13076_v57  ;;  %v3291_v55 = vadd.f32 %v20295_v41, %v3290_v11  ;;  %vm21551_vm15 = vcmask 1042434  }
 0x3a5   :  { %v20422_v3 = vsel %vm204_vm0, 0.0, %v6793_v30  ;;  %v6841_v4 = vsel %vm204_vm0, %v6793_v30, 0.0  ;;  %v4333_v12 = vcombine.high %v3299_v59, %v3299_v59  ;;  %v5870_v27 = vmax.f32 %v5718_v18, %v5726_v46 }
 0x3a6   :  { %v15454_v9 = vpack.i.bf16 %v20422_v3, %v20344_v39  ;;  %v6907_v29 = vrot.slane %v20422_v3, 1  ;;  %v6908_v23 = vrot.slane %v6841_v4, 1  ;;  %v5871_v45 = vmax.f32 %v5719_v44, %v5727_v54 }
 0x3a7   :  { %v5872_v49 = vmax.f32 %v5720_v0, %v5728_v13  ;;  %v5873_v40 = vmax.f32 %v5721_v32, %v5729_v19  ;;  %v4340_v58 = vrot.slane %v3299_v59, %v17699_v56  ;;  %v5998_v42 = vmax.f32 %v5870_v27, 0.0 }
 0x3a8   :  { %15455 = vrot.lane.b32.xlu1 %v15454_v9, %s16060_s16  ;;  %v20431_v7 = vsel %vm21550_vm9, %v6907_v29, %v6908_v23  ;;  %v4347_v53 = vrot.slane %v4333_v12, %v17699_v56  ;;  %v5999_v28 = vmax.f32 %v5871_v45, 0.0  ;;  %v6950_v5 = vrot.slane %v20422_v3, 2 }
 0x3a9   :  { %v15459_v51 = vpack.i.bf16 %v20431_v7, %v20401_v35  ;;  %v6000_v20 = vmax.f32 %v5872_v49, 0.0  ;;  %v6001_v52 = vmax.f32 %v5873_v40, 0.0  ;;  %v4348_v21 = vcombine.high %v4340_v58, %v4340_v58 }
 0x3aa   :  { %v4349_v34 = vcombine.high %v4347_v53, %v4347_v53  ;;  %v6569_v26 = vrot.slane %v5998_v42, %v18044_v43  ;;  %v6573_v47 = vrot.slane %v5999_v28, %v18044_v43  ;;  %v13085_v35 = vrot.slane %v4340_v58, 9 }
 0x3ab   :  { %15460 = vrot.lane.b32.xlu0 %v15459_v51, %s16061_s12  ;;  %v6577_v16 = vrot.slane %v6000_v20, %v18044_v43  ;;  %v6581_v11 = vrot.slane %v6001_v52, %v18044_v43  ;;  %v13087_v37 = vrot.slane %v4347_v53, 9  ;;  %v6951_v17 = vrot.slane %v6841_v4, 2 }
 0x3ac   :  { %15465 = vrot.lane.b32.xlu1 %v15459_v51, %s16048_s28  ;;  %v6760_v38 = vsel %vm6662_vm13, %v6573_v47, %v6569_v26  ;;  %v4299_v36 = vcombine.high %v3291_v55, %v3291_v55  ;;  %v13086_v2 = vrot.slane %v4348_v21, 9  ;;  %v13088_v61 = vrot.slane %v4349_v34, 9 }
 0x3ad   :  { %v6761_v46 = vsel %vm21551_vm15, %v6577_v16, %v6760_v38  ;;  %v20447_v25 = vsel %vm683_vm1, %v6950_v5, %v6951_v17  ;;  %v4306_v54 = vrot.slane %v3291_v55, %v17699_v56  ;;  %vm21552_vm4 = vcmask 1043459  }
 0x3ae   :  { %v15469_v24 = vpack.i.bf16 %v20447_v25, %v20358_v10  ;;  %v4313_v13 = vrot.slane %v4299_v36, %v17699_v56  ;;  %v6762_v22 = vsel %vm21552_vm4, %v6581_v11, %v6761_v46  ;;  %v5730_v31 = vmax.f32 %v4340_v58, %v13085_v35 }
 0x3af   :  { %v5732_v62 = vmax.f32 %v4347_v53, %v13087_v37  ;;  %v7440_v8 = vpack.c.bf16 %v20447_v25, %v20358_v10  ;;  %v4314_v30 = vcombine.high %v4306_v54, %v4306_v54  ;;  %v13077_v57 = vrot.slane %v4306_v54, 9 }
 0x3b0   :  { %15470 = vrot.lane.b32.xlu0 %v15469_v24, %s16045_s20  ;;  %v4315_v19 = vcombine.high %v4313_v13, %v4313_v13  ;;  %v13079_v59 = vrot.slane %v4313_v13, 9  ;;  %v5731_v18 = vmax.f32 %v4348_v21, %v13086_v2  ;;  %v5733_v44 = vmax.f32 %v4349_v34, %v13088_v61 }
 0x3b1   :  { %v13078_v0 = vrot.slane %v4314_v30, 9  ;;  %v5722_v32 = vmax.f32 %v4306_v54, %v13077_v57  ;;  %vm21553_vm3 = vcmask 1044484   ;;  %vm21554_vm14 = vcmask 1046534  }
 0x3b2   :  { %v13080_v4 = vrot.slane %v4315_v19, 9  ;;  %v5724_v12 = vmax.f32 %v4313_v13, %v13079_v59  ;;  %vm21555_vm9 = vcmask 1047559   ;;  %vm21556_vm15 = vcmask 1046528  }
 0x3b3   :  { %v5723_v9 = vmax.f32 %v4314_v30, %v13078_v0  ;;  %v5874_v23 = vmax.f32 %v5722_v32, %v5730_v31  ;;  %vm21557_vm4 = vcmask 1042434  }
 0x3b4   :  { %v5725_v29 = vmax.f32 %v4315_v19, %v13080_v4  ;;  %v5876_v27 = vmax.f32 %v5724_v12, %v5732_v62 }
 0x3b5   :  { %v5875_v45 = vmax.f32 %v5723_v9, %v5731_v18  ;;  %v6002_v40 = vmax.f32 %v5874_v23, 0.0 }
 0x3b6   :  { %v5877_v49 = vmax.f32 %v5725_v29, %v5733_v44  ;;  %v6004_v58 = vmax.f32 %v5876_v27, 0.0 }
 0x3b7   :  { %v6003_v42 = vmax.f32 %v5875_v45, 0.0  ;;  %v6585_v55 = vrot.slane %v6002_v40, %v18044_v43 }
 0x3b8   :  { %v6005_v53 = vmax.f32 %v5877_v49, 0.0  ;;  %v6593_v20 = vrot.slane %v6004_v58, %v18044_v43 }
 0x3b9   :  { %v6589_v51 = vrot.slane %v6003_v42, %v18044_v43  ;;  %v6763_v28 = vsel %vm21553_vm3, %v6585_v55, %v6762_v22  ;;  %vm21558_vm3 = vcmask 1043459  }
 0x3ba   :  { %v6597_v52 = vrot.slane %v6005_v53, %v18044_v43 }
 0x3bb   :  { %v6764_v21 = vsel %vm6670_vm2, %v6589_v51, %v6763_v28 }
 0x3bc   :  { %v6765_v34 = vsel %vm21554_vm14, %v6593_v20, %v6764_v21  ;;  %vm21559_vm14 = vcmask 1044484  }
 0x3bd   :  { %v6766_v5 = vsel %vm21555_vm9, %v6597_v52, %v6765_v34  ;;  %vm21560_vm9 = vcmask 1046534  }
 0x3be   :  { %v6794_v26 = vrot.slane %v6766_v5, 7 }
 0x3c0   :  { %v20466_v47 = vsel %vm204_vm0, 0.0, %v6794_v26  ;;  %v6842_v16 = vsel %vm204_vm0, %v6794_v26, 0.0 }
 0x3c1   :  { %v15474_v11 = vpack.i.bf16 %v20466_v47, %v20422_v3  ;;  %v6910_v35 = vrot.slane %v20466_v47, 1  ;;  %v6911_v37 = vrot.slane %v6842_v16, 1  ;;  %v6953_v17 = vrot.slane %v20466_v47, 2 }
 0x3c2   :  { %v6954_v38 = vrot.slane %v6842_v16, 2  ;;  %v13909_v24 = vpop.f32.mrb[56].mxu0 }
 0x3c3   :  { %15475 = vrot.lane.b32.xlu1 %v15474_v11, %s16057_s0  ;;  %v20475_v36 = vsel %vm21556_vm15, %v6910_v35, %v6911_v37  ;;  %v3312_v54 = vadd.f32 %v20295_v41, %v13909_v24  ;;  %v3303_v13 = vpop.f32.mrb[57].mxu0  ;;  %vm21561_vm15 = vcmask 1047559  }
 0x3c4   :  { %v15479_v46 = vpack.i.bf16 %v20475_v36, %v20431_v7  ;;  %v20480_v2 = vsel %vm683_vm1, %v6953_v17, %v6954_v38  ;;  %v3304_v22 = vadd.f32 %v20295_v41, %v3303_v13  ;;  %v13910_v31 = vpop.f32.mrb[58].mxu0 }
 0x3c5   :  { %v15484_v61 = vpack.i.bf16 %v20480_v2, %v20447_v25  ;;  %v4384_v30 = vcombine.high %v3312_v54, %v3312_v54  ;;  %v4391_v7 = vrot.slane %v3312_v54, %v17699_v56  ;;  %v3306_v19 = vpop.f32.mrb[59].mxu0  ;;  %v3315_v53 = vadd.f32 %v20295_v41, %v13910_v31 }
 0x3c6   :  { %15480 = vrot.lane.b32.xlu0 %v15479_v46, %s16058_s14  ;;  %v20489_v57 = vpop.permute.xlu0 %15410  ;;  %v4350_v59 = vcombine.high %v3304_v22, %v3304_v22  ;;  %v4357_v18 = vrot.slane %v3304_v22, %v17699_v56  ;;  %v3307_v52 = vadd.f32 %v20295_v41, %v3306_v19 }
 0x3c7   :  { %15485 = vrot.lane.b32.xlu1 %v15484_v61, %s16059_s15  ;;  %v4398_v0 = vrot.slane %v4384_v30, %v17699_v56  ;;  %v4399_v4 = vcombine.high %v4391_v7, %v4391_v7  ;;  %v13097_v32 = vrot.slane %v4391_v7, 9  ;;  %v15413_v23 = vunpack.i.h.bf16 %v20489_v57 }
 0x3c8   :  { %v4364_v9 = vrot.slane %v4350_v59, %v17699_v56  ;;  %v4365_v29 = vcombine.high %v4357_v18, %v4357_v18  ;;  %v15412_v40 = vunpack.i.l.bf16 %v20489_v57  ;;  %v13089_v42 = vrot.slane %v4357_v18, 9 }
 0x3c9   :  { %v15406_v62 = vpop.permute.xlu1 %15405  ;;  %v4400_v27 = vcombine.high %v4398_v0, %v4398_v0  ;;  %v13098_v45 = vrot.slane %v4399_v4, 9  ;;  %v13099_v49 = vrot.slane %v4398_v0, 9  ;;  %v5742_v20 = vmax.f32 %v4391_v7, %v13097_v32 }
 0x3ca   :  { %v15408_v44 = vunpack.i.h.bf16 %v15406_v62  ;;  %v15407_v12 = vunpack.i.l.bf16 %v15406_v62  ;;  %v4366_v58 = vcombine.high %v4364_v9, %v4364_v9  ;;  %v20499_v51 = vpop.permute.xlu0 %15420  ;;  %v13090_v26 = vrot.slane %v4365_v29, 9 }
 0x3cb   :  { %v13100_v28 = vrot.slane %v4400_v27, 9  ;;  %v5743_v34 = vmax.f32 %v4399_v4, %v13098_v45  ;;  %v5744_v5 = vmax.f32 %v4398_v0, %v13099_v49  ;;  %v13091_v11 = vrot.slane %v4364_v9, 9 }
 0x3cc   :  { %v7323_v55 = vsel %vm2560_vm7, %v20188_v33, %v15408_v44  ;;  %v7322_v21 = vsel %vm2560_vm7, %v20183_v1, %v15407_v12  ;;  %v13092_v35 = vrot.slane %v4366_v58, 9  ;;  %v5734_v37 = vmax.f32 %v4357_v18, %v13089_v42 }
 0x3cd   :  { %v5745_v16 = vmax.f32 %v4400_v27, %v13100_v28  ;;  %v15423_v17 = vunpack.i.h.bf16 %v20499_v51  ;;  %v15422_v33 = vunpack.i.l.bf16 %v20499_v51  ;;  %v5735_v38 = vmax.f32 %v4365_v29, %v13090_v26  ;;  %v15416_v22 = vpop.permute.xlu1 %15415 }
 0x3ce   :  { %v4401_v46 = vcombine.high %v3315_v53, %v3315_v53  ;;  %v5736_v61 = vmax.f32 %v4364_v9, %v13091_v11  ;;  %v5737_v24 = vmax.f32 %v4366_v58, %v13092_v35  ;;  %v5878_v54 = vmax.f32 %v5734_v37, %v5742_v20 }
 0x3cf   :  { %v4408_v13 = vrot.slane %v3315_v53, %v17699_v56  ;;  %v5879_v1 = vmax.f32 %v5735_v38, %v5743_v34  ;;  %v4367_v62 = vcombine.high %v3307_v52, %v3307_v52  ;;  %v4374_v30 = vrot.slane %v3307_v52, %v17699_v56 }
 0x3d0   :  { %v4415_v31 = vrot.slane %v4401_v46, %v17699_v56  ;;  %v5880_v7 = vmax.f32 %v5736_v61, %v5744_v5  ;;  %v5881_v19 = vmax.f32 %v5737_v24, %v5745_v16  ;;  %v6006_v59 = vmax.f32 %v5878_v54, 0.0 }
 0x3d1   :  { %v4416_v18 = vcombine.high %v4408_v13, %v4408_v13  ;;  %v6007_v44 = vmax.f32 %v5879_v1, 0.0  ;;  %v13101_v4 = vrot.slane %v4408_v13, 9  ;;  %v15418_v12 = vunpack.i.h.bf16 %v15416_v22  ;;  %v15426_v11 = vpop.permute.xlu1 %15425 }
 0x3d2   :  { %v4417_v0 = vcombine.high %v4415_v31, %v4415_v31  ;;  %v13103_v32 = vrot.slane %v4415_v31, 9  ;;  %v15417_v9 = vunpack.i.l.bf16 %v15416_v22  ;;  %v6008_v29 = vmax.f32 %v5880_v7, 0.0 }
 0x3d3   :  { %v6009_v27 = vmax.f32 %v5881_v19, 0.0  ;;  %v6601_v45 = vrot.slane %v6006_v59, %v18044_v43  ;;  %v6605_v49 = vrot.slane %v6007_v44, %v18044_v43  ;;  %v13102_v58 = vrot.slane %v4416_v18, 9 }
 0x3d4   :  { %v13104_v42 = vrot.slane %v4417_v0, 9  ;;  %v6609_v53 = vrot.slane %v6008_v29, %v18044_v43  ;;  %v5746_v20 = vmax.f32 %v4408_v13, %v13101_v4  ;;  %v4381_v52 = vrot.slane %v4367_v62, %v17699_v56 }
 0x3d5   :  { %v6613_v28 = vrot.slane %v6009_v27, %v18044_v43  ;;  %v6767_v34 = vsel %vm6662_vm13, %v6605_v49, %v6601_v45  ;;  %v5748_v5 = vmax.f32 %v4415_v31, %v13103_v32  ;;  %v4382_v26 = vcombine.high %v4374_v30, %v4374_v30 }
 0x3d6   :  { %v13093_v16 = vrot.slane %v4374_v30, 9  ;;  %v6768_v35 = vsel %vm21557_vm4, %v6609_v53, %v6767_v34  ;;  %v4383_v37 = vcombine.high %v4381_v52, %v4381_v52  ;;  %v13095_v38 = vrot.slane %v4381_v52, 9 }
 0x3d7   :  { %v20519_v46 = vsel %vm2820_vm11, %v7323_v55, %v15413_v23  ;;  %v5747_v61 = vmax.f32 %v4416_v18, %v13102_v58  ;;  %v13094_v24 = vrot.slane %v4382_v26, 9  ;;  %v6769_v13 = vsel %vm21558_vm3, %v6613_v28, %v6768_v35 }
 0x3d8   :  { %v5738_v54 = vmax.f32 %v4374_v30, %v13093_v16  ;;  %v7337_v22 = vsel %vm2820_vm11, %v7322_v21, %v15412_v40  ;;  %v5749_v1 = vmax.f32 %v4417_v0, %v13104_v42  ;;  %v13096_v31 = vrot.slane %v4383_v37, 9 }
 0x3d9   :  { %v5740_v62 = vmax.f32 %v4381_v52, %v13095_v38  ;;  %v7353_v7 = vsel %vm7344_vm5, %v19991_v60, %v15417_v9  ;;  %v15427_v19 = vunpack.i.l.bf16 %v15426_v11  ;;  %v5739_v59 = vmax.f32 %v4382_v26, %v13094_v24 }
 0x3da   :  { %v5882_v44 = vmax.f32 %v5738_v54, %v5746_v20  ;;  %v7354_v55 = vsel %vm7344_vm5, %v7337_v22, %v15418_v12  ;;  %v15428_v18 = vunpack.i.h.bf16 %v15426_v11  ;;  %v5741_v30 = vmax.f32 %v4383_v37, %v13096_v31 }
 0x3db   :  { %v5884_v4 = vmax.f32 %v5740_v62, %v5748_v5  ;;  %v5883_v32 = vmax.f32 %v5739_v59, %v5747_v61  ;;  %v7370_v40 = vsel %vm7361_vm10, %v7353_v7, %v15422_v33  ;;  %v7371_v60 = vsel %vm7361_vm10, %v7354_v55, %v15423_v17 }
 0x3dc   :  { %v6010_v29 = vmax.f32 %v5882_v44, 0.0  ;;  %v5885_v21 = vmax.f32 %v5741_v30, %v5749_v1  ;;  %v7387_v9 = vsel %vm7378_vm6, %v7370_v40, %v15427_v19  ;;  %v7388_v58 = vsel %vm7378_vm6, %v7371_v60, %v15428_v18 }
 0x3dd   :  { %v6012_v0 = vmax.f32 %v5884_v4, 0.0  ;;  %v6011_v12 = vmax.f32 %v5883_v32, 0.0  ;;  %vm21562_vm4 = vcmask 1046528   ;;  %vm21563_vm3 = vcmask 1042434  }
 0x3de   :  { %v6617_v45 = vrot.slane %v6010_v29, %v18044_v43  ;;  %v6013_v42 = vmax.f32 %v5885_v21, 0.0 }
 0x3df   :  { %v6621_v20 = vrot.slane %v6011_v12, %v18044_v43  ;;  %v6625_v17 = vrot.slane %v6012_v0, %v18044_v43 }
 0x3e0   :  { %v15431_v23 = vpop.permute.xlu0 %15430  ;;  %v6770_v33 = vsel %vm21559_vm14, %v6617_v45, %v6769_v13  ;;  %v6629_v26 = vrot.slane %v6013_v42, %v18044_v43  ;;  %vm21564_vm14 = vcmask 1043459  }
 0x3e1   :  { %v15433_v57 = vunpack.i.h.bf16 %v15431_v23  ;;  %v15432_v27 = vunpack.i.l.bf16 %v15431_v23  ;;  %v6771_v16 = vsel %vm6670_vm2, %v6621_v20, %v6770_v33 }
 0x3e2   :  { %v6772_v35 = vsel %vm21560_vm9, %v6625_v17, %v6771_v16  ;;  %vm21565_vm9 = vcmask 1044484  }
 0x3e3   :  { %v7404_v52 = vsel %vm7395_vm8, %v7387_v9, %v15432_v27  ;;  %v7405_v51 = vsel %vm7395_vm8, %v7388_v58, %v15433_v57  ;;  %v6773_v37 = vsel %vm21561_vm15, %v6629_v26, %v6772_v35 }
 0x3e4   :  { %v15436_v49 = vpop.permute.xlu1 %15435  ;;  %v6795_v38 = vrot.slane %v6773_v37, 7 }
 0x3e5   :  { %v15438_v53 = vunpack.i.h.bf16 %v15436_v49  ;;  %v15437_v28 = vunpack.i.l.bf16 %v15436_v49 }
 0x3e6   :  { %v20553_v61 = vsel %vm204_vm0, 0.0, %v6795_v38  ;;  %v20556_v24 = vsel %vm204_vm0, %v6795_v38, 0.0 }
 0x3e7   :  { %v7421_v34 = vsel %vm7412_vm12, %v7404_v52, %v15437_v28  ;;  %v7422_v5 = vsel %vm7412_vm12, %v7405_v51, %v15438_v53  ;;  %v15489_v13 = vpack.i.bf16 %v20553_v61, %v20466_v47  ;;  %v6913_v22 = vrot.slane %v20553_v61, 1 }
 0x3e8   :  { %v7437_v11 = vpack.c.bf16 %v7422_v5, %v7421_v34  ;;  %v6914_v1 = vrot.slane %v20556_v24, 1  ;;  %v6956_v7 = vrot.slane %v20553_v61, 2 }
 0x3e9   :  { %15490 = vrot.lane.b32.xlu0 %v15489_v13, %s16060_s16 }
 0x3ea   :  { %7613 = vmatmul.mubr.bf16.gmra.mrb[16].mxu1 %v7437_v11  ;;  %v20566_v62 = vsel %vm21562_vm4, %v6913_v22, %v6914_v1 }
 0x3eb   :  { %13136 = vmatprep.mubr.msk.bf16.mxu1 %vm2560_vm7, %v7440_v8  ;;  %v15494_v55 = vpack.i.bf16 %v20566_v62, %v20475_v36 }
 0x3ed   :  { %v13913_v54 = vpop.f32.mrb[60].mxu0  ;;  %15495 = vrot.lane.b32.xlu1 %v15494_v55, %s16061_s12  ;;  %15500 = vrot.lane.b32.xlu0 %v15494_v55, %s16048_s28 }
 0x3ee   :  { %v3328_v31 = vadd.f32 %v20295_v41, %v13913_v54  ;;  %v3319_v10 = vpop.f32.mrb[61].mxu0 }
 0x3ef   :  { %v3320_v25 = vadd.f32 %v20295_v41, %v3319_v10  ;;  %v13914_v8 = vpop.f32.mrb[62].mxu0 }
 0x3f0   :  { %v4452_v19 = vcombine.high %v3328_v31, %v3328_v31  ;;  %v4459_v59 = vrot.slane %v3328_v31, %v17699_v56  ;;  %v3331_v44 = vadd.f32 %v20295_v41, %v13914_v8  ;;  %v3322_v23 = vpop.f32.mrb[63].mxu0 }
 0x3f1   :  { %v4418_v18 = vcombine.high %v3320_v25, %v3320_v25  ;;  %v4425_v30 = vrot.slane %v3320_v25, %v17699_v56  ;;  %v3323_v4 = vadd.f32 %v20295_v41, %v3322_v23 }
 0x3f2   :  { %v4466_v32 = vrot.slane %v4452_v19, %v17699_v56  ;;  %v4467_v29 = vcombine.high %v4459_v59, %v4459_v59  ;;  %v13113_v57 = vrot.slane %v4459_v59, 9  ;;  %v4469_v27 = vcombine.high %v3331_v44, %v3331_v44 }
 0x3f3   :  { %v4432_v40 = vrot.slane %v4418_v18, %v17699_v56  ;;  %v4433_v21 = vcombine.high %v4425_v30, %v4425_v30  ;;  %v13105_v0 = vrot.slane %v4425_v30, 9  ;;  %v4476_v60 = vrot.slane %v3331_v44, %v17699_v56  ;;  %v20585_v18 = vld [vmem:[%s21207_s4] ss:$0 sm:$0xff] }
 0x3f4   :  { %v4468_v36 = vcombine.high %v4466_v32, %v4466_v32  ;;  %v13114_v9 = vrot.slane %v4467_v29, 9  ;;  %v13115_v12 = vrot.slane %v4466_v32, 9  ;;  %v5758_v45 = vmax.f32 %v4459_v59, %v13113_v57 }
 0x3f5   :  { %v4434_v41 = vcombine.high %v4432_v40, %v4432_v40  ;;  %v13106_v49 = vrot.slane %v4433_v21, 9  ;;  %v13107_v58 = vrot.slane %v4432_v40, 9  ;;  %v5750_v42 = vmax.f32 %v4425_v30, %v13105_v0 }
 0x3f6   :  { %v13116_v53 = vrot.slane %v4468_v36, 9  ;;  %v5759_v28 = vmax.f32 %v4467_v29, %v13114_v9  ;;  %v5760_v20 = vmax.f32 %v4466_v32, %v13115_v12  ;;  %v4483_v33 = vrot.slane %v4469_v27, %v17699_v56  ;;  %v7582_v52 = vpop.f32.mrb[0].mxu1 }
 0x3f7   :  { %v13108_v51 = vrot.slane %v4434_v41, 9  ;;  %v5751_v17 = vmax.f32 %v4433_v21, %v13106_v49  ;;  %v5752_v34 = vmax.f32 %v4432_v40, %v13107_v58  ;;  %v5886_v5 = vmax.f32 %v5750_v42, %v5758_v45  ;;  %v7584_v26 = vpop.f32.mrb[1].mxu1 }
 0x3f8   :  { %v5761_v16 = vmax.f32 %v4468_v36, %v13116_v53  ;;  %v4484_v11 = vcombine.high %v4476_v60, %v4476_v60  ;;  %v4485_v35 = vcombine.high %v4483_v33, %v4483_v33  ;;  %v13117_v37 = vrot.slane %v4476_v60, 9  ;;  %v7585_v38 = vpop.f32.mrb[2].mxu1 }
 0x3f9   :  { %v5753_v54 = vmax.f32 %v4434_v41, %v13108_v51  ;;  %v5887_v13 = vmax.f32 %v5751_v17, %v5759_v28  ;;  %v5888_v22 = vmax.f32 %v5752_v34, %v5760_v20  ;;  %v6014_v1 = vmax.f32 %v5886_v5, 0.0  ;;  %v7587_v31 = vpop.f32.mrb[3].mxu1 }
 0x3fa   :  { %v13118_v10 = vrot.slane %v4484_v11, 9  ;;  %v13119_v25 = vrot.slane %v4483_v33, 9  ;;  %v13120_v8 = vrot.slane %v4485_v35, 9  ;;  %v6957_v19 = vrot.slane %v20556_v24, 2 }
 0x3fb   :  { %v5889_v59 = vmax.f32 %v5753_v54, %v5761_v16  ;;  %v6015_v44 = vmax.f32 %v5887_v13, 0.0  ;;  %v6016_v23 = vmax.f32 %v5888_v22, 0.0  ;;  %v5762_v55 = vmax.f32 %v4476_v60, %v13117_v37 }
 0x3fc   :  { %v6633_v30 = vrot.slane %v6014_v1, %v18044_v43  ;;  %v5763_v32 = vmax.f32 %v4484_v11, %v13118_v10  ;;  %v5764_v29 = vmax.f32 %v4483_v33, %v13119_v25  ;;  %v4435_v57 = vcombine.high %v3323_v4, %v3323_v4 }
 0x3fd   :  { %v6017_v27 = vmax.f32 %v5889_v59, 0.0  ;;  %v6637_v40 = vrot.slane %v6015_v44, %v18044_v43  ;;  %v6641_v21 = vrot.slane %v6016_v23, %v18044_v43  ;;  %v4442_v24 = vrot.slane %v3323_v4, %v17699_v56 }
 0x3fe   :  { %v4449_v0 = vrot.slane %v4435_v57, %v17699_v56  ;;  %v20595_v60 = vsel %vm683_vm1, %v6956_v7, %v6957_v19  ;;  %v7583_v36 = vadd.f32 %v20585_v18, %v7582_v52  ;;  %v7586_v9 = vadd.f32 %v20585_v18, %v7585_v38 }
 0x3ff   :  { %v6645_v12 = vrot.slane %v6017_v27, %v18044_v43  ;;  %v6774_v45 = vsel %vm6662_vm13, %v6637_v40, %v6633_v30  ;;  %v4450_v41 = vcombine.high %v4442_v24, %v4442_v24  ;;  %v13109_v49 = vrot.slane %v4442_v24, 9  ;;  %v20601_v58 = vpop.f32.mrb[4].mxu1 }
 0x400   :  { %v6775_v4 = vsel %vm21563_vm3, %v6641_v21, %v6774_v45  ;;  %v4451_v42 = vcombine.high %v4449_v0, %v4449_v0  ;;  %v13111_v53 = vrot.slane %v4449_v0, 9  ;;  %v15504_v7 = vpack.i.bf16 %v20595_v60, %v20480_v2  ;;  %v7592_v28 = vpop.f32.mrb[5].mxu1 }
 0x401   :  { %v13110_v20 = vrot.slane %v4450_v41, 9  ;;  %v5754_v33 = vmax.f32 %v4442_v24, %v13109_v49  ;;  %v6776_v52 = vsel %vm21564_vm14, %v6645_v12, %v6775_v4  ;;  %v7661_v51 = vcombine.high %v7583_v36, %v7583_v36  ;;  %v7593_v17 = vpop.f32.mrb[6].mxu1  ;;  %v7056_v24 = vpop.permute.xlu1 %7055 }
 0x402   :  { %v5765_v34 = vmax.f32 %v4485_v35, %v13120_v8  ;;  %v13112_v5 = vrot.slane %v4451_v42, 9  ;;  %v5756_v26 = vmax.f32 %v4449_v0, %v13111_v53  ;;  %15505 = vrot.lane.b32.xlu1 %v15504_v7, %s16045_s20  ;;  %v7668_v16 = vrot.slane %v7583_v36, %v17699_v56  ;;  %v7595_v11 = vpop.f32.mrb[7].mxu1  ;;  %v7011_v8 = vpop.permute.xlu0 %7010 }
 0x403   :  { %v5755_v37 = vmax.f32 %v4450_v41, %v13110_v20  ;;  %v5890_v38 = vmax.f32 %v5754_v33, %v5762_v55  ;;  %v7675_v54 = vrot.slane %v7661_v51, %v17699_v56  ;;  %v7678_v31 = vcombine.high %v7586_v9, %v7586_v9 }
 0x404   :  { %v5757_v13 = vmax.f32 %v4451_v42, %v13112_v5  ;;  %v5892_v22 = vmax.f32 %v5756_v26, %v5764_v29  ;;  %v7676_v1 = vcombine.high %v7668_v16, %v7668_v16  ;;  %v7685_v35 = vrot.slane %v7586_v9, %v17699_v56 }
 0x405   :  { %v5891_v10 = vmax.f32 %v5755_v37, %v5763_v32  ;;  %v6018_v25 = vmax.f32 %v5890_v38, 0.0  ;;  %v7677_v19 = vcombine.high %v7675_v54, %v7675_v54  ;;  %v13139_v30 = vrot.slane %v7668_v16, 9 }
 0x406   :  { %v5893_v59 = vmax.f32 %v5757_v13, %v5765_v34  ;;  %v13141_v57 = vrot.slane %v7675_v54, 9  ;;  %v13140_v27 = vrot.slane %v7676_v1, 9  ;;  %v7692_v55 = vrot.slane %v7678_v31, %v17699_v56  ;;  %v15441_v45 = vpop.permute.xlu0 %15440 }
 0x407   :  { %v6019_v44 = vmax.f32 %v5891_v10, 0.0  ;;  %v6649_v23 = vrot.slane %v6018_v25, %v18044_v43  ;;  %v13142_v21 = vrot.slane %v7677_v19, 9  ;;  %v7693_v32 = vcombine.high %v7685_v35, %v7685_v35 }
 0x408   :  { %v6020_v0 = vmax.f32 %v5892_v22, 0.0  ;;  %v7694_v36 = vcombine.high %v7692_v55, %v7692_v55  ;;  %v13143_v9 = vrot.slane %v7685_v35, 9  ;;  %v13145_v12 = vrot.slane %v7692_v55, 9 }
 0x409   :  { %v6653_v40 = vrot.slane %v6019_v44, %v18044_v43  ;;  %v6777_v29 = vsel %vm21565_vm9, %v6649_v23, %v6776_v52  ;;  %v20616_v49 = vmax.f32 %v7668_v16, %v13139_v30  ;;  %v20618_v4 = vmax.f32 %v7675_v54, %v13141_v57 }
 0x40a   :  { %v13144_v42 = vrot.slane %v7693_v32, 9  ;;  %v6021_v53 = vmax.f32 %v5893_v59, 0.0  ;;  %v13146_v7 = vrot.slane %v7694_v36, 9  ;;  %v20620_v28 = vmax.f32 %v7685_v35, %v13143_v9 }
 0x40b   :  { %v6778_v41 = vsel %vm6670_vm2, %v6653_v40, %v6777_v29  ;;  %v20622_v20 = vmax.f32 %v7692_v55, %v13145_v12  ;;  %v20624_v33 = vmax.f32 %v7676_v1, %v13140_v27  ;;  %v20626_v52 = vmax.f32 %v7677_v19, %v13142_v21  ;;  %v15446_v37 = vpop.permute.xlu1 %15445  ;;  %v15451_v12 = vpop.permute.xlu0 %15450 }
 0x40c   :  { %v20628_v51 = vmax.f32 %v7693_v32, %v13144_v42  ;;  %v15443_v34 = vunpack.i.h.bf16 %v15441_v45  ;;  %v20630_v5 = vmax.f32 %v7694_v36, %v13146_v7  ;;  %v8253_v26 = vmax.f32 %v20616_v49, %v20620_v28 }
 0x40d   :  { %v8255_v16 = vmax.f32 %v20618_v4, %v20622_v20  ;;  %v15442_v11 = vunpack.i.l.bf16 %v15441_v45  ;;  %v7324_v38 = vsel %vm2560_vm7, %v20268_v14, %v7011_v8  ;;  %v6657_v54 = vrot.slane %v6020_v0, %v18044_v43 }
 0x40e   :  { %v8254_v13 = vmax.f32 %v20624_v33, %v20628_v51  ;;  %v7339_v22 = vsel %vm2820_vm11, %v7324_v38, %v7056_v24  ;;  %v7591_v31 = vadd.f32 %v20585_v18, %v20601_v58  ;;  %v6661_v10 = vrot.slane %v6021_v53, %v18044_v43 }
 0x40f   :  { %v15448_v25 = vunpack.i.h.bf16 %v15446_v37  ;;  %v7594_v19 = vadd.f32 %v20585_v18, %v7593_v17  ;;  %vm21566_vm2 = vcmask 1046534   ;;  %v7355_v35 = vsel %vm7344_vm5, %v20519_v46, %v15442_v11 }
 0x410   :  { %v6779_v14 = vsel %vm21566_vm2, %v6657_v54, %v6778_v41  ;;  %v7356_v8 = vsel %vm7344_vm5, %v7339_v22, %v15443_v34  ;;  %v7695_v59 = vcombine.high %v7591_v31, %v7591_v31  ;;  %v7702_v44 = vrot.slane %v7591_v31, %v17699_v56 }
 0x411   :  { %v15447_v23 = vunpack.i.l.bf16 %v15446_v37  ;;  %v7712_v30 = vcombine.high %v7594_v19, %v7594_v19  ;;  %v7719_v57 = vrot.slane %v7594_v19, %v17699_v56  ;;  %v6780_v58 = vsel %vm21561_vm15, %v6661_v10, %v6779_v14 }
 0x412   :  { %v7709_v27 = vrot.slane %v7695_v59, %v17699_v56  ;;  %v7710_v55 = vcombine.high %v7702_v44, %v7702_v44  ;;  %v13147_v17 = vrot.slane %v7702_v44, 9  ;;  %v6796_v40 = vrot.slane %v6780_v58, 7 }
 0x413   :  { %v7373_v29 = vsel %vm7361_vm10, %v7356_v8, %v15448_v25  ;;  %v7726_v46 = vrot.slane %v7712_v30, %v17699_v56  ;;  %v7727_v21 = vcombine.high %v7719_v57, %v7719_v57  ;;  %v13151_v32 = vrot.slane %v7719_v57, 9 }
 0x414   :  { %v7711_v24 = vcombine.high %v7709_v27, %v7709_v27  ;;  %v13148_v0 = vrot.slane %v7710_v55, 9  ;;  %v13149_v36 = vrot.slane %v7709_v27, 9  ;;  %v20658_v9 = vmax.f32 %v7702_v44, %v13147_v17 }
 0x415   :  { %v7728_v45 = vcombine.high %v7726_v46, %v7726_v46  ;;  %v13152_v41 = vrot.slane %v7727_v21, 9  ;;  %v13153_v42 = vrot.slane %v7726_v46, 9  ;;  %v20660_v53 = vmax.f32 %v7719_v57, %v13151_v32 }
 0x416   :  { %v13150_v7 = vrot.slane %v7711_v24, 9  ;;  %v20662_v34 = vmax.f32 %v7710_v55, %v13148_v0  ;;  %v20664_v11 = vmax.f32 %v7709_v27, %v13149_v36  ;;  %v6828_v37 = vsel %vm204_vm0, 0.0, %v6796_v40 }
 0x417   :  { %v13154_v38 = vrot.slane %v7728_v45, 9  ;;  %v20667_v54 = vmax.f32 %v7727_v21, %v13152_v41  ;;  %v20669_v22 = vmax.f32 %v7726_v46, %v13153_v42  ;;  %v15453_v25 = vunpack.i.h.bf16 %v15451_v12 }
 0x418   :  { %v15509_v19 = vpack.i.bf16 %v6828_v37, %v20553_v61  ;;  %v6844_v14 = vsel %vm204_vm0, %v6796_v40, 0.0  ;;  %v6966_v8 = vrot.slane %v6828_v37, 1  ;;  %v20675_v59 = vmax.f32 %v7711_v24, %v13150_v7  ;;  %vm21567_vm0 = vmmov %vm21562_vm4 }
 0x419   :  { %v20677_v44 = vmax.f32 %v7728_v45, %v13154_v38  ;;  %v6967_v27 = vrot.slane %v6844_v14, 1  ;;  %v6972_v55 = vrot.slane %v6828_v37, 2  ;;  %v6973_v17 = vrot.slane %v6844_v14, 2 }
 0x41a   :  { %v15456_v10 = vpop.permute.xlu1 %15455  ;;  %15510 = vrot.lane.b32.xlu0 %v15509_v19, %s16057_s0  ;;  %v7372_v40 = vsel %vm7361_vm10, %v7355_v35, %v15447_v23  ;;  %v15452_v21 = vunpack.i.l.bf16 %v15451_v12  ;;  %v7390_v41 = vsel %vm7378_vm6, %v7373_v29, %v15453_v25  ;;  %v21568_v28 = vmax.f32 %v20626_v52, %v20630_v5  ;;  %v8549_v5 = vld [vmem:[#allocation3] sm:$0xff] }
 0x41b   :  { %v15458_v46 = vunpack.i.h.bf16 %v15456_v10  ;;  %v6968_v24 = vsel %vm21567_vm0, %v6966_v8, %v6967_v27  ;;  %v20689_v0 = vsel %vm683_vm1, %v6972_v55, %v6973_v17  ;;  %v15457_v36 = vunpack.i.l.bf16 %v15456_v10 }
 0x41c   :  { %v15514_v42 = vpack.i.bf16 %v6968_v24, %v20566_v62  ;;  %v15519_v7 = vpack.i.bf16 %v20689_v0, %v20595_v60  ;;  %v7389_v12 = vsel %vm7378_vm6, %v7372_v40, %v15452_v21  ;;  %v7442_v62 = vpack.c.bf16 %v20595_v60, %v20480_v2 }
 0x41d   :  { %v15461_v58 = vpop.permute.xlu0 %15460  ;;  %v7407_v35 = vsel %vm7395_vm8, %v7390_v41, %v15458_v46  ;;  %v7406_v10 = vsel %vm7395_vm8, %v7389_v12, %v15457_v36  ;;  %vm16063_vm1 = vmmov 0  }
 0x41e   :  { %v15463_v45 = vunpack.i.h.bf16 %v15461_v58  ;;  %v15462_v23 = vunpack.i.l.bf16 %v15461_v58  ;;  %15515 = vrot.lane.b32.xlu1 %v15514_v42, %s16058_s14  ;;  %15520 = vrot.lane.b32.xlu0 %v15519_v7, %s16059_s15 }
 0x420   :  { %v7424_v38 = vsel %vm7412_vm12, %v7407_v35, %v15463_v45  ;;  %v7423_v29 = vsel %vm7412_vm12, %v7406_v10, %v15462_v23 }
 0x421   :  { %v7439_v25 = vpack.c.bf16 %v7424_v38, %v7423_v29 }
 0x422   :  { %7252 = vrot.lane.b32.xlu1 %v6828_v37, %s16060_s16  ;;  %7297 = vrot.lane.b32.xlu0 %v6968_v24, %s16061_s12 }
 0x423   :  { %7621 = vmatmul.mubr.bf16.gmra.mrb[20].mxu1 %v7439_v25 }
 0x424   :  { %13137 = vmatprep.mubr.msk.bf16.mxu1 %vm2560_vm7, %v7442_v62 }
 0x43a   :  { %v7598_v19 = vpop.f32.mrb[8].mxu1 }
 0x43b   :  { %v7599_v14 = vadd.f32 %v20585_v18, %v7598_v19  ;;  %v7600_v8 = vpop.f32.mrb[9].mxu1 }
 0x43c   :  { %v7601_v58 = vpop.f32.mrb[10].mxu1 }
 0x43d   :  { %v7729_v27 = vcombine.high %v7599_v14, %v7599_v14  ;;  %v7736_v55 = vrot.slane %v7599_v14, %v17699_v56  ;;  %v7602_v17 = vadd.f32 %v20585_v18, %v7601_v58  ;;  %v7603_v46 = vpop.f32.mrb[11].mxu1 }
 0x43f   :  { %v7743_v37 = vrot.slane %v7729_v27, %v17699_v56  ;;  %v7744_v40 = vcombine.high %v7736_v55, %v7736_v55  ;;  %v13155_v21 = vrot.slane %v7736_v55, 9  ;;  %v7746_v24 = vcombine.high %v7602_v17, %v7602_v17 }
 0x440   :  { %v7753_v2 = vrot.slane %v7602_v17, %v17699_v56 }
 0x441   :  { %v7745_v60 = vcombine.high %v7743_v37, %v7743_v37  ;;  %v13156_v36 = vrot.slane %v7744_v40, 9  ;;  %v13157_v45 = vrot.slane %v7743_v37, 9  ;;  %v7760_v41 = vrot.slane %v7746_v24, %v17699_v56 }
 0x442   :  { %v7761_v42 = vcombine.high %v7753_v2, %v7753_v2  ;;  %v13159_v7 = vrot.slane %v7753_v2, 9  ;;  %v20713_v23 = vmax.f32 %v7736_v55, %v13155_v21  ;;  %v15471_v21 = vpop.permute.xlu0 %15470 }
 0x443   :  { %v13158_v35 = vrot.slane %v7745_v60, 9  ;;  %v7762_v12 = vcombine.high %v7760_v41, %v7760_v41  ;;  %v13161_v10 = vrot.slane %v7760_v41, 9  ;;  %v20717_v25 = vmax.f32 %v7744_v40, %v13156_v36  ;;  %v15466_v40 = vpop.permute.xlu1 %15465 }
 0x444   :  { %v13160_v38 = vrot.slane %v7761_v42, 9  ;;  %v20715_v29 = vmax.f32 %v7753_v2, %v13159_v7  ;;  %v20719_v62 = vmax.f32 %v7743_v37, %v13157_v45  ;;  %v15468_v2 = vunpack.i.h.bf16 %v15466_v40 }
 0x445   :  { %v13162_v19 = vrot.slane %v7762_v12, 9  ;;  %v20723_v8 = vmax.f32 %v7760_v41, %v13161_v10  ;;  %v20727_v27 = vmax.f32 %v7745_v60, %v13158_v35  ;;  %v15467_v36 = vunpack.i.l.bf16 %v15466_v40 }
 0x446   :  { %v20721_v14 = vmax.f32 %v7761_v42, %v13160_v38  ;;  %v15481_v45 = vpop.permute.xlu0 %15480  ;;  %v15473_v41 = vunpack.i.h.bf16 %v15471_v21  ;;  %v15472_v60 = vunpack.i.l.bf16 %v15471_v21  ;;  %v7326_v10 = vsel %vm2560_vm7, %v20422_v3, %v15468_v2 }
 0x447   :  { %v20729_v55 = vmax.f32 %v7762_v12, %v13162_v19  ;;  %v15476_v24 = vpop.permute.xlu1 %15475  ;;  %v15483_v35 = vunpack.i.h.bf16 %v15481_v45  ;;  %v15482_v12 = vunpack.i.l.bf16 %v15481_v45  ;;  %v7325_v19 = vsel %vm2560_vm7, %v20344_v39, %v15467_v36 }
 0x448   :  { %v15478_v42 = vunpack.i.h.bf16 %v15476_v24  ;;  %v15477_v7 = vunpack.i.l.bf16 %v15476_v24  ;;  %v7340_v37 = vsel %vm2820_vm11, %v7325_v19, %v15472_v60  ;;  %v7341_v17 = vsel %vm2820_vm11, %v7326_v10, %v15473_v41 }
 0x44a   :  { %v7357_v40 = vsel %vm7344_vm5, %v7340_v37, %v15477_v7  ;;  %v7358_v46 = vsel %vm7344_vm5, %v7341_v17, %v15478_v42 }
 0x44b   :  { %v15486_v38 = vpop.permute.xlu1 %15485  ;;  %v7374_v45 = vsel %vm7361_vm10, %v7357_v40, %v15482_v12  ;;  %v7375_v31 = vsel %vm7361_vm10, %v7358_v46, %v15483_v35 }
 0x44c   :  { %v15488_v21 = vunpack.i.h.bf16 %v15486_v38  ;;  %v15487_v58 = vunpack.i.l.bf16 %v15486_v38 }
 0x44e   :  { %v7391_v39 = vsel %vm7378_vm6, %v7374_v45, %v15487_v58  ;;  %v7392_v36 = vsel %vm7378_vm6, %v7375_v31, %v15488_v21  ;;  %v7444_v21 = vpack.c.bf16 %v21536_v48, %v20689_v0 }
 0x45b   :  { %v15491_v24 = vpop.permute.xlu0 %15490 }
 0x45c   :  { %v15493_v32 = vunpack.i.h.bf16 %v15491_v24  ;;  %v15492_v3 = vunpack.i.l.bf16 %v15491_v24 }
 0x45e   :  { %v7408_v37 = vsel %vm7395_vm8, %v7391_v39, %v15492_v3  ;;  %v7409_v17 = vsel %vm7395_vm8, %v7392_v36, %v15493_v32 }
 0x45f   :  { %v15496_v2 = vpop.permute.xlu1 %15495 }
 0x460   :  { %v15498_v60 = vunpack.i.h.bf16 %v15496_v2  ;;  %v15497_v41 = vunpack.i.l.bf16 %v15496_v2 }
 0x462   :  { %v7425_v12 = vsel %vm7412_vm12, %v7408_v37, %v15497_v41  ;;  %v7426_v46 = vsel %vm7412_vm12, %v7409_v17, %v15498_v60 }
 0x463   :  { %v7441_v10 = vpack.c.bf16 %v7426_v46, %v7425_v12 }
 0x465   :  { %7629 = vmatmul.mubr.bf16.gmra.mrb[24].mxu1 %v7441_v10 }
 0x466   :  { %13138 = vmatprep.mubr.msk.bf16.mxu1 %vm2560_vm7, %v7444_v21 }
 0x468   :  { %v7606_v42 = vpop.f32.mrb[12].mxu1 }
 0x469   :  { %v7607_v7 = vadd.f32 %v20585_v18, %v7606_v42  ;;  %v7608_v38 = vpop.f32.mrb[13].mxu1 }
 0x46a   :  { %v7609_v35 = vpop.f32.mrb[14].mxu1 }
 0x46b   :  { %v7763_v19 = vcombine.high %v7607_v7, %v7607_v7  ;;  %v7770_v58 = vrot.slane %v7607_v7, %v17699_v56  ;;  %v7610_v31 = vadd.f32 %v20585_v18, %v7609_v35  ;;  %v7611_v40 = vpop.f32.mrb[15].mxu1 }
 0x46d   :  { %v7777_v32 = vrot.slane %v7763_v19, %v17699_v56  ;;  %v7778_v24 = vcombine.high %v7770_v58, %v7770_v58  ;;  %v13163_v45 = vrot.slane %v7770_v58, 9  ;;  %v7780_v3 = vcombine.high %v7610_v31, %v7610_v31 }
 0x46e   :  { %v7787_v2 = vrot.slane %v7610_v31, %v17699_v56 }
 0x46f   :  { %v7779_v39 = vcombine.high %v7777_v32, %v7777_v32  ;;  %v13164_v36 = vrot.slane %v7778_v24, 9  ;;  %v13165_v60 = vrot.slane %v7777_v32, 9  ;;  %v7794_v41 = vrot.slane %v7780_v3, %v17699_v56  ;;  %v15501_v3 = vpop.permute.xlu0 %15500 }
 0x470   :  { %v7795_v37 = vcombine.high %v7787_v2, %v7787_v2  ;;  %v13167_v17 = vrot.slane %v7787_v2, 9  ;;  %v20762_v7 = vmax.f32 %v7770_v58, %v13163_v45 }
 0x471   :  { %v13166_v42 = vrot.slane %v7779_v39, 9  ;;  %v7796_v48 = vcombine.high %v7794_v41, %v7794_v41  ;;  %v13169_v38 = vrot.slane %v7794_v41, 9  ;;  %v20766_v46 = vmax.f32 %v7778_v24, %v13164_v36 }
 0x472   :  { %v13168_v0 = vrot.slane %v7795_v37, 9  ;;  %v20764_v12 = vmax.f32 %v7787_v2, %v13167_v17  ;;  %v20768_v35 = vmax.f32 %v7777_v32, %v13165_v60  ;;  %v15503_v36 = vunpack.i.h.bf16 %v15501_v3 }
 0x473   :  { %v13170_v10 = vrot.slane %v7796_v48, 9  ;;  %v20772_v31 = vmax.f32 %v7794_v41, %v13169_v38  ;;  %v20776_v21 = vmax.f32 %v7779_v39, %v13166_v42  ;;  %v15502_v60 = vunpack.i.l.bf16 %v15501_v3 }
 0x474   :  { %v20770_v19 = vmax.f32 %v7795_v37, %v13168_v0  ;;  %v15506_v2 = vpop.permute.xlu1 %15505 }
 0x475   :  { %v20778_v58 = vmax.f32 %v7796_v48, %v13170_v10  ;;  %v15508_v37 = vunpack.i.h.bf16 %v15506_v2  ;;  %v15507_v17 = vunpack.i.l.bf16 %v15506_v2  ;;  %v7328_v48 = vsel %vm2560_vm7, %v20553_v61, %v15503_v36 }
 0x476   :  { %v7327_v0 = vsel %vm2560_vm7, %v20466_v47, %v15502_v60  ;;  %vm12821_vm7 = vcmask 1024  }
 0x477   :  { %v7343_v38 = vsel %vm2820_vm11, %v7328_v48, %v15508_v37  ;;  %v7342_v10 = vsel %vm2820_vm11, %v7327_v0, %v15507_v17 }
 0x48c   :  { %v15511_v41 = vpop.permute.xlu0 %15510 }
 0x48d   :  { %v15513_v39 = vunpack.i.h.bf16 %v15511_v41  ;;  %v15512_v42 = vunpack.i.l.bf16 %v15511_v41 }
 0x48f   :  { %v7359_v2 = vsel %vm7344_vm5, %v7342_v10, %v15512_v42  ;;  %v7360_v41 = vsel %vm7344_vm5, %v7343_v38, %v15513_v39 }
 0x490   :  { %v15516_v32 = vpop.permute.xlu1 %15515  ;;  %v15521_v45 = vpop.permute.xlu0 %15520 }
 0x491   :  { %v15518_v24 = vunpack.i.h.bf16 %v15516_v32  ;;  %v15517_v40 = vunpack.i.l.bf16 %v15516_v32  ;;  %v15523_v3 = vunpack.i.h.bf16 %v15521_v45  ;;  %v15522_v30 = vunpack.i.l.bf16 %v15521_v45 }
 0x493   :  { %v7377_v57 = vsel %vm7361_vm10, %v7360_v41, %v15518_v24  ;;  %v7376_v61 = vsel %vm7361_vm10, %v7359_v2, %v15517_v40 }
 0x494   :  { %v7394_v47 = vsel %vm7378_vm6, %v7377_v57, %v15523_v3  ;;  %v7253_v36 = vpop.permute.xlu1 %7252  ;;  %v7393_v60 = vsel %vm7378_vm6, %v7376_v61, %v15522_v30  ;;  %v7298_v37 = vpop.permute.xlu0 %7297 }
 0x495   :  { %v7410_v17 = vsel %vm7395_vm8, %v7393_v60, %v7253_v36  ;;  %v7411_v45 = vsel %vm7395_vm8, %v7394_v47, %v15398_v50 }
 0x496   :  { %v7427_v32 = vsel %vm7412_vm12, %v7410_v17, %v7298_v37  ;;  %v7428_v24 = vsel %vm7412_vm12, %v7411_v45, %v15403_v6 }
 0x497   :  { %v7443_v39 = vpack.c.bf16 %v7428_v24, %v7427_v32 }
 0x499   :  { %7637 = vmatmul.mubr.bf16.gmra.mrb[28].mxu1 %v7443_v39 }
 0x4bd   :  { %v7614_v40 = vpop.f32.mrb[16].mxu1 }
 0x4be   :  { %v7615_v57 = vadd.f32 %v20585_v18, %v7614_v40  ;;  %v7616_v42 = vpop.f32.mrb[17].mxu1  ;;  %v8285_v40 = vmax.f32 %v8253_v26, 0.0  ;;  %v8288_v26 = vmax.f32 %v21568_v28, 0.0 }
 0x4bf   :  { %v7617_v30 = vpop.f32.mrb[18].mxu1 }
 0x4c0   :  { %v7797_v48 = vcombine.high %v7615_v57, %v7615_v57  ;;  %v7804_v0 = vrot.slane %v7615_v57, %v17699_v56  ;;  %v7618_v15 = vadd.f32 %v20585_v18, %v7617_v30  ;;  %v7619_v38 = vpop.f32.mrb[19].mxu1  ;;  %v8362_v52 = vrot.slane %v8288_v26, %v18044_v43 }
 0x4c2   :  { %v7811_v50 = vrot.slane %v7797_v48, %v17699_v56  ;;  %v7812_v10 = vcombine.high %v7804_v0, %v7804_v0  ;;  %v13171_v3 = vrot.slane %v7804_v0, 9  ;;  %v7814_v63 = vcombine.high %v7618_v15, %v7618_v15 }
 0x4c3   :  { %v7821_v6 = vrot.slane %v7618_v15, %v17699_v56 }
 0x4c4   :  { %v7813_v2 = vcombine.high %v7811_v50, %v7811_v50  ;;  %v13172_v41 = vrot.slane %v7812_v10, 9  ;;  %v13173_v61 = vrot.slane %v7811_v50, 9  ;;  %v7828_v47 = vrot.slane %v7814_v63, %v17699_v56 }
 0x4c5   :  { %v7829_v36 = vcombine.high %v7821_v6, %v7821_v6  ;;  %v13175_v60 = vrot.slane %v7821_v6, 9  ;;  %v8221_v17 = vmax.f32 %v7804_v0, %v13171_v3  ;;  %v8287_v63 = vmax.f32 %v8255_v16, 0.0 }
 0x4c6   :  { %v13174_v37 = vrot.slane %v7813_v2, 9  ;;  %v7830_v45 = vcombine.high %v7828_v47, %v7828_v47  ;;  %v13177_v24 = vrot.slane %v7828_v47, 9  ;;  %v8222_v57 = vmax.f32 %v7812_v10, %v13172_v41 }
 0x4c7   :  { %v13176_v32 = vrot.slane %v7829_v36, 9  ;;  %v8225_v39 = vmax.f32 %v7821_v6, %v13175_v60  ;;  %v8223_v42 = vmax.f32 %v7811_v50, %v13173_v61  ;;  %v8286_v0 = vmax.f32 %v8254_v13, 0.0 }
 0x4c8   :  { %v13178_v30 = vrot.slane %v7830_v45, 9  ;;  %v8227_v15 = vmax.f32 %v7828_v47, %v13177_v24  ;;  %v8224_v1 = vmax.f32 %v7813_v2, %v13174_v37  ;;  %v8322_v50 = vrot.slane %v8285_v40, %v18044_v43  ;;  %v8550_v47 = vld [vmem:[#allocation3 + $0x8] sm:$0xff]  ;;  %v8557_v24 = vld [vmem:[#allocation3 + $0x40] sm:$0xff] }
 0x4c9   :  { %v8226_v48 = vmax.f32 %v7829_v36, %v13176_v32  ;;  %v8269_v38 = vmax.f32 %v8221_v17, %v8225_v39  ;;  %v8334_v16 = vrot.slane %v8286_v0, %v18044_v43  ;;  %v8348_v33 = vrot.slane %v8287_v63, %v18044_v43  ;;  %v8554_v32 = vld [vmem:[#allocation3 + $0x28] sm:$0xff]  ;;  %v8561_v39 = vld [vmem:[#allocation3 + $0x60] sm:$0xff] }
 0x4ca   :  { %v8228_v3 = vmax.f32 %v7830_v45, %v13178_v30  ;;  %v8271_v60 = vmax.f32 %v8223_v42, %v8227_v15  ;;  %v13206_v42 = vcombine.high %v8550_v47, %v8554_v32  ;;  %v8558_v30 = vld [vmem:[#allocation3 + $0x48] sm:$0xff]  ;;  %v8565_v15 = vld [vmem:[#allocation3 + $0x80] sm:$0xff]  ;;  %v13212_v63 = vcombine.high %v8557_v24, %v8561_v39 }
 0x4cb   :  { %v8270_v6 = vmax.f32 %v8222_v57, %v8226_v48  ;;  %v8301_v49 = vmax.f32 %v8269_v38, 0.0  ;;  %v13205_v57 = vcombine.low %v8550_v47, %v8554_v32  ;;  %v8562_v48 = vld [vmem:[#allocation3 + $0x68] sm:$0xff] }
 0x4cc   :  { %v8272_v10 = vmax.f32 %v8224_v1, %v8228_v3  ;;  %v8303_v41 = vmax.f32 %v8271_v60, 0.0  ;;  %v8553_v1 = vld [vmem:[#allocation3 + $0x20] sm:$0xff]  ;;  %v13214_v0 = vcombine.high %v8558_v30, %v8562_v48  ;;  %v8570_v60 = vld [vmem:[#allocation3 + $0xa8] sm:$0xff]  ;;  %10209 = vmatprep.subr.bf16.mxu0 %v13206_v42  ;;  %v13213_v28 = vcombine.low %v8558_v30, %v8562_v48 }
 0x4cd   :  { %v8326_v4 = vrot.slane %v8301_v49, %v18044_v43  ;;  %v8302_v20 = vmax.f32 %v8270_v6, 0.0  ;;  %v13203_v45 = vcombine.low %v8549_v5, %v8553_v1  ;;  %v13204_v40 = vcombine.high %v8549_v5, %v8553_v1  ;;  %v8569_v3 = vld [vmem:[#allocation3 + $0xa0] sm:$0xff]  ;;  %v8566_v6 = vld [vmem:[#allocation3 + $0x88] sm:$0xff]  ;;  %10210 = vmatpush1.bf16.msra.mxu0 %v13205_v57 }
 0x4ce   :  { %v8304_v51 = vmax.f32 %v8272_v10, 0.0  ;;  %v8352_v2 = vrot.slane %v8303_v41, %v18044_v43  ;;  %v13211_v49 = vcombine.low %v8557_v24, %v8561_v39  ;;  %10211 = vmatprep.subr.bf16.mxu0 %v13214_v0  ;;  %v13220_v26 = vcombine.high %v8565_v15, %v8569_v3  ;;  %v8578_v1 = vld [vmem:[#allocation3 + $0xe8] sm:$0xff] }
 0x4cf   :  { %v8338_v13 = vrot.slane %v8302_v20, %v18044_v43  ;;  %v20831_v61 = vsel %vm6662_vm13, %v8326_v4, %v8322_v50  ;;  %10127 = vmatprep.subr.bf16.mxu1 %v13204_v40  ;;  %v13222_v50 = vcombine.high %v8566_v6, %v8570_v60  ;;  %v13219_v10 = vcombine.low %v8565_v15, %v8569_v3 }
 0x4d0   :  { %v20838_v37 = vsel %vm6662_vm13, %v8352_v2, %v8348_v33  ;;  %v8366_v17 = vrot.slane %v8304_v51, %v18044_v43  ;;  %10128 = vmatpush1.bf16.msra.mxu1 %v13203_v45  ;;  %v13221_v41 = vcombine.low %v8566_v6, %v8570_v60  ;;  %v8573_v33 = vld [vmem:[#allocation3 + $0xc0] sm:$0xff]  ;;  %v21569_v15 = vmax.f32 %v20664_v11, %v20669_v22  ;;  %v8586_v11 = vld [vmem:[#allocation3 + $0x128] sm:$0xff] }
 0x4d1   :  { %v20835_v36 = vsel %vm6662_vm13, %v8338_v13, %v8334_v16  ;;  %10129 = vmatprep.subr.bf16.mxu1 %v13212_v63  ;;  %10212 = vmatpush1.bf16.msra.mxu0 %v13213_v28  ;;  %v8577_v51 = vld [vmem:[#allocation3 + $0xe0] sm:$0xff]  ;;  %v8574_v13 = vld [vmem:[#allocation3 + $0xc8] sm:$0xff] }
 0x4d2   :  { %v20842_v38 = vsel %vm6662_vm13, %v8366_v17, %v8362_v52  ;;  %10213 = vmatprep.subr.bf16.mxu0 %v13222_v50  ;;  %v13227_v52 = vcombine.low %v8573_v33, %v8577_v51  ;;  %v13228_v5 = vcombine.high %v8573_v33, %v8577_v51  ;;  %v13229_v24 = vcombine.low %v8574_v13, %v8578_v1  ;;  %v8585_v50 = vld [vmem:[#allocation3 + $0x120] sm:$0xff] }
 0x4d3   :  { %v13230_v39 = vcombine.high %v8574_v13, %v8578_v1  ;;  %v20852_v63 = vmax.f32 %v21569_v15, 0.0  ;;  %v8589_v22 = vld [vmem:[#allocation3 + $0x140] sm:$0xff]  ;;  %v8594_v1 = vld [vmem:[#allocation3 + $0x168] sm:$0xff]  ;;  %v21570_v15 = vmax.f32 %v20662_v34, %v20667_v54 }
 0x4d4   :  { %10130 = vmatpush1.bf16.msra.mxu1 %v13211_v49 }
 0x4d5   :  { %10131 = vmatprep.subr.bf16.mxu1 %v13220_v26  ;;  %10214 = vmatpush1.bf16.msra.mxu0 %v13221_v41  ;;  %v8581_v26 = vld [vmem:[#allocation3 + $0x100] sm:$0xff] }
 0x4d6   :  { %10215 = vmatprep.subr.bf16.mxu0 %v13230_v39 }
 0x4d8   :  { %10132 = vmatpush1.bf16.msra.mxu1 %v13219_v10  ;;  %v8582_v10 = vld [vmem:[#allocation3 + $0x108] sm:$0xff] }
 0x4d9   :  { %10133 = vmatprep.subr.bf16.mxu1 %v13228_v5  ;;  %10216 = vmatpush1.bf16.msra.mxu0 %v13229_v24  ;;  %v8590_v5 = vld [vmem:[#allocation3 + $0x148] sm:$0xff] }
 0x4dc   :  { %10134 = vmatpush1.bf16.msra.mxu1 %v13227_v52  ;;  %v8593_v52 = vld [vmem:[#allocation3 + $0x160] sm:$0xff] }
 0x4f6   :  { %v7622_v4 = vpop.f32.mrb[20].mxu1 }
 0x4f7   :  { %v7623_v20 = vadd.f32 %v20585_v18, %v7622_v4  ;;  %v7624_v16 = vpop.f32.mrb[21].mxu1 }
 0x4f8   :  { %v7625_v2 = vpop.f32.mrb[22].mxu1  ;;  %v13235_v16 = vcombine.low %v8581_v26, %v8585_v50 }
 0x4f9   :  { %v7831_v47 = vcombine.high %v7623_v20, %v7623_v20  ;;  %v7838_v17 = vrot.slane %v7623_v20, %v17699_v56  ;;  %v7626_v45 = vadd.f32 %v20585_v18, %v7625_v2  ;;  %v7627_v32 = vpop.f32.mrb[23].mxu1 }
 0x4fa   :  { %v13238_v32 = vcombine.high %v8582_v10, %v8586_v11 }
 0x4fb   :  { %v7845_v40 = vrot.slane %v7831_v47, %v17699_v56  ;;  %v7846_v57 = vcombine.high %v7838_v17, %v7838_v17  ;;  %v13179_v42 = vrot.slane %v7838_v17, 9  ;;  %v7848_v30 = vcombine.high %v7626_v45, %v7626_v45 }
 0x4fc   :  { %v7855_v48 = vrot.slane %v7626_v45, %v17699_v56  ;;  %v13237_v45 = vcombine.low %v8582_v10, %v8586_v11  ;;  %10217 = vmatprep.subr.bf16.mxu0 %v13238_v32 }
 0x4fd   :  { %v7847_v0 = vcombine.high %v7845_v40, %v7845_v40  ;;  %v13180_v18 = vrot.slane %v7846_v57, 9  ;;  %v13181_v3 = vrot.slane %v7845_v40, 9  ;;  %v20854_v6 = vmax.f32 %v7838_v17, %v13179_v42 }
 0x4fe   :  { %v7862_v60 = vrot.slane %v7848_v30, %v17699_v56  ;;  %v7863_v49 = vcombine.high %v7855_v48, %v7855_v48  ;;  %v13183_v28 = vrot.slane %v7855_v48, 9  ;;  %v13236_v17 = vcombine.high %v8581_v26, %v8585_v50  ;;  %v8601_v30 = vld [vmem:[#allocation3 + $0x1a0] sm:$0xff]  ;;  %10218 = vmatpush1.bf16.msra.mxu0 %v13237_v45 }
 0x4ff   :  { %v13182_v41 = vrot.slane %v7847_v0, 9  ;;  %v8230_v4 = vmax.f32 %v7846_v57, %v13180_v18  ;;  %v8231_v20 = vmax.f32 %v7845_v40, %v13181_v3  ;;  %v8597_v40 = vld [vmem:[#allocation3 + $0x180] sm:$0xff]  ;;  %v8290_v18 = vmax.f32 %v21570_v15, 0.0 }
 0x500   :  { %v7864_v33 = vcombine.high %v7862_v60, %v7862_v60  ;;  %v13184_v51 = vrot.slane %v7863_v49, 9  ;;  %v13185_v13 = vrot.slane %v7862_v60, 9  ;;  %v8233_v2 = vmax.f32 %v7855_v48, %v13183_v28  ;;  %10135 = vmatprep.subr.bf16.mxu1 %v13236_v17 }
 0x501   :  { %v8232_v47 = vmax.f32 %v7847_v0, %v13182_v41  ;;  %v13243_v48 = vcombine.low %v8589_v22, %v8593_v52  ;;  %v13244_v3 = vcombine.high %v8589_v22, %v8593_v52  ;;  %v13245_v28 = vcombine.low %v8590_v5, %v8594_v1  ;;  %10136 = vmatpush1.bf16.msra.mxu1 %v13235_v16  ;;  %v8609_v22 = vld [vmem:[#allocation3 + $0x1e0] sm:$0xff]  ;;  %v8610_v52 = vld [vmem:[#allocation3 + $0x1e8] sm:$0xff] }
 0x502   :  { %v13186_v24 = vrot.slane %v7864_v33, 9  ;;  %v8234_v39 = vmax.f32 %v7863_v49, %v13184_v51  ;;  %v8235_v42 = vmax.f32 %v7862_v60, %v13185_v13  ;;  %v8273_v57 = vmax.f32 %v20854_v6, %v8233_v2  ;;  %v8598_v49 = vld [vmem:[#allocation3 + $0x188] sm:$0xff]  ;;  %v8605_v13 = vld [vmem:[#allocation3 + $0x1c0] sm:$0xff] }
 0x503   :  { %v8602_v60 = vld [vmem:[#allocation3 + $0x1a8] sm:$0xff]  ;;  %v21571_v6 = vmax.f32 %v20675_v59, %v20677_v44  ;;  %10137 = vmatprep.subr.bf16.mxu1 %v13244_v3  ;;  %v13246_v41 = vcombine.high %v8590_v5, %v8594_v1  ;;  %v13252_v34 = vcombine.high %v8597_v40, %v8601_v30  ;;  %v13260_v45 = vcombine.high %v8605_v13, %v8609_v22 }
 0x504   :  { %v8236_v0 = vmax.f32 %v7864_v33, %v13186_v24  ;;  %v8274_v26 = vmax.f32 %v8230_v4, %v8234_v39  ;;  %v8275_v50 = vmax.f32 %v8231_v20, %v8235_v42  ;;  %v8388_v33 = vrot.slane %v8290_v18, %v18044_v43  ;;  %v8606_v2 = vld [vmem:[#allocation3 + $0x1c8] sm:$0xff]  ;;  %v8613_v42 = vld [vmem:[#allocation3 + $0x200] sm:$0xff] }
 0x505   :  { %v8292_v10 = vmax.f32 %v21571_v6, 0.0  ;;  %v8402_v4 = vrot.slane %v20852_v63, %v18044_v43  ;;  %10219 = vmatprep.subr.bf16.mxu0 %v13246_v41  ;;  %v13251_v20 = vcombine.low %v8597_v40, %v8601_v30  ;;  %v13254_v16 = vcombine.high %v8598_v49, %v8602_v60  ;;  %10138 = vmatpush1.bf16.msra.mxu1 %v13243_v48  ;;  %v8617_v40 = vld [vmem:[#allocation3 + $0x220] sm:$0xff]  ;;  %v8614_v18 = vld [vmem:[#allocation3 + $0x208] sm:$0xff] }
 0x506   :  { %v8276_v54 = vmax.f32 %v8232_v47, %v8236_v0  ;;  %v8307_v11 = vmax.f32 %v8275_v50, 0.0  ;;  %v8306_v51 = vmax.f32 %v8274_v26, 0.0  ;;  %10220 = vmatpush1.bf16.msra.mxu0 %v13245_v28  ;;  %v13253_v1 = vcombine.low %v8598_v49, %v8602_v60  ;;  %10139 = vmatprep.subr.bf16.mxu1 %v13252_v34  ;;  %v8622_v60 = vld [vmem:[#allocation3 + $0x248] sm:$0xff] }
 0x507   :  { %v8305_v47 = vmax.f32 %v8273_v57, 0.0  ;;  %v8416_v17 = vrot.slane %v8292_v10, %v18044_v43  ;;  %10221 = vmatprep.subr.bf16.mxu0 %v13254_v16  ;;  %v13262_v39 = vcombine.high %v8606_v2, %v8610_v52  ;;  %v8618_v57 = vld [vmem:[#allocation3 + $0x228] sm:$0xff]  ;;  %v21572_v48 = vmax.f32 %v20658_v9, %v20660_v53  ;;  %v8625_v53 = vld [vmem:[#allocation3 + $0x260] sm:$0xff] }
 0x508   :  { %v8308_v59 = vmax.f32 %v8276_v54, 0.0  ;;  %v8392_v44 = vrot.slane %v8306_v51, %v18044_v43  ;;  %v8406_v5 = vrot.slane %v8307_v11, %v18044_v43  ;;  %v13259_v0 = vcombine.low %v8605_v13, %v8609_v22  ;;  %v8626_v6 = vld [vmem:[#allocation3 + $0x268] sm:$0xff]  ;;  %v8629_v54 = vld [vmem:[#allocation3 + $0x280] sm:$0xff] }
 0x509   :  { %v8289_v3 = vmax.f32 %v21572_v48, 0.0  ;;  %10140 = vmatpush1.bf16.msra.mxu1 %v13251_v20  ;;  %v13261_v26 = vcombine.low %v8606_v2, %v8610_v52  ;;  %v13268_v50 = vcombine.high %v8613_v42, %v8617_v40  ;;  %v8380_v49 = vrot.slane %v8305_v47, %v18044_v43  ;;  %v8633_v11 = vld [vmem:[#allocation3 + $0x2a0] sm:$0xff]  ;;  %v8630_v13 = vld [vmem:[#allocation3 + $0x288] sm:$0xff] }
 0x50a   :  { %v8393_v63 = vsel %vm6662_vm13, %v8392_v44, %v8388_v33  ;;  %v8407_v32 = vsel %vm6662_vm13, %v8406_v5, %v8402_v4  ;;  %v8420_v24 = vrot.slane %v8308_v59, %v18044_v43  ;;  %10222 = vmatpush1.bf16.msra.mxu0 %v13253_v1  ;;  %10141 = vmatprep.subr.bf16.mxu1 %v13260_v45  ;;  %v20885_v22 = vld [vmem:[#allocation3 + $0x400] sm:$0xff]  ;;  %v8634_v4 = vld [vmem:[#allocation3 + $0x2a8] sm:$0xff] }
 0x50b   :  { %v15524_v30 = vpack.i.bf16 %v20835_v36, %v8393_v63  ;;  %v15529_v15 = vpack.i.bf16 %v20838_v37, %v8407_v32  ;;  %v8621_v37 = vld [vmem:[#allocation3 + $0x240] sm:$0xff]  ;;  %10223 = vmatprep.subr.bf16.mxu0 %v13262_v39  ;;  %v13270_v9 = vcombine.high %v8614_v18, %v8618_v57  ;;  %v8376_v10 = vrot.slane %v8289_v3, %v18044_v43  ;;  %v20892_v16 = vld [vmem:[#allocation3 + $0x408] sm:$0xff] }
 0x50c   :  { %v8421_v28 = vsel %vm6662_vm13, %v8420_v24, %v8416_v17  ;;  %v13267_v41 = vcombine.low %v8613_v42, %v8617_v40  ;;  %v13269_v34 = vcombine.low %v8614_v18, %v8618_v57  ;;  %v13278_v51 = vcombine.high %v8622_v60, %v8626_v6  ;;  %v20887_v33 = vld [vmem:[#allocation3 + $0x420] sm:$0xff]  ;;  %v20894_v2 = vld [vmem:[#allocation3 + $0x428] sm:$0xff] }
 0x50d   :  { %15525 = vrot.lane.b32.xlu1 %v15524_v30, %s16045_s20  ;;  %15530 = vrot.lane.b32.xlu0 %v15529_v15, %s16058_s14  ;;  %v15534_v36 = vpack.i.bf16 %v20842_v38, %v8421_v28  ;;  %v13276_v38 = vcombine.high %v8621_v37, %v8625_v53  ;;  %v20890_v20 = vsel %vm6662_vm13, %v8380_v49, %v8376_v10  ;;  %v8637_v47 = vld [vmem:[#allocation3 + $0x2c0] sm:$0xff]  ;;  %v8638_v63 = vld [vmem:[#allocation3 + $0x2c8] sm:$0xff] }
 0x50e   :  { %10142 = vmatpush1.bf16.msra.mxu1 %v13259_v0  ;;  %10224 = vmatpush1.bf16.msra.mxu0 %v13261_v26  ;;  %v13275_v52 = vcombine.low %v8621_v37, %v8625_v53  ;;  %v13277_v59 = vcombine.low %v8622_v60, %v8626_v6  ;;  %v13331_v44 = vcombine.low %v20885_v22, %v20887_v33  ;;  %v8641_v45 = vld [vmem:[#allocation3 + $0x2e0] sm:$0xff]  ;;  %v8642_v32 = vld [vmem:[#allocation3 + $0x2e8] sm:$0xff] }
 0x50f   :  { %10143 = vmatprep.subr.bf16.mxu1 %v13268_v50  ;;  %10225 = vmatprep.subr.bf16.mxu0 %v13270_v9  ;;  %v13284_v5 = vcombine.high %v8629_v54, %v8633_v11  ;;  %v13286_v1 = vcombine.high %v8630_v13, %v8634_v4  ;;  %v13333_v17 = vcombine.low %v20892_v16, %v20894_v2  ;;  %v8645_v30 = vld [vmem:[#allocation3 + $0x300] sm:$0xff]  ;;  %v8646_v18 = vld [vmem:[#allocation3 + $0x308] sm:$0xff] }
 0x510   :  { %v13283_v24 = vcombine.low %v8629_v54, %v8633_v11  ;;  %v13285_v39 = vcombine.low %v8630_v13, %v8634_v4  ;;  %v13292_v42 = vcombine.high %v8637_v47, %v8641_v45  ;;  %v13294_v40 = vcombine.high %v8638_v63, %v8642_v32  ;;  %v8649_v15 = vld [vmem:[#allocation3 + $0x320] sm:$0xff]  ;;  %v8650_v57 = vld [vmem:[#allocation3 + $0x328] sm:$0xff] }
 0x511   :  { %15535 = vrot.lane.b32.xlu1 %v15534_v36, %s16060_s16  ;;  %v13291_v48 = vcombine.low %v8637_v47, %v8641_v45  ;;  %v13293_v3 = vcombine.low %v8638_v63, %v8642_v32  ;;  %v13300_v28 = vcombine.high %v8645_v30, %v8649_v15  ;;  %v13302_v0 = vcombine.high %v8646_v18, %v8650_v57  ;;  %v8653_v26 = vld [vmem:[#allocation3 + $0x340] sm:$0xff]  ;;  %v8654_v50 = vld [vmem:[#allocation3 + $0x348] sm:$0xff] }
 0x512   :  { %10144 = vmatpush1.bf16.msra.mxu1 %v13267_v41  ;;  %10226 = vmatpush1.bf16.msra.mxu0 %v13269_v34  ;;  %v8657_v36 = vld [vmem:[#allocation3 + $0x360] sm:$0xff]  ;;  %v8658_v37 = vld [vmem:[#allocation3 + $0x368] sm:$0xff]  ;;  %v13299_v49 = vcombine.low %v8645_v30, %v8649_v15  ;;  %v13301_v9 = vcombine.low %v8646_v18, %v8650_v57 }
 0x513   :  { %10145 = vmatprep.subr.bf16.mxu1 %v13276_v38  ;;  %10227 = vmatprep.subr.bf16.mxu0 %v13278_v51  ;;  %v13308_v53 = vcombine.high %v8653_v26, %v8657_v36  ;;  %v13310_v60 = vcombine.high %v8654_v50, %v8658_v37  ;;  %v8661_v6 = vld [vmem:[#allocation3 + $0x380] sm:$0xff]  ;;  %v8662_v41 = vld [vmem:[#allocation3 + $0x388] sm:$0xff]  ;;  %v13307_v54 = vcombine.low %v8653_v26, %v8657_v36 }
 0x514   :  { %v8665_v10 = vld [vmem:[#allocation3 + $0x3a0] sm:$0xff]  ;;  %v8666_v34 = vld [vmem:[#allocation3 + $0x3a8] sm:$0xff]  ;;  %v13309_v11 = vcombine.low %v8654_v50, %v8658_v37 }
 0x515   :  { %v13316_v38 = vcombine.high %v8661_v6, %v8665_v10  ;;  %v13318_v51 = vcombine.high %v8662_v41, %v8666_v34  ;;  %v8669_v13 = vld [vmem:[#allocation3 + $0x3c0] sm:$0xff] }
 0x516   :  { %10146 = vmatpush1.bf16.msra.mxu1 %v13275_v52  ;;  %10228 = vmatpush1.bf16.msra.mxu0 %v13277_v59  ;;  %v8673_v4 = vld [vmem:[#allocation3 + $0x3e0] sm:$0xff]  ;;  %v8670_v52 = vld [vmem:[#allocation3 + $0x3c8] sm:$0xff] }
 0x517   :  { %10147 = vmatprep.subr.bf16.mxu1 %v13284_v5  ;;  %10229 = vmatprep.subr.bf16.mxu0 %v13286_v1  ;;  %v8674_v59 = vld [vmem:[#allocation3 + $0x3e8] sm:$0xff]  ;;  %v13315_v5 = vcombine.low %v8661_v6, %v8665_v10  ;;  %v13317_v1 = vcombine.low %v8662_v41, %v8666_v34  ;;  %v13324_v47 = vcombine.high %v8669_v13, %v8673_v4 }
 0x518   :  { %v13326_v45 = vcombine.high %v8670_v52, %v8674_v59  ;;  %v13323_v63 = vcombine.low %v8669_v13, %v8673_v4  ;;  %v13325_v32 = vcombine.low %v8670_v52, %v8674_v59  ;;  %v21573_v13 = vmax.f32 %v20713_v23, %v20715_v29 }
 0x519   :  { %v21576_v29 = vmax.f32 %v20727_v27, %v20729_v55 }
 0x51a   :  { %10148 = vmatpush1.bf16.msra.mxu1 %v13283_v24  ;;  %10230 = vmatpush1.bf16.msra.mxu0 %v13285_v39  ;;  %v13332_v24 = vcombine.high %v20885_v22, %v20887_v33  ;;  %v13334_v39 = vcombine.high %v20892_v16, %v20894_v2  ;;  %v8293_v4 = vmax.f32 %v21573_v13, 0.0  ;;  %v8709_v16 = vld [vmem:[#allocation3 + $0x500] sm:$0xff] }
 0x51b   :  { %10149 = vmatprep.subr.bf16.mxu1 %v13292_v42  ;;  %10231 = vmatprep.subr.bf16.mxu0 %v13294_v40  ;;  %v15994_v40 = vld [vmem:[%s21207_s4] ss:$0 sm:$0xff]  ;;  %v8713_v2 = vld [vmem:[#allocation3 + $0x520] sm:$0xff] }
 0x51e   :  { %10150 = vmatpush1.bf16.msra.mxu1 %v13291_v48  ;;  %10232 = vmatpush1.bf16.msra.mxu0 %v13293_v3 }
 0x51f   :  { %10151 = vmatprep.subr.bf16.mxu1 %v13300_v28  ;;  %10233 = vmatprep.subr.bf16.mxu0 %v13302_v0 }
 0x522   :  { %10152 = vmatpush1.bf16.msra.mxu1 %v13299_v49  ;;  %10234 = vmatpush1.bf16.msra.mxu0 %v13301_v9 }
 0x523   :  { %10153 = vmatprep.subr.bf16.mxu1 %v13308_v53  ;;  %10235 = vmatprep.subr.bf16.mxu0 %v13310_v60 }
 0x526   :  { %10154 = vmatpush1.bf16.msra.mxu1 %v13307_v54  ;;  %10236 = vmatpush1.bf16.msra.mxu0 %v13309_v11 }
 0x527   :  { %10155 = vmatprep.subr.bf16.mxu1 %v13316_v38  ;;  %10237 = vmatprep.subr.bf16.mxu0 %v13318_v51 }
 0x52a   :  { %10156 = vmatpush1.bf16.msra.mxu1 %v13315_v5  ;;  %10238 = vmatpush1.bf16.msra.mxu0 %v13317_v1 }
 0x52b   :  { %10157 = vmatprep.subr.bf16.mxu1 %v13324_v47  ;;  %10239 = vmatprep.subr.bf16.mxu0 %v13326_v45 }
 0x52e   :  { %10158 = vmatpush1.bf16.msra.mxu1 %v13323_v63  ;;  %10240 = vmatpush1.bf16.msra.mxu0 %v13325_v32  ;;  %v21574_v63 = vmax.f32 %v20719_v62, %v20723_v8 }
 0x52f   :  { %10168 = vmatprep.subr.bf16.mxu1 %v13332_v24  ;;  %10250 = vmatprep.subr.bf16.mxu0 %v13334_v39  ;;  %v21575_v39 = vmax.f32 %v20717_v25, %v20721_v14 }
 0x530   :  { %v8295_v32 = vmax.f32 %v21574_v63, 0.0 }
 0x532   :  { %v8456_v25 = vrot.slane %v8295_v32, %v18044_v43 }
 0x538   :  { %v7630_v42 = vpop.f32.mrb[24].mxu1 }
 0x539   :  { %v7631_v30 = vadd.f32 %v15994_v40, %v7630_v42  ;;  %v7632_v15 = vpop.f32.mrb[25].mxu1  ;;  %v8294_v42 = vmax.f32 %v21575_v39, 0.0 }
 0x53a   :  { %v7633_v18 = vpop.f32.mrb[26].mxu1 }
 0x53b   :  { %v7865_v57 = vcombine.high %v7631_v30, %v7631_v30  ;;  %v7872_v48 = vrot.slane %v7631_v30, %v17699_v56  ;;  %v7634_v3 = vadd.f32 %v15994_v40, %v7633_v18  ;;  %v7635_v28 = vpop.f32.mrb[27].mxu1 }
 0x53d   :  { %v7879_v0 = vrot.slane %v7865_v57, %v17699_v56  ;;  %v7880_v26 = vcombine.high %v7872_v48, %v7872_v48  ;;  %v13187_v36 = vrot.slane %v7872_v48, 9  ;;  %v7882_v50 = vcombine.high %v7634_v3, %v7634_v3 }
 0x53e   :  { %v7889_v37 = vrot.slane %v7634_v3, %v17699_v56  ;;  %v8296_v57 = vmax.f32 %v21576_v29, 0.0 }
 0x53f   :  { %v7881_v49 = vcombine.high %v7879_v0, %v7879_v0  ;;  %v13188_v9 = vrot.slane %v7880_v26, 9  ;;  %v13189_v53 = vrot.slane %v7879_v0, 9  ;;  %v7896_v60 = vrot.slane %v7882_v50, %v17699_v56 }
 0x540   :  { %v7897_v6 = vcombine.high %v7889_v37, %v7889_v37  ;;  %v13191_v10 = vrot.slane %v7889_v37, 9  ;;  %v8237_v34 = vmax.f32 %v7872_v48, %v13187_v36  ;;  %v8430_v48 = vrot.slane %v8293_v4, %v18044_v43 }
 0x541   :  { %v13190_v41 = vrot.slane %v7881_v49, 9  ;;  %v7898_v54 = vcombine.high %v7896_v60, %v7896_v60  ;;  %v13193_v38 = vrot.slane %v7896_v60, 9  ;;  %v8238_v52 = vmax.f32 %v7880_v26, %v13188_v9 }
 0x542   :  { %v13192_v11 = vrot.slane %v7897_v6, 9  ;;  %v8241_v51 = vmax.f32 %v7889_v37, %v13191_v10  ;;  %v8239_v59 = vmax.f32 %v7879_v0, %v13189_v53  ;;  %v8442_v0 = vrot.slane %v8294_v42, %v18044_v43 }
 0x543   :  { %v13194_v5 = vrot.slane %v7898_v54, 9  ;;  %v8243_v47 = vmax.f32 %v7896_v60, %v13193_v38  ;;  %v8240_v24 = vmax.f32 %v7881_v49, %v13190_v41  ;;  %v8470_v37 = vrot.slane %v8296_v57, %v18044_v43 }
 0x544   :  { %v8242_v1 = vmax.f32 %v7897_v6, %v13192_v11  ;;  %v8277_v45 = vmax.f32 %v8237_v34, %v8241_v51 }
 0x545   :  { %v8244_v30 = vmax.f32 %v7898_v54, %v13194_v5  ;;  %v8279_v18 = vmax.f32 %v8239_v59, %v8243_v47 }
 0x546   :  { %v8278_v15 = vmax.f32 %v8238_v52, %v8242_v1  ;;  %v8309_v23 = vmax.f32 %v8277_v45, 0.0 }
 0x547   :  { %v8280_v3 = vmax.f32 %v8240_v24, %v8244_v30  ;;  %v8311_v28 = vmax.f32 %v8279_v18, 0.0 }
 0x548   :  { %v8434_v62 = vrot.slane %v8309_v23, %v18044_v43  ;;  %v8310_v8 = vmax.f32 %v8278_v15, 0.0  ;;  %v21577_v15 = vmax.f32 %v20762_v7, %v20764_v12  ;;  %v21580_v12 = vmax.f32 %v20776_v21, %v20778_v58 }
 0x549   :  { %v8312_v14 = vmax.f32 %v8280_v3, 0.0  ;;  %v8460_v36 = vrot.slane %v8311_v28, %v18044_v43 }
 0x54a   :  { %v8446_v26 = vrot.slane %v8310_v8, %v18044_v43  ;;  %v20930_v50 = vsel %vm6662_vm13, %v8434_v62, %v8430_v48  ;;  %v8297_v18 = vmax.f32 %v21577_v15, 0.0  ;;  %v8690_v15 = vld [vmem:[#allocation3 + $0x468] sm:$0xff] }
 0x54b   :  { %v20936_v55 = vsel %vm6662_vm13, %v8460_v36, %v8456_v25  ;;  %v8474_v49 = vrot.slane %v8312_v14, %v18044_v43 }
 0x54c   :  { %v20933_v27 = vsel %vm6662_vm13, %v8446_v26, %v8442_v0  ;;  %v21579_v0 = vmax.f32 %v20766_v46, %v20770_v19 }
 0x54d   :  { %v20941_v9 = vsel %vm6662_vm13, %v8474_v49, %v8470_v37  ;;  %v8300_v37 = vmax.f32 %v21580_v12, 0.0  ;;  %v8484_v49 = vrot.slane %v8297_v18, %v18044_v43 }
 0x54e   :  { %v8298_v25 = vmax.f32 %v21579_v0, 0.0 }
 0x54f   :  { %v8524_v21 = vrot.slane %v8300_v37, %v18044_v43 }
 0x56c   :  { %v7638_v53 = vpop.f32.mrb[28].mxu1 }
 0x56d   :  { %v7639_v60 = vadd.f32 %v15994_v40, %v7638_v53  ;;  %v7640_v6 = vpop.f32.mrb[29].mxu1 }
 0x56e   :  { %v7641_v10 = vpop.f32.mrb[30].mxu1  ;;  %v8496_v6 = vrot.slane %v8298_v25, %v18044_v43 }
 0x56f   :  { %v7899_v41 = vcombine.high %v7639_v60, %v7639_v60  ;;  %v7906_v34 = vrot.slane %v7639_v60, %v17699_v56  ;;  %v7642_v54 = vadd.f32 %v15994_v40, %v7641_v10  ;;  %v7643_v11 = vpop.f32.mrb[31].mxu1 }
 0x571   :  { %v7913_v38 = vrot.slane %v7899_v41, %v17699_v56  ;;  %v7914_v51 = vcombine.high %v7906_v34, %v7906_v34  ;;  %v13195_v13 = vrot.slane %v7906_v34, 9  ;;  %v7916_v4 = vcombine.high %v7642_v54, %v7642_v54 }
 0x572   :  { %v7923_v52 = vrot.slane %v7642_v54, %v17699_v56 }
 0x573   :  { %v7915_v59 = vcombine.high %v7913_v38, %v7913_v38  ;;  %v13196_v5 = vrot.slane %v7914_v51, 9  ;;  %v13197_v1 = vrot.slane %v7913_v38, 9  ;;  %v7930_v47 = vrot.slane %v7916_v4, %v17699_v56 }
 0x574   :  { %v7931_v45 = vcombine.high %v7923_v52, %v7923_v52  ;;  %v13199_v63 = vrot.slane %v7923_v52, 9  ;;  %v8245_v24 = vmax.f32 %v7906_v34, %v13195_v13  ;;  %v21578_v56 = vmax.f32 %v20768_v35, %v20772_v31 }
 0x575   :  { %v13198_v32 = vrot.slane %v7915_v59, 9  ;;  %v7932_v39 = vcombine.high %v7930_v47, %v7930_v47  ;;  %v13201_v40 = vrot.slane %v7930_v47, 9  ;;  %v8246_v23 = vmax.f32 %v7914_v51, %v13196_v5 }
 0x576   :  { %v13200_v42 = vrot.slane %v7931_v45, 9  ;;  %v8249_v30 = vmax.f32 %v7923_v52, %v13199_v63  ;;  %v8247_v29 = vmax.f32 %v7913_v38, %v13197_v1  ;;  %v8299_v62 = vmax.f32 %v21578_v56, 0.0  ;;  %v8698_v56 = vld [vmem:[#allocation3 + $0x4a8] sm:$0xff] }
 0x577   :  { %v13202_v57 = vrot.slane %v7932_v39, 9  ;;  %v8251_v3 = vmax.f32 %v7930_v47, %v13201_v40  ;;  %v8248_v8 = vmax.f32 %v7915_v59, %v13198_v32 }
 0x578   :  { %v8250_v48 = vmax.f32 %v7931_v45, %v13200_v42  ;;  %v8281_v28 = vmax.f32 %v8245_v24, %v8249_v30  ;;  %v8510_v46 = vrot.slane %v8299_v62, %v18044_v43  ;;  %v8689_v30 = vld [vmem:[#allocation3 + $0x460] sm:$0xff] }
 0x579   :  { %v8252_v14 = vmax.f32 %v7932_v39, %v13202_v57  ;;  %v8283_v36 = vmax.f32 %v8247_v29, %v8251_v3  ;;  %v8685_v39 = vld [vmem:[#allocation3 + $0x440] sm:$0xff] }
 0x57a   :  { %v8282_v26 = vmax.f32 %v8246_v23, %v8250_v48  ;;  %v8313_v7 = vmax.f32 %v8281_v28, 0.0  ;;  %v13340_v29 = vcombine.high %v8685_v39, %v8689_v30  ;;  %v8693_v48 = vld [vmem:[#allocation3 + $0x480] sm:$0xff]  ;;  %v8694_v28 = vld [vmem:[#allocation3 + $0x488] sm:$0xff]  ;;  %v13339_v62 = vcombine.low %v8685_v39, %v8689_v30 }
 0x57b   :  { %v8284_v53 = vmax.f32 %v8248_v8, %v8252_v14  ;;  %v8315_v60 = vmax.f32 %v8283_v36, 0.0  ;;  %v8697_v3 = vld [vmem:[#allocation3 + $0x4a0] sm:$0xff]  ;;  %v13350_v25 = vcombine.high %v8694_v28, %v8698_v56  ;;  %v8702_v36 = vld [vmem:[#allocation3 + $0x4c8] sm:$0xff]  ;;  %v13349_v37 = vcombine.low %v8694_v28, %v8698_v56 }
 0x57c   :  { %v8488_v35 = vrot.slane %v8313_v7, %v18044_v43  ;;  %v8314_v31 = vmax.f32 %v8282_v26, 0.0  ;;  %v13348_v0 = vcombine.high %v8693_v48, %v8697_v3  ;;  %v8701_v14 = vld [vmem:[#allocation3 + $0x4c0] sm:$0xff]  ;;  %v8706_v7 = vld [vmem:[#allocation3 + $0x4e8] sm:$0xff]  ;;  %v13347_v12 = vcombine.low %v8693_v48, %v8697_v3 }
 0x57d   :  { %v8316_v19 = vmax.f32 %v8284_v53, 0.0  ;;  %v8514_v41 = vrot.slane %v8315_v60, %v18044_v43  ;;  %v8705_v26 = vld [vmem:[#allocation3 + $0x4e0] sm:$0xff]  ;;  %v13358_v33 = vcombine.high %v8702_v36, %v8706_v7  ;;  %v13357_v53 = vcombine.low %v8702_v36, %v8706_v7  ;;  %v8754_v48 = vld [vmem:[#allocation3 + $0x668] sm:$0xff] }
 0x57e   :  { %v8500_v10 = vrot.slane %v8314_v31, %v18044_v43  ;;  %v20966_v34 = vsel %vm6662_vm13, %v8488_v35, %v8484_v49  ;;  %v13356_v22 = vcombine.high %v8701_v14, %v8705_v26  ;;  %v13355_v49 = vcombine.low %v8701_v14, %v8705_v26  ;;  %v8717_v31 = vld [vmem:[#allocation3 + $0x540] sm:$0xff]  ;;  %v8762_v14 = vld [vmem:[#allocation3 + $0x6a8] sm:$0xff] }
 0x57f   :  { %v15526_v58 = vpop.permute.xlu1 %15525  ;;  %v15531_v54 = vpop.permute.xlu0 %15530  ;;  %v8515_v38 = vsel %vm6662_vm13, %v8514_v41, %v8510_v46  ;;  %v8528_v51 = vrot.slane %v8316_v19, %v18044_v43  ;;  %v13364_v60 = vcombine.high %v8709_v16, %v8713_v2  ;;  %v8718_v46 = vld [vmem:[#allocation3 + $0x548] sm:$0xff]  ;;  %v8745_v39 = vld [vmem:[#allocation3 + $0x620] sm:$0xff] }
 0x580   :  { %v8501_v11 = vsel %vm6662_vm13, %v8500_v10, %v8496_v6  ;;  %v15528_v13 = vunpack.i.h.bf16 %v15526_v58  ;;  %v15544_v52 = vpack.i.bf16 %v20936_v55, %v8515_v38  ;;  %v15527_v59 = vunpack.i.l.bf16 %v15526_v58  ;;  %v8721_v6 = vld [vmem:[#allocation3 + $0x560] sm:$0xff]  ;;  %v8722_v19 = vld [vmem:[#allocation3 + $0x568] sm:$0xff] }
 0x581   :  { %v15539_v4 = vpack.i.bf16 %v20933_v27, %v8501_v11  ;;  %v15533_v5 = vunpack.i.h.bf16 %v15531_v54  ;;  %v8529_v1 = vsel %vm6662_vm13, %v8528_v51, %v8524_v21  ;;  %v15532_v45 = vunpack.i.l.bf16 %v15531_v54  ;;  %v8725_v54 = vld [vmem:[#allocation3 + $0x580] sm:$0xff]  ;;  %v8726_v38 = vld [vmem:[#allocation3 + $0x588] sm:$0xff] }
 0x582   :  { %v8533_v47 = vsel %vm2820_vm11, %v20831_v61, %v15528_v13  ;;  %15545 = vrot.lane.b32.xlu1 %v15544_v52, %s16058_s14  ;;  %v15549_v63 = vpack.i.bf16 %v20941_v9, %v8529_v1  ;;  %v8536_v32 = vsel %vm2820_vm11, %v20890_v20, %v15527_v59  ;;  %v8686_v61 = vld [vmem:[#allocation3 + $0x448] sm:$0xff]  ;;  %v13363_v10 = vcombine.low %v8709_v16, %v8713_v2  ;;  %v8729_v11 = vld [vmem:[#allocation3 + $0x5a0] sm:$0xff] }
 0x583   :  { %15540 = vrot.lane.b32.xlu0 %v15539_v4, %s16045_s20  ;;  %v15536_v27 = vpop.permute.xlu1 %15535  ;;  %v8534_v42 = vsel %vm7361_vm10, %v8533_v47, %v15533_v5  ;;  %v8537_v40 = vsel %vm7361_vm10, %v8536_v32, %v15532_v45  ;;  %v13342_v57 = vcombine.high %v8686_v61, %v8690_v15  ;;  %v13341_v8 = vcombine.low %v8686_v61, %v8690_v15  ;;  %v8730_v51 = vld [vmem:[#allocation3 + $0x5a8] sm:$0xff]  ;;  %v8733_v5 = vld [vmem:[#allocation3 + $0x5c0] sm:$0xff] }
 0x584   :  { %v15538_v24 = vunpack.i.h.bf16 %v15536_v27  ;;  %v15537_v55 = vunpack.i.l.bf16 %v15536_v27  ;;  %v13372_v21 = vcombine.high %v8717_v31, %v8721_v6  ;;  %v13374_v58 = vcombine.high %v8718_v46, %v8722_v19  ;;  %v8737_v1 = vld [vmem:[#allocation3 + $0x5e0] sm:$0xff]  ;;  %v8734_v47 = vld [vmem:[#allocation3 + $0x5c8] sm:$0xff] }
 0x585   :  { %v13371_v13 = vcombine.low %v8717_v31, %v8721_v6  ;;  %v13373_v4 = vcombine.low %v8718_v46, %v8722_v19  ;;  %v13380_v52 = vcombine.high %v8725_v54, %v8729_v11  ;;  %v13382_v59 = vcombine.high %v8726_v38, %v8730_v51  ;;  %v8738_v45 = vld [vmem:[#allocation3 + $0x5e8] sm:$0xff] }
 0x586   :  { %v8535_v18 = vsel %vm7395_vm8, %v8534_v42, %v15538_v24  ;;  %v8538_v23 = vsel %vm7395_vm8, %v8537_v40, %v15537_v55  ;;  %v13381_v32 = vcombine.low %v8726_v38, %v8730_v51  ;;  %v13388_v27 = vcombine.high %v8733_v5, %v8737_v1  ;;  %v8741_v55 = vld [vmem:[#allocation3 + $0x600] sm:$0xff]  ;;  %v8742_v42 = vld [vmem:[#allocation3 + $0x608] sm:$0xff] }
 0x587   :  { %15550 = vrot.lane.b32.xlu0 %v15549_v63, %s16060_s16  ;;  %v20987_v9 = vpack.c.bf16 %v8535_v18, %v8535_v18  ;;  %v20989_v20 = vpack.c.bf16 %v8538_v23, %v8538_v23  ;;  %v13379_v63 = vcombine.low %v8725_v54, %v8729_v11  ;;  %v13390_v24 = vcombine.high %v8734_v47, %v8738_v45  ;;  %v8746_v40 = vld [vmem:[#allocation3 + $0x628] sm:$0xff]  ;;  %v8749_v23 = vld [vmem:[#allocation3 + $0x640] sm:$0xff] }
 0x588   :  { %v13387_v30 = vcombine.low %v8733_v5, %v8737_v1  ;;  %v13389_v61 = vcombine.low %v8734_v47, %v8738_v45  ;;  %v13396_v15 = vcombine.high %v8741_v55, %v8745_v39  ;;  %v13398_v18 = vcombine.high %v8742_v42, %v8746_v40  ;;  %v8770_v16 = vld [vmem:[#allocation3 + $0x6e8] sm:$0xff] }
 0x589   :  { %10159 = vmatprep.mubr.bf16.mxu1 %v20989_v20  ;;  %10241 = vmatprep.mubr.bf16.mxu0 %v20989_v20  ;;  %v13395_v3 = vcombine.low %v8741_v55, %v8745_v39  ;;  %v13397_v28 = vcombine.low %v8742_v42, %v8746_v40  ;;  %v8778_v31 = vld [vmem:[#allocation3 + $0x728] sm:$0xff] }
 0x58a   :  { %10160 = vmatmul.mubr.bf16.vlgmr.msra.gmra.mrb[32].mxu1 %v20987_v9  ;;  %10242 = vmatmul.mubr.bf16.vlgmr.msra.gmra.mrb[64].mxu0 %v20987_v9  ;;  %v8786_v54 = vld [vmem:[#allocation3 + $0x768] sm:$0xff] }
 0x58b   :  { %10169 = vmatpush1.bf16.msra.mxu1 %v13331_v44  ;;  %10251 = vmatpush1.bf16.msra.mxu0 %v13333_v17  ;;  %v8710_v44 = vld [vmem:[#allocation3 + $0x508] sm:$0xff] }
 0x58c   :  { %10170 = vmatprep.subr.bf16.mxu1 %v13340_v29  ;;  %10252 = vmatprep.subr.bf16.mxu0 %v13342_v57  ;;  %v8714_v17 = vld [vmem:[#allocation3 + $0x528] sm:$0xff]  ;;  %v8753_v29 = vld [vmem:[#allocation3 + $0x660] sm:$0xff] }
 0x58d   :  { %v13366_v35 = vcombine.high %v8710_v44, %v8714_v17  ;;  %v13365_v41 = vcombine.low %v8710_v44, %v8714_v17  ;;  %v8750_v57 = vld [vmem:[#allocation3 + $0x648] sm:$0xff]  ;;  %v13404_v56 = vcombine.high %v8749_v23, %v8753_v29  ;;  %v13403_v26 = vcombine.low %v8749_v23, %v8753_v29  ;;  %v8556_v23 = vld [vmem:[#allocation3 + $0x38] sm:$0xff] }
 0x58e   :  { %v13405_v36 = vcombine.low %v8750_v57, %v8754_v48  ;;  %v8794_v5 = vld [vmem:[#allocation3 + $0x7a8] sm:$0xff] }
 0x58f   :  { %10171 = vmatpush1.bf16.msra.mxu1 %v13339_v62  ;;  %10253 = vmatpush1.bf16.msra.mxu0 %v13341_v8  ;;  %v13406_v62 = vcombine.high %v8750_v57, %v8754_v48  ;;  %v8757_v8 = vld [vmem:[#allocation3 + $0x680] sm:$0xff]  ;;  %v8802_v55 = vld [vmem:[#allocation3 + $0x7e8] sm:$0xff] }
 0x590   :  { %10172 = vmatprep.subr.bf16.mxu1 %v13348_v0  ;;  %10254 = vmatprep.subr.bf16.mxu0 %v13350_v25  ;;  %v8761_v0 = vld [vmem:[#allocation3 + $0x6a0] sm:$0xff]  ;;  %v8758_v25 = vld [vmem:[#allocation3 + $0x688] sm:$0xff] }
 0x591   :  { %v13412_v7 = vcombine.high %v8757_v8, %v8761_v0  ;;  %v13411_v2 = vcombine.low %v8757_v8, %v8761_v0  ;;  %v13413_v44 = vcombine.low %v8758_v25, %v8762_v14 }
 0x593   :  { %10173 = vmatpush1.bf16.msra.mxu1 %v13347_v12  ;;  %10255 = vmatpush1.bf16.msra.mxu0 %v13349_v37  ;;  %v13414_v12 = vcombine.high %v8758_v25, %v8762_v14  ;;  %v8765_v37 = vld [vmem:[#allocation3 + $0x6c0] sm:$0xff] }
 0x594   :  { %10174 = vmatprep.subr.bf16.mxu1 %v13356_v22  ;;  %10256 = vmatprep.subr.bf16.mxu0 %v13358_v33  ;;  %v8769_v22 = vld [vmem:[#allocation3 + $0x6e0] sm:$0xff]  ;;  %v8766_v33 = vld [vmem:[#allocation3 + $0x6c8] sm:$0xff] }
 0x595   :  { %v13420_v17 = vcombine.high %v8765_v37, %v8769_v22  ;;  %v13419_v6 = vcombine.low %v8765_v37, %v8769_v22  ;;  %v13421_v46 = vcombine.low %v8766_v33, %v8770_v16 }
 0x597   :  { %10175 = vmatpush1.bf16.msra.mxu1 %v13355_v49  ;;  %10257 = vmatpush1.bf16.msra.mxu0 %v13357_v53  ;;  %v13422_v49 = vcombine.high %v8766_v33, %v8770_v16  ;;  %v8773_v53 = vld [vmem:[#allocation3 + $0x700] sm:$0xff]  ;;  %v8559_v33 = vld [vmem:[#allocation3 + $0x50] sm:$0xff] }
 0x598   :  { %10176 = vmatprep.subr.bf16.mxu1 %v13364_v60  ;;  %10258 = vmatprep.subr.bf16.mxu0 %v13366_v35  ;;  %v8777_v60 = vld [vmem:[#allocation3 + $0x720] sm:$0xff]  ;;  %v8774_v35 = vld [vmem:[#allocation3 + $0x708] sm:$0xff] }
 0x599   :  { %v13428_v19 = vcombine.high %v8773_v53, %v8777_v60  ;;  %v13427_v11 = vcombine.low %v8773_v53, %v8777_v60  ;;  %v13429_v38 = vcombine.low %v8774_v35, %v8778_v31 }
 0x59b   :  { %10177 = vmatpush1.bf16.msra.mxu1 %v13363_v10  ;;  %10259 = vmatpush1.bf16.msra.mxu0 %v13365_v41  ;;  %v13430_v10 = vcombine.high %v8774_v35, %v8778_v31  ;;  %v8781_v41 = vld [vmem:[#allocation3 + $0x740] sm:$0xff]  ;;  %v8567_v35 = vld [vmem:[#allocation3 + $0x90] sm:$0xff] }
 0x59c   :  { %10178 = vmatprep.subr.bf16.mxu1 %v13372_v21  ;;  %10260 = vmatprep.subr.bf16.mxu0 %v13374_v58  ;;  %v8785_v21 = vld [vmem:[#allocation3 + $0x760] sm:$0xff]  ;;  %v8782_v58 = vld [vmem:[#allocation3 + $0x748] sm:$0xff] }
 0x59d   :  { %v13436_v51 = vcombine.high %v8781_v41, %v8785_v21  ;;  %v13435_v1 = vcombine.low %v8781_v41, %v8785_v21  ;;  %v13437_v47 = vcombine.low %v8782_v58, %v8786_v54 }
 0x59f   :  { %10179 = vmatpush1.bf16.msra.mxu1 %v13371_v13  ;;  %10261 = vmatpush1.bf16.msra.mxu0 %v13373_v4  ;;  %v13438_v13 = vcombine.high %v8782_v58, %v8786_v54  ;;  %v8789_v4 = vld [vmem:[#allocation3 + $0x780] sm:$0xff] }
 0x5a0   :  { %10180 = vmatprep.subr.bf16.mxu1 %v13380_v52  ;;  %10262 = vmatprep.subr.bf16.mxu0 %v13382_v59  ;;  %v8793_v52 = vld [vmem:[#allocation3 + $0x7a0] sm:$0xff]  ;;  %v8790_v59 = vld [vmem:[#allocation3 + $0x788] sm:$0xff] }
 0x5a1   :  { %v13444_v45 = vcombine.high %v8789_v4, %v8793_v52  ;;  %v13443_v39 = vcombine.low %v8789_v4, %v8793_v52  ;;  %v13445_v42 = vcombine.low %v8790_v59, %v8794_v5 }
 0x5a3   :  { %10181 = vmatpush1.bf16.msra.mxu1 %v13379_v63  ;;  %10263 = vmatpush1.bf16.msra.mxu0 %v13381_v32  ;;  %v13446_v63 = vcombine.high %v8790_v59, %v8794_v5  ;;  %v8797_v32 = vld [vmem:[#allocation3 + $0x7c0] sm:$0xff] }
 0x5a4   :  { %10182 = vmatprep.subr.bf16.mxu1 %v13388_v27  ;;  %10264 = vmatprep.subr.bf16.mxu0 %v13390_v24  ;;  %v8801_v27 = vld [vmem:[#allocation3 + $0x7e0] sm:$0xff]  ;;  %v8798_v24 = vld [vmem:[#allocation3 + $0x7c8] sm:$0xff] }
 0x5a5   :  { %v13452_v40 = vcombine.high %v8797_v32, %v8801_v27  ;;  %v13451_v29 = vcombine.low %v8797_v32, %v8801_v27  ;;  %v13453_v57 = vcombine.low %v8798_v24, %v8802_v55 }
 0x5a7   :  { %10183 = vmatpush1.bf16.msra.mxu1 %v13387_v30  ;;  %10265 = vmatpush1.bf16.msra.mxu0 %v13389_v61  ;;  %v13454_v30 = vcombine.high %v8798_v24, %v8802_v55  ;;  %v8551_v61 = vld [vmem:[#allocation3 + $0x10] sm:$0xff] }
 0x5a8   :  { %10184 = vmatprep.subr.bf16.mxu1 %v13396_v15  ;;  %10266 = vmatprep.subr.bf16.mxu0 %v13398_v18  ;;  %v8555_v15 = vld [vmem:[#allocation3 + $0x30] sm:$0xff]  ;;  %v8552_v18 = vld [vmem:[#allocation3 + $0x18] sm:$0xff] }
 0x5a9   :  { %v13208_v48 = vcombine.high %v8551_v61, %v8555_v15  ;;  %v13209_v60 = vcombine.low %v8552_v18, %v8556_v23  ;;  %v8591_v55 = vld [vmem:[#allocation3 + $0x150] sm:$0xff] }
 0x5ab   :  { %10185 = vmatpush1.bf16.msra.mxu1 %v13395_v3  ;;  %10267 = vmatpush1.bf16.msra.mxu0 %v13397_v28  ;;  %v13210_v3 = vcombine.high %v8552_v18, %v8556_v23  ;;  %v8599_v23 = vld [vmem:[#allocation3 + $0x190] sm:$0xff] }
 0x5ac   :  { %10186 = vmatprep.subr.bf16.mxu1 %v13404_v56  ;;  %10268 = vmatprep.subr.bf16.mxu0 %v13406_v62 }
 0x5af   :  { %10187 = vmatpush1.bf16.msra.mxu1 %v13403_v26  ;;  %10269 = vmatpush1.bf16.msra.mxu0 %v13405_v36 }
 0x5b0   :  { %10188 = vmatprep.subr.bf16.mxu1 %v13412_v7  ;;  %10270 = vmatprep.subr.bf16.mxu0 %v13414_v12 }
 0x5b3   :  { %10189 = vmatpush1.bf16.msra.mxu1 %v13411_v2  ;;  %10271 = vmatpush1.bf16.msra.mxu0 %v13413_v44  ;;  %v8563_v44 = vld [vmem:[#allocation3 + $0x70] sm:$0xff] }
 0x5b4   :  { %10190 = vmatprep.subr.bf16.mxu1 %v13420_v17  ;;  %10272 = vmatprep.subr.bf16.mxu0 %v13422_v49  ;;  %v8560_v17 = vld [vmem:[#allocation3 + $0x58] sm:$0xff]  ;;  %v13216_v31 = vcombine.high %v8559_v33, %v8563_v44  ;;  %v13215_v41 = vcombine.low %v8559_v33, %v8563_v44 }
 0x5b5   :  { %v8564_v49 = vld [vmem:[#allocation3 + $0x78] sm:$0xff] }
 0x5b6   :  { %v13217_v21 = vcombine.low %v8560_v17, %v8564_v49  ;;  %v8616_v33 = vld [vmem:[#allocation3 + $0x218] sm:$0xff] }
 0x5b7   :  { %10191 = vmatpush1.bf16.msra.mxu1 %v13419_v6  ;;  %10273 = vmatpush1.bf16.msra.mxu0 %v13421_v46  ;;  %v13218_v6 = vcombine.high %v8560_v17, %v8564_v49  ;;  %v8571_v46 = vld [vmem:[#allocation3 + $0xb0] sm:$0xff] }
 0x5b8   :  { %10192 = vmatprep.subr.bf16.mxu1 %v13428_v19  ;;  %10274 = vmatprep.subr.bf16.mxu0 %v13430_v10  ;;  %v8568_v19 = vld [vmem:[#allocation3 + $0x98] sm:$0xff]  ;;  %v13224_v58 = vcombine.high %v8567_v35, %v8571_v46  ;;  %v13223_v4 = vcombine.low %v8567_v35, %v8571_v46 }
 0x5b9   :  { %v8572_v10 = vld [vmem:[#allocation3 + $0xb8] sm:$0xff] }
 0x5ba   :  { %v13226_v54 = vcombine.high %v8568_v19, %v8572_v10  ;;  %v13225_v52 = vcombine.low %v8568_v19, %v8572_v10  ;;  %v8624_v35 = vld [vmem:[#allocation3 + $0x258] sm:$0xff] }
 0x5bb   :  { %10193 = vmatpush1.bf16.msra.mxu1 %v13427_v11  ;;  %10275 = vmatpush1.bf16.msra.mxu0 %v13429_v38  ;;  %v8575_v11 = vld [vmem:[#allocation3 + $0xd0] sm:$0xff] }
 0x5bc   :  { %10194 = vmatprep.subr.bf16.mxu1 %v13436_v51  ;;  %10276 = vmatprep.subr.bf16.mxu0 %v13438_v13  ;;  %v8579_v38 = vld [vmem:[#allocation3 + $0xf0] sm:$0xff]  ;;  %v8576_v51 = vld [vmem:[#allocation3 + $0xd8] sm:$0xff] }
 0x5bd   :  { %v8580_v13 = vld [vmem:[#allocation3 + $0xf8] sm:$0xff]  ;;  %v13232_v59 = vcombine.high %v8575_v11, %v8579_v38 }
 0x5be   :  { %v13234_v5 = vcombine.high %v8576_v51, %v8580_v13  ;;  %v13233_v32 = vcombine.low %v8576_v51, %v8580_v13 }
 0x5bf   :  { %10195 = vmatpush1.bf16.msra.mxu1 %v13435_v1  ;;  %10277 = vmatpush1.bf16.msra.mxu0 %v13437_v47  ;;  %v8583_v1 = vld [vmem:[#allocation3 + $0x110] sm:$0xff] }
 0x5c0   :  { %10196 = vmatprep.subr.bf16.mxu1 %v13444_v45  ;;  %10278 = vmatprep.subr.bf16.mxu0 %v13446_v63  ;;  %v8587_v47 = vld [vmem:[#allocation3 + $0x130] sm:$0xff]  ;;  %v8584_v45 = vld [vmem:[#allocation3 + $0x118] sm:$0xff]  ;;  %v13231_v63 = vcombine.low %v8575_v11, %v8579_v38 }
 0x5c1   :  { %v13240_v27 = vcombine.high %v8583_v1, %v8587_v47 }
 0x5c3   :  { %10197 = vmatpush1.bf16.msra.mxu1 %v13443_v39  ;;  %10279 = vmatpush1.bf16.msra.mxu0 %v13445_v42  ;;  %v8595_v39 = vld [vmem:[#allocation3 + $0x170] sm:$0xff]  ;;  %v8592_v42 = vld [vmem:[#allocation3 + $0x158] sm:$0xff] }
 0x5c4   :  { %10198 = vmatprep.subr.bf16.mxu1 %v13452_v40  ;;  %10280 = vmatprep.subr.bf16.mxu0 %v13454_v30  ;;  %v8596_v40 = vld [vmem:[#allocation3 + $0x178] sm:$0xff]  ;;  %v13239_v30 = vcombine.low %v8583_v1, %v8587_v47 }
 0x5c5   :  { %v13250_v18 = vcombine.high %v8592_v42, %v8596_v40 }
 0x5c7   :  { %10199 = vmatpush1.bf16.msra.mxu1 %v13451_v29  ;;  %10281 = vmatpush1.bf16.msra.mxu0 %v13453_v57  ;;  %v8603_v29 = vld [vmem:[#allocation3 + $0x1b0] sm:$0xff]  ;;  %v8600_v57 = vld [vmem:[#allocation3 + $0x198] sm:$0xff] }
 0x5c8   :  { %10291 = vmatprep.subr.bf16.mxu1 %v13208_v48  ;;  %10373 = vmatprep.subr.bf16.mxu0 %v13210_v3  ;;  %v8604_v48 = vld [vmem:[#allocation3 + $0x1b8] sm:$0xff]  ;;  %v13247_v3 = vcombine.low %v8591_v55, %v8595_v39 }
 0x5f4   :  { %v15546_v56 = vpop.permute.xlu1 %15545 }
 0x5f5   :  { %v15541_v28 = vpop.permute.xlu0 %15540  ;;  %v15548_v0 = vunpack.i.h.bf16 %v15546_v56  ;;  %v15547_v25 = vunpack.i.l.bf16 %v15546_v56  ;;  %v13256_v56 = vcombine.high %v8599_v23, %v8603_v29 }
 0x5f6   :  { %v15543_v62 = vunpack.i.h.bf16 %v15541_v28  ;;  %v15542_v8 = vunpack.i.l.bf16 %v15541_v28  ;;  %v13249_v28 = vcombine.low %v8592_v42, %v8596_v40 }
 0x5f8   :  { %v8539_v14 = vsel %vm2820_vm11, %v20930_v50, %v15543_v62  ;;  %v8542_v26 = vsel %vm2820_vm11, %v20966_v34, %v15542_v8  ;;  %v13207_v34 = vcombine.low %v8551_v61, %v8555_v15  ;;  %v13248_v15 = vcombine.high %v8591_v55, %v8595_v39  ;;  %v8607_v8 = vld [vmem:[#allocation3 + $0x1d0] sm:$0xff] }
 0x5f9   :  { %v15551_v36 = vpop.permute.xlu0 %15550  ;;  %v8540_v37 = vsel %vm7361_vm10, %v8539_v14, %v15548_v0  ;;  %v8543_v22 = vsel %vm7361_vm10, %v8542_v26, %v15547_v25  ;;  %v13258_v62 = vcombine.high %v8600_v57, %v8604_v48  ;;  %v8611_v0 = vld [vmem:[#allocation3 + $0x1f0] sm:$0xff]  ;;  %v8608_v25 = vld [vmem:[#allocation3 + $0x1d8] sm:$0xff]  ;;  %v13255_v26 = vcombine.low %v8599_v23, %v8603_v29 }
 0x5fa   :  { %v15553_v7 = vunpack.i.h.bf16 %v15551_v36  ;;  %v15552_v12 = vunpack.i.l.bf16 %v15551_v36  ;;  %v8612_v14 = vld [vmem:[#allocation3 + $0x1f8] sm:$0xff]  ;;  %v13257_v36 = vcombine.low %v8600_v57, %v8604_v48 }
 0x5fb   :  { %v13265_v44 = vcombine.low %v8608_v25, %v8612_v14 }
 0x5fc   :  { %v8541_v16 = vsel %vm7395_vm8, %v8540_v37, %v15553_v7  ;;  %v8544_v2 = vsel %vm7395_vm8, %v8543_v22, %v15552_v12  ;;  %v13264_v7 = vcombine.high %v8607_v8, %v8611_v0  ;;  %v13266_v12 = vcombine.high %v8608_v25, %v8612_v14  ;;  %v8615_v37 = vld [vmem:[#allocation3 + $0x210] sm:$0xff] }
 0x5fd   :  { %v21009_v53 = vpack.c.bf16 %v8541_v16, %v8541_v16  ;;  %v21011_v50 = vpack.c.bf16 %v8544_v2, %v8544_v2  ;;  %v8619_v22 = vld [vmem:[#allocation3 + $0x230] sm:$0xff]  ;;  %v8620_v16 = vld [vmem:[#allocation3 + $0x238] sm:$0xff]  ;;  %v13263_v2 = vcombine.low %v8607_v8, %v8611_v0 }
 0x5fe   :  { %v13272_v17 = vcombine.high %v8615_v37, %v8619_v22  ;;  %v13274_v49 = vcombine.high %v8616_v33, %v8620_v16  ;;  %v13273_v46 = vcombine.low %v8616_v33, %v8620_v16 }
 0x5ff   :  { %10200 = vmatprep.mubr.bf16.mxu1 %v21011_v50  ;;  %10282 = vmatprep.mubr.bf16.mxu0 %v21011_v50 }
 0x600   :  { %10201 = vmatmul.mubr.bf16.vlgmr.msra.gmra.mrb[32].mxu1 %v21009_v53  ;;  %10283 = vmatmul.mubr.bf16.vlgmr.msra.gmra.mrb[64].mxu0 %v21009_v53 }
 0x601   :  { %10292 = vmatpush1.bf16.msra.mxu1 %v13207_v34  ;;  %10374 = vmatpush1.bf16.msra.mxu0 %v13209_v60  ;;  %v8623_v34 = vld [vmem:[#allocation3 + $0x250] sm:$0xff] }
 0x602   :  { %10323 = vmatprep.mubr.bf16.mxu1 %v20989_v20  ;;  %10405 = vmatprep.mubr.bf16.mxu0 %v20989_v20  ;;  %v8588_v20 = vld [vmem:[#allocation3 + $0x138] sm:$0xff]  ;;  %v8627_v60 = vld [vmem:[#allocation3 + $0x270] sm:$0xff] }
 0x603   :  { %10293 = vmatprep.subr.bf16.mxu1 %v13216_v31  ;;  %10375 = vmatprep.subr.bf16.mxu0 %v13218_v6  ;;  %v13242_v24 = vcombine.high %v8584_v45, %v8588_v20  ;;  %v13241_v61 = vcombine.low %v8584_v45, %v8588_v20  ;;  %v8628_v31 = vld [vmem:[#allocation3 + $0x278] sm:$0xff]  ;;  %v13271_v6 = vcombine.low %v8615_v37, %v8619_v22 }
 0x604   :  { %v13280_v19 = vcombine.high %v8623_v34, %v8627_v60  ;;  %v13282_v10 = vcombine.high %v8624_v35, %v8628_v31  ;;  %v13279_v11 = vcombine.low %v8623_v34, %v8627_v60  ;;  %v13281_v38 = vcombine.low %v8624_v35, %v8628_v31 }
 0x605   :  { %10294 = vmatpush1.bf16.msra.mxu1 %v13215_v41  ;;  %10376 = vmatpush1.bf16.msra.mxu0 %v13217_v21  ;;  %v8631_v41 = vld [vmem:[#allocation3 + $0x290] sm:$0xff] }
 0x606   :  { %10295 = vmatprep.subr.bf16.mxu1 %v13224_v58  ;;  %10377 = vmatprep.subr.bf16.mxu0 %v13226_v54  ;;  %v8635_v21 = vld [vmem:[#allocation3 + $0x2b0] sm:$0xff]  ;;  %v8632_v58 = vld [vmem:[#allocation3 + $0x298] sm:$0xff] }
 0x607   :  { %v8636_v54 = vld [vmem:[#allocation3 + $0x2b8] sm:$0xff]  ;;  %v13288_v51 = vcombine.high %v8631_v41, %v8635_v21  ;;  %v13287_v1 = vcombine.low %v8631_v41, %v8635_v21 }
 0x608   :  { %v13290_v13 = vcombine.high %v8632_v58, %v8636_v54  ;;  %v13289_v47 = vcombine.low %v8632_v58, %v8636_v54 }
 0x609   :  { %10296 = vmatpush1.bf16.msra.mxu1 %v13223_v4  ;;  %10378 = vmatpush1.bf16.msra.mxu0 %v13225_v52  ;;  %v8639_v4 = vld [vmem:[#allocation3 + $0x2d0] sm:$0xff] }
 0x60a   :  { %10297 = vmatprep.subr.bf16.mxu1 %v13232_v59  ;;  %10379 = vmatprep.subr.bf16.mxu0 %v13234_v5  ;;  %v8643_v52 = vld [vmem:[#allocation3 + $0x2f0] sm:$0xff]  ;;  %v8640_v59 = vld [vmem:[#allocation3 + $0x2d8] sm:$0xff] }
 0x60b   :  { %v8644_v5 = vld [vmem:[#allocation3 + $0x2f8] sm:$0xff]  ;;  %v13296_v45 = vcombine.high %v8639_v4, %v8643_v52  ;;  %v13295_v55 = vcombine.low %v8639_v4, %v8643_v52 }
 0x60c   :  { %v13298_v20 = vcombine.high %v8640_v59, %v8644_v5  ;;  %v13297_v39 = vcombine.low %v8640_v59, %v8644_v5 }
 0x60d   :  { %10298 = vmatpush1.bf16.msra.mxu1 %v13231_v63  ;;  %10380 = vmatpush1.bf16.msra.mxu0 %v13233_v32  ;;  %v8647_v63 = vld [vmem:[#allocation3 + $0x310] sm:$0xff] }
 0x60e   :  { %10299 = vmatprep.subr.bf16.mxu1 %v13240_v27  ;;  %10381 = vmatprep.subr.bf16.mxu0 %v13242_v24  ;;  %v8651_v32 = vld [vmem:[#allocation3 + $0x330] sm:$0xff]  ;;  %v8648_v27 = vld [vmem:[#allocation3 + $0x318] sm:$0xff] }
 0x60f   :  { %v8652_v24 = vld [vmem:[#allocation3 + $0x338] sm:$0xff]  ;;  %v13304_v42 = vcombine.high %v8647_v63, %v8651_v32  ;;  %v13303_v23 = vcombine.low %v8647_v63, %v8651_v32 }
 0x610   :  { %v13306_v40 = vcombine.high %v8648_v27, %v8652_v24  ;;  %v13305_v29 = vcombine.low %v8648_v27, %v8652_v24  ;;  %v8711_v24 = vld [vmem:[#allocation3 + $0x510] sm:$0xff] }
 0x611   :  { %10300 = vmatpush1.bf16.msra.mxu1 %v13239_v30  ;;  %10382 = vmatpush1.bf16.msra.mxu0 %v13241_v61  ;;  %v8655_v30 = vld [vmem:[#allocation3 + $0x350] sm:$0xff] }
 0x612   :  { %10301 = vmatprep.subr.bf16.mxu1 %v13248_v15  ;;  %10383 = vmatprep.subr.bf16.mxu0 %v13250_v18  ;;  %v8659_v61 = vld [vmem:[#allocation3 + $0x370] sm:$0xff]  ;;  %v8656_v15 = vld [vmem:[#allocation3 + $0x358] sm:$0xff] }
 0x613   :  { %v8660_v18 = vld [vmem:[#allocation3 + $0x378] sm:$0xff]  ;;  %v13312_v57 = vcombine.high %v8655_v30, %v8659_v61  ;;  %v13311_v8 = vcombine.low %v8655_v30, %v8659_v61 }
 0x614   :  { %v13314_v48 = vcombine.high %v8656_v15, %v8660_v18  ;;  %v13313_v0 = vcombine.low %v8656_v15, %v8660_v18  ;;  %v8719_v15 = vld [vmem:[#allocation3 + $0x550] sm:$0xff] }
 0x615   :  { %10302 = vmatpush1.bf16.msra.mxu1 %v13247_v3  ;;  %10384 = vmatpush1.bf16.msra.mxu0 %v13249_v28  ;;  %v8663_v3 = vld [vmem:[#allocation3 + $0x390] sm:$0xff] }
 0x616   :  { %10303 = vmatprep.subr.bf16.mxu1 %v13256_v56  ;;  %10385 = vmatprep.subr.bf16.mxu0 %v13258_v62  ;;  %v8667_v28 = vld [vmem:[#allocation3 + $0x3b0] sm:$0xff]  ;;  %v8664_v56 = vld [vmem:[#allocation3 + $0x398] sm:$0xff] }
 0x617   :  { %v8668_v62 = vld [vmem:[#allocation3 + $0x3b8] sm:$0xff]  ;;  %v13320_v25 = vcombine.high %v8663_v3, %v8667_v28  ;;  %v13319_v37 = vcombine.low %v8663_v3, %v8667_v28  ;;  %v8723_v18 = vld [vmem:[#allocation3 + $0x570] sm:$0xff] }
 0x618   :  { %v13322_v14 = vcombine.high %v8664_v56, %v8668_v62  ;;  %v13321_v22 = vcombine.low %v8664_v56, %v8668_v62  ;;  %v13376_v3 = vcombine.high %v8719_v15, %v8723_v18  ;;  %v8727_v56 = vld [vmem:[#allocation3 + $0x590] sm:$0xff] }
 0x619   :  { %10304 = vmatpush1.bf16.msra.mxu1 %v13255_v26  ;;  %10386 = vmatpush1.bf16.msra.mxu0 %v13257_v36  ;;  %v8671_v26 = vld [vmem:[#allocation3 + $0x3d0] sm:$0xff] }
 0x61a   :  { %10305 = vmatprep.subr.bf16.mxu1 %v13264_v7  ;;  %10387 = vmatprep.subr.bf16.mxu0 %v13266_v12  ;;  %v8675_v36 = vld [vmem:[#allocation3 + $0x3f0] sm:$0xff]  ;;  %v8672_v7 = vld [vmem:[#allocation3 + $0x3d8] sm:$0xff] }
 0x61b   :  { %v8676_v12 = vld [vmem:[#allocation3 + $0x3f8] sm:$0xff]  ;;  %v13328_v33 = vcombine.high %v8671_v26, %v8675_v36  ;;  %v13327_v34 = vcombine.low %v8671_v26, %v8675_v36  ;;  %v8731_v62 = vld [vmem:[#allocation3 + $0x5b0] sm:$0xff] }
 0x61c   :  { %v13330_v16 = vcombine.high %v8672_v7, %v8676_v12  ;;  %v13329_v60 = vcombine.low %v8672_v7, %v8676_v12  ;;  %v13384_v26 = vcombine.high %v8727_v56, %v8731_v62  ;;  %v8735_v7 = vld [vmem:[#allocation3 + $0x5d0] sm:$0xff] }
 0x61d   :  { %10306 = vmatpush1.bf16.msra.mxu1 %v13263_v2  ;;  %10388 = vmatpush1.bf16.msra.mxu0 %v13265_v44  ;;  %v8679_v2 = vld [vmem:[#allocation3 + $0x410] sm:$0xff] }
 0x61e   :  { %10307 = vmatprep.subr.bf16.mxu1 %v13272_v17  ;;  %10389 = vmatprep.subr.bf16.mxu0 %v13274_v49  ;;  %v8683_v44 = vld [vmem:[#allocation3 + $0x430] sm:$0xff]  ;;  %v8680_v17 = vld [vmem:[#allocation3 + $0x418] sm:$0xff] }
 0x61f   :  { %v8684_v49 = vld [vmem:[#allocation3 + $0x438] sm:$0xff]  ;;  %v13336_v35 = vcombine.high %v8679_v2, %v8683_v44  ;;  %v13335_v41 = vcombine.low %v8679_v2, %v8683_v44  ;;  %v8739_v12 = vld [vmem:[#allocation3 + $0x5f0] sm:$0xff] }
 0x620   :  { %v13338_v31 = vcombine.high %v8680_v17, %v8684_v49  ;;  %v13337_v21 = vcombine.low %v8680_v17, %v8684_v49  ;;  %v13392_v2 = vcombine.high %v8735_v7, %v8739_v12  ;;  %v8743_v17 = vld [vmem:[#allocation3 + $0x610] sm:$0xff] }
 0x621   :  { %10308 = vmatpush1.bf16.msra.mxu1 %v13271_v6  ;;  %10390 = vmatpush1.bf16.msra.mxu0 %v13273_v46  ;;  %v8687_v6 = vld [vmem:[#allocation3 + $0x450] sm:$0xff] }
 0x622   :  { %10309 = vmatprep.subr.bf16.mxu1 %v13280_v19  ;;  %10391 = vmatprep.subr.bf16.mxu0 %v13282_v10  ;;  %v8691_v46 = vld [vmem:[#allocation3 + $0x470] sm:$0xff]  ;;  %v8688_v19 = vld [vmem:[#allocation3 + $0x458] sm:$0xff] }
 0x623   :  { %v8692_v10 = vld [vmem:[#allocation3 + $0x478] sm:$0xff]  ;;  %v13344_v58 = vcombine.high %v8687_v6, %v8691_v46  ;;  %v13343_v4 = vcombine.low %v8687_v6, %v8691_v46  ;;  %v8747_v49 = vld [vmem:[#allocation3 + $0x630] sm:$0xff] }
 0x624   :  { %v13346_v54 = vcombine.high %v8688_v19, %v8692_v10  ;;  %v13345_v52 = vcombine.low %v8688_v19, %v8692_v10  ;;  %v13400_v6 = vcombine.high %v8743_v17, %v8747_v49  ;;  %v8751_v19 = vld [vmem:[#allocation3 + $0x650] sm:$0xff] }
 0x625   :  { %10310 = vmatpush1.bf16.msra.mxu1 %v13279_v11  ;;  %10392 = vmatpush1.bf16.msra.mxu0 %v13281_v38  ;;  %v8695_v11 = vld [vmem:[#allocation3 + $0x490] sm:$0xff] }
 0x626   :  { %10311 = vmatprep.subr.bf16.mxu1 %v13288_v51  ;;  %10393 = vmatprep.subr.bf16.mxu0 %v13290_v13  ;;  %v8699_v38 = vld [vmem:[#allocation3 + $0x4b0] sm:$0xff]  ;;  %v8696_v51 = vld [vmem:[#allocation3 + $0x498] sm:$0xff] }
 0x627   :  { %v8700_v13 = vld [vmem:[#allocation3 + $0x4b8] sm:$0xff]  ;;  %v13352_v59 = vcombine.high %v8695_v11, %v8699_v38  ;;  %v8755_v10 = vld [vmem:[#allocation3 + $0x670] sm:$0xff] }
 0x628   :  { %v13354_v5 = vcombine.high %v8696_v51, %v8700_v13  ;;  %v13353_v63 = vcombine.low %v8696_v51, %v8700_v13  ;;  %v8759_v51 = vld [vmem:[#allocation3 + $0x690] sm:$0xff] }
 0x629   :  { %10312 = vmatpush1.bf16.msra.mxu1 %v13287_v1  ;;  %10394 = vmatpush1.bf16.msra.mxu0 %v13289_v47  ;;  %v8703_v1 = vld [vmem:[#allocation3 + $0x4d0] sm:$0xff] }
 0x62a   :  { %10313 = vmatprep.subr.bf16.mxu1 %v13296_v45  ;;  %10395 = vmatprep.subr.bf16.mxu0 %v13298_v20  ;;  %v8707_v47 = vld [vmem:[#allocation3 + $0x4f0] sm:$0xff]  ;;  %v8704_v45 = vld [vmem:[#allocation3 + $0x4d8] sm:$0xff] }
 0x62b   :  { %v8708_v20 = vld [vmem:[#allocation3 + $0x4f8] sm:$0xff]  ;;  %v13360_v32 = vcombine.high %v8703_v1, %v8707_v47  ;;  %v8763_v13 = vld [vmem:[#allocation3 + $0x6b0] sm:$0xff] }
 0x62c   :  { %v13362_v27 = vcombine.high %v8704_v45, %v8708_v20 }
 0x62d   :  { %10314 = vmatpush1.bf16.msra.mxu1 %v13295_v55  ;;  %10396 = vmatpush1.bf16.msra.mxu0 %v13297_v39  ;;  %v8715_v55 = vld [vmem:[#allocation3 + $0x530] sm:$0xff]  ;;  %v8716_v39 = vld [vmem:[#allocation3 + $0x538] sm:$0xff] }
 0x62e   :  { %10315 = vmatprep.subr.bf16.mxu1 %v13304_v42  ;;  %10397 = vmatprep.subr.bf16.mxu0 %v13306_v40  ;;  %v13359_v42 = vcombine.low %v8703_v1, %v8707_v47  ;;  %v13361_v40 = vcombine.low %v8704_v45, %v8708_v20  ;;  %v13368_v30 = vcombine.high %v8711_v24, %v8715_v55  ;;  %v8767_v45 = vld [vmem:[#allocation3 + $0x6d0] sm:$0xff] }
 0x62f   :  { %v13416_v1 = vcombine.high %v8759_v51, %v8763_v13  ;;  %v8771_v20 = vld [vmem:[#allocation3 + $0x6f0] sm:$0xff] }
 0x631   :  { %10316 = vmatpush1.bf16.msra.mxu1 %v13303_v23  ;;  %10398 = vmatpush1.bf16.msra.mxu0 %v13305_v29  ;;  %v8720_v23 = vld [vmem:[#allocation3 + $0x558] sm:$0xff] }
 0x632   :  { %10317 = vmatprep.subr.bf16.mxu1 %v13312_v57  ;;  %10399 = vmatprep.subr.bf16.mxu0 %v13314_v48  ;;  %v8724_v29 = vld [vmem:[#allocation3 + $0x578] sm:$0xff]  ;;  %v13367_v57 = vcombine.low %v8711_v24, %v8715_v55  ;;  %v13424_v24 = vcombine.high %v8767_v45, %v8771_v20 }
 0x633   :  { %v13378_v28 = vcombine.high %v8720_v23, %v8724_v29 }
 0x635   :  { %10318 = vmatpush1.bf16.msra.mxu1 %v13311_v8  ;;  %10400 = vmatpush1.bf16.msra.mxu0 %v13313_v0  ;;  %v8728_v8 = vld [vmem:[#allocation3 + $0x598] sm:$0xff] }
 0x636   :  { %10319 = vmatprep.subr.bf16.mxu1 %v13320_v25  ;;  %10401 = vmatprep.subr.bf16.mxu0 %v13322_v14  ;;  %v8732_v0 = vld [vmem:[#allocation3 + $0x5b8] sm:$0xff]  ;;  %v13375_v25 = vcombine.low %v8719_v15, %v8723_v18  ;;  %v13377_v14 = vcombine.low %v8720_v23, %v8724_v29  ;;  %v8783_v23 = vld [vmem:[#allocation3 + $0x750] sm:$0xff] }
 0x637   :  { %v13386_v36 = vcombine.high %v8728_v8, %v8732_v0  ;;  %v8787_v29 = vld [vmem:[#allocation3 + $0x770] sm:$0xff] }
 0x639   :  { %10320 = vmatpush1.bf16.msra.mxu1 %v13319_v37  ;;  %10402 = vmatpush1.bf16.msra.mxu0 %v13321_v22  ;;  %v8736_v37 = vld [vmem:[#allocation3 + $0x5d8] sm:$0xff] }
 0x63a   :  { %10321 = vmatprep.subr.bf16.mxu1 %v13328_v33  ;;  %10403 = vmatprep.subr.bf16.mxu0 %v13330_v16  ;;  %v8740_v22 = vld [vmem:[#allocation3 + $0x5f8] sm:$0xff]  ;;  %v13383_v33 = vcombine.low %v8727_v56, %v8731_v62  ;;  %v13385_v16 = vcombine.low %v8728_v8, %v8732_v0  ;;  %v13440_v56 = vcombine.high %v8783_v23, %v8787_v29  ;;  %v8791_v8 = vld [vmem:[#allocation3 + $0x790] sm:$0xff] }
 0x63b   :  { %v13394_v44 = vcombine.high %v8736_v37, %v8740_v22  ;;  %v8795_v0 = vld [vmem:[#allocation3 + $0x7b0] sm:$0xff] }
 0x63d   :  { %10322 = vmatpush1.bf16.msra.mxu1 %v13327_v34  ;;  %10404 = vmatpush1.bf16.msra.mxu0 %v13329_v60  ;;  %v8744_v34 = vld [vmem:[#allocation3 + $0x618] sm:$0xff] }
 0x63e   :  { %10332 = vmatprep.subr.bf16.mxu1 %v13336_v35  ;;  %10414 = vmatprep.subr.bf16.mxu0 %v13338_v31  ;;  %v8748_v60 = vld [vmem:[#allocation3 + $0x638] sm:$0xff]  ;;  %v13391_v35 = vcombine.low %v8735_v7, %v8739_v12  ;;  %v13393_v31 = vcombine.low %v8736_v37, %v8740_v22  ;;  %v13448_v7 = vcombine.high %v8791_v8, %v8795_v0  ;;  %v8799_v37 = vld [vmem:[#allocation3 + $0x7d0] sm:$0xff] }
 0x63f   :  { %v13402_v46 = vcombine.high %v8744_v34, %v8748_v60  ;;  %v8803_v22 = vld [vmem:[#allocation3 + $0x7f0] sm:$0xff] }
 0x640   :  { %10324 = vmatmul.mubr.bf16.vlgmr.msra.gmra.mrb[36].mxu1 %v20987_v9  ;;  %10406 = vmatmul.mubr.bf16.vlgmr.msra.gmra.mrb[68].mxu0 %v20987_v9  ;;  %v13351_v9 = vcombine.low %v8695_v11, %v8699_v38  ;;  %v13408_v11 = vcombine.high %v8751_v19, %v8755_v10 }
 0x641   :  { %10333 = vmatpush1.bf16.msra.mxu1 %v13335_v41  ;;  %10364 = vmatprep.mubr.bf16.mxu1 %v21011_v50  ;;  %v8752_v41 = vld [vmem:[#allocation3 + $0x658] sm:$0xff] }
 0x642   :  { %10415 = vmatpush1.bf16.msra.mxu0 %v13337_v21  ;;  %10446 = vmatprep.mubr.bf16.mxu0 %v21011_v50  ;;  %v8712_v50 = vld [vmem:[#allocation3 + $0x518] sm:$0xff] }
 0x643   :  { %10334 = vmatprep.subr.bf16.mxu1 %v13344_v58  ;;  %10416 = vmatprep.subr.bf16.mxu0 %v13346_v54  ;;  %v13370_v61 = vcombine.high %v8712_v50, %v8716_v39  ;;  %v13369_v48 = vcombine.low %v8712_v50, %v8716_v39  ;;  %v8756_v21 = vld [vmem:[#allocation3 + $0x678] sm:$0xff]  ;;  %v13399_v58 = vcombine.low %v8743_v17, %v8747_v49  ;;  %v8775_v50 = vld [vmem:[#allocation3 + $0x710] sm:$0xff] }
 0x644   :  { %v13401_v54 = vcombine.low %v8744_v34, %v8748_v60  ;;  %v13410_v38 = vcombine.high %v8752_v41, %v8756_v21  ;;  %v8779_v39 = vld [vmem:[#allocation3 + $0x730] sm:$0xff]  ;;  %v13456_v17 = vcombine.high %v8799_v37, %v8803_v22  ;;  %v13455_v34 = vcombine.low %v8799_v37, %v8803_v22  ;;  %v15649_v37 = vld [vmem:[#allocation5 + $0x1ac] ss:$16 sps:$4 sm:$0xff]  }
 0x645   :  { %10335 = vmatpush1.bf16.msra.mxu1 %v13343_v4  ;;  %v8760_v4 = vld [vmem:[#allocation3 + $0x698] sm:$0xff]  ;;  %v13432_v15 = vcombine.high %v8775_v50, %v8779_v39  ;;  %v15644_v22 = vld [vmem:[#allocation5 + $0x1a0] ss:$16 sps:$4 sm:$0xff]  }
 0x646   :  { %10417 = vmatpush1.bf16.msra.mxu0 %v13345_v52  ;;  %10336 = vmatprep.subr.bf16.mxu1 %v13352_v59  ;;  %v8764_v52 = vld [vmem:[#allocation3 + $0x6b8] sm:$0xff]  ;;  %v13407_v59 = vcombine.low %v8751_v19, %v8755_v10  ;;  %v15574_v19 = vld [vmem:[#allocation5 + $0x24] ss:$16 sps:$4 sm:$0xff]  }
 0x647   :  { %10418 = vmatprep.subr.bf16.mxu0 %v13354_v5  ;;  %v13409_v5 = vcombine.low %v8752_v41, %v8756_v21  ;;  %v13418_v47 = vcombine.high %v8760_v4, %v8764_v52  ;;  %v15577_v10 = vld [vmem:[#allocation5 + $0x2c] ss:$16 sps:$4 sm:$0xff]   ;;  %v15572_v41 = vld [vmem:[#allocation5 + $0x20] ss:$16 sps:$4 sm:$0xff]   ;;  %v15575_v21 = vld [vmem:[#allocation5 + $0x28] ss:$16 sps:$4 sm:$0xff]  }
 0x649   :  { %10337 = vmatpush1.bf16.msra.mxu1 %v13351_v9  ;;  %v8768_v9 = vld [vmem:[#allocation3 + $0x6d8] sm:$0xff] }
 0x64a   :  { %10419 = vmatpush1.bf16.msra.mxu0 %v13353_v63  ;;  %10338 = vmatprep.subr.bf16.mxu1 %v13360_v32  ;;  %v8772_v63 = vld [vmem:[#allocation3 + $0x6f8] sm:$0xff]  ;;  %v13415_v32 = vcombine.low %v8759_v51, %v8763_v13  ;;  %v15586_v51 = vld [vmem:[#allocation5 + $0x64] ss:$16 sps:$4 sm:$0xff]  }
 0x64b   :  { %10420 = vmatprep.subr.bf16.mxu0 %v13362_v27  ;;  %v13417_v27 = vcombine.low %v8760_v4, %v8764_v52  ;;  %v13426_v55 = vcombine.high %v8768_v9, %v8772_v63  ;;  %v15589_v13 = vld [vmem:[#allocation5 + $0x6c] ss:$16 sps:$4 sm:$0xff]   ;;  %v15584_v4 = vld [vmem:[#allocation5 + $0x60] ss:$16 sps:$4 sm:$0xff]   ;;  %v15592_v52 = vld [vmem:[#allocation5 + $0x84] ss:$16 sps:$4 sm:$0xff]  }
 0x64d   :  { %10339 = vmatpush1.bf16.msra.mxu1 %v13359_v42  ;;  %v8776_v42 = vld [vmem:[#allocation3 + $0x718] sm:$0xff] }
 0x64e   :  { %10421 = vmatpush1.bf16.msra.mxu0 %v13361_v40  ;;  %10340 = vmatprep.subr.bf16.mxu1 %v13368_v30  ;;  %v8780_v40 = vld [vmem:[#allocation3 + $0x738] sm:$0xff]  ;;  %v13423_v30 = vcombine.low %v8767_v45, %v8771_v20  ;;  %v15596_v20 = vld [vmem:[#allocation5 + $0xa0] ss:$16 sps:$4 sm:$0xff]  }
 0x64f   :  { %10422 = vmatprep.subr.bf16.mxu0 %v13370_v61  ;;  %v13425_v61 = vcombine.low %v8768_v9, %v8772_v63  ;;  %v13434_v18 = vcombine.high %v8776_v42, %v8780_v40  ;;  %v15601_v45 = vld [vmem:[#allocation5 + $0xac] ss:$16 sps:$4 sm:$0xff]   ;;  %v15599_v9 = vld [vmem:[#allocation5 + $0xa8] ss:$16 sps:$4 sm:$0xff]   ;;  %v15604_v63 = vld [vmem:[#allocation5 + $0xc4] ss:$16 sps:$4 sm:$0xff]  }
 0x651   :  { %10341 = vmatpush1.bf16.msra.mxu1 %v13367_v57  ;;  %v8784_v57 = vld [vmem:[#allocation3 + $0x758] sm:$0xff] }
 0x652   :  { %10423 = vmatpush1.bf16.msra.mxu0 %v13369_v48  ;;  %10342 = vmatprep.subr.bf16.mxu1 %v13376_v3  ;;  %v8788_v48 = vld [vmem:[#allocation3 + $0x778] sm:$0xff]  ;;  %v13431_v3 = vcombine.low %v8775_v50, %v8779_v39  ;;  %v15608_v39 = vld [vmem:[#allocation5 + $0xe0] ss:$16 sps:$4 sm:$0xff]  }
 0x653   :  { %10424 = vmatprep.subr.bf16.mxu0 %v13378_v28  ;;  %v13433_v28 = vcombine.low %v8776_v42, %v8780_v40  ;;  %v13442_v62 = vcombine.high %v8784_v57, %v8788_v48  ;;  %v15613_v50 = vld [vmem:[#allocation5 + $0xec] ss:$16 sps:$4 sm:$0xff]   ;;  %v15611_v42 = vld [vmem:[#allocation5 + $0xe8] ss:$16 sps:$4 sm:$0xff]   ;;  %v15616_v40 = vld [vmem:[#allocation5 + $0x104] ss:$16 sps:$4 sm:$0xff]  }
 0x655   :  { %10343 = vmatpush1.bf16.msra.mxu1 %v13375_v25  ;;  %v8792_v25 = vld [vmem:[#allocation3 + $0x798] sm:$0xff] }
 0x656   :  { %10425 = vmatpush1.bf16.msra.mxu0 %v13377_v14  ;;  %10344 = vmatprep.subr.bf16.mxu1 %v13384_v26  ;;  %v8796_v14 = vld [vmem:[#allocation3 + $0x7b8] sm:$0xff]  ;;  %v13439_v26 = vcombine.low %v8783_v23, %v8787_v29  ;;  %v15620_v29 = vld [vmem:[#allocation5 + $0x120] ss:$16 sps:$4 sm:$0xff]  }
 0x657   :  { %10426 = vmatprep.subr.bf16.mxu0 %v13386_v36  ;;  %v13441_v36 = vcombine.low %v8784_v57, %v8788_v48  ;;  %v13450_v12 = vcombine.high %v8792_v25, %v8796_v14  ;;  %v15625_v23 = vld [vmem:[#allocation5 + $0x12c] ss:$16 sps:$4 sm:$0xff]   ;;  %v15623_v57 = vld [vmem:[#allocation5 + $0x128] ss:$16 sps:$4 sm:$0xff]   ;;  %v15628_v48 = vld [vmem:[#allocation5 + $0x144] ss:$16 sps:$4 sm:$0xff]  }
 0x659   :  { %10345 = vmatpush1.bf16.msra.mxu1 %v13383_v33  ;;  %v8800_v33 = vld [vmem:[#allocation3 + $0x7d8] sm:$0xff] }
 0x65a   :  { %10427 = vmatpush1.bf16.msra.mxu0 %v13385_v16  ;;  %10346 = vmatprep.subr.bf16.mxu1 %v13392_v2  ;;  %v8804_v16 = vld [vmem:[#allocation3 + $0x7f8] sm:$0xff]  ;;  %v13447_v2 = vcombine.low %v8791_v8, %v8795_v0  ;;  %v15632_v0 = vld [vmem:[#allocation5 + $0x160] ss:$16 sps:$4 sm:$0xff]  }
 0x65b   :  { %10428 = vmatprep.subr.bf16.mxu0 %v13394_v44  ;;  %v13449_v44 = vcombine.low %v8792_v25, %v8796_v14  ;;  %v13458_v49 = vcombine.high %v8800_v33, %v8804_v16  ;;  %v13457_v60 = vcombine.low %v8800_v33, %v8804_v16  ;;  %v15637_v8 = vld [vmem:[#allocation5 + $0x16c] ss:$16 sps:$4 sm:$0xff]   ;;  %v15635_v25 = vld [vmem:[#allocation5 + $0x168] ss:$16 sps:$4 sm:$0xff]   ;;  %v15640_v14 = vld [vmem:[#allocation5 + $0x184] ss:$16 sps:$4 sm:$0xff]  }
 0x65c   :  { %v15647_v33 = vld [vmem:[#allocation5 + $0x1a8] ss:$16 sps:$4 sm:$0xff]   ;;  %v15652_v16 = vld [vmem:[#allocation5 + $0x1c4] ss:$16 sps:$4 sm:$0xff]  }
 0x65d   :  { %10347 = vmatpush1.bf16.msra.mxu1 %v13391_v35  ;;  %v15568_v35 = vld [vmem:[#allocation5 + $0x4] ss:$16 sps:$4 sm:$0xff]  }
 0x65e   :  { %10429 = vmatpush1.bf16.msra.mxu0 %v13393_v31  ;;  %10348 = vmatprep.subr.bf16.mxu1 %v13400_v6  ;;  %v15571_v31 = vld [vmem:[#allocation5 + $0xc] ss:$16 sps:$4 sm:$0xff]   ;;  %v15566_v6 = vld [vmem:[#allocation5] ss:$16 sps:$4 sm:$0xff]  }
 0x65f   :  { %10430 = vmatprep.subr.bf16.mxu0 %v13402_v46  ;;  %v15569_v46 = vld [vmem:[#allocation5 + $0x8] ss:$16 sps:$4 sm:$0xff]  }
 0x661   :  { %10349 = vmatpush1.bf16.msra.mxu1 %v13399_v58  ;;  %v15580_v58 = vld [vmem:[#allocation5 + $0x44] ss:$16 sps:$4 sm:$0xff]  }
 0x662   :  { %10431 = vmatpush1.bf16.msra.mxu0 %v13401_v54  ;;  %10350 = vmatprep.subr.bf16.mxu1 %v13408_v11  ;;  %v15583_v54 = vld [vmem:[#allocation5 + $0x4c] ss:$16 sps:$4 sm:$0xff]   ;;  %v15578_v11 = vld [vmem:[#allocation5 + $0x40] ss:$16 sps:$4 sm:$0xff]  }
 0x663   :  { %10432 = vmatprep.subr.bf16.mxu0 %v13410_v38  ;;  %v15581_v38 = vld [vmem:[#allocation5 + $0x48] ss:$16 sps:$4 sm:$0xff]  }
 0x665   :  { %10351 = vmatpush1.bf16.msra.mxu1 %v13407_v59  ;;  %v15595_v59 = vld [vmem:[#allocation5 + $0x8c] ss:$16 sps:$4 sm:$0xff]  }
 0x666   :  { %10433 = vmatpush1.bf16.msra.mxu0 %v13409_v5  ;;  %10352 = vmatprep.subr.bf16.mxu1 %v13416_v1  ;;  %v15590_v5 = vld [vmem:[#allocation5 + $0x80] ss:$16 sps:$4 sm:$0xff]   ;;  %v15593_v1 = vld [vmem:[#allocation5 + $0x88] ss:$16 sps:$4 sm:$0xff]  }
 0x667   :  { %10434 = vmatprep.subr.bf16.mxu0 %v13418_v47  ;;  %v15598_v47 = vld [vmem:[#allocation5 + $0xa4] ss:$16 sps:$4 sm:$0xff]  }
 0x669   :  { %10353 = vmatpush1.bf16.msra.mxu1 %v13415_v32  ;;  %v15607_v32 = vld [vmem:[#allocation5 + $0xcc] ss:$16 sps:$4 sm:$0xff]  }
 0x66a   :  { %10435 = vmatpush1.bf16.msra.mxu0 %v13417_v27  ;;  %10354 = vmatprep.subr.bf16.mxu1 %v13424_v24  ;;  %v15602_v27 = vld [vmem:[#allocation5 + $0xc0] ss:$16 sps:$4 sm:$0xff]   ;;  %v15605_v24 = vld [vmem:[#allocation5 + $0xc8] ss:$16 sps:$4 sm:$0xff]  }
 0x66b   :  { %10436 = vmatprep.subr.bf16.mxu0 %v13426_v55  ;;  %v15610_v55 = vld [vmem:[#allocation5 + $0xe4] ss:$16 sps:$4 sm:$0xff]  }
 0x66d   :  { %10355 = vmatpush1.bf16.msra.mxu1 %v13423_v30  ;;  %v15619_v30 = vld [vmem:[#allocation5 + $0x10c] ss:$16 sps:$4 sm:$0xff]  }
 0x66e   :  { %10437 = vmatpush1.bf16.msra.mxu0 %v13425_v61  ;;  %10356 = vmatprep.subr.bf16.mxu1 %v13432_v15  ;;  %v15614_v61 = vld [vmem:[#allocation5 + $0x100] ss:$16 sps:$4 sm:$0xff]   ;;  %v15617_v15 = vld [vmem:[#allocation5 + $0x108] ss:$16 sps:$4 sm:$0xff]  }
 0x66f   :  { %10438 = vmatprep.subr.bf16.mxu0 %v13434_v18  ;;  %v15622_v18 = vld [vmem:[#allocation5 + $0x124] ss:$16 sps:$4 sm:$0xff]  }
 0x671   :  { %10357 = vmatpush1.bf16.msra.mxu1 %v13431_v3  ;;  %v15631_v3 = vld [vmem:[#allocation5 + $0x14c] ss:$16 sps:$4 sm:$0xff]  }
 0x672   :  { %10439 = vmatpush1.bf16.msra.mxu0 %v13433_v28  ;;  %10358 = vmatprep.subr.bf16.mxu1 %v13440_v56  ;;  %v15626_v28 = vld [vmem:[#allocation5 + $0x140] ss:$16 sps:$4 sm:$0xff]   ;;  %v15629_v56 = vld [vmem:[#allocation5 + $0x148] ss:$16 sps:$4 sm:$0xff]  }
 0x673   :  { %10440 = vmatprep.subr.bf16.mxu0 %v13442_v62  ;;  %v15634_v62 = vld [vmem:[#allocation5 + $0x164] ss:$16 sps:$4 sm:$0xff]  }
 0x675   :  { %10359 = vmatpush1.bf16.msra.mxu1 %v13439_v26  ;;  %v15643_v26 = vld [vmem:[#allocation5 + $0x18c] ss:$16 sps:$4 sm:$0xff]  }
 0x676   :  { %10441 = vmatpush1.bf16.msra.mxu0 %v13441_v36  ;;  %10360 = vmatprep.subr.bf16.mxu1 %v13448_v7  ;;  %v15638_v36 = vld [vmem:[#allocation5 + $0x180] ss:$16 sps:$4 sm:$0xff]   ;;  %v15641_v7 = vld [vmem:[#allocation5 + $0x188] ss:$16 sps:$4 sm:$0xff]  }
 0x677   :  { %10442 = vmatprep.subr.bf16.mxu0 %v13450_v12  ;;  %v15646_v12 = vld [vmem:[#allocation5 + $0x1a4] ss:$16 sps:$4 sm:$0xff]  }
 0x679   :  { %10361 = vmatpush1.bf16.msra.mxu1 %v13447_v2  ;;  %v15655_v2 = vld [vmem:[#allocation5 + $0x1cc] ss:$16 sps:$4 sm:$0xff]  }
 0x67a   :  { %10443 = vmatpush1.bf16.msra.mxu0 %v13449_v44  ;;  %10362 = vmatprep.subr.bf16.mxu1 %v13456_v17  ;;  %v15650_v44 = vld [vmem:[#allocation5 + $0x1c0] ss:$16 sps:$4 sm:$0xff]   ;;  %v15653_v17 = vld [vmem:[#allocation5 + $0x1c8] ss:$16 sps:$4 sm:$0xff]  }
 0x67b   :  { %10444 = vmatprep.subr.bf16.mxu0 %v13458_v49  ;;  %v15658_v49 = vld [vmem:[#allocation5 + $0x1e4] ss:$16 sps:$4 sm:$0xff]  }
 0x67d   :  { %10363 = vmatpush1.bf16.msra.mxu1 %v13455_v34  ;;  %v15661_v34 = vld [vmem:[#allocation5 + $0x1ec] ss:$16 sps:$4 sm:$0xff]  }
 0x67e   :  { %10445 = vmatpush1.bf16.msra.mxu0 %v13457_v60  ;;  %12029 = vmatprep.subr.bf16.mxu1 %v15568_v35  ;;  %v15656_v60 = vld [vmem:[#allocation5 + $0x1e0] ss:$16 sps:$4 sm:$0xff]   ;;  %v15659_v35 = vld [vmem:[#allocation5 + $0x1e8] ss:$16 sps:$4 sm:$0xff]  }
 0x67f   :  { %12193 = vmatprep.subr.bf16.mxu0 %v15571_v31  ;;  %v15664_v31 = vld [vmem:[#allocation5 + $0x204] ss:$16 sps:$4 sm:$0xff]  }
 0x680   :  { %10365 = vmatmul.mubr.bf16.vlgmr.msra.gmra.mrb[36].mxu1 %v21009_v53 }
 0x681   :  { %10447 = vmatmul.mubr.bf16.vlgmr.msra.gmra.mrb[68].mxu0 %v21009_v53  ;;  %12030 = vmatpush1.bf16.msra.mxu1 %v15566_v6  ;;  %v15587_v53 = vld [vmem:[#allocation5 + $0x68] ss:$16 sps:$4 sm:$0xff]   ;;  %v15667_v6 = vld [vmem:[#allocation5 + $0x20c] ss:$16 sps:$4 sm:$0xff]  }
 0x682   :  { %12194 = vmatpush1.bf16.msra.mxu0 %v15569_v46  ;;  %12031 = vmatprep.subr.bf16.mxu1 %v15574_v19  ;;  %v21028_v46 = vld [vmem:[%s21209_s6] sm:$0xff]  ;;  %v21581_v19 = vld [vmem:[#allocation35_spill] sm:$0xff] }
 0x683   :  { %12195 = vmatprep.subr.bf16.mxu0 %v15577_v10  ;;  %v8813_v10 = vsub.s32 1, %v21581_v19 }
 0x685   :  { %12032 = vmatpush1.bf16.msra.mxu1 %v15572_v41  ;;  %v8821_v41 = vsub.s32 3, %v21581_v19 }
 0x686   :  { %12196 = vmatpush1.bf16.msra.mxu0 %v15575_v21  ;;  %12033 = vmatprep.subr.bf16.mxu1 %v15580_v58  ;;  %v8810_v21 = vrot.slane %v21028_v46, %v18044_v43  ;;  %v8814_v58 = vrot.slane %v21028_v46, %v8813_v10 }
 0x687   :  { %12197 = vmatprep.subr.bf16.mxu0 %v15583_v54  ;;  %v8822_v54 = vrot.slane %v21028_v46, %v8821_v41 }
 0x689   :  { %12034 = vmatpush1.bf16.msra.mxu1 %v15578_v11 }
 0x68a   :  { %12198 = vmatpush1.bf16.msra.mxu0 %v15581_v38  ;;  %12035 = vmatprep.subr.bf16.mxu1 %v15586_v51 }
 0x68b   :  { %12199 = vmatprep.subr.bf16.mxu0 %v15589_v13 }
 0x68d   :  { %12036 = vmatpush1.bf16.msra.mxu1 %v15584_v4 }
 0x68e   :  { %12200 = vmatpush1.bf16.msra.mxu0 %v15587_v53  ;;  %12037 = vmatprep.subr.bf16.mxu1 %v15592_v52 }
 0x68f   :  { %12201 = vmatprep.subr.bf16.mxu0 %v15595_v59 }
 0x691   :  { %12038 = vmatpush1.bf16.msra.mxu1 %v15590_v5 }
 0x692   :  { %12202 = vmatpush1.bf16.msra.mxu0 %v15593_v1  ;;  %12039 = vmatprep.subr.bf16.mxu1 %v15598_v47 }
 0x693   :  { %12203 = vmatprep.subr.bf16.mxu0 %v15601_v45 }
 0x695   :  { %12040 = vmatpush1.bf16.msra.mxu1 %v15596_v20 }
 0x696   :  { %12204 = vmatpush1.bf16.msra.mxu0 %v15599_v9  ;;  %12041 = vmatprep.subr.bf16.mxu1 %v15604_v63 }
 0x697   :  { %12205 = vmatprep.subr.bf16.mxu0 %v15607_v32  ;;  %v15662_v32 = vld [vmem:[#allocation5 + $0x200] ss:$16 sps:$4 sm:$0xff]  }
 0x699   :  { %12042 = vmatpush1.bf16.msra.mxu1 %v15602_v27  ;;  %v15665_v27 = vld [vmem:[#allocation5 + $0x208] ss:$16 sps:$4 sm:$0xff]  }
 0x69a   :  { %12206 = vmatpush1.bf16.msra.mxu0 %v15605_v24  ;;  %12043 = vmatprep.subr.bf16.mxu1 %v15610_v55  ;;  %v15670_v55 = vld [vmem:[#allocation5 + $0x224] ss:$16 sps:$4 sm:$0xff]  }
 0x69b   :  { %12207 = vmatprep.subr.bf16.mxu0 %v15613_v50  ;;  %v15673_v50 = vld [vmem:[#allocation5 + $0x22c] ss:$16 sps:$4 sm:$0xff]  }
 0x69d   :  { %12044 = vmatpush1.bf16.msra.mxu1 %v15608_v39 }
 0x69e   :  { %12208 = vmatpush1.bf16.msra.mxu0 %v15611_v42  ;;  %12045 = vmatprep.subr.bf16.mxu1 %v15616_v40  ;;  %v15668_v42 = vld [vmem:[#allocation5 + $0x220] ss:$16 sps:$4 sm:$0xff]   ;;  %v15671_v40 = vld [vmem:[#allocation5 + $0x228] ss:$16 sps:$4 sm:$0xff]  }
 0x69f   :  { %12209 = vmatprep.subr.bf16.mxu0 %v15619_v30  ;;  %v15676_v30 = vld [vmem:[#allocation5 + $0x244] ss:$16 sps:$4 sm:$0xff]  }
 0x6a1   :  { %12046 = vmatpush1.bf16.msra.mxu1 %v15614_v61  ;;  %v15679_v61 = vld [vmem:[#allocation5 + $0x24c] ss:$16 sps:$4 sm:$0xff]  }
 0x6a2   :  { %12210 = vmatpush1.bf16.msra.mxu0 %v15617_v15  ;;  %12047 = vmatprep.subr.bf16.mxu1 %v15622_v18  ;;  %v15674_v15 = vld [vmem:[#allocation5 + $0x240] ss:$16 sps:$4 sm:$0xff]   ;;  %v15677_v18 = vld [vmem:[#allocation5 + $0x248] ss:$16 sps:$4 sm:$0xff]  }
 0x6a3   :  { %12211 = vmatprep.subr.bf16.mxu0 %v15625_v23  ;;  %v15682_v23 = vld [vmem:[#allocation5 + $0x264] ss:$16 sps:$4 sm:$0xff]  }
 0x6a5   :  { %12048 = vmatpush1.bf16.msra.mxu1 %v15620_v29  ;;  %v15685_v29 = vld [vmem:[#allocation5 + $0x26c] ss:$16 sps:$4 sm:$0xff]  }
 0x6a6   :  { %12212 = vmatpush1.bf16.msra.mxu0 %v15623_v57  ;;  %12049 = vmatprep.subr.bf16.mxu1 %v15628_v48  ;;  %v15680_v57 = vld [vmem:[#allocation5 + $0x260] ss:$16 sps:$4 sm:$0xff]   ;;  %v15683_v48 = vld [vmem:[#allocation5 + $0x268] ss:$16 sps:$4 sm:$0xff]  }
 0x6a7   :  { %12213 = vmatprep.subr.bf16.mxu0 %v15631_v3  ;;  %v15688_v3 = vld [vmem:[#allocation5 + $0x284] ss:$16 sps:$4 sm:$0xff]  }
 0x6a9   :  { %12050 = vmatpush1.bf16.msra.mxu1 %v15626_v28  ;;  %v15691_v28 = vld [vmem:[#allocation5 + $0x28c] ss:$16 sps:$4 sm:$0xff]  }
 0x6aa   :  { %12214 = vmatpush1.bf16.msra.mxu0 %v15629_v56  ;;  %12051 = vmatprep.subr.bf16.mxu1 %v15634_v62  ;;  %v15686_v56 = vld [vmem:[#allocation5 + $0x280] ss:$16 sps:$4 sm:$0xff]   ;;  %v15689_v62 = vld [vmem:[#allocation5 + $0x288] ss:$16 sps:$4 sm:$0xff]  }
 0x6ab   :  { %12215 = vmatprep.subr.bf16.mxu0 %v15637_v8  ;;  %v15694_v8 = vld [vmem:[#allocation5 + $0x2a4] ss:$16 sps:$4 sm:$0xff]  }
 0x6ad   :  { %12052 = vmatpush1.bf16.msra.mxu1 %v15632_v0  ;;  %v15697_v0 = vld [vmem:[#allocation5 + $0x2ac] ss:$16 sps:$4 sm:$0xff]  }
 0x6ae   :  { %12216 = vmatpush1.bf16.msra.mxu0 %v15635_v25  ;;  %12053 = vmatprep.subr.bf16.mxu1 %v15640_v14  ;;  %v15692_v25 = vld [vmem:[#allocation5 + $0x2a0] ss:$16 sps:$4 sm:$0xff]   ;;  %v15695_v14 = vld [vmem:[#allocation5 + $0x2a8] ss:$16 sps:$4 sm:$0xff]  }
 0x6af   :  { %12217 = vmatprep.subr.bf16.mxu0 %v15643_v26  ;;  %v15700_v26 = vld [vmem:[#allocation5 + $0x2c4] ss:$16 sps:$4 sm:$0xff]  }
 0x6b1   :  { %12054 = vmatpush1.bf16.msra.mxu1 %v15638_v36  ;;  %v15703_v36 = vld [vmem:[#allocation5 + $0x2cc] ss:$16 sps:$4 sm:$0xff]  }
 0x6b2   :  { %12218 = vmatpush1.bf16.msra.mxu0 %v15641_v7  ;;  %12055 = vmatprep.subr.bf16.mxu1 %v15646_v12  ;;  %v15698_v7 = vld [vmem:[#allocation5 + $0x2c0] ss:$16 sps:$4 sm:$0xff]   ;;  %v15701_v12 = vld [vmem:[#allocation5 + $0x2c8] ss:$16 sps:$4 sm:$0xff]  }
 0x6b3   :  { %12219 = vmatprep.subr.bf16.mxu0 %v15649_v37  ;;  %v15706_v37 = vld [vmem:[#allocation5 + $0x2e4] ss:$16 sps:$4 sm:$0xff]  }
 0x6b5   :  { %12056 = vmatpush1.bf16.msra.mxu1 %v15644_v22  ;;  %v15709_v22 = vld [vmem:[#allocation5 + $0x2ec] ss:$16 sps:$4 sm:$0xff]  }
 0x6b6   :  { %12220 = vmatpush1.bf16.msra.mxu0 %v15647_v33  ;;  %12057 = vmatprep.subr.bf16.mxu1 %v15652_v16  ;;  %v15704_v33 = vld [vmem:[#allocation5 + $0x2e0] ss:$16 sps:$4 sm:$0xff]   ;;  %v15707_v16 = vld [vmem:[#allocation5 + $0x2e8] ss:$16 sps:$4 sm:$0xff]  }
 0x6b7   :  { %12221 = vmatprep.subr.bf16.mxu0 %v15655_v2  ;;  %v15712_v2 = vld [vmem:[#allocation5 + $0x304] ss:$16 sps:$4 sm:$0xff]  }
 0x6b9   :  { %12058 = vmatpush1.bf16.msra.mxu1 %v15650_v44  ;;  %v15715_v44 = vld [vmem:[#allocation5 + $0x30c] ss:$16 sps:$4 sm:$0xff]  }
 0x6ba   :  { %12222 = vmatpush1.bf16.msra.mxu0 %v15653_v17  ;;  %12059 = vmatprep.subr.bf16.mxu1 %v15658_v49  ;;  %v15710_v17 = vld [vmem:[#allocation5 + $0x300] ss:$16 sps:$4 sm:$0xff]   ;;  %v15713_v49 = vld [vmem:[#allocation5 + $0x308] ss:$16 sps:$4 sm:$0xff]  }
 0x6bb   :  { %12223 = vmatprep.subr.bf16.mxu0 %v15661_v34  ;;  %v15718_v34 = vld [vmem:[#allocation5 + $0x324] ss:$16 sps:$4 sm:$0xff]  }
 0x6bd   :  { %12060 = vmatpush1.bf16.msra.mxu1 %v15656_v60  ;;  %v15721_v60 = vld [vmem:[#allocation5 + $0x32c] ss:$16 sps:$4 sm:$0xff]  }
 0x6be   :  { %12224 = vmatpush1.bf16.msra.mxu0 %v15659_v35  ;;  %12070 = vmatprep.subr.bf16.mxu1 %v15664_v31  ;;  %v15716_v35 = vld [vmem:[#allocation5 + $0x320] ss:$16 sps:$4 sm:$0xff]   ;;  %v15719_v31 = vld [vmem:[#allocation5 + $0x328] ss:$16 sps:$4 sm:$0xff]  }
 0x6bf   :  { %12234 = vmatprep.subr.bf16.mxu0 %v15667_v6  ;;  %v15724_v6 = vld [vmem:[#allocation5 + $0x344] ss:$16 sps:$4 sm:$0xff]  }
 0x6d3   :  { %v10202_v11 = vpop.f32.mrb[32].mxu1  ;;  %v21040_v38 = vpop.f32.mrb[64].mxu0 }
 0x6d4   :  { %v13935_v51 = vadd.f32 %v10202_v11, %v8810_v21  ;;  %v10204_v13 = vpop.f32.mrb[33].mxu1  ;;  %v10286_v4 = vpop.f32.mrb[65].mxu0  ;;  %v15727_v21 = vld [vmem:[#allocation5 + $0x34c] ss:$16 sps:$4 sm:$0xff]   ;;  %v15730_v11 = vld [vmem:[#allocation5 + $0x364] ss:$16 sps:$4 sm:$0xff]  }
 0x6d5   :  { %v13936_v53 = vadd.f32 %v10204_v13, %v8814_v58  ;;  %v13938_v52 = vadd.f32 %v10286_v4, %v8822_v54  ;;  %v10206_v59 = vpop.f32.mrb[34].mxu1  ;;  %v10288_v5 = vpop.f32.mrb[66].mxu0  ;;  %v15722_v58 = vld [vmem:[#allocation5 + $0x340] ss:$16 sps:$4 sm:$0xff]   ;;  %v15725_v54 = vld [vmem:[#allocation5 + $0x348] ss:$16 sps:$4 sm:$0xff]  }
 0x6d6   :  { %v10455_v1 = vmax.f32 %v13935_v51, 0.0  ;;  %v10207_v47 = vpop.f32.mrb[35].mxu1  ;;  %v10289_v45 = vpop.f32.mrb[67].mxu0  ;;  %v15733_v51 = vld [vmem:[#allocation5 + $0x36c] ss:$16 sps:$4 sm:$0xff]  }
 0x6d7   :  { %v10456_v20 = vmax.f32 %v13936_v53, 0.0  ;;  %v10458_v9 = vmax.f32 %v13938_v52, 0.0  ;;  %v15728_v13 = vld [vmem:[#allocation5 + $0x360] ss:$16 sps:$4 sm:$0xff]   ;;  %v15731_v4 = vld [vmem:[#allocation5 + $0x368] ss:$16 sps:$4 sm:$0xff]  }
 0x6d8   :  { %v10463_v24 = vpack.c.bf16 %v10455_v1, %v10455_v1  ;;  %v15736_v53 = vld [vmem:[#allocation5 + $0x384] ss:$16 sps:$4 sm:$0xff]   ;;  %v15739_v52 = vld [vmem:[#allocation5 + $0x38c] ss:$16 sps:$4 sm:$0xff]   ;;  %v15734_v59 = vld [vmem:[#allocation5 + $0x380] ss:$16 sps:$4 sm:$0xff]  }
 0x6d9   :  { %v10464_v63 = vpack.c.bf16 %v10456_v20, %v10456_v20  ;;  %v10466_v39 = vpack.c.bf16 %v10458_v9, %v10458_v9  ;;  %v15737_v5 = vld [vmem:[#allocation5 + $0x388] ss:$16 sps:$4 sm:$0xff]   ;;  %v8817_v1 = vsub.s32 2, %v21581_v19  ;;  %v15742_v47 = vld [vmem:[#allocation5 + $0x3a4] ss:$16 sps:$4 sm:$0xff]  }
 0x6da   :  { %v15745_v45 = vld [vmem:[#allocation5 + $0x3ac] ss:$16 sps:$4 sm:$0xff]   ;;  %v15740_v20 = vld [vmem:[#allocation5 + $0x3a0] ss:$16 sps:$4 sm:$0xff]   ;;  %v15743_v9 = vld [vmem:[#allocation5 + $0x3a8] ss:$16 sps:$4 sm:$0xff]  }
 0x6db   :  { %12061 = vmatprep.mubr.bf16.mxu1 %v10464_v63  ;;  %12225 = vmatprep.mubr.bf16.mxu0 %v10464_v63  ;;  %v8818_v63 = vrot.slane %v21028_v46, %v8817_v1 }
 0x6dc   :  { %12062 = vmatmul.mubr.bf16.vlgmr.msra.gmra.mrb[40].mxu1 %v10463_v24  ;;  %12226 = vmatmul.mubr.bf16.vlgmr.msra.gmra.mrb[72].mxu0 %v10463_v24  ;;  %v15746_v24 = vld [vmem:[#allocation5 + $0x3c0] ss:$16 sps:$4 sm:$0xff]  }
 0x6dd   :  { %12071 = vmatpush1.bf16.msra.mxu1 %v15662_v32  ;;  %12235 = vmatpush1.bf16.msra.mxu0 %v15665_v27  ;;  %v15748_v32 = vld [vmem:[#allocation5 + $0x3c4] ss:$16 sps:$4 sm:$0xff]   ;;  %v15751_v27 = vld [vmem:[#allocation5 + $0x3cc] ss:$16 sps:$4 sm:$0xff]  }
 0x6de   :  { %12102 = vmatprep.mubr.bf16.mxu1 %v10466_v39  ;;  %12266 = vmatprep.mubr.bf16.mxu0 %v10466_v39  ;;  %v15754_v39 = vld [vmem:[#allocation5 + $0x3e4] ss:$16 sps:$4 sm:$0xff]  }
 0x6df   :  { %12072 = vmatprep.subr.bf16.mxu1 %v15670_v55  ;;  %12236 = vmatprep.subr.bf16.mxu0 %v15673_v50  ;;  %v15749_v55 = vld [vmem:[#allocation5 + $0x3c8] ss:$16 sps:$4 sm:$0xff]   ;;  %v13937_v50 = vadd.f32 %v21040_v38, %v8818_v63  ;;  %v15766_v38 = vld [vmem:[#allocation5 + $0x424] ss:$16 sps:$4 sm:$0xff]   ;;  %v15824_v63 = vld [vmem:[#allocation5 + $0x560] ss:$16 sps:$4 sm:$0xff]  }
 0x6e1   :  { %12073 = vmatpush1.bf16.msra.mxu1 %v15668_v42  ;;  %12237 = vmatpush1.bf16.msra.mxu0 %v15671_v40  ;;  %v15757_v42 = vld [vmem:[#allocation5 + $0x3ec] ss:$16 sps:$4 sm:$0xff]   ;;  %v15752_v40 = vld [vmem:[#allocation5 + $0x3e0] ss:$16 sps:$4 sm:$0xff]  }
 0x6e2   :  { %12074 = vmatprep.subr.bf16.mxu1 %v15676_v30  ;;  %12238 = vmatprep.subr.bf16.mxu0 %v15679_v61  ;;  %v15755_v30 = vld [vmem:[#allocation5 + $0x3e8] ss:$16 sps:$4 sm:$0xff]   ;;  %v10457_v61 = vmax.f32 %v13937_v50, 0.0 }
 0x6e3   :  { %v15833_v50 = vld [vmem:[#allocation5 + $0x588] ss:$16 sps:$4 sm:$0xff]  }
 0x6e5   :  { %12075 = vmatpush1.bf16.msra.mxu1 %v15674_v15  ;;  %12239 = vmatpush1.bf16.msra.mxu0 %v15677_v18  ;;  %v15760_v15 = vld [vmem:[#allocation5 + $0x404] ss:$16 sps:$4 sm:$0xff]   ;;  %v15763_v18 = vld [vmem:[#allocation5 + $0x40c] ss:$16 sps:$4 sm:$0xff]  }
 0x6e6   :  { %12076 = vmatprep.subr.bf16.mxu1 %v15682_v23  ;;  %12240 = vmatprep.subr.bf16.mxu0 %v15685_v29  ;;  %v15758_v23 = vld [vmem:[#allocation5 + $0x400] ss:$16 sps:$4 sm:$0xff]   ;;  %v15761_v29 = vld [vmem:[#allocation5 + $0x408] ss:$16 sps:$4 sm:$0xff]  }
 0x6e9   :  { %12077 = vmatpush1.bf16.msra.mxu1 %v15680_v57  ;;  %12241 = vmatpush1.bf16.msra.mxu0 %v15683_v48  ;;  %v10465_v57 = vpack.c.bf16 %v10457_v61, %v10457_v61  ;;  %v15769_v48 = vld [vmem:[#allocation5 + $0x42c] ss:$16 sps:$4 sm:$0xff]   ;;  %v15839_v61 = vld [vmem:[#allocation5 + $0x5a8] ss:$16 sps:$4 sm:$0xff]  }
 0x6ea   :  { %12078 = vmatprep.subr.bf16.mxu1 %v15688_v3  ;;  %12242 = vmatprep.subr.bf16.mxu0 %v15691_v28  ;;  %v15764_v3 = vld [vmem:[#allocation5 + $0x420] ss:$16 sps:$4 sm:$0xff]   ;;  %v15767_v28 = vld [vmem:[#allocation5 + $0x428] ss:$16 sps:$4 sm:$0xff]  }
 0x6ed   :  { %12079 = vmatpush1.bf16.msra.mxu1 %v15686_v56  ;;  %12243 = vmatpush1.bf16.msra.mxu0 %v15689_v62  ;;  %v15772_v56 = vld [vmem:[#allocation5 + $0x444] ss:$16 sps:$4 sm:$0xff]   ;;  %v15775_v62 = vld [vmem:[#allocation5 + $0x44c] ss:$16 sps:$4 sm:$0xff]  }
 0x6ee   :  { %12080 = vmatprep.subr.bf16.mxu1 %v15694_v8  ;;  %12244 = vmatprep.subr.bf16.mxu0 %v15697_v0  ;;  %v15770_v8 = vld [vmem:[#allocation5 + $0x440] ss:$16 sps:$4 sm:$0xff]   ;;  %v15773_v0 = vld [vmem:[#allocation5 + $0x448] ss:$16 sps:$4 sm:$0xff]  }
 0x6f1   :  { %12081 = vmatpush1.bf16.msra.mxu1 %v15692_v25  ;;  %12245 = vmatpush1.bf16.msra.mxu0 %v15695_v14  ;;  %v15778_v25 = vld [vmem:[#allocation5 + $0x464] ss:$16 sps:$4 sm:$0xff]   ;;  %v15781_v14 = vld [vmem:[#allocation5 + $0x46c] ss:$16 sps:$4 sm:$0xff]  }
 0x6f2   :  { %12082 = vmatprep.subr.bf16.mxu1 %v15700_v26  ;;  %12246 = vmatprep.subr.bf16.mxu0 %v15703_v36  ;;  %v15776_v26 = vld [vmem:[#allocation5 + $0x460] ss:$16 sps:$4 sm:$0xff]   ;;  %v15779_v36 = vld [vmem:[#allocation5 + $0x468] ss:$16 sps:$4 sm:$0xff]  }
 0x6f5   :  { %12083 = vmatpush1.bf16.msra.mxu1 %v15698_v7  ;;  %12247 = vmatpush1.bf16.msra.mxu0 %v15701_v12  ;;  %v15784_v7 = vld [vmem:[#allocation5 + $0x484] ss:$16 sps:$4 sm:$0xff]   ;;  %v15787_v12 = vld [vmem:[#allocation5 + $0x48c] ss:$16 sps:$4 sm:$0xff]  }
 0x6f6   :  { %12084 = vmatprep.subr.bf16.mxu1 %v15706_v37  ;;  %12248 = vmatprep.subr.bf16.mxu0 %v15709_v22  ;;  %v15782_v37 = vld [vmem:[#allocation5 + $0x480] ss:$16 sps:$4 sm:$0xff]   ;;  %v15785_v22 = vld [vmem:[#allocation5 + $0x488] ss:$16 sps:$4 sm:$0xff]  }
 0x6f9   :  { %12085 = vmatpush1.bf16.msra.mxu1 %v15704_v33  ;;  %12249 = vmatpush1.bf16.msra.mxu0 %v15707_v16  ;;  %v15790_v33 = vld [vmem:[#allocation5 + $0x4a4] ss:$16 sps:$4 sm:$0xff]   ;;  %v15793_v16 = vld [vmem:[#allocation5 + $0x4ac] ss:$16 sps:$4 sm:$0xff]  }
 0x6fa   :  { %12086 = vmatprep.subr.bf16.mxu1 %v15712_v2  ;;  %12250 = vmatprep.subr.bf16.mxu0 %v15715_v44  ;;  %v15788_v2 = vld [vmem:[#allocation5 + $0x4a0] ss:$16 sps:$4 sm:$0xff]   ;;  %v15791_v44 = vld [vmem:[#allocation5 + $0x4a8] ss:$16 sps:$4 sm:$0xff]  }
 0x6fd   :  { %12087 = vmatpush1.bf16.msra.mxu1 %v15710_v17  ;;  %12251 = vmatpush1.bf16.msra.mxu0 %v15713_v49  ;;  %v15796_v17 = vld [vmem:[#allocation5 + $0x4c4] ss:$16 sps:$4 sm:$0xff]   ;;  %v15799_v49 = vld [vmem:[#allocation5 + $0x4cc] ss:$16 sps:$4 sm:$0xff]  }
 0x6fe   :  { %12088 = vmatprep.subr.bf16.mxu1 %v15718_v34  ;;  %12252 = vmatprep.subr.bf16.mxu0 %v15721_v60  ;;  %v15794_v34 = vld [vmem:[#allocation5 + $0x4c0] ss:$16 sps:$4 sm:$0xff]   ;;  %v15797_v60 = vld [vmem:[#allocation5 + $0x4c8] ss:$16 sps:$4 sm:$0xff]  }
 0x701   :  { %12089 = vmatpush1.bf16.msra.mxu1 %v15716_v35  ;;  %12253 = vmatpush1.bf16.msra.mxu0 %v15719_v31  ;;  %v15802_v35 = vld [vmem:[#allocation5 + $0x4e4] ss:$16 sps:$4 sm:$0xff]   ;;  %v15805_v31 = vld [vmem:[#allocation5 + $0x4ec] ss:$16 sps:$4 sm:$0xff]  }
 0x702   :  { %12090 = vmatprep.subr.bf16.mxu1 %v15724_v6  ;;  %12254 = vmatprep.subr.bf16.mxu0 %v15727_v21  ;;  %v15800_v6 = vld [vmem:[#allocation5 + $0x4e0] ss:$16 sps:$4 sm:$0xff]   ;;  %v15803_v21 = vld [vmem:[#allocation5 + $0x4e8] ss:$16 sps:$4 sm:$0xff]  }
 0x705   :  { %12091 = vmatpush1.bf16.msra.mxu1 %v15722_v58  ;;  %12255 = vmatpush1.bf16.msra.mxu0 %v15725_v54  ;;  %v15808_v58 = vld [vmem:[#allocation5 + $0x504] ss:$16 sps:$4 sm:$0xff]   ;;  %v15811_v54 = vld [vmem:[#allocation5 + $0x50c] ss:$16 sps:$4 sm:$0xff]  }
 0x706   :  { %12092 = vmatprep.subr.bf16.mxu1 %v15730_v11  ;;  %12256 = vmatprep.subr.bf16.mxu0 %v15733_v51  ;;  %v15806_v11 = vld [vmem:[#allocation5 + $0x500] ss:$16 sps:$4 sm:$0xff]   ;;  %v15809_v51 = vld [vmem:[#allocation5 + $0x508] ss:$16 sps:$4 sm:$0xff]  }
 0x709   :  { %12093 = vmatpush1.bf16.msra.mxu1 %v15728_v13  ;;  %12257 = vmatpush1.bf16.msra.mxu0 %v15731_v4  ;;  %v15814_v13 = vld [vmem:[#allocation5 + $0x524] ss:$16 sps:$4 sm:$0xff]   ;;  %v15817_v4 = vld [vmem:[#allocation5 + $0x52c] ss:$16 sps:$4 sm:$0xff]  }
 0x70a   :  { %12094 = vmatprep.subr.bf16.mxu1 %v15736_v53  ;;  %12258 = vmatprep.subr.bf16.mxu0 %v15739_v52  ;;  %v15812_v53 = vld [vmem:[#allocation5 + $0x520] ss:$16 sps:$4 sm:$0xff]   ;;  %v15815_v52 = vld [vmem:[#allocation5 + $0x528] ss:$16 sps:$4 sm:$0xff]  }
 0x70d   :  { %12095 = vmatpush1.bf16.msra.mxu1 %v15734_v59  ;;  %12259 = vmatpush1.bf16.msra.mxu0 %v15737_v5  ;;  %v15820_v59 = vld [vmem:[#allocation5 + $0x544] ss:$16 sps:$4 sm:$0xff]   ;;  %v15823_v5 = vld [vmem:[#allocation5 + $0x54c] ss:$16 sps:$4 sm:$0xff]  }
 0x70e   :  { %12096 = vmatprep.subr.bf16.mxu1 %v15742_v47  ;;  %12260 = vmatprep.subr.bf16.mxu0 %v15745_v45  ;;  %v15818_v47 = vld [vmem:[#allocation5 + $0x540] ss:$16 sps:$4 sm:$0xff]   ;;  %v15821_v45 = vld [vmem:[#allocation5 + $0x548] ss:$16 sps:$4 sm:$0xff]  }
 0x711   :  { %12097 = vmatpush1.bf16.msra.mxu1 %v15740_v20  ;;  %12261 = vmatpush1.bf16.msra.mxu0 %v15743_v9  ;;  %v15826_v20 = vld [vmem:[#allocation5 + $0x564] ss:$16 sps:$4 sm:$0xff]   ;;  %v15829_v9 = vld [vmem:[#allocation5 + $0x56c] ss:$16 sps:$4 sm:$0xff]  }
 0x712   :  { %12098 = vmatprep.subr.bf16.mxu1 %v15748_v32  ;;  %12262 = vmatprep.subr.bf16.mxu0 %v15751_v27  ;;  %v15827_v32 = vld [vmem:[#allocation5 + $0x568] ss:$16 sps:$4 sm:$0xff]   ;;  %v15832_v27 = vld [vmem:[#allocation5 + $0x584] ss:$16 sps:$4 sm:$0xff]  }
 0x715   :  { %12099 = vmatpush1.bf16.msra.mxu1 %v15746_v24  ;;  %12263 = vmatpush1.bf16.msra.mxu0 %v15749_v55  ;;  %v15835_v24 = vld [vmem:[#allocation5 + $0x58c] ss:$16 sps:$4 sm:$0xff]   ;;  %v15830_v55 = vld [vmem:[#allocation5 + $0x580] ss:$16 sps:$4 sm:$0xff]  }
 0x716   :  { %12100 = vmatprep.subr.bf16.mxu1 %v15754_v39  ;;  %12264 = vmatprep.subr.bf16.mxu0 %v15757_v42  ;;  %v15838_v39 = vld [vmem:[#allocation5 + $0x5a4] ss:$16 sps:$4 sm:$0xff]   ;;  %v15841_v42 = vld [vmem:[#allocation5 + $0x5ac] ss:$16 sps:$4 sm:$0xff]  }
 0x719   :  { %12101 = vmatpush1.bf16.msra.mxu1 %v15752_v40  ;;  %12265 = vmatpush1.bf16.msra.mxu0 %v15755_v30  ;;  %v8825_v40 = vsub.s32 4, %v21581_v19  ;;  %v15836_v30 = vld [vmem:[#allocation5 + $0x5a0] ss:$16 sps:$4 sm:$0xff]  }
 0x71a   :  { %12111 = vmatprep.subr.bf16.mxu1 %v15760_v15  ;;  %12275 = vmatprep.subr.bf16.mxu0 %v15763_v18  ;;  %v8829_v15 = vsub.s32 5, %v21581_v19  ;;  %v8837_v18 = vsub.s32 7, %v21581_v19 }
 0x71c   :  { %12103 = vmatmul.mubr.bf16.vlgmr.msra.gmra.mrb[40].mxu1 %v10465_v57  ;;  %12267 = vmatmul.mubr.bf16.vlgmr.msra.gmra.mrb[72].mxu0 %v10465_v57  ;;  %v8826_v57 = vrot.slane %v21028_v46, %v8825_v40  ;;  %v15895_v40 = vld [vmem:[#allocation5 + $0x6cc] ss:$16 sps:$4 sm:$0xff]  }
 0x71d   :  { %12112 = vmatpush1.bf16.msra.mxu1 %v15758_v23  ;;  %12276 = vmatpush1.bf16.msra.mxu0 %v15761_v29  ;;  %v15844_v23 = vld [vmem:[#allocation5 + $0x5c4] ss:$16 sps:$4 sm:$0xff]   ;;  %v15847_v29 = vld [vmem:[#allocation5 + $0x5cc] ss:$16 sps:$4 sm:$0xff]  }
 0x71e   :  { %12113 = vmatprep.subr.bf16.mxu1 %v15766_v38  ;;  %12277 = vmatprep.subr.bf16.mxu0 %v15769_v48  ;;  %v8830_v38 = vrot.slane %v21028_v46, %v8829_v15  ;;  %v15842_v48 = vld [vmem:[#allocation5 + $0x5c0] ss:$16 sps:$4 sm:$0xff]   ;;  %v15898_v15 = vld [vmem:[#allocation5 + $0x6e4] ss:$16 sps:$4 sm:$0xff]  }
 0x721   :  { %12114 = vmatpush1.bf16.msra.mxu1 %v15764_v3  ;;  %12278 = vmatpush1.bf16.msra.mxu0 %v15767_v28  ;;  %v15845_v3 = vld [vmem:[#allocation5 + $0x5c8] ss:$16 sps:$4 sm:$0xff]   ;;  %v8838_v28 = vrot.slane %v21028_v46, %v8837_v18  ;;  %v15901_v18 = vld [vmem:[#allocation5 + $0x6ec] ss:$16 sps:$4 sm:$0xff]  }
 0x722   :  { %12115 = vmatprep.subr.bf16.mxu1 %v15772_v56  ;;  %12279 = vmatprep.subr.bf16.mxu0 %v15775_v62  ;;  %v15850_v56 = vld [vmem:[#allocation5 + $0x5e4] ss:$16 sps:$4 sm:$0xff]   ;;  %v15853_v62 = vld [vmem:[#allocation5 + $0x5ec] ss:$16 sps:$4 sm:$0xff]  }
 0x725   :  { %12116 = vmatpush1.bf16.msra.mxu1 %v15770_v8  ;;  %12280 = vmatpush1.bf16.msra.mxu0 %v15773_v0 }
 0x726   :  { %12117 = vmatprep.subr.bf16.mxu1 %v15778_v25  ;;  %12281 = vmatprep.subr.bf16.mxu0 %v15781_v14 }
 0x729   :  { %12118 = vmatpush1.bf16.msra.mxu1 %v15776_v26  ;;  %12282 = vmatpush1.bf16.msra.mxu0 %v15779_v36  ;;  %v15848_v26 = vld [vmem:[#allocation5 + $0x5e0] ss:$16 sps:$4 sm:$0xff]  }
 0x72a   :  { %12119 = vmatprep.subr.bf16.mxu1 %v15784_v7  ;;  %12283 = vmatprep.subr.bf16.mxu0 %v15787_v12 }
 0x72d   :  { %12120 = vmatpush1.bf16.msra.mxu1 %v15782_v37  ;;  %12284 = vmatpush1.bf16.msra.mxu0 %v15785_v22  ;;  %v15851_v37 = vld [vmem:[#allocation5 + $0x5e8] ss:$16 sps:$4 sm:$0xff]   ;;  %v15856_v22 = vld [vmem:[#allocation5 + $0x604] ss:$16 sps:$4 sm:$0xff]  }
 0x72e   :  { %12121 = vmatprep.subr.bf16.mxu1 %v15790_v33  ;;  %12285 = vmatprep.subr.bf16.mxu0 %v15793_v16 }
 0x731   :  { %12122 = vmatpush1.bf16.msra.mxu1 %v15788_v2  ;;  %12286 = vmatpush1.bf16.msra.mxu0 %v15791_v44 }
 0x732   :  { %12123 = vmatprep.subr.bf16.mxu1 %v15796_v17  ;;  %12287 = vmatprep.subr.bf16.mxu0 %v15799_v49  ;;  %v15859_v17 = vld [vmem:[#allocation5 + $0x60c] ss:$16 sps:$4 sm:$0xff]  }
 0x735   :  { %12124 = vmatpush1.bf16.msra.mxu1 %v15794_v34  ;;  %12288 = vmatpush1.bf16.msra.mxu0 %v15797_v60 }
 0x736   :  { %12125 = vmatprep.subr.bf16.mxu1 %v15802_v35  ;;  %12289 = vmatprep.subr.bf16.mxu0 %v15805_v31  ;;  %v15854_v31 = vld [vmem:[#allocation5 + $0x600] ss:$16 sps:$4 sm:$0xff]  }
 0x739   :  { %12126 = vmatpush1.bf16.msra.mxu1 %v15800_v6  ;;  %12290 = vmatpush1.bf16.msra.mxu0 %v15803_v21  ;;  %v15857_v21 = vld [vmem:[#allocation5 + $0x608] ss:$16 sps:$4 sm:$0xff]  }
 0x73a   :  { %12127 = vmatprep.subr.bf16.mxu1 %v15808_v58  ;;  %12291 = vmatprep.subr.bf16.mxu0 %v15811_v54  ;;  %v15862_v54 = vld [vmem:[#allocation5 + $0x624] ss:$16 sps:$4 sm:$0xff]  }
 0x73d   :  { %12128 = vmatpush1.bf16.msra.mxu1 %v15806_v11  ;;  %12292 = vmatpush1.bf16.msra.mxu0 %v15809_v51  ;;  %v15865_v11 = vld [vmem:[#allocation5 + $0x62c] ss:$16 sps:$4 sm:$0xff]   ;;  %v15860_v51 = vld [vmem:[#allocation5 + $0x620] ss:$16 sps:$4 sm:$0xff]  }
 0x73e   :  { %12129 = vmatprep.subr.bf16.mxu1 %v15814_v13  ;;  %12293 = vmatprep.subr.bf16.mxu0 %v15817_v4  ;;  %v15863_v13 = vld [vmem:[#allocation5 + $0x628] ss:$16 sps:$4 sm:$0xff]   ;;  %v15868_v4 = vld [vmem:[#allocation5 + $0x644] ss:$16 sps:$4 sm:$0xff]  }
 0x741   :  { %12130 = vmatpush1.bf16.msra.mxu1 %v15812_v53  ;;  %12294 = vmatpush1.bf16.msra.mxu0 %v15815_v52  ;;  %v15871_v53 = vld [vmem:[#allocation5 + $0x64c] ss:$16 sps:$4 sm:$0xff]   ;;  %v15866_v52 = vld [vmem:[#allocation5 + $0x640] ss:$16 sps:$4 sm:$0xff]  }
 0x742   :  { %12131 = vmatprep.subr.bf16.mxu1 %v15820_v59  ;;  %12295 = vmatprep.subr.bf16.mxu0 %v15823_v5  ;;  %v15869_v59 = vld [vmem:[#allocation5 + $0x648] ss:$16 sps:$4 sm:$0xff]   ;;  %v15874_v5 = vld [vmem:[#allocation5 + $0x664] ss:$16 sps:$4 sm:$0xff]  }
 0x745   :  { %12132 = vmatpush1.bf16.msra.mxu1 %v15818_v47  ;;  %12296 = vmatpush1.bf16.msra.mxu0 %v15821_v45  ;;  %v15877_v47 = vld [vmem:[#allocation5 + $0x66c] ss:$16 sps:$4 sm:$0xff]   ;;  %v15872_v45 = vld [vmem:[#allocation5 + $0x660] ss:$16 sps:$4 sm:$0xff]  }
 0x746   :  { %12133 = vmatprep.subr.bf16.mxu1 %v15826_v20  ;;  %12297 = vmatprep.subr.bf16.mxu0 %v15829_v9  ;;  %v15875_v20 = vld [vmem:[#allocation5 + $0x668] ss:$16 sps:$4 sm:$0xff]   ;;  %v15880_v9 = vld [vmem:[#allocation5 + $0x684] ss:$16 sps:$4 sm:$0xff]  }
 0x749   :  { %12134 = vmatpush1.bf16.msra.mxu1 %v15824_v63  ;;  %12298 = vmatpush1.bf16.msra.mxu0 %v15827_v32  ;;  %v15883_v63 = vld [vmem:[#allocation5 + $0x68c] ss:$16 sps:$4 sm:$0xff]   ;;  %v15878_v32 = vld [vmem:[#allocation5 + $0x680] ss:$16 sps:$4 sm:$0xff]  }
 0x74a   :  { %12135 = vmatprep.subr.bf16.mxu1 %v15832_v27  ;;  %12299 = vmatprep.subr.bf16.mxu0 %v15835_v24  ;;  %v15881_v27 = vld [vmem:[#allocation5 + $0x688] ss:$16 sps:$4 sm:$0xff]   ;;  %v15886_v24 = vld [vmem:[#allocation5 + $0x6a4] ss:$16 sps:$4 sm:$0xff]  }
 0x74d   :  { %12136 = vmatpush1.bf16.msra.mxu1 %v15830_v55  ;;  %12300 = vmatpush1.bf16.msra.mxu0 %v15833_v50  ;;  %v15889_v55 = vld [vmem:[#allocation5 + $0x6ac] ss:$16 sps:$4 sm:$0xff]   ;;  %v15884_v50 = vld [vmem:[#allocation5 + $0x6a0] ss:$16 sps:$4 sm:$0xff]  }
 0x74e   :  { %12137 = vmatprep.subr.bf16.mxu1 %v15838_v39  ;;  %12301 = vmatprep.subr.bf16.mxu0 %v15841_v42  ;;  %v15887_v39 = vld [vmem:[#allocation5 + $0x6a8] ss:$16 sps:$4 sm:$0xff]   ;;  %v15892_v42 = vld [vmem:[#allocation5 + $0x6c4] ss:$16 sps:$4 sm:$0xff]  }
 0x751   :  { %12138 = vmatpush1.bf16.msra.mxu1 %v15836_v30  ;;  %12302 = vmatpush1.bf16.msra.mxu0 %v15839_v61  ;;  %v15890_v30 = vld [vmem:[#allocation5 + $0x6c0] ss:$16 sps:$4 sm:$0xff]   ;;  %v15893_v61 = vld [vmem:[#allocation5 + $0x6c8] ss:$16 sps:$4 sm:$0xff]  }
 0x752   :  { %12139 = vmatprep.subr.bf16.mxu1 %v15844_v23  ;;  %12303 = vmatprep.subr.bf16.mxu0 %v15847_v29  ;;  %v15896_v23 = vld [vmem:[#allocation5 + $0x6e0] ss:$16 sps:$4 sm:$0xff]   ;;  %v15899_v29 = vld [vmem:[#allocation5 + $0x6e8] ss:$16 sps:$4 sm:$0xff]  }
 0x753   :  { %v10366_v8 = vpop.f32.mrb[36].mxu1 }
 0x754   :  { %v13939_v0 = vadd.f32 %v10366_v8, %v8826_v57  ;;  %v21053_v25 = vpop.f32.mrb[68].mxu0  ;;  %v10368_v14 = vpop.f32.mrb[37].mxu1  ;;  %v15904_v57 = vld [vmem:[#allocation5 + $0x704] ss:$16 sps:$4 sm:$0xff]   ;;  %v15911_v8 = vld [vmem:[#allocation5 + $0x728] ss:$16 sps:$4 sm:$0xff]  }
 0x755   :  { %v13940_v36 = vadd.f32 %v10368_v14, %v8830_v38  ;;  %v10450_v7 = vpop.f32.mrb[69].mxu0  ;;  %v10370_v12 = vpop.f32.mrb[38].mxu1  ;;  %12140 = vmatpush1.bf16.msra.mxu1 %v15842_v48  ;;  %12304 = vmatpush1.bf16.msra.mxu0 %v15845_v3  ;;  %v15907_v38 = vld [vmem:[#allocation5 + $0x70c] ss:$16 sps:$4 sm:$0xff]   ;;  %v15902_v48 = vld [vmem:[#allocation5 + $0x700] ss:$16 sps:$4 sm:$0xff]  }
 0x756   :  { %v10459_v33 = vmax.f32 %v13939_v0, 0.0  ;;  %v13942_v16 = vadd.f32 %v10450_v7, %v8838_v28  ;;  %v10452_v2 = vpop.f32.mrb[70].mxu0  ;;  %v10371_v44 = vpop.f32.mrb[39].mxu1  ;;  %12141 = vmatprep.subr.bf16.mxu1 %v15850_v56  ;;  %12305 = vmatprep.subr.bf16.mxu0 %v15853_v62  ;;  %v15905_v3 = vld [vmem:[#allocation5 + $0x708] ss:$16 sps:$4 sm:$0xff]  }
 0x757   :  { %v10460_v49 = vmax.f32 %v13940_v36, 0.0  ;;  %v10453_v34 = vpop.f32.mrb[71].mxu0  ;;  %v15910_v28 = vld [vmem:[#allocation5 + $0x724] ss:$16 sps:$4 sm:$0xff]   ;;  %v15913_v56 = vld [vmem:[#allocation5 + $0x72c] ss:$16 sps:$4 sm:$0xff]  }
 0x758   :  { %v10462_v60 = vmax.f32 %v13942_v16, 0.0  ;;  %v10467_v6 = vpack.c.bf16 %v10459_v33, %v10459_v33  ;;  %v15908_v62 = vld [vmem:[#allocation5 + $0x720] ss:$16 sps:$4 sm:$0xff]   ;;  %v15916_v0 = vld [vmem:[#allocation5 + $0x744] ss:$16 sps:$4 sm:$0xff]   ;;  %v8833_v44 = vsub.s32 6, %v21581_v19 }
 0x759   :  { %v10468_v35 = vpack.c.bf16 %v10460_v49, %v10460_v49  ;;  %12142 = vmatpush1.bf16.msra.mxu1 %v15848_v26  ;;  %12306 = vmatpush1.bf16.msra.mxu0 %v15851_v37  ;;  %v15919_v14 = vld [vmem:[#allocation5 + $0x74c] ss:$16 sps:$4 sm:$0xff]   ;;  %v15914_v26 = vld [vmem:[#allocation5 + $0x740] ss:$16 sps:$4 sm:$0xff]   ;;  %v15917_v36 = vld [vmem:[#allocation5 + $0x748] ss:$16 sps:$4 sm:$0xff]  }
 0x75a   :  { %12152 = vmatprep.subr.bf16.mxu1 %v15856_v22  ;;  %12316 = vmatprep.subr.bf16.mxu0 %v15859_v17  ;;  %v10470_v58 = vpack.c.bf16 %v10462_v60, %v10462_v60  ;;  %v15922_v7 = vld [vmem:[#allocation5 + $0x764] ss:$16 sps:$4 sm:$0xff]   ;;  %v15925_v12 = vld [vmem:[#allocation5 + $0x76c] ss:$16 sps:$4 sm:$0xff]   ;;  %v15920_v37 = vld [vmem:[#allocation5 + $0x760] ss:$16 sps:$4 sm:$0xff]  }
 0x75b   :  { %12143 = vmatprep.mubr.bf16.mxu1 %v10468_v35  ;;  %12307 = vmatprep.mubr.bf16.mxu0 %v10468_v35  ;;  %v15923_v22 = vld [vmem:[#allocation5 + $0x768] ss:$16 sps:$4 sm:$0xff]   ;;  %v15928_v33 = vld [vmem:[#allocation5 + $0x784] ss:$16 sps:$4 sm:$0xff]   ;;  %v15931_v16 = vld [vmem:[#allocation5 + $0x78c] ss:$16 sps:$4 sm:$0xff]   ;;  %v8834_v35 = vrot.slane %v21028_v46, %v8833_v44 }
 0x75c   :  { %12144 = vmatmul.mubr.bf16.vlgmr.msra.gmra.mrb[40].mxu1 %v10467_v6  ;;  %12308 = vmatmul.mubr.bf16.vlgmr.msra.gmra.mrb[72].mxu0 %v10467_v6  ;;  %v15926_v2 = vld [vmem:[#allocation5 + $0x780] ss:$16 sps:$4 sm:$0xff]   ;;  %v15929_v17 = vld [vmem:[#allocation5 + $0x788] ss:$16 sps:$4 sm:$0xff]   ;;  %v15934_v49 = vld [vmem:[#allocation5 + $0x7a4] ss:$16 sps:$4 sm:$0xff]  }
 0x75d   :  { %12153 = vmatpush1.bf16.msra.mxu1 %v15854_v31  ;;  %12184 = vmatprep.mubr.bf16.mxu1 %v10470_v58  ;;  %v15937_v34 = vld [vmem:[#allocation5 + $0x7ac] ss:$16 sps:$4 sm:$0xff]   ;;  %v15932_v60 = vld [vmem:[#allocation5 + $0x7a0] ss:$16 sps:$4 sm:$0xff]   ;;  %v15935_v31 = vld [vmem:[#allocation5 + $0x7a8] ss:$16 sps:$4 sm:$0xff]  }
 0x75e   :  { %12317 = vmatpush1.bf16.msra.mxu0 %v15857_v21  ;;  %12348 = vmatprep.mubr.bf16.mxu0 %v10470_v58  ;;  %v15940_v6 = vld [vmem:[#allocation5 + $0x7c4] ss:$16 sps:$4 sm:$0xff]   ;;  %v15943_v21 = vld [vmem:[#allocation5 + $0x7cc] ss:$16 sps:$4 sm:$0xff]   ;;  %v15938_v58 = vld [vmem:[#allocation5 + $0x7c0] ss:$16 sps:$4 sm:$0xff]  }
 0x75f   :  { %12154 = vmatprep.subr.bf16.mxu1 %v15862_v54  ;;  %12318 = vmatprep.subr.bf16.mxu0 %v15865_v11  ;;  %v13941_v54 = vadd.f32 %v21053_v25, %v8834_v35  ;;  %v15941_v11 = vld [vmem:[#allocation5 + $0x7c8] ss:$16 sps:$4 sm:$0xff]   ;;  %v15951_v25 = vld [vmem:[%s21212_s9] sm:$0xff]  }
 0x760   :  { %v15947_v46 = vld [vmem:[#allocation5 + $0x7e8] ss:$16 sps:$4 sm:$0xff]  }
 0x761   :  { %12155 = vmatpush1.bf16.msra.mxu1 %v15860_v51  ;;  %v15946_v51 = vld [vmem:[#allocation5 + $0x7e4] ss:$16 sps:$4 sm:$0xff]  }
 0x762   :  { %12319 = vmatpush1.bf16.msra.mxu0 %v15863_v13  ;;  %12156 = vmatprep.subr.bf16.mxu1 %v15868_v4  ;;  %v15949_v13 = vld [vmem:[#allocation5 + $0x7ec] ss:$16 sps:$4 sm:$0xff]   ;;  %v15944_v4 = vld [vmem:[#allocation5 + $0x7e0] ss:$16 sps:$4 sm:$0xff]  }
 0x763   :  { %12320 = vmatprep.subr.bf16.mxu0 %v15871_v53  ;;  %v10461_v53 = vmax.f32 %v13941_v54, 0.0  ;;  %v15972_v44 = vld [vmem:[%s21212_s9 + $0xd8] sm:$0xff]   ;;  %v15977_v35 = vld [vmem:[%s21212_s9 + $0xa8] sm:$0xff]  }
 0x764   :  { %v15980_v54 = vld [vmem:[%s21212_s9 + $0xf8] sm:$0xff]  }
 0x765   :  { %12157 = vmatpush1.bf16.msra.mxu1 %v15866_v52  ;;  %v15950_v52 = vld [vmem:[%s21212_s9 + $0x40] sm:$0xff]   ;;  %v15981_v19 = vld [vmem:[%s21212_s9 + $0xb8] sm:$0xff]  }
 0x766   :  { %12321 = vmatpush1.bf16.msra.mxu0 %v15869_v59  ;;  %12158 = vmatprep.subr.bf16.mxu1 %v15874_v5  ;;  %v10469_v59 = vpack.c.bf16 %v10461_v53, %v10461_v53  ;;  %v15952_v5 = vld [vmem:[%s21212_s9 + $0x48] sm:$0xff]   ;;  %v15985_v53 = vld [vmem:[%s21214_s11 + $0x18] sm:$0xff]  }
 0x767   :  { %12322 = vmatprep.subr.bf16.mxu0 %v15877_v47  ;;  %v21582_v47 = vmov 0.0  }
 0x769   :  { %12159 = vmatpush1.bf16.msra.mxu1 %v15872_v45  ;;  %v15953_v45 = vld [vmem:[%s21212_s9 + $0x8] sm:$0xff]  }
 0x76a   :  { %12323 = vmatpush1.bf16.msra.mxu0 %v15875_v20  ;;  %12160 = vmatprep.subr.bf16.mxu1 %v15880_v9  ;;  %v15954_v20 = vld [vmem:[%s21212_s9 + $0x50] sm:$0xff]  }
 0x76b   :  { %12324 = vmatprep.subr.bf16.mxu0 %v15883_v63  ;;  %v15955_v9 = vld [vmem:[%s21212_s9 + $0x10] sm:$0xff]   ;;  %v15956_v63 = vld [vmem:[%s21212_s9 + $0x58] sm:$0xff]  }
 0x76d   :  { %12161 = vmatpush1.bf16.msra.mxu1 %v15878_v32  ;;  %v15957_v32 = vld [vmem:[%s21212_s9 + $0x18] sm:$0xff]  }
 0x76e   :  { %12325 = vmatpush1.bf16.msra.mxu0 %v15881_v27  ;;  %12162 = vmatprep.subr.bf16.mxu1 %v15886_v24  ;;  %v15958_v27 = vld [vmem:[%s21212_s9 + $0x60] sm:$0xff]  }
 0x76f   :  { %12326 = vmatprep.subr.bf16.mxu0 %v15889_v55  ;;  %v15959_v24 = vld [vmem:[%s21212_s9 + $0x20] sm:$0xff]   ;;  %v15960_v55 = vld [vmem:[%s21212_s9 + $0x68] sm:$0xff]  }
 0x771   :  { %12163 = vmatpush1.bf16.msra.mxu1 %v15884_v50  ;;  %v15961_v50 = vld [vmem:[%s21212_s9 + $0x28] sm:$0xff]  }
 0x772   :  { %12327 = vmatpush1.bf16.msra.mxu0 %v15887_v39  ;;  %12164 = vmatprep.subr.bf16.mxu1 %v15892_v42  ;;  %v15962_v39 = vld [vmem:[%s21212_s9 + $0x70] sm:$0xff]  }
 0x773   :  { %12328 = vmatprep.subr.bf16.mxu0 %v15895_v40  ;;  %v15963_v42 = vld [vmem:[%s21212_s9 + $0x30] sm:$0xff]   ;;  %v15964_v40 = vld [vmem:[%s21212_s9 + $0x78] sm:$0xff]  }
 0x775   :  { %12165 = vmatpush1.bf16.msra.mxu1 %v15890_v30  ;;  %v15965_v30 = vld [vmem:[%s21212_s9 + $0x38] sm:$0xff]  }
 0x776   :  { %12329 = vmatpush1.bf16.msra.mxu0 %v15893_v61  ;;  %12166 = vmatprep.subr.bf16.mxu1 %v15898_v15  ;;  %v15966_v61 = vld [vmem:[%s21212_s9 + $0xc0] sm:$0xff]  }
 0x777   :  { %12330 = vmatprep.subr.bf16.mxu0 %v15901_v18  ;;  %v10727_v15 = vld [vmem:[%s21211_s8] sm:$0xf] }
 0x778   :  { %v10732_v18 = vrot.slane %v10727_v15, %v18044_v43 }
 0x779   :  { %12167 = vmatpush1.bf16.msra.mxu1 %v15896_v23  ;;  %v10736_v23 = vrot.slane %v10727_v15, %v8813_v10  ;;  %v15967_v10 = vld [vmem:[%s21212_s9 + $0x80] sm:$0xff]  }
 0x77a   :  { %12331 = vmatpush1.bf16.msra.mxu0 %v15899_v29  ;;  %12168 = vmatprep.subr.bf16.mxu1 %v15904_v57  ;;  %v10744_v29 = vrot.slane %v10727_v15, %v8821_v41 }
 0x77b   :  { %12332 = vmatprep.subr.bf16.mxu0 %v15907_v38 }
 0x77d   :  { %12169 = vmatpush1.bf16.msra.mxu1 %v15902_v48 }
 0x77e   :  { %12333 = vmatpush1.bf16.msra.mxu0 %v15905_v3  ;;  %12170 = vmatprep.subr.bf16.mxu1 %v15910_v28 }
 0x77f   :  { %12334 = vmatprep.subr.bf16.mxu0 %v15913_v56 }
 0x781   :  { %12171 = vmatpush1.bf16.msra.mxu1 %v15908_v62 }
 0x782   :  { %12335 = vmatpush1.bf16.msra.mxu0 %v15911_v8  ;;  %12172 = vmatprep.subr.bf16.mxu1 %v15916_v0 }
 0x783   :  { %12336 = vmatprep.subr.bf16.mxu0 %v15919_v14 }
 0x785   :  { %12173 = vmatpush1.bf16.msra.mxu1 %v15914_v26 }
 0x786   :  { %12337 = vmatpush1.bf16.msra.mxu0 %v15917_v36  ;;  %12174 = vmatprep.subr.bf16.mxu1 %v15922_v7 }
 0x787   :  { %12338 = vmatprep.subr.bf16.mxu0 %v15925_v12 }
 0x789   :  { %12175 = vmatpush1.bf16.msra.mxu1 %v15920_v37  ;;  %v15968_v37 = vld [vmem:[%s21212_s9 + $0xc8] sm:$0xff]  }
 0x78a   :  { %12339 = vmatpush1.bf16.msra.mxu0 %v15923_v22  ;;  %12176 = vmatprep.subr.bf16.mxu1 %v15928_v33  ;;  %v15969_v33 = vld [vmem:[%s21212_s9 + $0x88] sm:$0xff]  }
 0x78b   :  { %12340 = vmatprep.subr.bf16.mxu0 %v15931_v16  ;;  %v15970_v16 = vld [vmem:[%s21212_s9 + $0xd0] sm:$0xff]  }
 0x78d   :  { %12177 = vmatpush1.bf16.msra.mxu1 %v15926_v2  ;;  %v15971_v2 = vld [vmem:[%s21212_s9 + $0x90] sm:$0xff]  }
 0x78e   :  { %12341 = vmatpush1.bf16.msra.mxu0 %v15929_v17  ;;  %12178 = vmatprep.subr.bf16.mxu1 %v15934_v49  ;;  %v15973_v17 = vld [vmem:[%s21212_s9 + $0x98] sm:$0xff]   ;;  %v15974_v49 = vld [vmem:[%s21212_s9 + $0xe0] sm:$0xff]  }
 0x78f   :  { %12342 = vmatprep.subr.bf16.mxu0 %v15937_v34  ;;  %v15975_v34 = vld [vmem:[%s21212_s9 + $0xa0] sm:$0xff]  }
 0x791   :  { %12179 = vmatpush1.bf16.msra.mxu1 %v15932_v60  ;;  %v15976_v60 = vld [vmem:[%s21212_s9 + $0xe8] sm:$0xff]  }
 0x792   :  { %12343 = vmatpush1.bf16.msra.mxu0 %v15935_v31  ;;  %12180 = vmatprep.subr.bf16.mxu1 %v15940_v6  ;;  %v10740_v31 = vrot.slane %v10727_v15, %v8817_v1  ;;  %v15978_v6 = vld [vmem:[%s21212_s9 + $0xf0] sm:$0xff]  }
 0x793   :  { %12344 = vmatprep.subr.bf16.mxu0 %v15943_v21  ;;  %v15979_v21 = vld [vmem:[%s21212_s9 + $0xb0] sm:$0xff]  }
 0x795   :  { %12181 = vmatpush1.bf16.msra.mxu1 %v15938_v58 }
 0x796   :  { %12345 = vmatpush1.bf16.msra.mxu0 %v15941_v11  ;;  %12182 = vmatprep.subr.bf16.mxu1 %v15946_v51  ;;  %v15982_v51 = vld [vmem:[%s21214_s11] sm:$0xff]  }
 0x797   :  { %12346 = vmatprep.subr.bf16.mxu0 %v15949_v13  ;;  %v15983_v13 = vld [vmem:[%s21214_s11 + $0x8] sm:$0xff]  }
 0x799   :  { %12183 = vmatpush1.bf16.msra.mxu1 %v15944_v4  ;;  %v15984_v4 = vld [vmem:[%s21214_s11 + $0x10] sm:$0xff]  }
 0x79a   :  { %12347 = vmatpush1.bf16.msra.mxu0 %v15947_v46  ;;  %13792 = vmatprep.subr.bf16.mxu1 %v15950_v52  ;;  %v15986_v46 = vld [vmem:[%s21214_s11 + $0x20] sm:$0xff]   ;;  %v15987_v52 = vld [vmem:[%s21214_s11 + $0x28] sm:$0xff]  }
 0x79b   :  { %13915 = vmatprep.subr.bf16.mxu0 %v21582_v47 }
 0x79c   :  { %12185 = vmatmul.mubr.bf16.vlgmr.msra.gmra.mrb[40].mxu1 %v10469_v59 }
 0x79d   :  { %12349 = vmatmul.mubr.bf16.vlgmr.msra.gmra.mrb[72].mxu0 %v10469_v59  ;;  %13793 = vmatpush3.bf16.msra.mxu1 %v15951_v25  ;;  %v15988_v25 = vld [vmem:[%s21214_s11 + $0x30] sm:$0xff]   ;;  %v15989_v59 = vld [vmem:[%s21214_s11 + $0x38] sm:$0xff]  }
 0x79e   :  { %13794 = vmatprep.subr.bf16.mxu1 %v15952_v5  ;;  %13916 = vmatpush3.bf16.msra.mxu0 %v15982_v51 }
 0x79f   :  { %13917 = vmatprep.subr.bf16.mxu0 %v21582_v47  ;;  %13931 = vmatprep.mubr.msk.bf16.mxu0 %vm16063_vm1, %v21582_v47 }
 0x7a1   :  { %13795 = vmatpush3.bf16.msra.mxu1 %v15953_v45 }
 0x7a2   :  { %13796 = vmatprep.subr.bf16.mxu1 %v15954_v20  ;;  %13918 = vmatpush3.bf16.msra.mxu0 %v15983_v13 }
 0x7a3   :  { %13919 = vmatprep.subr.bf16.mxu0 %v21582_v47 }
 0x7a5   :  { %13797 = vmatpush3.bf16.msra.mxu1 %v15955_v9 }
 0x7a6   :  { %13798 = vmatprep.subr.bf16.mxu1 %v15956_v63  ;;  %13920 = vmatpush3.bf16.msra.mxu0 %v15984_v4 }
 0x7a7   :  { %13921 = vmatprep.subr.bf16.mxu0 %v21582_v47 }
 0x7a9   :  { %13799 = vmatpush3.bf16.msra.mxu1 %v15957_v32  ;;  %v13715_v32 = vld [vmem:[%s21213_s10] ss:$0 sm:$0xff] }
 0x7aa   :  { %13800 = vmatprep.subr.bf16.mxu1 %v15958_v27  ;;  %13922 = vmatpush3.bf16.msra.mxu0 %v15985_v53 }
 0x7ab   :  { %13923 = vmatprep.subr.bf16.mxu0 %v21582_v47 }
 0x7ad   :  { %13801 = vmatpush3.bf16.msra.mxu1 %v15959_v24 }
 0x7ae   :  { %13802 = vmatprep.subr.bf16.mxu1 %v15960_v55  ;;  %13924 = vmatpush3.bf16.msra.mxu0 %v15986_v46 }
 0x7af   :  { %13925 = vmatprep.subr.bf16.mxu0 %v21582_v47 }
 0x7b1   :  { %13803 = vmatpush3.bf16.msra.mxu1 %v15961_v50 }
 0x7b2   :  { %13804 = vmatprep.subr.bf16.mxu1 %v15962_v39  ;;  %13926 = vmatpush3.bf16.msra.mxu0 %v15987_v52 }
 0x7b3   :  { %13927 = vmatprep.subr.bf16.mxu0 %v21582_v47 }
 0x7b5   :  { %13805 = vmatpush3.bf16.msra.mxu1 %v15963_v42 }
 0x7b6   :  { %13806 = vmatprep.subr.bf16.mxu1 %v15964_v40  ;;  %13928 = vmatpush3.bf16.msra.mxu0 %v15988_v25 }
 0x7b7   :  { %13929 = vmatprep.subr.bf16.mxu0 %v21582_v47  ;;  %v13748_v47 = vld [vmem:[#allocation2] ss:$0 sm:$0xff] }
 0x7b9   :  { %13807 = vmatpush3.bf16.msra.mxu1 %v15965_v30 }
 0x7ba   :  { %13814 = vmatprep.subr.bf16.mxu1 %v15966_v61  ;;  %13930 = vmatpush3.bf16.msra.mxu0 %v15989_v59 }
 0x86f   :  { %v12186_v57 = vpop.f32.mrb[40].mxu1 }
 0x870   :  { %v13943_v38 = vadd.f32 %v12186_v57, %v10732_v18  ;;  %v12350_v48 = vpop.f32.mrb[72].mxu0  ;;  %v12188_v3 = vpop.f32.mrb[41].mxu1 }
 0x871   :  { %v13944_v28 = vadd.f32 %v12188_v3, %v10736_v23  ;;  %v12352_v56 = vpop.f32.mrb[73].mxu0  ;;  %v12190_v62 = vpop.f32.mrb[42].mxu1  ;;  %v13945_v58 = vadd.f32 %v12350_v48, %v10740_v31 }
 0x872   :  { %v12357_v8 = vmax.f32 %v13943_v38, 0.0  ;;  %v13946_v0 = vadd.f32 %v12352_v56, %v10744_v29  ;;  %v12354_v14 = vpop.f32.mrb[74].mxu0  ;;  %v12191_v26 = vpop.f32.mrb[43].mxu1 }
 0x873   :  { %v12358_v36 = vmax.f32 %v13944_v28, 0.0  ;;  %v12355_v7 = vpop.f32.mrb[75].mxu0  ;;  %v12359_v1 = vmax.f32 %v13945_v58, 0.0 }
 0x874   :  { %v12360_v43 = vmax.f32 %v13946_v0, 0.0  ;;  %v12361_v41 = vpack.c.bf16 %v12357_v8, %v12357_v8 }
 0x875   :  { %v12362_v12 = vpack.c.bf16 %v12358_v36, %v12358_v36  ;;  %v12363_v11 = vpack.c.bf16 %v12359_v1, %v12359_v1 }
 0x876   :  { %v12364_v22 = vpack.c.bf16 %v12360_v43, %v12360_v43 }
 0x877   :  { %12660 = vmatprep.mubr.bf16.mxu1 %v12362_v12 }
 0x878   :  { %12661 = vmatmul.mubr.bf16.vlgmr.msra.gmra.mrb[44].mxu1 %v12361_v41 }
 0x879   :  { %13815 = vmatpush3.bf16.msra.mxu1 %v15967_v10  ;;  %12700 = vmatprep.mubr.bf16.mxu1 %v12364_v22 }
 0x87a   :  { %13816 = vmatprep.subr.bf16.mxu1 %v15968_v37 }
 0x87d   :  { %13817 = vmatpush3.bf16.msra.mxu1 %v15969_v33 }
 0x87e   :  { %13818 = vmatprep.subr.bf16.mxu1 %v15970_v16 }
 0x881   :  { %13819 = vmatpush3.bf16.msra.mxu1 %v15971_v2 }
 0x882   :  { %13820 = vmatprep.subr.bf16.mxu1 %v15972_v44 }
 0x885   :  { %13821 = vmatpush3.bf16.msra.mxu1 %v15973_v17 }
 0x886   :  { %13822 = vmatprep.subr.bf16.mxu1 %v15974_v49 }
 0x889   :  { %13823 = vmatpush3.bf16.msra.mxu1 %v15975_v34 }
 0x88a   :  { %13824 = vmatprep.subr.bf16.mxu1 %v15976_v60 }
 0x88d   :  { %13825 = vmatpush3.bf16.msra.mxu1 %v15977_v35 }
 0x88e   :  { %13826 = vmatprep.subr.bf16.mxu1 %v15978_v6 }
 0x891   :  { %13827 = vmatpush3.bf16.msra.mxu1 %v15979_v21 }
 0x892   :  { %13828 = vmatprep.subr.bf16.mxu1 %v15980_v54 }
 0x895   :  { %13829 = vmatpush3.bf16.msra.mxu1 %v15981_v19 }
 0x898   :  { %12701 = vmatmul.mubr.bf16.vlgmr.msra.gmra.mrb[48].mxu1 %v12363_v11 }
 0x94b   :  { %v13808_v5 = vpop.f32.mrb[44].mxu1 }
 0x94c   :  { %v13809_v45 = vpop.f32.mrb[45].mxu1 }
 0x94d   :  { %v13810_v20 = vadd.f32 %v13809_v45, %v13808_v5  ;;  %v13811_v9 = vpop.f32.mrb[46].mxu1 }
 0x94e   :  { %v13812_v63 = vpop.f32.mrb[47].mxu1 }
 0x94f   :  { %v12663_v55 = vadd.f32 %v13810_v20, %v13715_v32 }
 0x96b   :  { %v13830_v27 = vpop.f32.mrb[48].mxu1 }
 0x96c   :  { %v13831_v24 = vpop.f32.mrb[49].mxu1 }
 0x96d   :  { %v13832_v50 = vadd.f32 %v13831_v24, %v13830_v27  ;;  %v13833_v39 = vpop.f32.mrb[50].mxu1 }
 0x96e   :  { %v13834_v42 = vpop.f32.mrb[51].mxu1 }
 0x96f   :  { %v12703_v40 = vadd.f32 %v13832_v50, %v12663_v55 }
 0x971   :  { %v12708_v30 = vmax.f32 %v12703_v40, 0.0 }
 0x973   :  { %v12709_v61 = vpack.c.bf16 %v12708_v30, %v12708_v30 }
 0x975   :  { %13932 = vmatmul.mubr.bf16.vlgmr.msra.gmra.mrb[76].mxu0 %v12709_v61 }
 0xa48   :  { %v12815_v15 = vpop.f32.mrb[76].mxu0 }
 0xa49   :  { %v12816_v18 = vadd.f32 %v13748_v47, %v12815_v15  ;;  %v13933_v23 = vpop.f32.mrb[77].mxu0 }
 0xa4a   :  { %v12818_v29 = vpop.f32.mrb[78].mxu0 }
 0xa4b   :  { %12822 = vst.msk [vmem:[%s21216_s13] sm:$0x3] %vm12821_vm7, %v12816_v18  ;;  %v13934_v57 = vpop.f32.mrb[79].mxu0 }
 0xa4c   :  { %12827 = vsyncpa [#allocation4], 1 }
 0xa4d   :  { %12828 = vsyncpa [#allocation6], 1 }

</bundles_post_ra>
